<compile_context>
chip_gen: v7x
topology: tpu7x:2x2x1
jax: 0.10.0
libtpu: 0.0.40
codegen_flags: <defaults>
</compile_context>

<pallas_src>
import functools

import jax
import jax.numpy as jnp
from jax.experimental import pallas as pl
from jax.experimental.pallas import tpu as pltpu


# ----------------------------- Pallas kernel -------------------------------- #

def _gatv2_layer(x_bf, adjb_ref, w_ref, b_ref, att_ref, cb_ref,
                 xlr_ref, out_ref, *, heads, out_c, n, tq):
    """One GATv2Conv (merged lin_l||lin_r) + bias + fused ReLU -> out_ref (N, H*C).

    x_bf     : (N, in)   bf16  input node features (value)
    adjb_ref : (N, N)    bf16  additive mask: 0 where edge j->i (incl self), -1e30 else
    w_ref    : (in, 2*H*C) bf16  [w_l || w_r]
    b_ref    : (1, 2*H*C)  f32   [b_l || b_r]
    att_ref  : (H, 1, C)   f32   attention vectors
    cb_ref   : (1, H*C)    f32   conv output bias
    xlr_ref  : (N, 2*H*C)  f32   scratch for the merged projection
    out_ref  : (N, H*C)    bf16  relu(concat_h(sum_j alpha_hij * xl[h,j]) + bias)
    """
    hc = heads * out_c
    # Merged projection (single bf16 MXU matmul, f32 accumulation):
    #   xlr[:, :hc] = lin_l(x)  (sources),  xlr[:, hc:] = lin_r(x)  (targets)
    xlr_ref[...] = (
        jnp.dot(x_bf, w_ref[...], preferred_element_type=jnp.float32)
        + b_ref[...]
    )

    n_tiles = n // tq
    for h in range(heads):                       # heads is a small static constant
        c0 = h * out_c
        xl = xlr_ref[:, c0:c0 + out_c]           # (N, C) lin_l(x), source side (f32)
        xl_bf = xl.astype(jnp.bfloat16)
        a = att_ref[h]                           # (1, C) attention vector (f32)
        cb = cb_ref[:, c0:c0 + out_c]            # (1, C) bias slice

        for t in range(n_tiles):                 # static; n_tiles == 1 when tq == n
            r0 = t * tq
            xr_t = xlr_ref[pl.ds(r0, tq), hc + c0:hc + c0 + out_c]   # (tq, C) lin_r
            # e[i, j] = att . leaky_relu(xr[i] + xl[j]),  negative_slope = 0.2
            s = xr_t[:, None, :] + xl[None, :, :]                    # (tq, N, C)
            s = jnp.maximum(s, 0.2 * s)                              # LeakyReLU
            e = jnp.sum(s * a[None, :, :], axis=-1)                  # (tq, N)
            e = e + adjb_ref[pl.ds(r0, tq), :].astype(jnp.float32)   # mask bias
            # masked softmax over source nodes j (self-loops guarantee denom >= 1)
            e = e - jnp.max(e, axis=-1, keepdims=True)
            p = jnp.exp(e)
            alpha = p * pl.reciprocal(jnp.sum(p, axis=-1, keepdims=True),
                                      approx=True)
            agg = jnp.dot(alpha.astype(jnp.bfloat16), xl_bf,
                          preferred_element_type=jnp.float32)        # (tq, C)
            out_ref[pl.ds(r0, tq), c0:c0 + out_c] = (
                jnp.maximum(agg + cb, 0.0).astype(out_ref.dtype))


def fused_forward_kernel(x_ref, adjb_ref,
                         w1_ref, b1_ref, att1_ref, cb1_ref,
                         w2_ref, b2_ref, att2_ref, cb2_ref,
                         wp1_ref, bp1_ref, wp2_ref, bp2_ref,
                         o_ref,
                         xlr_ref, h1_ref, h2_ref,
                         *, heads, out_c, n, tq):
    # conv1 + ReLU   (dropout = identity, eval mode)
    _gatv2_layer(x_ref[...], adjb_ref, w1_ref, b1_ref, att1_ref, cb1_ref,
                 xlr_ref, h1_ref, heads=heads, out_c=out_c, n=n, tq=tq)
    # conv2 + ReLU   (dropout = identity, eval mode)
    _gatv2_layer(h1_ref[...], adjb_ref, w2_ref, b2_ref, att2_ref, cb2_ref,
                 xlr_ref, h2_ref, heads=heads, out_c=out_c, n=n, tq=tq)
    # post_mp: Linear -> (Dropout = identity) -> Linear (lane-padded) -> sigmoid
    # TODO(synk): training-time dropout is not implemented (inference only).
    hmid = (jnp.dot(h2_ref[...], wp1_ref[...],
                    preferred_element_type=jnp.float32) + bp1_ref[...])
    y = (jnp.dot(hmid.astype(jnp.bfloat16), wp2_ref[...],
                 preferred_element_type=jnp.float32) + bp2_ref[...])
    # Exact sigmoid (tiny op; keeps probabilities in [0, 1] exactly).
    o_ref[...] = 1.0 / (1.0 + jnp.exp(-y))


# ------------------------------ JAX wrapper --------------------------------- #

def prepare_params(params, output_dim):
    """One-time preprocessing: merge lin_l||lin_r, pre-cast weights to bf16,
    lane-pad the classifier head."""
    def merge(p):
        return {"w_lr": jnp.concatenate([p["w_l"], p["w_r"]],
                                        axis=1).astype(jnp.bfloat16),
                "b_lr": jnp.concatenate([p["b_l"], p["b_r"]], axis=1),
                "att": p["att"], "bias": p["bias"]}
    pm = params["post_mp"]
    out_pad = ((output_dim + 127) // 128) * 128
    wp2 = jnp.zeros((pm["w2"].shape[0], out_pad), jnp.float32)
    wp2 = wp2.at[:, :output_dim].set(pm["w2"])
    bp2 = jnp.zeros((1, out_pad), jnp.float32).at[:, :output_dim].set(pm["b2"])
    return {"conv1": merge(params["conv1"]),
            "conv2": merge(params["conv2"]),
            "post_mp": {"w1": pm["w1"].astype(jnp.bfloat16), "b1": pm["b1"],
                        "w2p": wp2.astype(jnp.bfloat16), "b2p": bp2},
            "out_dim": output_dim, "out_pad": out_pad}


def transaction_classifier_forward(x, adj, prep, heads, hidden_dim, *, tq=None):
    n = x.shape[0]
    if tq is None:
        tq = n   # single full-row tile: fewest/largest MXU ops, native bf16 packing
    assert tq % 8 == 0 and n % tq == 0, "n must be a multiple of tq (tq multiple of 8)"
    hc = heads * hidden_dim

    # Additive adjacency bias: 0 for edges (incl. self-loops), -1e30 otherwise.
    # bf16 keeps the f32 exponent range, so -1e30 is safe (no inf - inf).
    adj_bias = jnp.where(adj > 0, 0.0, -1e30).astype(jnp.bfloat16)
    x_bf = x.astype(jnp.bfloat16)

    vmem = pl.BlockSpec(memory_space=pltpu.MemorySpace.VMEM)
    kernel = functools.partial(fused_forward_kernel, heads=heads,
                               out_c=hidden_dim, n=n, tq=tq)
    c1, c2, pm = prep["conv1"], prep["conv2"], prep["post_mp"]

    out = pl.pallas_call(
        kernel,
        out_shape=jax.ShapeDtypeStruct((n, prep["out_pad"]), jnp.float32),
        in_specs=[vmem] * 14,
        out_specs=vmem,
        scratch_shapes=[
            pltpu.VMEM((n, 2 * hc), jnp.float32),   # merged xl || xr projection
            pltpu.VMEM((n, hc), jnp.bfloat16),      # conv1 output (post ReLU)
            pltpu.VMEM((n, hc), jnp.bfloat16),      # conv2 output (post ReLU)
        ],
        compiler_params=pltpu.CompilerParams(vmem_limit_bytes=32 * 1024 * 1024),
    )(x_bf, adj_bias,
      c1["w_lr"], c1["b_lr"], c1["att"], c1["bias"],
      c2["w_lr"], c2["b_lr"], c2["att"], c2["bias"],
      pm["w1"], pm["b1"], pm["w2p"], pm["b2p"])

    return out[:, :prep["out_dim"]]


# -------------------------- pure-JAX reference ------------------------------ #

def reference_forward(x, adj, params, heads, hidden_dim):
    """Dense GATv2Conv x2 + post_mp MLP + sigmoid (matches the kernel math)."""
    def gatv2(xin, p):
        xl = xin @ p["w_l"] + p["b_l"]            # (N, H*C) source side
        xr = xin @ p["w_r"] + p["b_r"]            # (N, H*C) target side
        outs = []
        for h in range(heads):
            c0 = h * hidden_dim
            xl_h = xl[:, c0:c0 + hidden_dim]
            xr_h = xr[:, c0:c0 + hidden_dim]
            a = p["att"][h, 0]                    # (C,)
            s = xr_h[:, None, :] + xl_h[None, :, :]
            s = jnp.where(s >= 0, s, 0.2 * s)
            e = jnp.einsum("ijc,c->ij", s, a)
            e = jnp.where(adj > 0, e, -1e30)
            alpha = jax.nn.softmax(e, axis=-1)
            outs.append(alpha @ xl_h)
        return jnp.concatenate(outs, axis=-1) + p["bias"]

    h1 = jax.nn.relu(gatv2(x, params["conv1"]))
    h2 = jax.nn.relu(gatv2(h1, params["conv2"]))
    pm = params["post_mp"]
    y = (h2 @ pm["w1"] + pm["b1"]) @ pm["w2"] + pm["b2"]
    return jax.nn.sigmoid(y)


# ------------------------- deterministic parameters ------------------------- #

def glorot(key, shape):
    lim = (6.0 / (shape[0] + shape[-1])) ** 0.5
    return jax.random.uniform(key, shape, jnp.float32, -lim, lim)


def make_gatv2_params(key, in_dim, out_c, heads):
    k = jax.random.split(key, 3)
    return {
        "w_l": glorot(k[0], (in_dim, heads * out_c)),
        "b_l": jnp.zeros((1, heads * out_c), jnp.float32),
        "w_r": glorot(k[1], (in_dim, heads * out_c)),
        "b_r": jnp.zeros((1, heads * out_c), jnp.float32),
        "att": glorot(k[2], (heads, 1, out_c)),
        "bias": jnp.zeros((1, heads * out_c), jnp.float32),
    }


if __name__ == "__main__":
    key = jax.random.PRNGKey(0)
    N = 16            # number of graph nodes (transactions)
    E = 48            # number of directed edges
    input_dim = 16
    hidden_dim = 128  # args['hidden_dim'] -> per-head channels are lane-aligned
    heads = 2         # args['heads']
    output_dim = 2

    ks = jax.random.split(key, 8)

    # node features and random edge_index [2, E] (src row 0, dst row 1)
    x = jax.random.normal(ks[0], (N, input_dim), jnp.float32)
    src = jax.random.randint(ks[1], (E,), 0, N)
    dst = jax.random.randint(ks[2], (E,), 0, N)
    adj = jnp.zeros((N, N), jnp.float32).at[dst, src].set(1.0)
    adj = jnp.maximum(adj, jnp.eye(N, dtype=jnp.float32))   # add_self_loops=True

    params = {
        "conv1": make_gatv2_params(ks[3], input_dim, hidden_dim, heads),
        "conv2": make_gatv2_params(ks[4], heads * hidden_dim, hidden_dim, heads),
        "post_mp": {
            "w1": glorot(ks[5], (heads * hidden_dim, hidden_dim)),
            "b1": jnp.zeros((1, hidden_dim), jnp.float32),
            "w2": glorot(ks[6], (hidden_dim, output_dim)),
            "b2": jnp.zeros((1, output_dim), jnp.float32),
        },
    }

    prep = prepare_params(params, output_dim)
    out = transaction_classifier_forward(x, adj, prep, heads, hidden_dim)
    out = jax.block_until_ready(out)

    assert out.shape == (N, output_dim)
    assert bool(jnp.all(jnp.isfinite(out)))
    # exact sigmoid -> valid probabilities
    assert bool(jnp.all((out >= 0.0) & (out <= 1.0)))

    # Cross-check against a pure-JAX reference using the same bf16-rounded
    # weights / inputs the kernel consumes (remaining delta: bf16 intermediates
    # and the approx softmax reciprocal inside the kernel).
    def _q(w):
        return w.astype(jnp.bfloat16).astype(jnp.float32)
    params_q = {
        "conv1": {**params["conv1"],
                  "w_l": _q(params["conv1"]["w_l"]), "w_r": _q(params["conv1"]["w_r"])},
        "conv2": {**params["conv2"],
                  "w_l": _q(params["conv2"]["w_l"]), "w_r": _q(params["conv2"]["w_r"])},
        "post_mp": {**params["post_mp"],
                    "w1": _q(params["post_mp"]["w1"]),
                    "w2": _q(params["post_mp"]["w2"])},
    }
    ref = reference_forward(_q(x), adj, params_q, heads, hidden_dim)
    assert bool(jnp.max(jnp.abs(out - ref)) < 3e-2)

    print("KERNEL_OK")
</pallas_src>

<mosaic_0001>
module attributes {stable_mosaic.version = 11 : i64} {
  func.func @fused_forward_kernel(%arg0: memref<16x16xbf16, #tpu.memory_space<vmem>>, %arg1: memref<16x16xbf16, #tpu.memory_space<vmem>>, %arg2: memref<16x512xbf16, #tpu.memory_space<vmem>>, %arg3: memref<1x512xf32, #tpu.memory_space<vmem>>, %arg4: memref<2x1x128xf32, #tpu.memory_space<vmem>>, %arg5: memref<1x256xf32, #tpu.memory_space<vmem>>, %arg6: memref<256x512xbf16, #tpu.memory_space<vmem>>, %arg7: memref<1x512xf32, #tpu.memory_space<vmem>>, %arg8: memref<2x1x128xf32, #tpu.memory_space<vmem>>, %arg9: memref<1x256xf32, #tpu.memory_space<vmem>>, %arg10: memref<256x128xbf16, #tpu.memory_space<vmem>>, %arg11: memref<1x128xf32, #tpu.memory_space<vmem>>, %arg12: memref<128x128xbf16, #tpu.memory_space<vmem>>, %arg13: memref<1x128xf32, #tpu.memory_space<vmem>>, %arg14: memref<16x128xf32, #tpu.memory_space<vmem>>, %arg15: memref<16x512xf32, #tpu.memory_space<vmem>>, %arg16: memref<16x256xbf16, #tpu.memory_space<vmem>>, %arg17: memref<16x256xbf16, #tpu.memory_space<vmem>>) attributes {dimension_semantics = [], scalar_prefetch = 0 : i64, scratch_operands = 3 : i64, tpu.core_type = #tpu.core_type<tc>} {
    %c0 = arith.constant 0 : index
    %c0_0 = arith.constant 0 : index
    %0 = vector.load %arg0[%c0, %c0_0] : memref<16x16xbf16, #tpu.memory_space<vmem>>, vector<16x16xbf16>
    %c0_1 = arith.constant 0 : index
    %c0_2 = arith.constant 0 : index
    %1 = vector.load %arg2[%c0_1, %c0_2] : memref<16x512xbf16, #tpu.memory_space<vmem>>, vector<16x512xbf16>
    %cst = arith.constant dense<0.000000e+00> : vector<16x512xf32>
    %2 = tpu.matmul %0, %1, %cst {dimension_numbers = #tpu.dot_dimension_numbers<[1], [0], [0], [1], [0, 0, 1, 1], [], []>} : vector<16x16xbf16>, vector<16x512xbf16>, vector<16x512xf32> -> vector<16x512xf32>
    %c0_3 = arith.constant 0 : index
    %c0_4 = arith.constant 0 : index
    %3 = vector.load %arg3[%c0_3, %c0_4] : memref<1x512xf32, #tpu.memory_space<vmem>>, vector<1x512xf32>
    %4 = vector.broadcast %3 : vector<1x512xf32> to vector<16x512xf32>
    %5 = arith.addf %2, %4 : vector<16x512xf32>
    %c0_5 = arith.constant 0 : index
    %c0_6 = arith.constant 0 : index
    %6 = vector.load %arg15[%c0_5, %c0_6] : memref<16x512xf32, #tpu.memory_space<vmem>>, vector<16x512xf32>
    tpu.vector_store %arg15[%c0_5, %c0_6], %5 {strides = array<i32>} : memref<16x512xf32, #tpu.memory_space<vmem>>, vector<16x512xf32>,
    %c0_7 = arith.constant 0 : index
    %c0_8 = arith.constant 0 : index
    %7 = vector.load %arg15[%c0_7, %c0_8] : memref<16x512xf32, #tpu.memory_space<vmem>>, vector<16x128xf32>
    %8 = arith.truncf %7 : vector<16x128xf32> to vector<16x128xbf16>
    %c0_9 = arith.constant 0 : index
    %c0_10 = arith.constant 0 : index
    %c0_11 = arith.constant 0 : index
    %9 = vector.load %arg4[%c0_9, %c0_10, %c0_11] : memref<2x1x128xf32, #tpu.memory_space<vmem>>, vector<1x1x128xf32>
    %10 = vector.shape_cast %9 : vector<1x1x128xf32> to vector<1x128xf32>
    %c0_12 = arith.constant 0 : index
    %c0_13 = arith.constant 0 : index
    %11 = vector.load %arg5[%c0_12, %c0_13] : memref<1x256xf32, #tpu.memory_space<vmem>>, vector<1x128xf32>
    %c0_14 = arith.constant 0 : index
    %c256 = arith.constant 256 : index
    %12 = vector.load %arg15[%c0_14, %c256] : memref<16x512xf32, #tpu.memory_space<vmem>>, vector<16x128xf32>
    %13 = vector.shape_cast %12 : vector<16x128xf32> to vector<16x1x128xf32>
    %14 = vector.shape_cast %7 : vector<16x128xf32> to vector<1x16x128xf32>
    %15 = vector.broadcast %13 : vector<16x1x128xf32> to vector<16x16x128xf32>
    %16 = vector.broadcast %14 : vector<1x16x128xf32> to vector<16x16x128xf32>
    %17 = arith.addf %15, %16 : vector<16x16x128xf32>
    %cst_15 = arith.constant 2.000000e-01 : f32
    %18 = vector.broadcast %cst_15 : f32 to vector<16x16x128xf32>
    %19 = arith.mulf %18, %17 : vector<16x16x128xf32>
    %20 = arith.maximumf %17, %19 : vector<16x16x128xf32>
    %21 = vector.shape_cast %10 : vector<1x128xf32> to vector<1x1x128xf32>
    %22 = vector.broadcast %21 : vector<1x1x128xf32> to vector<16x16x128xf32>
    %23 = arith.mulf %20, %22 : vector<16x16x128xf32>
    %cst_16 = arith.constant dense<0.000000e+00> : vector<16x16xf32>
    %24 = vector.multi_reduction <add>, %23, %cst_16 [2] : vector<16x16x128xf32> to vector<16x16xf32>
    %c0_17 = arith.constant 0 : index
    %c0_18 = arith.constant 0 : index
    %25 = vector.load %arg1[%c0_17, %c0_18] : memref<16x16xbf16, #tpu.memory_space<vmem>>, vector<16x16xbf16>
    %26 = arith.extf %25 : vector<16x16xbf16> to vector<16x16xf32>
    %27 = arith.addf %24, %26 : vector<16x16xf32>
    %cst_19 = arith.constant dense<0xFF800000> : vector<16xf32>
    %28 = vector.multi_reduction <maximumf>, %27, %cst_19 [1] : vector<16x16xf32> to vector<16xf32>
    %29 = vector.shape_cast %28 : vector<16xf32> to vector<16x1xf32>
    %30 = vector.broadcast %29 : vector<16x1xf32> to vector<16x16xf32>
    %31 = arith.subf %27, %30 : vector<16x16xf32>
    %32 = math.exp %31 : vector<16x16xf32>
    %cst_20 = arith.constant dense<0.000000e+00> : vector<16xf32>
    %33 = vector.multi_reduction <add>, %32, %cst_20 [1] : vector<16x16xf32> to vector<16xf32>
    %34 = vector.shape_cast %33 : vector<16xf32> to vector<16x1xf32>
    %35 = tpu.reciprocal %34 {approx = true} : vector<16x1xf32> -> vector<16x1xf32>
    %36 = vector.broadcast %35 : vector<16x1xf32> to vector<16x16xf32>
    %37 = arith.mulf %32, %36 : vector<16x16xf32>
    %38 = arith.truncf %37 : vector<16x16xf32> to vector<16x16xbf16>
    %cst_21 = arith.constant dense<0.000000e+00> : vector<16x128xf32>
    %39 = tpu.matmul %38, %8, %cst_21 {dimension_numbers = #tpu.dot_dimension_numbers<[1], [0], [0], [1], [0, 0, 1, 1], [], []>} : vector<16x16xbf16>, vector<16x128xbf16>, vector<16x128xf32> -> vector<16x128xf32>
    %40 = vector.broadcast %11 : vector<1x128xf32> to vector<16x128xf32>
    %41 = arith.addf %39, %40 : vector<16x128xf32>
    %cst_22 = arith.constant 0.000000e+00 : f32
    %42 = vector.broadcast %cst_22 : f32 to vector<16x128xf32>
    %43 = arith.maximumf %41, %42 : vector<16x128xf32>
    %44 = arith.truncf %43 : vector<16x128xf32> to vector<16x128xbf16>
    %c0_23 = arith.constant 0 : index
    %c0_24 = arith.constant 0 : index
    %45 = vector.load %arg16[%c0_23, %c0_24] : memref<16x256xbf16, #tpu.memory_space<vmem>>, vector<16x128xbf16>
    tpu.vector_store %arg16[%c0_23, %c0_24], %44 {strides = array<i32>} : memref<16x256xbf16, #tpu.memory_space<vmem>>, vector<16x128xbf16>,
    %c0_25 = arith.constant 0 : index
    %c128 = arith.constant 128 : index
    %46 = vector.load %arg15[%c0_25, %c128] : memref<16x512xf32, #tpu.memory_space<vmem>>, vector<16x128xf32>
    %47 = arith.truncf %46 : vector<16x128xf32> to vector<16x128xbf16>
    %c1 = arith.constant 1 : index
    %c0_26 = arith.constant 0 : index
    %c0_27 = arith.constant 0 : index
    %48 = vector.load %arg4[%c1, %c0_26, %c0_27] : memref<2x1x128xf32, #tpu.memory_space<vmem>>, vector<1x1x128xf32>
    %49 = vector.shape_cast %48 : vector<1x1x128xf32> to vector<1x128xf32>
    %c0_28 = arith.constant 0 : index
    %c128_29 = arith.constant 128 : index
    %50 = vector.load %arg5[%c0_28, %c128_29] : memref<1x256xf32, #tpu.memory_space<vmem>>, vector<1x128xf32>
    %c0_30 = arith.constant 0 : index
    %c384 = arith.constant 384 : index
    %51 = vector.load %arg15[%c0_30, %c384] : memref<16x512xf32, #tpu.memory_space<vmem>>, vector<16x128xf32>
    %52 = vector.shape_cast %51 : vector<16x128xf32> to vector<16x1x128xf32>
    %53 = vector.shape_cast %46 : vector<16x128xf32> to vector<1x16x128xf32>
    %54 = vector.broadcast %52 : vector<16x1x128xf32> to vector<16x16x128xf32>
    %55 = vector.broadcast %53 : vector<1x16x128xf32> to vector<16x16x128xf32>
    %56 = arith.addf %54, %55 : vector<16x16x128xf32>
    %cst_31 = arith.constant 2.000000e-01 : f32
    %57 = vector.broadcast %cst_31 : f32 to vector<16x16x128xf32>
    %58 = arith.mulf %57, %56 : vector<16x16x128xf32>
    %59 = arith.maximumf %56, %58 : vector<16x16x128xf32>
    %60 = vector.shape_cast %49 : vector<1x128xf32> to vector<1x1x128xf32>
    %61 = vector.broadcast %60 : vector<1x1x128xf32> to vector<16x16x128xf32>
    %62 = arith.mulf %59, %61 : vector<16x16x128xf32>
    %cst_32 = arith.constant dense<0.000000e+00> : vector<16x16xf32>
    %63 = vector.multi_reduction <add>, %62, %cst_32 [2] : vector<16x16x128xf32> to vector<16x16xf32>
    %c0_33 = arith.constant 0 : index
    %c0_34 = arith.constant 0 : index
    %64 = vector.load %arg1[%c0_33, %c0_34] : memref<16x16xbf16, #tpu.memory_space<vmem>>, vector<16x16xbf16>
    %65 = arith.extf %64 : vector<16x16xbf16> to vector<16x16xf32>
    %66 = arith.addf %63, %65 : vector<16x16xf32>
    %cst_35 = arith.constant dense<0xFF800000> : vector<16xf32>
    %67 = vector.multi_reduction <maximumf>, %66, %cst_35 [1] : vector<16x16xf32> to vector<16xf32>
    %68 = vector.shape_cast %67 : vector<16xf32> to vector<16x1xf32>
    %69 = vector.broadcast %68 : vector<16x1xf32> to vector<16x16xf32>
    %70 = arith.subf %66, %69 : vector<16x16xf32>
    %71 = math.exp %70 : vector<16x16xf32>
    %cst_36 = arith.constant dense<0.000000e+00> : vector<16xf32>
    %72 = vector.multi_reduction <add>, %71, %cst_36 [1] : vector<16x16xf32> to vector<16xf32>
    %73 = vector.shape_cast %72 : vector<16xf32> to vector<16x1xf32>
    %74 = tpu.reciprocal %73 {approx = true} : vector<16x1xf32> -> vector<16x1xf32>
    %75 = vector.broadcast %74 : vector<16x1xf32> to vector<16x16xf32>
    %76 = arith.mulf %71, %75 : vector<16x16xf32>
    %77 = arith.truncf %76 : vector<16x16xf32> to vector<16x16xbf16>
    %cst_37 = arith.constant dense<0.000000e+00> : vector<16x128xf32>
    %78 = tpu.matmul %77, %47, %cst_37 {dimension_numbers = #tpu.dot_dimension_numbers<[1], [0], [0], [1], [0, 0, 1, 1], [], []>} : vector<16x16xbf16>, vector<16x128xbf16>, vector<16x128xf32> -> vector<16x128xf32>
    %79 = vector.broadcast %50 : vector<1x128xf32> to vector<16x128xf32>
    %80 = arith.addf %78, %79 : vector<16x128xf32>
    %cst_38 = arith.constant 0.000000e+00 : f32
    %81 = vector.broadcast %cst_38 : f32 to vector<16x128xf32>
    %82 = arith.maximumf %80, %81 : vector<16x128xf32>
    %83 = arith.truncf %82 : vector<16x128xf32> to vector<16x128xbf16>
    %c0_39 = arith.constant 0 : index
    %c128_40 = arith.constant 128 : index
    %84 = vector.load %arg16[%c0_39, %c128_40] : memref<16x256xbf16, #tpu.memory_space<vmem>>, vector<16x128xbf16>
    tpu.vector_store %arg16[%c0_39, %c128_40], %83 {strides = array<i32>} : memref<16x256xbf16, #tpu.memory_space<vmem>>, vector<16x128xbf16>,
    %c0_41 = arith.constant 0 : index
    %c0_42 = arith.constant 0 : index
    %85 = vector.load %arg16[%c0_41, %c0_42] : memref<16x256xbf16, #tpu.memory_space<vmem>>, vector<16x256xbf16>
    %c0_43 = arith.constant 0 : index
    %c0_44 = arith.constant 0 : index
    %86 = vector.load %arg6[%c0_43, %c0_44] : memref<256x512xbf16, #tpu.memory_space<vmem>>, vector<256x512xbf16>
    %cst_45 = arith.constant dense<0.000000e+00> : vector<16x512xf32>
    %87 = tpu.matmul %85, %86, %cst_45 {dimension_numbers = #tpu.dot_dimension_numbers<[1], [0], [0], [1], [0, 0, 1, 1], [], []>} : vector<16x256xbf16>, vector<256x512xbf16>, vector<16x512xf32> -> vector<16x512xf32>
    %c0_46 = arith.constant 0 : index
    %c0_47 = arith.constant 0 : index
    %88 = vector.load %arg7[%c0_46, %c0_47] : memref<1x512xf32, #tpu.memory_space<vmem>>, vector<1x512xf32>
    %89 = vector.broadcast %88 : vector<1x512xf32> to vector<16x512xf32>
    %90 = arith.addf %87, %89 : vector<16x512xf32>
    %c0_48 = arith.constant 0 : index
    %c0_49 = arith.constant 0 : index
    %91 = vector.load %arg15[%c0_48, %c0_49] : memref<16x512xf32, #tpu.memory_space<vmem>>, vector<16x512xf32>
    tpu.vector_store %arg15[%c0_48, %c0_49], %90 {strides = array<i32>} : memref<16x512xf32, #tpu.memory_space<vmem>>, vector<16x512xf32>,
    %c0_50 = arith.constant 0 : index
    %c0_51 = arith.constant 0 : index
    %92 = vector.load %arg15[%c0_50, %c0_51] : memref<16x512xf32, #tpu.memory_space<vmem>>, vector<16x128xf32>
    %93 = arith.truncf %92 : vector<16x128xf32> to vector<16x128xbf16>
    %c0_52 = arith.constant 0 : index
    %c0_53 = arith.constant 0 : index
    %c0_54 = arith.constant 0 : index
    %94 = vector.load %arg8[%c0_52, %c0_53, %c0_54] : memref<2x1x128xf32, #tpu.memory_space<vmem>>, vector<1x1x128xf32>
    %95 = vector.shape_cast %94 : vector<1x1x128xf32> to vector<1x128xf32>
    %c0_55 = arith.constant 0 : index
    %c0_56 = arith.constant 0 : index
    %96 = vector.load %arg9[%c0_55, %c0_56] : memref<1x256xf32, #tpu.memory_space<vmem>>, vector<1x128xf32>
    %c0_57 = arith.constant 0 : index
    %c256_58 = arith.constant 256 : index
    %97 = vector.load %arg15[%c0_57, %c256_58] : memref<16x512xf32, #tpu.memory_space<vmem>>, vector<16x128xf32>
    %98 = vector.shape_cast %97 : vector<16x128xf32> to vector<16x1x128xf32>
    %99 = vector.shape_cast %92 : vector<16x128xf32> to vector<1x16x128xf32>
    %100 = vector.broadcast %98 : vector<16x1x128xf32> to vector<16x16x128xf32>
    %101 = vector.broadcast %99 : vector<1x16x128xf32> to vector<16x16x128xf32>
    %102 = arith.addf %100, %101 : vector<16x16x128xf32>
    %cst_59 = arith.constant 2.000000e-01 : f32
    %103 = vector.broadcast %cst_59 : f32 to vector<16x16x128xf32>
    %104 = arith.mulf %103, %102 : vector<16x16x128xf32>
    %105 = arith.maximumf %102, %104 : vector<16x16x128xf32>
    %106 = vector.shape_cast %95 : vector<1x128xf32> to vector<1x1x128xf32>
    %107 = vector.broadcast %106 : vector<1x1x128xf32> to vector<16x16x128xf32>
    %108 = arith.mulf %105, %107 : vector<16x16x128xf32>
    %cst_60 = arith.constant dense<0.000000e+00> : vector<16x16xf32>
    %109 = vector.multi_reduction <add>, %108, %cst_60 [2] : vector<16x16x128xf32> to vector<16x16xf32>
    %c0_61 = arith.constant 0 : index
    %c0_62 = arith.constant 0 : index
    %110 = vector.load %arg1[%c0_61, %c0_62] : memref<16x16xbf16, #tpu.memory_space<vmem>>, vector<16x16xbf16>
    %111 = arith.extf %110 : vector<16x16xbf16> to vector<16x16xf32>
    %112 = arith.addf %109, %111 : vector<16x16xf32>
    %cst_63 = arith.constant dense<0xFF800000> : vector<16xf32>
    %113 = vector.multi_reduction <maximumf>, %112, %cst_63 [1] : vector<16x16xf32> to vector<16xf32>
    %114 = vector.shape_cast %113 : vector<16xf32> to vector<16x1xf32>
    %115 = vector.broadcast %114 : vector<16x1xf32> to vector<16x16xf32>
    %116 = arith.subf %112, %115 : vector<16x16xf32>
    %117 = math.exp %116 : vector<16x16xf32>
    %cst_64 = arith.constant dense<0.000000e+00> : vector<16xf32>
    %118 = vector.multi_reduction <add>, %117, %cst_64 [1] : vector<16x16xf32> to vector<16xf32>
    %119 = vector.shape_cast %118 : vector<16xf32> to vector<16x1xf32>
    %120 = tpu.reciprocal %119 {approx = true} : vector<16x1xf32> -> vector<16x1xf32>
    %121 = vector.broadcast %120 : vector<16x1xf32> to vector<16x16xf32>
    %122 = arith.mulf %117, %121 : vector<16x16xf32>
    %123 = arith.truncf %122 : vector<16x16xf32> to vector<16x16xbf16>
    %cst_65 = arith.constant dense<0.000000e+00> : vector<16x128xf32>
    %124 = tpu.matmul %123, %93, %cst_65 {dimension_numbers = #tpu.dot_dimension_numbers<[1], [0], [0], [1], [0, 0, 1, 1], [], []>} : vector<16x16xbf16>, vector<16x128xbf16>, vector<16x128xf32> -> vector<16x128xf32>
    %125 = vector.broadcast %96 : vector<1x128xf32> to vector<16x128xf32>
    %126 = arith.addf %124, %125 : vector<16x128xf32>
    %cst_66 = arith.constant 0.000000e+00 : f32
    %127 = vector.broadcast %cst_66 : f32 to vector<16x128xf32>
    %128 = arith.maximumf %126, %127 : vector<16x128xf32>
    %129 = arith.truncf %128 : vector<16x128xf32> to vector<16x128xbf16>
    %c0_67 = arith.constant 0 : index
    %c0_68 = arith.constant 0 : index
    %130 = vector.load %arg17[%c0_67, %c0_68] : memref<16x256xbf16, #tpu.memory_space<vmem>>, vector<16x128xbf16>
    tpu.vector_store %arg17[%c0_67, %c0_68], %129 {strides = array<i32>} : memref<16x256xbf16, #tpu.memory_space<vmem>>, vector<16x128xbf16>,
    %c0_69 = arith.constant 0 : index
    %c128_70 = arith.constant 128 : index
    %131 = vector.load %arg15[%c0_69, %c128_70] : memref<16x512xf32, #tpu.memory_space<vmem>>, vector<16x128xf32>
    %132 = arith.truncf %131 : vector<16x128xf32> to vector<16x128xbf16>
    %c1_71 = arith.constant 1 : index
    %c0_72 = arith.constant 0 : index
    %c0_73 = arith.constant 0 : index
    %133 = vector.load %arg8[%c1_71, %c0_72, %c0_73] : memref<2x1x128xf32, #tpu.memory_space<vmem>>, vector<1x1x128xf32>
    %134 = vector.shape_cast %133 : vector<1x1x128xf32> to vector<1x128xf32>
    %c0_74 = arith.constant 0 : index
    %c128_75 = arith.constant 128 : index
    %135 = vector.load %arg9[%c0_74, %c128_75] : memref<1x256xf32, #tpu.memory_space<vmem>>, vector<1x128xf32>
    %c0_76 = arith.constant 0 : index
    %c384_77 = arith.constant 384 : index
    %136 = vector.load %arg15[%c0_76, %c384_77] : memref<16x512xf32, #tpu.memory_space<vmem>>, vector<16x128xf32>
    %137 = vector.shape_cast %136 : vector<16x128xf32> to vector<16x1x128xf32>
    %138 = vector.shape_cast %131 : vector<16x128xf32> to vector<1x16x128xf32>
    %139 = vector.broadcast %137 : vector<16x1x128xf32> to vector<16x16x128xf32>
    %140 = vector.broadcast %138 : vector<1x16x128xf32> to vector<16x16x128xf32>
    %141 = arith.addf %139, %140 : vector<16x16x128xf32>
    %cst_78 = arith.constant 2.000000e-01 : f32
    %142 = vector.broadcast %cst_78 : f32 to vector<16x16x128xf32>
    %143 = arith.mulf %142, %141 : vector<16x16x128xf32>
    %144 = arith.maximumf %141, %143 : vector<16x16x128xf32>
    %145 = vector.shape_cast %134 : vector<1x128xf32> to vector<1x1x128xf32>
    %146 = vector.broadcast %145 : vector<1x1x128xf32> to vector<16x16x128xf32>
    %147 = arith.mulf %144, %146 : vector<16x16x128xf32>
    %cst_79 = arith.constant dense<0.000000e+00> : vector<16x16xf32>
    %148 = vector.multi_reduction <add>, %147, %cst_79 [2] : vector<16x16x128xf32> to vector<16x16xf32>
    %c0_80 = arith.constant 0 : index
    %c0_81 = arith.constant 0 : index
    %149 = vector.load %arg1[%c0_80, %c0_81] : memref<16x16xbf16, #tpu.memory_space<vmem>>, vector<16x16xbf16>
    %150 = arith.extf %149 : vector<16x16xbf16> to vector<16x16xf32>
    %151 = arith.addf %148, %150 : vector<16x16xf32>
    %cst_82 = arith.constant dense<0xFF800000> : vector<16xf32>
    %152 = vector.multi_reduction <maximumf>, %151, %cst_82 [1] : vector<16x16xf32> to vector<16xf32>
    %153 = vector.shape_cast %152 : vector<16xf32> to vector<16x1xf32>
    %154 = vector.broadcast %153 : vector<16x1xf32> to vector<16x16xf32>
    %155 = arith.subf %151, %154 : vector<16x16xf32>
    %156 = math.exp %155 : vector<16x16xf32>
    %cst_83 = arith.constant dense<0.000000e+00> : vector<16xf32>
    %157 = vector.multi_reduction <add>, %156, %cst_83 [1] : vector<16x16xf32> to vector<16xf32>
    %158 = vector.shape_cast %157 : vector<16xf32> to vector<16x1xf32>
    %159 = tpu.reciprocal %158 {approx = true} : vector<16x1xf32> -> vector<16x1xf32>
    %160 = vector.broadcast %159 : vector<16x1xf32> to vector<16x16xf32>
    %161 = arith.mulf %156, %160 : vector<16x16xf32>
    %162 = arith.truncf %161 : vector<16x16xf32> to vector<16x16xbf16>
    %cst_84 = arith.constant dense<0.000000e+00> : vector<16x128xf32>
    %163 = tpu.matmul %162, %132, %cst_84 {dimension_numbers = #tpu.dot_dimension_numbers<[1], [0], [0], [1], [0, 0, 1, 1], [], []>} : vector<16x16xbf16>, vector<16x128xbf16>, vector<16x128xf32> -> vector<16x128xf32>
    %164 = vector.broadcast %135 : vector<1x128xf32> to vector<16x128xf32>
    %165 = arith.addf %163, %164 : vector<16x128xf32>
    %cst_85 = arith.constant 0.000000e+00 : f32
    %166 = vector.broadcast %cst_85 : f32 to vector<16x128xf32>
    %167 = arith.maximumf %165, %166 : vector<16x128xf32>
    %168 = arith.truncf %167 : vector<16x128xf32> to vector<16x128xbf16>
    %c0_86 = arith.constant 0 : index
    %c128_87 = arith.constant 128 : index
    %169 = vector.load %arg17[%c0_86, %c128_87] : memref<16x256xbf16, #tpu.memory_space<vmem>>, vector<16x128xbf16>
    tpu.vector_store %arg17[%c0_86, %c128_87], %168 {strides = array<i32>} : memref<16x256xbf16, #tpu.memory_space<vmem>>, vector<16x128xbf16>,
    %c0_88 = arith.constant 0 : index
    %c0_89 = arith.constant 0 : index
    %170 = vector.load %arg17[%c0_88, %c0_89] : memref<16x256xbf16, #tpu.memory_space<vmem>>, vector<16x256xbf16>
    %c0_90 = arith.constant 0 : index
    %c0_91 = arith.constant 0 : index
    %171 = vector.load %arg10[%c0_90, %c0_91] : memref<256x128xbf16, #tpu.memory_space<vmem>>, vector<256x128xbf16>
    %cst_92 = arith.constant dense<0.000000e+00> : vector<16x128xf32>
    %172 = tpu.matmul %170, %171, %cst_92 {dimension_numbers = #tpu.dot_dimension_numbers<[1], [0], [0], [1], [0, 0, 1, 1], [], []>} : vector<16x256xbf16>, vector<256x128xbf16>, vector<16x128xf32> -> vector<16x128xf32>
    %c0_93 = arith.constant 0 : index
    %c0_94 = arith.constant 0 : index
    %173 = vector.load %arg11[%c0_93, %c0_94] : memref<1x128xf32, #tpu.memory_space<vmem>>, vector<1x128xf32>
    %174 = vector.broadcast %173 : vector<1x128xf32> to vector<16x128xf32>
    %175 = arith.addf %172, %174 : vector<16x128xf32>
    %176 = arith.truncf %175 : vector<16x128xf32> to vector<16x128xbf16>
    %c0_95 = arith.constant 0 : index
    %c0_96 = arith.constant 0 : index
    %177 = vector.load %arg12[%c0_95, %c0_96] : memref<128x128xbf16, #tpu.memory_space<vmem>>, vector<128x128xbf16>
    %cst_97 = arith.constant dense<0.000000e+00> : vector<16x128xf32>
    %178 = tpu.matmul %176, %177, %cst_97 {dimension_numbers = #tpu.dot_dimension_numbers<[1], [0], [0], [1], [0, 0, 1, 1], [], []>} : vector<16x128xbf16>, vector<128x128xbf16>, vector<16x128xf32> -> vector<16x128xf32>
    %c0_98 = arith.constant 0 : index
    %c0_99 = arith.constant 0 : index
    %179 = vector.load %arg13[%c0_98, %c0_99] : memref<1x128xf32, #tpu.memory_space<vmem>>, vector<1x128xf32>
    %180 = vector.broadcast %179 : vector<1x128xf32> to vector<16x128xf32>
    %181 = arith.addf %178, %180 : vector<16x128xf32>
    %cst_100 = arith.constant 0.000000e+00 : f32
    %182 = vector.broadcast %cst_100 : f32 to vector<16x128xf32>
    %183 = arith.subf %182, %181 : vector<16x128xf32>
    %184 = math.exp %183 : vector<16x128xf32>
    %cst_101 = arith.constant 1.000000e+00 : f32
    %185 = vector.broadcast %cst_101 : f32 to vector<16x128xf32>
    %186 = arith.addf %185, %184 : vector<16x128xf32>
    %cst_102 = arith.constant 1.000000e+00 : f32
    %187 = vector.broadcast %cst_102 : f32 to vector<16x128xf32>
    %188 = arith.divf %187, %186 : vector<16x128xf32>
    %c0_103 = arith.constant 0 : index
    %c0_104 = arith.constant 0 : index
    %189 = vector.load %arg14[%c0_103, %c0_104] : memref<16x128xf32, #tpu.memory_space<vmem>>, vector<16x128xf32>
    tpu.vector_store %arg14[%c0_103, %c0_104], %188 {strides = array<i32>} : memref<16x128xf32, #tpu.memory_space<vmem>>, vector<16x128xf32>,
    return
  }
}

</mosaic_0001>

<bundles_post_ra>
// kernel: tpu_custom_call.1
= control target key start
LH: loop header
LB: loop body
LE: loop exit
PB: predicated region body
PF: predicated region fallthrough
CT: control target
= control target key end

     0   :  { %19 = vsyncpa [#allocation6], 0  ;;  %s13538_s0 = inlined_call_operand.hbm [shape: bf16[16,16], index: 0, kind: input, shape index: {}]   ;;  %s13539_s1 = inlined_call_operand.hbm [shape: bf16[16,16], index: 1, kind: input, shape index: {}]   ;;  %s13540_s2 = inlined_call_operand.hbm [shape: bf16[16,512], index: 2, kind: input, shape index: {}]   ;;  %s13541_s3 = inlined_call_operand.vmem [shape: f32[1,512], index: 3, kind: input, shape index: {}]   ;;  %s13542_s4 = inlined_call_operand.vmem [shape: f32[2,1,128], index: 4, kind: input, shape index: {}]   ;;  %s13543_s5 = inlined_call_operand.vmem [shape: f32[1,256], index: 5, kind: input, shape index: {}]   ;;  %s13544_s6 = inlined_call_operand.hbm [shape: bf16[256,512], index: 6, kind: input, shape index: {}]   ;;  %s13545_s7 = inlined_call_operand.vmem [shape: f32[1,512], index: 7, kind: input, shape index: {}]   ;;  %s13546_s8 = inlined_call_operand.vmem [shape: f32[2,1,128], index: 8, kind: input, shape index: {}]   ;;  %s13547_s9 = inlined_call_operand.vmem [shape: f32[1,256], index: 9, kind: input, shape index: {}]   ;;  %s13548_s10 = inlined_call_operand.hbm [shape: bf16[256,128], index: 10, kind: input, shape index: {}]   ;;  %s13549_s11 = inlined_call_operand.vmem [shape: f32[1,128], index: 11, kind: input, shape index: {}]   ;;  %s13550_s12 = inlined_call_operand.hbm [shape: bf16[128,128], index: 12, kind: input, shape index: {}]   ;;  %s13551_s13 = inlined_call_operand.vmem [shape: f32[1,128], index: 13, kind: input, shape index: {}]   ;;  %s13552_s14 = inlined_call_operand.hbm [shape: f32[16,128], index: 14, kind: output, shape index: {}]  }
   0x1   :  { %20 = vsyncpa [#allocation9], 0 }
   0x2   :  { %21 = vsyncpa [#allocation12], 0 }
   0x3   :  { %22 = vsyncpa [#allocation15], 0 }
   0x4   :  { %23 = vsyncpa [#allocation7], 0  ;;  %s9466_s29 = smov [#allocation8]   ;;  %s9302_s17 = scalar_lea.hbm %s13539_s1, 128 }
   0x5   :  { %s41_s30 = sshll.u32 %s9466_s29, 4  ;;  %p9303_p0 = scmp.ne.s32.totalorder %s13539_s1, %s9302_s17  ;;  %s42_s30 = int_to_ptr.vmem [resolvable:$true] %s41_s30 }
   0x6   :  { %p9306_p1 = scmp.lt.u32.totalorder %s9302_s17, %s13539_s1 }
   0x8   :  { %p9308_p2 = pnand %p9306_p1, %p9303_p0 }
   0xa   :  { %9311 = shalt.err (!%p9308_p2)
}
   0xb   :  { %s9312_s22 = scalar_lea.vmem %s42_s30, 128  ;;  %p9317_p4 = scmp.lt.s32.totalorder %s42_s30, %s42_s30 }
   0xc   :  { %p9313_p3 = scmp.ne.s32.totalorder %s42_s30, %s9312_s22  ;;  %p9318_p5 = scmp.lt.s32.totalorder %s9312_s22, %s9312_s22 }
   0xe   :  { %p9319_p6 = por %p9318_p5, %p9317_p4 }
  0x10   :  { %p9320_p7 = pnand %p9319_p6, %p9313_p3 }
  0x12   :  { %9323 = shalt.err (!%p9320_p7)
}
  0x13   :  { %s9467_s23 = smov 64   ;;  %s9468_s24 = smov 4  }
  0x14   :  { %47 = dma.hbm_to_vmem [thread:$0]  %s13539_s1, 128, %s42_s30, [#allocation9], %s9467_s23, %s9467_s23, %s9468_s24  }
  0x15   :  { %s9469_s27 = smov [#allocation11]   ;;  %s9470_s29 = smov [#allocation5]  }
  0x16   :  { %s71_s28 = sshll.u32 %s9469_s27, 4  ;;  %s29_s15 = sshll.u32 %s9470_s29, 4  ;;  %s72_s28 = int_to_ptr.vmem [resolvable:$true] %s71_s28  ;;  %s30_s15 = int_to_ptr.vmem [resolvable:$true] %s29_s15 }
  0x17   :  { %s9324_s18 = scalar_lea.hbm %s13544_s6, 8192 }
  0x18   :  { %p9325_p8 = scmp.ne.s32.totalorder %s13544_s6, %s9324_s18  ;;  %p9328_p9 = scmp.lt.u32.totalorder %s9324_s18, %s13544_s6 }
  0x1a   :  { %p9330_p10 = pnand %p9328_p9, %p9325_p8 }
  0x1c   :  { %9333 = shalt.err (!%p9330_p10)
}
  0x1d   :  { %s9334_s1 = scalar_lea.vmem %s72_s28, 8192  ;;  %p9339_p12 = scmp.lt.s32.totalorder %s72_s28, %s72_s28 }
  0x1e   :  { %p9335_p11 = scmp.ne.s32.totalorder %s72_s28, %s9334_s1  ;;  %p9340_p13 = scmp.lt.s32.totalorder %s9334_s1, %s9334_s1 }
  0x20   :  { %p9341_p0 = por %p9340_p13, %p9339_p12 }
  0x22   :  { %p9342_p1 = pnand %p9341_p0, %p9335_p11 }
  0x24   :  { %9345 = shalt.err (!%p9342_p1)
}
  0x25   :  { %s9471_s30 = smov 256   ;;  %s9472_s25 = smov 16  }
  0x26   :  { %77 = dma.hbm_to_vmem [thread:$0]  %s13544_s6, 8192, %s72_s28, [#allocation12], %s9471_s30, %s9471_s30, %s9472_s25  }
  0x27   :  { %s9346_s17 = scalar_lea.hbm %s13538_s0, 128 }
  0x28   :  { %p9347_p2 = scmp.ne.s32.totalorder %s13538_s0, %s9346_s17  ;;  %p9350_p3 = scmp.lt.u32.totalorder %s9346_s17, %s13538_s0 }
  0x2a   :  { %p9352_p4 = pnand %p9350_p3, %p9347_p2 }
  0x2c   :  { %9355 = shalt.err (!%p9352_p4)
}
  0x2d   :  { %s9356_s22 = scalar_lea.vmem %s30_s15, 128  ;;  %p9361_p6 = scmp.lt.s32.totalorder %s30_s15, %s30_s15 }
  0x2e   :  { %p9357_p5 = scmp.ne.s32.totalorder %s30_s15, %s9356_s22  ;;  %p9362_p7 = scmp.lt.s32.totalorder %s9356_s22, %s9356_s22 }
  0x30   :  { %p9363_p8 = por %p9362_p7, %p9361_p6 }
  0x32   :  { %p9364_p9 = pnand %p9363_p8, %p9357_p5 }
  0x34   :  { %9367 = shalt.err (!%p9364_p9)
}
  0x35   :  { %35 = dma.hbm_to_vmem [thread:$0]  %s13538_s0, 128, %s30_s15, [#allocation6], %s9467_s23, %s9467_s23, %s9468_s24  }
  0x36   :  { %s9473_s1 = smov [#allocation10]   ;;  %s9474_s27 = smov [#allocation13]  }
  0x37   :  { %s53_s26 = sshll.u32 %s9473_s1, 4  ;;  %s89_s29 = sshll.u32 %s9474_s27, 4  ;;  %s54_s26 = int_to_ptr.vmem [resolvable:$true] %s53_s26  ;;  %s90_s29 = int_to_ptr.vmem [resolvable:$true] %s89_s29 }
  0x38   :  { %s9368_s18 = scalar_lea.hbm %s13540_s2, 512 }
  0x39   :  { %p9369_p10 = scmp.ne.s32.totalorder %s13540_s2, %s9368_s18  ;;  %p9372_p11 = scmp.lt.u32.totalorder %s9368_s18, %s13540_s2 }
  0x3b   :  { %p9374_p12 = pnand %p9372_p11, %p9369_p10 }
  0x3d   :  { %9377 = shalt.err (!%p9374_p12)
}
  0x3e   :  { %s9378_s0 = scalar_lea.vmem %s54_s26, 512  ;;  %p9383_p0 = scmp.lt.s32.totalorder %s54_s26, %s54_s26 }
  0x3f   :  { %p9379_p13 = scmp.ne.s32.totalorder %s54_s26, %s9378_s0  ;;  %p9384_p1 = scmp.lt.s32.totalorder %s9378_s0, %s9378_s0 }
  0x41   :  { %p9385_p2 = por %p9384_p1, %p9383_p0 }
  0x43   :  { %p9386_p3 = pnand %p9385_p2, %p9379_p13 }
  0x45   :  { %9389 = shalt.err (!%p9386_p3)
}
  0x46   :  { %59 = dma.hbm_to_vmem [thread:$0]  %s13540_s2, 512, %s54_s26, [#allocation9], %s9471_s30, %s9471_s30, %s9472_s25  }
  0x47   :  { %s9390_s27 = scalar_lea.hbm %s13548_s10, 2048 }
  0x48   :  { %p9391_p4 = scmp.ne.s32.totalorder %s13548_s10, %s9390_s27  ;;  %p9394_p5 = scmp.lt.u32.totalorder %s9390_s27, %s13548_s10 }
  0x4a   :  { %p9396_p6 = pnand %p9394_p5, %p9391_p4 }
  0x4c   :  { %9399 = shalt.err (!%p9396_p6)
}
  0x4d   :  { %s9400_s20 = scalar_lea.vmem %s90_s29, 2048  ;;  %p9405_p8 = scmp.lt.s32.totalorder %s90_s29, %s90_s29 }
  0x4e   :  { %p9401_p7 = scmp.ne.s32.totalorder %s90_s29, %s9400_s20  ;;  %p9406_p9 = scmp.lt.s32.totalorder %s9400_s20, %s9400_s20 }
  0x50   :  { %p9407_p10 = por %p9406_p9, %p9405_p8 }
  0x52   :  { %p9408_p11 = pnand %p9407_p10, %p9401_p7 }
  0x54   :  { %9411 = shalt.err (!%p9408_p11)
}
  0x55   :  { %95 = dma.hbm_to_vmem [thread:$0]  %s13548_s10, 2048, %s90_s29, [#allocation12], %s9467_s23, %s9467_s23, %s9468_s24  }
  0x56   :  { %s9475_s25 = smov [#allocation14]   ;;  %s9412_s0 = scalar_lea.hbm %s13550_s12, 1024 }
  0x57   :  { %s103_s26 = sshll.u32 %s9475_s25, 4  ;;  %p9413_p12 = scmp.ne.s32.totalorder %s13550_s12, %s9412_s0  ;;  %s104_s26 = int_to_ptr.vmem [resolvable:$true] %s103_s26 }
  0x58   :  { %p9416_p13 = scmp.lt.u32.totalorder %s9412_s0, %s13550_s12 }
  0x5a   :  { %p9418_p0 = pnand %p9416_p13, %p9413_p12 }
  0x5c   :  { %9421 = shalt.err (!%p9418_p0)
}
  0x5d   :  { %s9422_s27 = scalar_lea.vmem %s104_s26, 1024  ;;  %p9427_p2 = scmp.lt.s32.totalorder %s104_s26, %s104_s26 }
  0x5e   :  { %p9423_p1 = scmp.ne.s32.totalorder %s104_s26, %s9422_s27  ;;  %p9428_p3 = scmp.lt.s32.totalorder %s9422_s27, %s9422_s27 }
  0x60   :  { %p9429_p4 = por %p9428_p3, %p9427_p2 }
  0x62   :  { %p9430_p5 = pnand %p9429_p4, %p9423_p1 }
  0x64   :  { %9433 = shalt.err (!%p9430_p5)
}
  0x65   :  { %109 = dma.hbm_to_vmem [thread:$0]  %s13550_s12, 1024, %s104_s26, [#allocation15], %s9467_s23, %s9467_s23, %s9468_s24  }
  0x66   :  { %9456 = dma.done.wait [#allocation6], 128  }
  0x67   :  { %9457 = vsyncadd [#allocation6], 4294967168 }
  0x68   :  { %9458 = dma.done.wait [#allocation9], 640  }
  0x69   :  { %9459 = vsyncadd [#allocation9], 4294966656 }
  0x6a   :  { %9460 = dma.done.wait [#allocation12], 10240  }
  0x6b   :  { %9461 = vsyncadd [#allocation12], 4294957056 }
  0x6c   :  { %9462 = dma.done.wait [#allocation15], 1024  }
  0x6d   :  { %9463 = vsyncadd [#allocation15], 4294966272  ;;  %v13555_v0 = vlaneseq  ;;  %v9476_v1 = vmov 0   ;;  %v8895_v3 = vld [vmem:[#allocation10 + $0xc] ss:$16 sps:$4 sm:$0xff]   ;;  %v8901_v8 = vld [vmem:[#allocation5] sm:$0xff]  }
  0x6e   :  { %263 = vmatprep.mubr.bf16.mxu1 %v9476_v1  ;;  %220 = vmatprep.mubr.bf16.mxu0 %v9476_v1  ;;  %v8897_v4 = vld [vmem:[#allocation10 + $0x8] ss:$16 sps:$4 sm:$0xff]   ;;  %v8898_v6 = vld [vmem:[#allocation10 + $0x4] ss:$16 sps:$4 sm:$0xff]   ;;  %v8900_v7 = vld [vmem:[#allocation10] ss:$16 sps:$4 sm:$0xff]  }
  0x6f   :  { %8894 = vset.pattern.permute.xlu1 %v9476_v1  ;;  %8893 = vset.pattern.permute.xlu0 %v9476_v1  ;;  %v9649_v2 = vshrl.u32 %v13555_v0, 7  ;;  %vm184_vm0 = vcmask 130048   ;;  %v8778_v9 = vld [vmem:[#allocation8] sm:$0xff]   ;;  %v13553_v35 = vmov 0.0   ;;  %v9478_v36 = vmov 1966171168  }
  0x70   :  { %231 = vmatprep.subr.bf16.mxu1 %v8895_v3  ;;  %188 = vmatprep.subr.bf16.mxu0 %v8898_v6  ;;  %v8779_v10 = vunpack.c.l.bf16 %v8778_v9  ;;  %v8780_v26 = vunpack.c.h.bf16 %v8778_v9  ;;  %v293_v37 = vunpack.c.l.s4 %v9478_v36  ;;  %v137_v38 = vld [vmem:[%s13541_s3] sm:$0xf]  ;;  %vm1052_vm1 = vcmask 130112  }
  0x71   :  { %13769 = vst [vmem:[#allocation22_spill] sm:$0xff] %v9649_v2  ;;  %v9652_v5 = vsub.s32 0, %v9649_v2  ;;  %232 = vmatpush1.bf16.msra.mxu1 %v8897_v4  ;;  %v9655_v11 = vsub.s32 1, %v9649_v2  ;;  %189 = vmatpush1.bf16.msra.mxu0 %v8900_v7  ;;  %v9662_v13 = vsub.s32 2, %v9649_v2  ;;  %v9674_v16 = vsub.s32 3, %v9649_v2 }
  0x72   :  { %v9682_v18 = vsub.s32 4, %v9649_v2  ;;  %v9690_v20 = vsub.s32 5, %v9649_v2  ;;  %v9698_v22 = vsub.s32 6, %v9649_v2  ;;  %v9702_v23 = vsub.s32 7, %v9649_v2  ;;  %8832 = vmatprep.subr.bf16.mxu0 %v13553_v35  ;;  %8838 = vmatprep.subr.bf16.mxu1 %v13553_v35 }
  0x73   :  { %13770 = vst [vmem:[#allocation23_spill] sm:$0xff] %v9652_v5  ;;  %13771 = vst [vmem:[#allocation24_spill] sm:$0xff] %v9655_v11  ;;  %v9659_v12 = vrot.slane %v8779_v10, %v9652_v5  ;;  %v9667_v14 = vrot.slane %v8779_v10, %v9655_v11  ;;  %v9671_v15 = vrot.slane %v8779_v10, %v9662_v13  ;;  %v294_v39 = vunpack.c.0.s8 %v293_v37 }
  0x74   :  { %8672 = vmatmul.mubr.msk.bf16.vlgmr.msra.gmra.mrb[0].mxu1 %vm184_vm0, %v8901_v8  ;;  %13772 = vst [vmem:[#allocation25_spill] sm:$0xff] %v9662_v13  ;;  %8671 = vmatmul.mubr.msk.bf16.vlgmr.msra.gmra.mrb[0].mxu0 %vm184_vm0, %v8901_v8  ;;  %13773 = vst [vmem:[#allocation26_spill] sm:$0xff] %v9674_v16  ;;  %v9679_v17 = vrot.slane %v8779_v10, %v9674_v16  ;;  %v9687_v19 = vrot.slane %v8779_v10, %v9682_v18  ;;  %vm1189_vm2 = vcmask 1041409   ;;  %vm1191_vm3 = vcmask 1042434  }
  0x75   :  { %682 = vbcast.lane.b32.xlu1 %v9659_v12, 264  ;;  %678 = vbcast.lane.b32.xlu0 %v9659_v12, 256  ;;  %13774 = vst [vmem:[#allocation27_spill] sm:$0xff] %v9682_v18  ;;  %13775 = vst [vmem:[#allocation28_spill] sm:$0xff] %v9690_v20  ;;  %v9695_v21 = vrot.slane %v8779_v10, %v9690_v20  ;;  %v9706_v24 = vrot.slane %v8779_v10, %v9698_v22  ;;  %vm1193_vm4 = vcmask 1043459   ;;  %vm1195_vm5 = vcmask 1044484  }
  0x76   :  { %13776 = vst [vmem:[#allocation29_spill] sm:$0xff] %v9698_v22  ;;  %13777 = vst [vmem:[#allocation30_spill] sm:$0xff] %v9702_v23  ;;  %v9711_v25 = vrot.slane %v8779_v10, %v9702_v23  ;;  %v9716_v27 = vrot.slane %v8780_v26, %v9652_v5  ;;  %v9721_v28 = vrot.slane %v8780_v26, %v9655_v11  ;;  %vm1197_vm6 = vcmask 1045509  }
  0x77   :  { %v9726_v29 = vrot.slane %v8780_v26, %v9662_v13  ;;  %v9731_v30 = vrot.slane %v8780_v26, %v9674_v16  ;;  %v9736_v31 = vrot.slane %v8780_v26, %v9682_v18  ;;  %v9741_v32 = vrot.slane %v8780_v26, %v9690_v20 }
  0x78   :  { %v9746_v33 = vrot.slane %v8780_v26, %v9698_v22  ;;  %v9751_v34 = vrot.slane %v8780_v26, %v9702_v23  ;;  %v150_v40 = vrot.slane %v137_v38, %v9662_v13  ;;  %v154_v41 = vrot.slane %v137_v38, %v9674_v16 }
  0x79   :  { %689 = vbcast.lane.b32.xlu1 %v9667_v14, 256  ;;  %700 = vbcast.lane.b32.xlu0 %v9671_v15, 256  ;;  %v9766_v42 = vsub.s32 %v294_v39, %v9649_v2  ;;  %v142_v55 = vrot.slane %v137_v38, %v9652_v5  ;;  %v146_v61 = vrot.slane %v137_v38, %v9655_v11  ;;  %vm1199_vm7 = vcmask 1046534  }
  0x7a   :  { %vm1201_vm8 = vcmask 1047559   ;;  %vm9479_vm9 = vmmov 0  }
  0x7b   :  { %13778 = vst [vmem:[#allocation31_spill] sm:$0xff] %v9766_v42 }
  0x7d   :  { %693 = vbcast.lane.b32.xlu1 %v9667_v14, 264  ;;  %711 = vbcast.lane.b32.xlu0 %v9679_v17, 256 }
  0x81   :  { %704 = vbcast.lane.b32.xlu1 %v9671_v15, 264  ;;  %722 = vbcast.lane.b32.xlu0 %v9687_v19, 256 }
  0x85   :  { %715 = vbcast.lane.b32.xlu1 %v9679_v17, 264  ;;  %733 = vbcast.lane.b32.xlu0 %v9695_v21, 256 }
  0x89   :  { %726 = vbcast.lane.b32.xlu1 %v9687_v19, 264  ;;  %744 = vbcast.lane.b32.xlu0 %v9706_v24, 256 }
  0x8d   :  { %737 = vbcast.lane.b32.xlu1 %v9695_v21, 264  ;;  %755 = vbcast.lane.b32.xlu0 %v9711_v25, 256 }
  0x91   :  { %748 = vbcast.lane.b32.xlu1 %v9706_v24, 264  ;;  %766 = vbcast.lane.b32.xlu0 %v9716_v27, 256 }
  0x95   :  { %759 = vbcast.lane.b32.xlu1 %v9711_v25, 264  ;;  %777 = vbcast.lane.b32.xlu0 %v9721_v28, 256 }
  0x99   :  { %770 = vbcast.lane.b32.xlu1 %v9716_v27, 264  ;;  %788 = vbcast.lane.b32.xlu0 %v9726_v29, 256 }
  0x9d   :  { %781 = vbcast.lane.b32.xlu1 %v9721_v28, 264  ;;  %799 = vbcast.lane.b32.xlu0 %v9731_v30, 256 }
  0xa1   :  { %792 = vbcast.lane.b32.xlu1 %v9726_v29, 264  ;;  %810 = vbcast.lane.b32.xlu0 %v9736_v31, 256 }
  0xa5   :  { %803 = vbcast.lane.b32.xlu1 %v9731_v30, 264  ;;  %821 = vbcast.lane.b32.xlu0 %v9741_v32, 256 }
  0xa9   :  { %814 = vbcast.lane.b32.xlu1 %v9736_v31, 264  ;;  %832 = vbcast.lane.b32.xlu0 %v9746_v33, 256 }
  0xad   :  { %825 = vbcast.lane.b32.xlu1 %v9741_v32, 264  ;;  %843 = vbcast.lane.b32.xlu0 %v9751_v34, 256 }
  0xb1   :  { %836 = vbcast.lane.b32.xlu1 %v9746_v33, 264 }
  0xb5   :  { %847 = vbcast.lane.b32.xlu1 %v9751_v34, 264 }
  0xb9   :  { %2576 = vbcast.lane.b32.xlu1 %v9659_v12, 256 }
 0x147   :  { %v265_v43 = vpop.f32.mrb[0].mxu1  ;;  %v222_v48 = vpop.f32.mrb[0].mxu0 }
 0x148   :  { %v266_v44 = vadd.f32 %v265_v43, %v150_v40  ;;  %v267_v45 = vpop.f32.mrb[1].mxu1  ;;  %v224_v51 = vpop.f32.mrb[1].mxu0  ;;  %v9779_v60 = vadd.f32 %v222_v48, %v142_v55 }
 0x149   :  { %v9768_v46 = vadd.f32 %v267_v45, %v154_v41  ;;  %v269_v47 = vpop.f32.mrb[2].mxu1  ;;  %v226_v52 = vpop.f32.mrb[2].mxu0  ;;  %v9791_v6 = vadd.f32 %v224_v51, %v146_v61  ;;  %v9817_v45 = vld [vmem:[%s13542_s4] ss:$0 sm:$0xff] }
 0x14a   :  { %v298_v49 = vrot.slane %v266_v44, %v9766_v42  ;;  %v271_v50 = vpop.f32.mrb[3].mxu1  ;;  %v228_v56 = vpop.f32.mrb[3].mxu0  ;;  %v291_v57 = vcombine.high %v266_v44, %v266_v44  ;;  %v9785_v1 = vadd.f32 %v269_v47, %v150_v40  ;;  %v9787_v3 = vadd.f32 %v226_v52, %v142_v55 }
 0x14b   :  { %v2196_v54 = vrot.slane %v9768_v46, %v9766_v42  ;;  %v9793_v7 = vadd.f32 %v228_v56, %v146_v61  ;;  %v9812_v44 = vadd.f32 %v271_v50, %v154_v41  ;;  %v9830_v41 = vld [vmem:[%s13542_s4 + $0x1] ss:$0 sm:$0xff] }
 0x14c   :  { %v314_v53 = vrot.slane %v298_v49, %v9766_v42  ;;  %v306_v62 = vcombine.high %v298_v49, %v298_v49  ;;  %v9783_v63 = vrot.slane %v291_v57, %v9766_v42  ;;  %v284_v10 = vpack.c.bf16 %v9787_v3, %v9779_v60 }
 0x14d   :  { %v9777_v59 = vrot.slane %v2196_v54, %v9766_v42  ;;  %v9807_v37 = vrot.slane %v9785_v1, %v9766_v42  ;;  %v2181_v38 = vpack.c.bf16 %v9793_v7, %v9791_v6  ;;  %v2204_v43 = vcombine.high %v2196_v54, %v2196_v54 }
 0x14e   :  { %v392_v58 = vrot.slane %v314_v53, %v9652_v5  ;;  %v9797_v9 = vrot.slane %v306_v62, %v9766_v42  ;;  %v9803_v26 = vrot.slane %v9783_v63, %v9766_v42  ;;  %v336_v36 = vcombine.high %v314_v53, %v314_v53  ;;  %8833 = vmatpush3.bf16.msra.mxu0 %v284_v10 }
 0x14f   :  { %v2290_v4 = vrot.slane %v9777_v59, %v9652_v5  ;;  %8839 = vmatpush3.bf16.msra.mxu1 %v2181_v38  ;;  %v9825_v53 = vrot.slane %v9807_v37, %v9766_v42  ;;  %v9839_v62 = vrot.slane %v9812_v44, %v9766_v42 }
 0x150   :  { %v469_v8 = vadd.f32 %v392_v58, %v9779_v60  ;;  %v470_v47 = vadd.f32 %v392_v58, %v9787_v3  ;;  %v396_v51 = vrot.slane %v9797_v9, %v9652_v5  ;;  %v400_v54 = vrot.slane %v336_v36, %v9652_v5 }
 0x151   :  { %v2367_v40 = vadd.f32 %v2290_v4, %v9791_v6  ;;  %v2368_v52 = vadd.f32 %v2290_v4, %v9793_v7  ;;  %v408_v55 = vrot.slane %v9803_v26, %v9652_v5  ;;  %v338_v20 = vcombine.high %v9797_v9, %v9797_v9 }
 0x152   :  { %v501_v39 = vmul.f32 0.2, %v469_v8  ;;  %v502_v50 = vmul.f32 0.2, %v470_v47  ;;  %v471_v58 = vadd.f32 %v396_v51, %v9779_v60  ;;  %v473_v10 = vadd.f32 %v400_v54, %v9779_v60 }
 0x153   :  { %v2399_v49 = vmul.f32 0.2, %v2367_v40  ;;  %v2400_v61 = vmul.f32 0.2, %v2368_v52 }
 0x154   :  { %v533_v48 = vmax.f32 %v469_v8, %v501_v39  ;;  %v534_v4 = vmax.f32 %v470_v47, %v502_v50  ;;  %v472_v8 = vadd.f32 %v396_v51, %v9787_v3  ;;  %v503_v38 = vmul.f32 0.2, %v471_v58 }
 0x155   :  { %v2431_v57 = vmax.f32 %v2367_v40, %v2399_v49  ;;  %v474_v39 = vadd.f32 %v400_v54, %v9787_v3  ;;  %v9846_v40 = vrot.slane %v2204_v43, %v9766_v42  ;;  %v2432_v49 = vmax.f32 %v2368_v52, %v2400_v61 }
 0x156   :  { %v571_v56 = vmul.f32 %v9817_v45, %v533_v48  ;;  %v424_v48 = vrot.slane %v9825_v53, %v9652_v5  ;;  %v504_v35 = vmul.f32 0.2, %v472_v8  ;;  %v572_v47 = vmul.f32 %v9817_v45, %v534_v4 }
 0x157   :  { %v2469_v36 = vmul.f32 %v9830_v41, %v2431_v57  ;;  %v535_v51 = vmax.f32 %v471_v58, %v503_v38  ;;  %v505_v50 = vmul.f32 0.2, %v473_v10  ;;  %v2189_v57 = vcombine.high %v9768_v46, %v9768_v46 }
 0x158   :  { %603 = vadd.xlane.f32.xlu0 %v571_v56  ;;  %v477_v56 = vadd.f32 %v408_v55, %v9779_v60  ;;  %v9856_v54 = vrot.slane %v9839_v62, %v9766_v42  ;;  %v536_v0 = vmax.f32 %v472_v8, %v504_v35  ;;  %v506_v52 = vmul.f32 0.2, %v474_v39 }
 0x159   :  { %2501 = vadd.xlane.f32.xlu1 %v2469_v36  ;;  %v573_v43 = vmul.f32 %v9817_v45, %v535_v51  ;;  %v478_v61 = vadd.f32 %v408_v55, %v9787_v3  ;;  %v485_v4 = vadd.f32 %v424_v48, %v9779_v60  ;;  %v2470_v58 = vmul.f32 %v9830_v41, %v2432_v49 }
 0x15a   :  { %v537_v36 = vmax.f32 %v473_v10, %v505_v50  ;;  %v509_v38 = vmul.f32 0.2, %v477_v56  ;;  %v2294_v46 = vrot.slane %v9846_v40, %v9652_v5  ;;  %v9865_v23 = vrot.slane %v2189_v57, %v9766_v42 }
 0x15b   :  { %v2322_v35 = vrot.slane %v9856_v54, %v9652_v5  ;;  %v574_v55 = vmul.f32 %v9817_v45, %v536_v0  ;;  %v538_v8 = vmax.f32 %v474_v39, %v506_v52  ;;  %v510_v51 = vmul.f32 0.2, %v478_v61 }
 0x15c   :  { %605 = vadd.xlane.f32.xlu0 %v572_v47  ;;  %v2234_v47 = vcombine.high %v9777_v59, %v9777_v59  ;;  %v486_v10 = vadd.f32 %v424_v48, %v9787_v3  ;;  %v575_v49 = vmul.f32 %v9817_v45, %v537_v36  ;;  %v541_v50 = vmax.f32 %v477_v56, %v509_v38 }
 0x15d   :  { %607 = vadd.xlane.f32.xlu1 %v573_v43  ;;  %v517_v43 = vmul.f32 0.2, %v485_v4  ;;  %v2369_v57 = vadd.f32 %v2294_v46, %v9791_v6  ;;  %v9877_v59 = vrot.slane %v9865_v23, %v9766_v42  ;;  %v2383_v22 = vadd.f32 %v2322_v35, %v9791_v6 }
 0x15e   :  { %v576_v0 = vmul.f32 %v9817_v45, %v538_v8  ;;  %v542_v39 = vmax.f32 %v478_v61, %v510_v51  ;;  %v518_v52 = vmul.f32 0.2, %v486_v10  ;;  %v2298_v48 = vrot.slane %v2234_v47, %v9652_v5 }
 0x15f   :  { %v549_v56 = vmax.f32 %v485_v4, %v517_v43  ;;  %v2401_v36 = vmul.f32 0.2, %v2369_v57  ;;  %v2370_v38 = vadd.f32 %v2294_v46, %v9793_v7  ;;  %v2306_v51 = vrot.slane %v9877_v59, %v9652_v5 }
 0x160   :  { %2503 = vadd.xlane.f32.xlu0 %v2470_v58  ;;  %v579_v58 = vmul.f32 %v9817_v45, %v541_v50  ;;  %v580_v61 = vmul.f32 %v9817_v45, %v542_v39  ;;  %v550_v8 = vmax.f32 %v486_v10, %v518_v52  ;;  %v2371_v47 = vadd.f32 %v2298_v48, %v9791_v6 }
 0x161   :  { %609 = vadd.xlane.f32.xlu1 %v574_v55  ;;  %v307_v55 = vcombine.high %v9783_v63, %v9783_v63  ;;  %v587_v4 = vmul.f32 %v9817_v45, %v549_v56  ;;  %v2433_v46 = vmax.f32 %v2369_v57, %v2401_v36  ;;  %v2402_v50 = vmul.f32 0.2, %v2370_v38 }
 0x162   :  { %v2384_v63 = vadd.f32 %v2322_v35, %v9793_v7  ;;  %v2403_v10 = vmul.f32 0.2, %v2371_v47  ;;  %v2375_v39 = vadd.f32 %v2306_v51, %v9791_v6  ;;  %v404_v52 = vrot.slane %v338_v20, %v9652_v5 }
 0x163   :  { %v9895_v43 = vrot.slane %v307_v55, %v9766_v42  ;;  %v2434_v56 = vmax.f32 %v2370_v38, %v2402_v50  ;;  %v2372_v36 = vadd.f32 %v2298_v48, %v9793_v7  ;;  %v337_v35 = vcombine.high %v9803_v26, %v9803_v26 }
 0x164   :  { %611 = vadd.xlane.f32.xlu0 %v575_v49  ;;  %v2415_v49 = vmul.f32 0.2, %v2383_v22  ;;  %v2416_v57 = vmul.f32 0.2, %v2384_v63  ;;  %v476_v20 = vadd.f32 %v404_v52, %v9787_v3  ;;  %v2376_v26 = vadd.f32 %v2306_v51, %v9793_v7 }
 0x165   :  { %613 = vadd.xlane.f32.xlu1 %v576_v0  ;;  %v588_v0 = vmul.f32 %v9817_v45, %v550_v8  ;;  %v412_v8 = vrot.slane %v9895_v43, %v9652_v5  ;;  %v2472_v38 = vmul.f32 %v9830_v41, %v2434_v56  ;;  %v475_v56 = vadd.f32 %v404_v52, %v9779_v60 }
 0x166   :  { %v2447_v9 = vmax.f32 %v2383_v22, %v2415_v49  ;;  %v355_v22 = vcombine.high %v9807_v37, %v9807_v37  ;;  %v2435_v49 = vmax.f32 %v2371_v47, %v2403_v10  ;;  %v2448_v48 = vmax.f32 %v2384_v63, %v2416_v57 }
 0x167   :  { %v340_v37 = vcombine.high %v9785_v1, %v9785_v1  ;;  %v416_v47 = vrot.slane %v337_v35, %v9652_v5  ;;  %v480_v10 = vadd.f32 %v412_v8, %v9787_v3  ;;  %v2408_v51 = vmul.f32 0.2, %v2376_v26 }
 0x168   :  { %619 = vadd.xlane.f32.xlu0 %v579_v58  ;;  %v2471_v58 = vmul.f32 %v9830_v41, %v2433_v46  ;;  %v2485_v55 = vmul.f32 %v9830_v41, %v2447_v9  ;;  %v9915_v46 = vrot.slane %v355_v22, %v9766_v42  ;;  %v2473_v50 = vmul.f32 %v9830_v41, %v2435_v49 }
 0x169   :  { %621 = vadd.xlane.f32.xlu1 %v580_v61  ;;  %v2407_v61 = vmul.f32 0.2, %v2375_v39  ;;  %v2486_v63 = vmul.f32 %v9830_v41, %v2448_v48  ;;  %v9923_v1 = vrot.slane %v340_v37, %v9766_v42  ;;  %v385_v57 = vcombine.high %v9825_v53, %v9825_v53 }
 0x16a   :  { %v482_v35 = vadd.f32 %v416_v47, %v9787_v3  ;;  %v428_v49 = vrot.slane %v9915_v46, %v9652_v5  ;;  %v2440_v52 = vmax.f32 %v2376_v26, %v2408_v51  ;;  %v2253_v48 = vcombine.high %v9839_v62, %v9839_v62  ;;  %v9942_v26 = vpop.permute.xlu1 %682 }
 0x16b   :  { %v2439_v9 = vmax.f32 %v2375_v39, %v2407_v61  ;;  %v507_v61 = vmul.f32 0.2, %v475_v56  ;;  %v9935_v53 = vrot.slane %v9923_v1, %v9766_v42  ;;  %v339_v13 = vcombine.high %v9895_v43, %v9895_v43 }
 0x16c   :  { %635 = vadd.xlane.f32.xlu0 %v587_v4  ;;  %v2404_v4 = vmul.f32 0.2, %v2372_v36  ;;  %v9947_v62 = vrot.slane %v2253_v48, %v9766_v42 }
 0x16d   :  { %637 = vadd.xlane.f32.xlu1 %v588_v0  ;;  %v508_v0 = vmul.f32 0.2, %v476_v20  ;;  %v2477_v39 = vmul.f32 %v9830_v41, %v2439_v9  ;;  %v432_v9 = vrot.slane %v385_v57, %v9652_v5  ;;  %v440_v57 = vrot.slane %v9935_v53, %v9652_v5 }
 0x16f   :  { %v540_v22 = vmax.f32 %v476_v20, %v508_v0  ;;  %v539_v0 = vmax.f32 %v475_v56, %v507_v61  ;;  %v9959_v61 = vpop.permute.xlu1 %689 }
 0x170   :  { %2505 = vadd.xlane.f32.xlu0 %v2471_v58  ;;  %v2436_v58 = vmax.f32 %v2372_v36, %v2404_v4  ;;  %v514_v4 = vmul.f32 0.2, %v482_v35 }
 0x171   :  { %2533 = vadd.xlane.f32.xlu1 %v2485_v55  ;;  %v512_v55 = vmul.f32 0.2, %v480_v10  ;;  %v578_v20 = vmul.f32 %v9817_v45, %v540_v22  ;;  %v490_v22 = vadd.f32 %v432_v9, %v9787_v3 }
 0x172   :  { %v2474_v36 = vmul.f32 %v9830_v41, %v2436_v58  ;;  %v481_v58 = vadd.f32 %v416_v47, %v9779_v60  ;;  %v546_v51 = vmax.f32 %v482_v35, %v514_v4  ;;  %v487_v47 = vadd.f32 %v428_v49, %v9779_v60 }
 0x173   :  { %v544_v37 = vmax.f32 %v480_v10, %v512_v55  ;;  %v577_v55 = vmul.f32 %v9817_v45, %v539_v0  ;;  %v2283_v35 = vcombine.high %v9856_v54, %v9856_v54  ;;  %v489_v0 = vadd.f32 %v432_v9, %v9779_v60 }
 0x174   :  { %2507 = vadd.xlane.f32.xlu0 %v2472_v38  ;;  %v479_v38 = vadd.f32 %v412_v8, %v9779_v60  ;;  %v2478_v8 = vmul.f32 %v9830_v41, %v2440_v52  ;;  %v2238_v52 = vcombine.high %v9812_v44, %v9812_v44  ;;  %v584_v48 = vmul.f32 %v9817_v45, %v546_v51 }
 0x175   :  { %2509 = vadd.xlane.f32.xlu1 %v2473_v50  ;;  %v488_v50 = vadd.f32 %v428_v49, %v9787_v3  ;;  %v582_v10 = vmul.f32 %v9817_v45, %v544_v37  ;;  %v494_v37 = vadd.f32 %v440_v57, %v9787_v3  ;;  %v519_v44 = vmul.f32 0.2, %v487_v47 }
 0x176   :  { %v2236_v54 = vcombine.high %v9846_v40, %v9846_v40  ;;  %v493_v40 = vadd.f32 %v440_v57, %v9779_v60 }
 0x178   :  { %2535 = vadd.xlane.f32.xlu0 %v2486_v63  ;;  %v511_v63 = vmul.f32 0.2, %v479_v38 }
 0x179   :  { %2517 = vadd.xlane.f32.xlu1 %v2477_v39  ;;  %v520_v39 = vmul.f32 0.2, %v488_v50 }
 0x17a   :  { %v543_v56 = vmax.f32 %v479_v38, %v511_v63  ;;  %v2326_v38 = vrot.slane %v9947_v62, %v9652_v5  ;;  %v9970_v63 = vrot.slane %v2238_v52, %v9766_v42  ;;  %v2205_v52 = vcombine.high %v9865_v23, %v9865_v23 }
 0x17b   :  { %v552_v4 = vmax.f32 %v488_v50, %v520_v39  ;;  %v2330_v50 = vrot.slane %v2283_v35, %v9652_v5  ;;  %v526_v39 = vmul.f32 0.2, %v494_v37  ;;  %v525_v23 = vmul.f32 0.2, %v493_v40 }
 0x17c   :  { %2511 = vadd.xlane.f32.xlu0 %v2474_v36  ;;  %v513_v36 = vmul.f32 0.2, %v481_v58  ;;  %v581_v49 = vmul.f32 %v9817_v45, %v543_v56  ;;  %v9975_v56 = vpop.permute.xlu1 %693  ;;  %v9983_v35 = vrot.slane %v9970_v63, %v9766_v42 }
 0x17d   :  { %617 = vadd.xlane.f32.xlu1 %v578_v20  ;;  %v522_v20 = vmul.f32 0.2, %v490_v22  ;;  %v590_v51 = vmul.f32 %v9817_v45, %v552_v4  ;;  %v558_v4 = vmax.f32 %v494_v37, %v526_v39 }
 0x17e   :  { %v2338_v39 = vrot.slane %v9983_v35, %v9652_v5 }
 0x17f   :  { %v596_v37 = vmul.f32 %v9817_v45, %v558_v4 }
 0x180   :  { %2519 = vadd.xlane.f32.xlu0 %v2478_v8  ;;  %v545_v8 = vmax.f32 %v481_v58, %v513_v36  ;;  %v551_v58 = vmax.f32 %v487_v47, %v519_v44  ;;  %v521_v36 = vmul.f32 0.2, %v489_v0  ;;  %v9988_v47 = vpop.permute.xlu0 %678  ;;  %v2386_v44 = vadd.f32 %v2326_v38, %v9793_v7  ;;  %v9995_v18 = vpop.permute.xlu1 %704 }
 0x181   :  { %625 = vadd.xlane.f32.xlu1 %v582_v10  ;;  %v554_v10 = vmax.f32 %v490_v22, %v522_v20  ;;  %v2387_v22 = vadd.f32 %v2330_v50, %v9791_v6 }
 0x182   :  { %v583_v9 = vmul.f32 %v9817_v45, %v545_v8  ;;  %v589_v57 = vmul.f32 %v9817_v45, %v551_v58  ;;  %v553_v8 = vmax.f32 %v489_v0, %v521_v36  ;;  %v557_v58 = vmax.f32 %v493_v40, %v525_v23 }
 0x183   :  { %v2388_v36 = vadd.f32 %v2330_v50, %v9793_v7 }
 0x184   :  { %615 = vadd.xlane.f32.xlu0 %v577_v55  ;;  %v2385_v55 = vadd.f32 %v2326_v38, %v9791_v6  ;;  %v591_v0 = vmul.f32 %v9817_v45, %v553_v8  ;;  %v2418_v38 = vmul.f32 0.2, %v2386_v44  ;;  %v10011_v8 = vpop.permute.xlu1 %715  ;;  %v595_v50 = vmul.f32 %v9817_v45, %v557_v58 }
 0x185   :  { %629 = vadd.xlane.f32.xlu1 %v584_v48  ;;  %v592_v48 = vmul.f32 %v9817_v45, %v554_v10  ;;  %v2420_v23 = vmul.f32 0.2, %v2388_v36 }
 0x186   :  { %v2417_v20 = vmul.f32 0.2, %v2385_v55  ;;  %v2450_v40 = vmax.f32 %v2386_v44, %v2418_v38 }
 0x187   :  { %v2452_v58 = vmax.f32 %v2388_v36, %v2420_v23  ;;  %v420_v36 = vrot.slane %v339_v13, %v9652_v5 }
 0x188   :  { %623 = vadd.xlane.f32.xlu0 %v581_v49  ;;  %v2302_v49 = vrot.slane %v2236_v54, %v9652_v5  ;;  %v2449_v10 = vmax.f32 %v2385_v55, %v2417_v20  ;;  %v2235_v55 = vcombine.high %v9877_v59, %v9877_v59  ;;  %v2488_v44 = vmul.f32 %v9830_v41, %v2450_v40 }
 0x189   :  { %641 = vadd.xlane.f32.xlu1 %v590_v51  ;;  %v9993_v51 = vrot.slane %v2205_v52, %v9766_v42  ;;  %v10003_v52 = vpop.permute.xlu0 %700 }
 0x18a   :  { %v2373_v54 = vadd.f32 %v2302_v49, %v9791_v6  ;;  %v2487_v4 = vmul.f32 %v9830_v41, %v2449_v10  ;;  %v2314_v10 = vrot.slane %v2235_v55, %v9652_v5 }
 0x18c   :  { %627 = vadd.xlane.f32.xlu0 %v583_v9  ;;  %v2419_v9 = vmul.f32 0.2, %v2387_v22  ;;  %v2405_v20 = vmul.f32 0.2, %v2373_v54 }
 0x18d   :  { %645 = vadd.xlane.f32.xlu1 %v592_v48  ;;  %v10020_v11 = vpop.permute.xlu0 %711 }
 0x18e   :  { %v2451_v48 = vmax.f32 %v2387_v22, %v2419_v9  ;;  %v2374_v22 = vadd.f32 %v2302_v49, %v9793_v7  ;;  %v2437_v59 = vmax.f32 %v2373_v54, %v2405_v20  ;;  %v2392_v49 = vadd.f32 %v2338_v39, %v9793_v7 }
 0x18f   :  { %v387_v54 = vcombine.high %v9915_v46, %v9915_v46 }
 0x190   :  { %639 = vadd.xlane.f32.xlu0 %v589_v57  ;;  %v2310_v57 = vrot.slane %v9993_v51, %v9652_v5  ;;  %v2489_v9 = vmul.f32 %v9830_v41, %v2451_v48  ;;  %v2406_v38 = vmul.f32 0.2, %v2374_v22  ;;  %v356_v48 = vcombine.high %v9923_v1, %v9923_v1 }
 0x191   :  { %653 = vadd.xlane.f32.xlu1 %v596_v37  ;;  %v2391_v37 = vadd.f32 %v2338_v39, %v9791_v6  ;;  %v2475_v43 = vmul.f32 %v9830_v41, %v2437_v59  ;;  %v2490_v39 = vmul.f32 %v9830_v41, %v2452_v58  ;;  %v2424_v23 = vmul.f32 0.2, %v2392_v49 }
 0x192   :  { %v2377_v16 = vadd.f32 %v2310_v57, %v9791_v6  ;;  %v2438_v40 = vmax.f32 %v2374_v22, %v2406_v38  ;;  %v2378_v1 = vadd.f32 %v2310_v57, %v9793_v7  ;;  %v10036_v46 = vrot.slane %v356_v48, %v9766_v42 }
 0x193   :  { %v436_v13 = vrot.slane %v387_v54, %v9652_v5  ;;  %v2456_v57 = vmax.f32 %v2392_v49, %v2424_v23  ;;  %v2380_v38 = vadd.f32 %v2314_v10, %v9793_v7  ;;  %v483_v23 = vadd.f32 %v420_v36, %v9779_v60 }
 0x194   :  { %643 = vadd.xlane.f32.xlu0 %v591_v0  ;;  %v2423_v0 = vmul.f32 0.2, %v2391_v37  ;;  %v2409_v55 = vmul.f32 0.2, %v2377_v16  ;;  %v2476_v22 = vmul.f32 %v9830_v41, %v2438_v40  ;;  %v2410_v58 = vmul.f32 0.2, %v2378_v1 }
 0x195   :  { %2537 = vadd.xlane.f32.xlu1 %v2487_v4  ;;  %v10028_v4 = vpop.permute.xlu1 %726  ;;  %v444_v54 = vrot.slane %v10036_v46, %v9652_v5  ;;  %v2494_v49 = vmul.f32 %v9830_v41, %v2456_v57 }
 0x196   :  { %v2455_v20 = vmax.f32 %v2391_v37, %v2423_v0  ;;  %v484_v0 = vadd.f32 %v420_v36, %v9787_v3  ;;  %v2442_v40 = vmax.f32 %v2378_v1, %v2410_v58  ;;  %v515_v58 = vmul.f32 0.2, %v483_v23 }
 0x197   :  { %v496_v1 = vadd.f32 %v444_v54, %v9787_v3 }
 0x198   :  { %651 = vadd.xlane.f32.xlu0 %v595_v50  ;;  %v2379_v50 = vadd.f32 %v2314_v10, %v9791_v6  ;;  %v2493_v37 = vmul.f32 %v9830_v41, %v2455_v20  ;;  %v516_v20 = vmul.f32 0.2, %v484_v0  ;;  %v2412_v10 = vmul.f32 0.2, %v2380_v38 }
 0x199   :  { %2541 = vadd.xlane.f32.xlu1 %v2489_v9  ;;  %v10038_v9 = vpop.permute.xlu0 %722  ;;  %v2480_v36 = vmul.f32 %v9830_v41, %v2442_v40 }
 0x19a   :  { %v2411_v59 = vmul.f32 0.2, %v2379_v50  ;;  %v2444_v57 = vmax.f32 %v2380_v38, %v2412_v10  ;;  %v495_v10 = vadd.f32 %v444_v54, %v9779_v60 }
 0x19c   :  { %2539 = vadd.xlane.f32.xlu0 %v2488_v44  ;;  %v2441_v44 = vmax.f32 %v2377_v16, %v2409_v55  ;;  %v386_v16 = vcombine.high %v9935_v53, %v9935_v53  ;;  %v2443_v55 = vmax.f32 %v2379_v50, %v2411_v59  ;;  %v2254_v53 = vcombine.high %v9970_v63, %v9970_v63 }
 0x19d   :  { %2513 = vadd.xlane.f32.xlu1 %v2475_v43  ;;  %v10043_v43 = vpop.permute.xlu1 %737  ;;  %v2285_v50 = vcombine.high %v9947_v62, %v9947_v62  ;;  %v491_v63 = vadd.f32 %v436_v13, %v9779_v60  ;;  %v2482_v38 = vmul.f32 %v9830_v41, %v2444_v57  ;;  %v527_v54 = vmul.f32 0.2, %v495_v10 }
 0x19e   :  { %v2479_v48 = vmul.f32 %v9830_v41, %v2441_v44  ;;  %v448_v59 = vrot.slane %v386_v16, %v9652_v5  ;;  %v10069_v62 = vrot.slane %v2254_v53, %v9766_v42  ;;  %v2284_v53 = vcombine.high %v9983_v35, %v9983_v35 }
 0x19f   :  { %v2334_v16 = vrot.slane %v2285_v50, %v9652_v5  ;;  %v523_v40 = vmul.f32 0.2, %v491_v63 }
 0x1a0   :  { %2543 = vadd.xlane.f32.xlu0 %v2490_v39  ;;  %v492_v39 = vadd.f32 %v436_v13, %v9787_v3  ;;  %v547_v13 = vmax.f32 %v483_v23, %v515_v58  ;;  %v497_v58 = vadd.f32 %v448_v59, %v9779_v60 }
 0x1a1   :  { %2549 = vadd.xlane.f32.xlu1 %v2493_v37  ;;  %v10053_v37 = vpop.permute.xlu0 %733  ;;  %v10061_v44 = vpop.permute.xlu1 %748  ;;  %v2389_v50 = vadd.f32 %v2334_v16, %v9791_v6  ;;  %v555_v57 = vmax.f32 %v491_v63, %v523_v40 }
 0x1a2   :  { %13779 = vst [vmem:[#allocation32_spill] sm:$0xff] %v10061_v44  ;;  %v524_v2 = vmul.f32 0.2, %v492_v39  ;;  %v585_v23 = vmul.f32 %v9817_v45, %v547_v13  ;;  %v559_v13 = vmax.f32 %v495_v10, %v527_v54  ;;  %v529_v40 = vmul.f32 0.2, %v497_v58 }
 0x1a3   :  { %v2421_v42 = vmul.f32 0.2, %v2389_v50  ;;  %v593_v63 = vmul.f32 %v9817_v45, %v555_v57 }
 0x1a4   :  { %2515 = vadd.xlane.f32.xlu0 %v2476_v22  ;;  %v2481_v22 = vmul.f32 %v9830_v41, %v2443_v55  ;;  %v556_v55 = vmax.f32 %v492_v39, %v524_v2  ;;  %v597_v10 = vmul.f32 %v9817_v45, %v559_v13 }
 0x1a5   :  { %2521 = vadd.xlane.f32.xlu1 %v2479_v48  ;;  %v548_v48 = vmax.f32 %v484_v0, %v516_v20  ;;  %v10071_v44 = vpop.permute.xlu0 %744  ;;  %v528_v20 = vmul.f32 0.2, %v496_v1 }
 0x1a6   :  { %v594_v2 = vmul.f32 %v9817_v45, %v556_v55 }
 0x1a7   :  { %v586_v0 = vmul.f32 %v9817_v45, %v548_v48  ;;  %v560_v39 = vmax.f32 %v496_v1, %v528_v20 }
 0x1a8   :  { %2551 = vadd.xlane.f32.xlu0 %v2494_v49  ;;  %v498_v49 = vadd.f32 %v448_v59, %v9787_v3  ;;  %v2390_v59 = vadd.f32 %v2334_v16, %v9793_v7  ;;  %v561_v16 = vmax.f32 %v497_v58, %v529_v40 }
 0x1a9   :  { %2525 = vadd.xlane.f32.xlu1 %v2481_v22  ;;  %v10076_v22 = vpop.permute.xlu1 %759  ;;  %v598_v1 = vmul.f32 %v9817_v45, %v560_v39 }
 0x1aa   :  { %13780 = vst [vmem:[#allocation33_spill] sm:$0xff] %v10076_v22  ;;  %v530_v48 = vmul.f32 0.2, %v498_v49  ;;  %v2422_v57 = vmul.f32 0.2, %v2390_v59  ;;  %v599_v58 = vmul.f32 %v9817_v45, %v561_v16 }
 0x1ac   :  { %2523 = vadd.xlane.f32.xlu0 %v2480_v36  ;;  %v2342_v36 = vrot.slane %v10069_v62, %v9652_v5  ;;  %v562_v55 = vmax.f32 %v498_v49, %v530_v48  ;;  %v2454_v13 = vmax.f32 %v2390_v59, %v2422_v57 }
 0x1ad   :  { %633 = vadd.xlane.f32.xlu1 %v586_v0  ;;  %v10086_v0 = vpop.permute.xlu0 %755  ;;  %v10090_v35 = vpop.permute.xlu1 %770 }
 0x1ae   :  { %13781 = vst [vmem:[#allocation34_spill] sm:$0xff] %v10086_v0  ;;  %v2393_v20 = vadd.f32 %v2342_v36, %v9791_v6  ;;  %v2453_v0 = vmax.f32 %v2389_v50, %v2421_v42  ;;  %v600_v49 = vmul.f32 %v9817_v45, %v562_v55  ;;  %v2394_v42 = vadd.f32 %v2342_v36, %v9793_v7 }
 0x1b0   :  { %2527 = vadd.xlane.f32.xlu0 %v2482_v38  ;;  %v2346_v38 = vrot.slane %v2284_v53, %v9652_v5  ;;  %v2425_v39 = vmul.f32 0.2, %v2393_v20  ;;  %v2491_v50 = vmul.f32 %v9830_v41, %v2453_v0  ;;  %v2426_v40 = vmul.f32 0.2, %v2394_v42 }
 0x1b1   :  { %649 = vadd.xlane.f32.xlu1 %v594_v2  ;;  %v2237_v2 = vcombine.high %v9993_v51, %v9993_v51  ;;  %v10099_v22 = vpop.permute.xlu0 %766  ;;  %v388_v51 = vcombine.high %v10036_v46, %v10036_v46  ;;  %v2286_v46 = vcombine.high %v10069_v62, %v10069_v62 }
 0x1b2   :  { %v2395_v53 = vadd.f32 %v2346_v38, %v9791_v6  ;;  %v2396_v36 = vadd.f32 %v2346_v38, %v9793_v7 }
 0x1b3   :  { %v2318_v48 = vrot.slane %v2237_v2, %v9652_v5  ;;  %v452_v2 = vrot.slane %v388_v51, %v9652_v5  ;;  %v2350_v62 = vrot.slane %v2286_v46, %v9652_v5 }
 0x1b4   :  { %631 = vadd.xlane.f32.xlu0 %v585_v23  ;;  %v10106_v23 = vpop.permute.xlu1 %781  ;;  %v2427_v54 = vmul.f32 0.2, %v2395_v53  ;;  %v2428_v16 = vmul.f32 0.2, %v2396_v36 }
 0x1b5   :  { %657 = vadd.xlane.f32.xlu1 %v598_v1  ;;  %v2457_v1 = vmax.f32 %v2393_v20, %v2425_v39  ;;  %v2381_v55 = vadd.f32 %v2318_v48, %v9791_v6  ;;  %v500_v51 = vadd.f32 %v452_v2, %v9787_v3  ;;  %v2382_v59 = vadd.f32 %v2318_v48, %v9793_v7 }
 0x1b6   :  { %v2460_v46 = vmax.f32 %v2396_v36, %v2428_v16 }
 0x1b7   :  { %v2495_v20 = vmul.f32 %v9830_v41, %v2457_v1  ;;  %v2413_v39 = vmul.f32 0.2, %v2381_v55  ;;  %v2397_v1 = vadd.f32 %v2350_v62, %v9791_v6 }
 0x1b8   :  { %647 = vadd.xlane.f32.xlu0 %v593_v63  ;;  %v10115_v63 = vpop.permute.xlu0 %777  ;;  %v10119_v0 = vpop.permute.xlu1 %792 }
 0x1b9   :  { %661 = vadd.xlane.f32.xlu1 %v600_v49  ;;  %v2459_v49 = vmax.f32 %v2395_v53, %v2427_v54  ;;  %v2445_v53 = vmax.f32 %v2381_v55, %v2413_v39  ;;  %v532_v54 = vmul.f32 0.2, %v500_v51  ;;  %v2498_v55 = vmul.f32 %v9830_v41, %v2460_v46 }
 0x1ba   :  { %v2398_v39 = vadd.f32 %v2350_v62, %v9793_v7 }
 0x1bb   :  { %v2497_v38 = vmul.f32 %v9830_v41, %v2459_v49  ;;  %v2483_v48 = vmul.f32 %v9830_v41, %v2445_v53 }
 0x1bc   :  { %655 = vadd.xlane.f32.xlu0 %v597_v10  ;;  %v2492_v10 = vmul.f32 %v9830_v41, %v2454_v13  ;;  %v10126_v57 = vpop.permute.xlu0 %788  ;;  %v2414_v13 = vmul.f32 0.2, %v2382_v59 }
 0x1bd   :  { %2545 = vadd.xlane.f32.xlu1 %v2491_v50  ;;  %v2458_v50 = vmax.f32 %v2394_v42, %v2426_v40  ;;  %v499_v42 = vadd.f32 %v452_v2, %v9779_v60  ;;  %v564_v40 = vmax.f32 %v500_v51, %v532_v54 }
 0x1be   :  { %v2446_v6 = vmax.f32 %v2382_v59, %v2414_v13 }
 0x1bf   :  { %v2496_v3 = vmul.f32 %v9830_v41, %v2458_v50  ;;  %v531_v49 = vmul.f32 0.2, %v499_v42  ;;  %v602_v36 = vmul.f32 %v9817_v45, %v564_v40  ;;  %v2430_v50 = vmul.f32 0.2, %v2398_v39 }
 0x1c0   :  { %659 = vadd.xlane.f32.xlu0 %v599_v58  ;;  %v10130_v58 = vpop.permute.xlu1 %803  ;;  %v2484_v2 = vmul.f32 %v9830_v41, %v2446_v6 }
 0x1c1   :  { %2553 = vadd.xlane.f32.xlu1 %v2495_v20  ;;  %v2429_v20 = vmul.f32 0.2, %v2397_v1  ;;  %v563_v51 = vmax.f32 %v499_v42, %v531_v49  ;;  %v2462_v62 = vmax.f32 %v2398_v39, %v2430_v50 }
 0x1c3   :  { %v2461_v60 = vmax.f32 %v2397_v1, %v2429_v20  ;;  %v601_v7 = vmul.f32 %v9817_v45, %v563_v51  ;;  %v2500_v1 = vmul.f32 %v9830_v41, %v2462_v62 }
 0x1c4   :  { %2547 = vadd.xlane.f32.xlu0 %v2492_v10  ;;  %v10135_v10 = vpop.permute.xlu0 %799 }
 0x1c5   :  { %2557 = vadd.xlane.f32.xlu1 %v2497_v38  ;;  %v10139_v38 = vpop.permute.xlu1 %814  ;;  %v2499_v53 = vmul.f32 %v9830_v41, %v2461_v60 }
 0x1c8   :  { %2555 = vadd.xlane.f32.xlu0 %v2496_v3  ;;  %v10143_v16 = vpop.permute.xlu0 %810 }
 0x1c9   :  { %2529 = vadd.xlane.f32.xlu1 %v2483_v48  ;;  %v10146_v59 = vpop.permute.xlu1 %825 }
 0x1cc   :  { %2559 = vadd.xlane.f32.xlu0 %v2498_v55  ;;  %v10149_v54 = vpop.permute.xlu0 %821 }
 0x1cd   :  { %665 = vadd.xlane.f32.xlu1 %v602_v36  ;;  %v10152_v3 = vpop.permute.xlu1 %836 }
 0x1ce   :  { %13782 = vst [vmem:[#allocation35_spill] sm:$0xff] %v10152_v3 }
 0x1d0   :  { %2531 = vadd.xlane.f32.xlu0 %v2484_v2  ;;  %v10154_v46 = vpop.permute.xlu0 %832 }
 0x1d1   :  { %2561 = vadd.xlane.f32.xlu1 %v2499_v53  ;;  %v10156_v13 = vpop.permute.xlu1 %847 }
 0x1d2   :  { %13783 = vst [vmem:[#allocation36_spill] sm:$0xff] %v10156_v13 }
 0x1d4   :  { %663 = vadd.xlane.f32.xlu0 %v601_v7  ;;  %v10158_v42 = vpop.permute.xlu0 %843 }
 0x1d5   :  { %v10160_v48 = vpop.permute.xlu1 %2576 }
 0x1d8   :  { %2563 = vadd.xlane.f32.xlu0 %v2500_v1 }
 0x1e2   :  { %2587 = vbcast.lane.b32.xlu1 %v9667_v14, 256 }
 0x1e5   :  { %v10163_v45 = vpop.xlane.xlu0 %603 }
 0x1e6   :  { %v2502_v40 = vpop.xlane.xlu1 %2501  ;;  %2591 = vbcast.lane.b32.xlu1 %v9667_v14, 264 }
 0x1e9   :  { %v606_v20 = vpop.xlane.xlu0 %605 }
 0x1ea   :  { %2664 = vbcast.lane.b32.xlu1 %v9716_v27, 256  ;;  %v10167_v41 = vpop.xlane.xlu1 %607 }
 0x1ed   :  { %v10169_v55 = vpop.xlane.xlu0 %2503 }
 0x1ee   :  { %2580 = vbcast.lane.b32.xlu0 %v9659_v12, 264  ;;  %2675 = vbcast.lane.b32.xlu1 %v9721_v28, 256  ;;  %v10173_v6 = vpop.xlane.xlu1 %609 }
 0x1f1   :  { %v10175_v49 = vpop.xlane.xlu0 %611 }
 0x1f2   :  { %2668 = vbcast.lane.b32.xlu0 %v9716_v27, 264  ;;  %2598 = vbcast.lane.b32.xlu1 %v9671_v15, 256  ;;  %v10179_v14 = vpop.xlane.xlu1 %613 }
 0x1f5   :  { %v10181_v39 = vpop.xlane.xlu0 %619 }
 0x1f6   :  { %2679 = vbcast.lane.b32.xlu0 %v9721_v28, 264  ;;  %2686 = vbcast.lane.b32.xlu1 %v9726_v29, 256  ;;  %v10185_v36 = vpop.xlane.xlu1 %621 }
 0x1f9   :  { %v10187_v12 = vpop.xlane.xlu0 %635 }
 0x1fa   :  { %2602 = vbcast.lane.b32.xlu0 %v9671_v15, 264  ;;  %2609 = vbcast.lane.b32.xlu1 %v9679_v17, 256  ;;  %v10191_v60 = vpop.xlane.xlu1 %637 }
 0x1fd   :  { %v10193_v27 = vpop.xlane.xlu0 %2505 }
 0x1fe   :  { %2690 = vbcast.lane.b32.xlu0 %v9726_v29, 264  ;;  %2697 = vbcast.lane.b32.xlu1 %v9731_v30, 256  ;;  %v10197_v2 = vpop.xlane.xlu1 %2533 }
 0x201   :  { %v10199_v28 = vpop.xlane.xlu0 %2507 }
 0x202   :  { %2613 = vbcast.lane.b32.xlu0 %v9679_v17, 264  ;;  %2620 = vbcast.lane.b32.xlu1 %v9687_v19, 256  ;;  %v10203_v51 = vpop.xlane.xlu1 %2509 }
 0x205   :  { %v10205_v15 = vpop.xlane.xlu0 %2535 }
 0x206   :  { %2701 = vbcast.lane.b32.xlu0 %v9731_v30, 264  ;;  %2708 = vbcast.lane.b32.xlu1 %v9736_v31, 256  ;;  %v10209_v50 = vpop.xlane.xlu1 %2517 }
 0x207   :  { %13784 = vst [vmem:[#allocation37_spill] sm:$0xff] %v10209_v50  ;;  %v10257_v50 = vadd.f32 %v10160_v48, %v2502_v40 }
 0x209   :  { %v10211_v29 = vpop.xlane.xlu0 %2511  ;;  %13788 = vst [vmem:[#allocation41_spill] sm:$0xff] %v10257_v50 }
 0x20a   :  { %13785 = vst [vmem:[#allocation38_spill] sm:$0xff] %v10211_v29  ;;  %2624 = vbcast.lane.b32.xlu0 %v9687_v19, 264  ;;  %2631 = vbcast.lane.b32.xlu1 %v9695_v21, 256  ;;  %v10215_v53 = vpop.xlane.xlu1 %617 }
 0x20d   :  { %v10217_v17 = vpop.xlane.xlu0 %2519 }
 0x20e   :  { %13786 = vst [vmem:[#allocation39_spill] sm:$0xff] %v10217_v17  ;;  %2712 = vbcast.lane.b32.xlu0 %v9736_v31, 264  ;;  %2719 = vbcast.lane.b32.xlu1 %v9741_v32, 256  ;;  %v10221_v7 = vpop.xlane.xlu1 %625 }
 0x211   :  { %v10223_v30 = vpop.xlane.xlu0 %615 }
 0x212   :  { %2635 = vbcast.lane.b32.xlu0 %v9695_v21, 264  ;;  %2642 = vbcast.lane.b32.xlu1 %v9706_v24, 256  ;;  %v10227_v62 = vpop.xlane.xlu1 %629 }
 0x215   :  { %v10229_v19 = vpop.xlane.xlu0 %623 }
 0x216   :  { %2723 = vbcast.lane.b32.xlu0 %v9741_v32, 264  ;;  %2730 = vbcast.lane.b32.xlu1 %v9746_v33, 256  ;;  %v10233_v1 = vpop.xlane.xlu1 %641  ;;  %v10248_v32 = vadd.f32 %v9942_v26, %v606_v20  ;;  %v10267_v26 = vadd.f32 %v9988_v47, %v10163_v45 }
 0x218   :  { %13787 = vst [vmem:[#allocation40_spill] sm:$0xff] %v10248_v32  ;;  %13789 = vst [vmem:[#allocation42_spill] sm:$0xff] %v10267_v26 }
 0x219   :  { %v10235_v31 = vpop.xlane.xlu0 %627 }
 0x21a   :  { %2646 = vbcast.lane.b32.xlu0 %v9706_v24, 264  ;;  %2653 = vbcast.lane.b32.xlu1 %v9711_v25, 256  ;;  %v10239_v5 = vpop.xlane.xlu1 %645 }
 0x21d   :  { %v10241_v21 = vpop.xlane.xlu0 %639 }
 0x21e   :  { %2734 = vbcast.lane.b32.xlu0 %v9746_v33, 264  ;;  %2741 = vbcast.lane.b32.xlu1 %v9751_v34, 256  ;;  %v10245_v17 = vpop.xlane.xlu1 %653 }
 0x221   :  { %v10250_v29 = vpop.xlane.xlu0 %643 }
 0x222   :  { %2657 = vbcast.lane.b32.xlu0 %v9711_v25, 264  ;;  %v10253_v24 = vpop.xlane.xlu1 %2537  ;;  %949 = vperm.xlu1 %8894, %v10248_v32   ;;  %v10271_v25 = vadd.f32 %v9959_v61, %v10167_v41  ;;  %v10290_v61 = vadd.f32 %v10038_v9, %v10181_v39 }
 0x224   :  { %13790 = vst [vmem:[#allocation43_spill] sm:$0xff] %v10271_v25  ;;  %13795 = vst [vmem:[#allocation48_spill] sm:$0xff] %v10290_v61 }
 0x225   :  { %v10259_v13 = vpop.xlane.xlu0 %651 }
 0x226   :  { %2745 = vbcast.lane.b32.xlu0 %v9751_v34, 264  ;;  %v10262_v33 = vpop.xlane.xlu1 %2541  ;;  %2844 = vperm.xlu1 %8894, %v10257_v50   ;;  %v10281_v34 = vadd.f32 %v10003_v52, %v10175_v49  ;;  %v10299_v52 = vadd.f32 %v10099_v22, %v10187_v12 }
 0x228   :  { %13792 = vst [vmem:[#allocation45_spill] sm:$0xff] %v10281_v34  ;;  %13798 = vst [vmem:[#allocation51_spill] sm:$0xff] %v10299_v52 }
 0x229   :  { %v10273_v20 = vpop.xlane.xlu0 %2539 }
 0x22a   :  { %13791 = vst [vmem:[#allocation44_spill] sm:$0xff] %v10273_v20  ;;  %946 = vperm.xlu0 %8893, %v10267_v26   ;;  %v10276_v48 = vpop.xlane.xlu1 %2513  ;;  %952 = vperm.xlu1 %8894, %v10271_v25  }
 0x22d   :  { %v10283_v40 = vpop.xlane.xlu0 %2543 }
 0x22e   :  { %13793 = vst [vmem:[#allocation46_spill] sm:$0xff] %v10283_v40  ;;  %v10285_v47 = vpop.xlane.xlu1 %2549  ;;  %958 = vperm.xlu1 %8894, %v10281_v34  }
 0x22f   :  { %13794 = vst [vmem:[#allocation47_spill] sm:$0xff] %v10285_v47 }
 0x231   :  { %v10292_v45 = vpop.xlane.xlu0 %2515 }
 0x232   :  { %13796 = vst [vmem:[#allocation49_spill] sm:$0xff] %v10292_v45  ;;  %v10294_v41 = vpop.xlane.xlu1 %2521  ;;  %970 = vperm.xlu1 %8894, %v10290_v61  }
 0x233   :  { %13797 = vst [vmem:[#allocation50_spill] sm:$0xff] %v10294_v41 }
 0x235   :  { %v10301_v49 = vpop.xlane.xlu0 %2551 }
 0x236   :  { %13799 = vst [vmem:[#allocation52_spill] sm:$0xff] %v10301_v49  ;;  %v10303_v50 = vpop.xlane.xlu1 %2525  ;;  %994 = vperm.xlu1 %8894, %v10299_v52  }
 0x237   :  { %13800 = vst [vmem:[#allocation53_spill] sm:$0xff] %v10303_v50 }
 0x239   :  { %v10306_v34 = vpop.xlane.xlu0 %2523 }
 0x23a   :  { %13801 = vst [vmem:[#allocation54_spill] sm:$0xff] %v10306_v34  ;;  %v10308_v9 = vpop.xlane.xlu1 %633 }
 0x23d   :  { %v10310_v39 = vpop.xlane.xlu0 %2527 }
 0x23e   :  { %13802 = vst [vmem:[#allocation55_spill] sm:$0xff] %v10310_v39  ;;  %v10312_v25 = vpop.xlane.xlu1 %649 }
 0x241   :  { %v632_v32 = vpop.xlane.xlu0 %631 }
 0x242   :  { %v10314_v61 = vpop.xlane.xlu1 %657 }
 0x245   :  { %v10316_v26 = vpop.xlane.xlu0 %647 }
 0x246   :  { %v10318_v22 = vpop.xlane.xlu1 %661 }
 0x247   :  { %13803 = vst [vmem:[#allocation56_spill] sm:$0xff] %v10318_v22 }
 0x249   :  { %v10320_v12 = vpop.xlane.xlu0 %655 }
 0x24a   :  { %v10322_v49 = vpop.xlane.xlu1 %2545 }
 0x24b   :  { %13804 = vst [vmem:[#allocation57_spill] sm:$0xff] %v10322_v49 }
 0x24d   :  { %v10324_v52 = vpop.xlane.xlu0 %659 }
 0x24e   :  { %v10326_v34 = vpop.xlane.xlu1 %2553 }
 0x24f   :  { %13805 = vst [vmem:[#allocation58_spill] sm:$0xff] %v10326_v34 }
 0x251   :  { %v10328_v50 = vpop.xlane.xlu0 %2547 }
 0x252   :  { %13806 = vst [vmem:[#allocation59_spill] sm:$0xff] %v10328_v50  ;;  %v10330_v39 = vpop.xlane.xlu1 %2557 }
 0x253   :  { %13807 = vst [vmem:[#allocation60_spill] sm:$0xff] %v10330_v39 }
 0x255   :  { %v10332_v45 = vpop.xlane.xlu0 %2555 }
 0x256   :  { %13808 = vst [vmem:[#allocation61_spill] sm:$0xff] %v10332_v45  ;;  %v10334_v40 = vpop.xlane.xlu1 %2529 }
 0x257   :  { %13809 = vst [vmem:[#allocation62_spill] sm:$0xff] %v10334_v40 }
 0x259   :  { %v10336_v41 = vpop.xlane.xlu0 %2559 }
 0x25a   :  { %13810 = vst [vmem:[#allocation63_spill] sm:$0xff] %v10336_v41  ;;  %v10338_v47 = vpop.xlane.xlu1 %665 }
 0x25d   :  { %v10340_v20 = vpop.xlane.xlu0 %2531 }
 0x25e   :  { %13811 = vst [vmem:[#allocation64_spill] sm:$0xff] %v10340_v20  ;;  %v10342_v3 = vpop.xlane.xlu1 %2561 }
 0x25f   :  { %13812 = vst [vmem:[#allocation65_spill] sm:$0xff] %v10342_v3  ;;  %v10361_v3 = vadd.f32 %v9975_v56, %v10173_v6  ;;  %v10381_v56 = vadd.f32 %v10028_v4, %v10185_v36  ;;  %v10391_v6 = vadd.f32 %v10090_v35, %v10191_v60  ;;  %v10405_v36 = vadd.f32 %v10126_v57, %v10250_v29 }
 0x261   :  { %v10344_v49 = vpop.xlane.xlu0 %663  ;;  %13814 = vst [vmem:[#allocation67_spill] sm:$0xff] %v10391_v6  ;;  %13816 = vst [vmem:[#allocation69_spill] sm:$0xff] %v10405_v36 }
 0x262   :  { %v2588_v22 = vpop.permute.xlu1 %2587 }
 0x263   :  { %v10347_v34 = vadd.f32 %v2588_v22, %v10193_v27  ;;  %v10366_v27 = vadd.f32 %v10020_v11, %v10223_v30  ;;  %v10386_v11 = vadd.f32 %v10071_v44, %v10235_v31  ;;  %v10442_v30 = vadd.f32 %v10135_v10, %v10316_v26 }
 0x264   :  { %v10495_v26 = vadd.f32 %v10146_v59, %v10314_v61  ;;  %v13838_v59 = vld [vmem:[#allocation36_spill] sm:$0xff] }
 0x265   :  { %v10349_v50 = vpop.xlane.xlu0 %2563  ;;  %2850 = vperm.xlu1 %8894, %v10347_v34   ;;  %v10513_v61 = vadd.f32 %v13838_v59, %v10338_v47 }
 0x266   :  { %v2592_v45 = vpop.permute.xlu1 %2591  ;;  %13832 = vst [vmem:[#allocation79_spill] sm:$0xff] %v10495_v26 }
 0x267   :  { %v10400_v4 = vadd.f32 %v2592_v45, %v10199_v28  ;;  %v10419_v28 = vadd.f32 %v10011_v8, %v10215_v53  ;;  %v13821_v8 = vld [vmem:[#allocation32_spill] sm:$0xff]  ;;  %v13834_v45 = vld [vmem:[#allocation35_spill] sm:$0xff] }
 0x268   :  { %v10437_v53 = vadd.f32 %v13821_v8, %v10227_v62  ;;  %v10457_v62 = vadd.f32 %v10119_v0, %v10239_v5  ;;  %v10472_v5 = vadd.f32 %v10158_v42, %v10344_v49  ;;  %v13846_v8 = vld [vmem:[#allocation50_spill] sm:$0xff] }
 0x269   :  { %v2581_v40 = vpop.permute.xlu0 %2580 }
 0x26a   :  { %v10353_v41 = vadd.f32 %v2581_v40, %v10169_v55  ;;  %v2665_v39 = vpop.permute.xlu1 %2664  ;;  %v10371_v55 = vadd.f32 %v9995_v18, %v10179_v14  ;;  %13825 = vst [vmem:[#allocation74_spill] sm:$0xff] %v10457_v62  ;;  %13828 = vst [vmem:[#allocation77_spill] sm:$0xff] %v10472_v5  ;;  %v13833_v40 = vld [vmem:[#allocation56_spill] sm:$0xff] }
 0x26b   :  { %v10356_v20 = vadd.f32 %v2665_v39, %v10197_v2  ;;  %v10376_v2 = vadd.f32 %v10053_v37, %v10229_v19  ;;  %v10396_v37 = vadd.f32 %v10115_v63, %v10241_v21  ;;  %v10414_v63 = vadd.f32 %v10143_v16, %v10259_v13  ;;  %v13820_v13 = vld [vmem:[#allocation34_spill] sm:$0xff]  ;;  %v13829_v21 = vld [vmem:[#allocation33_spill] sm:$0xff] }
 0x26c   :  { %2847 = vperm.xlu0 %8893, %v10353_v41   ;;  %v10432_v29 = vadd.f32 %v13820_v13, %v632_v32  ;;  %13822 = vst [vmem:[#allocation34_spill] sm:$0xff] %v10442_v30  ;;  %v10452_v19 = vadd.f32 %v10149_v54, %v10320_v12  ;;  %v10467_v54 = vadd.f32 %v10139_v38, %v10245_v17  ;;  %v13840_v39 = vld [vmem:[#allocation37_spill] sm:$0xff]  ;;  %v13841_v12 = vld [vmem:[#allocation44_spill] sm:$0xff] }
 0x26d   :  { %13813 = vst [vmem:[#allocation66_spill] sm:$0xff] %v10356_v20  ;;  %2892 = vperm.xlu1 %8894, %v10356_v20   ;;  %13815 = vst [vmem:[#allocation68_spill] sm:$0xff] %v10396_v37  ;;  %v2669_v44 = vpop.permute.xlu0 %2668  ;;  %v10486_v38 = vadd.f32 %v10130_v58, %v10312_v25 }
 0x26e   :  { %v2676_v18 = vpop.permute.xlu1 %2675  ;;  %v10409_v35 = vadd.f32 %v2669_v44, %v10205_v15  ;;  %13818 = vst [vmem:[#allocation71_spill] sm:$0xff] %v10414_v63  ;;  %v10428_v15 = vadd.f32 %v10043_v43, %v10221_v7  ;;  %v10447_v7 = vadd.f32 %v10106_v23, %v10233_v1  ;;  %13824 = vst [vmem:[#allocation73_spill] sm:$0xff] %v10452_v19  ;;  %v13843_v44 = vld [vmem:[#allocation47_spill] sm:$0xff] }
 0x26f   :  { %v10423_v57 = vadd.f32 %v2676_v18, %v10253_v24  ;;  %v10462_v23 = vadd.f32 %v10154_v46, %v10324_v52  ;;  %13827 = vst [vmem:[#allocation76_spill] sm:$0xff] %v10467_v54  ;;  %v10477_v46 = vadd.f32 %v13829_v21, %v10308_v9  ;;  %13830 = vst [vmem:[#allocation33_spill] sm:$0xff] %v10486_v38 }
 0x270   :  { %955 = vperm.xlu0 %8893, %v10361_v3   ;;  %13817 = vst [vmem:[#allocation70_spill] sm:$0xff] %v10409_v35  ;;  %13823 = vst [vmem:[#allocation32_spill] sm:$0xff] %v10447_v7  ;;  %v10504_v52 = vadd.f32 %v13834_v45, %v13833_v40  ;;  %v13849_v40 = vld [vmem:[#allocation58_spill] sm:$0xff] }
 0x271   :  { %964 = vperm.xlu1 %8894, %v10366_v27   ;;  %13819 = vst [vmem:[#allocation72_spill] sm:$0xff] %v10423_v57  ;;  %v2680_v10 = vpop.permute.xlu0 %2679  ;;  %13826 = vst [vmem:[#allocation75_spill] sm:$0xff] %v10462_v23 }
 0x272   :  { %v2599_v14 = vpop.permute.xlu1 %2598  ;;  %13835 = vst [vmem:[#allocation56_spill] sm:$0xff] %v10504_v52  ;;  %v10521_v18 = vadd.f32 %v2680_v10, %v13841_v12  ;;  %v13847_v10 = vld [vmem:[#allocation46_spill] sm:$0xff]  ;;  %v13854_v12 = vld [vmem:[#allocation59_spill] sm:$0xff] }
 0x273   :  { %v10481_v32 = vadd.f32 %v2599_v14, %v10203_v51 }
 0x274   :  { %961 = vperm.xlu0 %8893, %v10371_v55   ;;  %13842 = vst [vmem:[#allocation36_spill] sm:$0xff] %v10521_v18 }
 0x275   :  { %976 = vperm.xlu1 %8894, %v10376_v2   ;;  %v2603_v0 = vpop.permute.xlu0 %2602 }
 0x276   :  { %v2687_v60 = vpop.permute.xlu1 %2686 }
 0x277   :  { %v10490_v24 = vadd.f32 %v2687_v60, %v10262_v33  ;;  %v13836_v33 = vld [vmem:[#allocation57_spill] sm:$0xff] }
 0x278   :  { %973 = vperm.xlu0 %8893, %v10381_v56   ;;  %13839 = vst [vmem:[#allocation57_spill] sm:$0xff] %v10513_v61 }
 0x279   :  { %982 = vperm.xlu1 %8894, %v10386_v11   ;;  %v2691_v42 = vpop.permute.xlu0 %2690  ;;  %13831 = vst [vmem:[#allocation78_spill] sm:$0xff] %v10490_v24 }
 0x27a   :  { %v2610_v16 = vpop.permute.xlu1 %2609 }
 0x27b   :  { %v10499_v51 = vadd.f32 %v2610_v16, %v10276_v48  ;;  %v13845_v16 = vld [vmem:[#allocation38_spill] sm:$0xff] }
 0x27c   :  { %997 = vperm.xlu0 %8893, %v10391_v6   ;;  %v10529_v13 = vadd.f32 %v2603_v0, %v13845_v16  ;;  %v13851_v0 = vld [vmem:[#allocation49_spill] sm:$0xff] }
 0x27d   :  { %1000 = vperm.xlu1 %8894, %v10396_v37   ;;  %v2614_v58 = vpop.permute.xlu0 %2613 }
 0x27e   :  { %v2698_v43 = vpop.permute.xlu1 %2697 }
 0x27f   :  { %v10508_v49 = vadd.f32 %v2698_v43, %v13836_v33  ;;  %v10545_v33 = vadd.f32 %v2614_v58, %v13851_v0  ;;  %v13858_v58 = vld [vmem:[#allocation39_spill] sm:$0xff] }
 0x280   :  { %2853 = vperm.xlu0 %8893, %v10400_v4  }
 0x281   :  { %1006 = vperm.xlu1 %8894, %v10405_v36   ;;  %13837 = vst [vmem:[#allocation35_spill] sm:$0xff] %v10508_v49  ;;  %v2702_v48 = vpop.permute.xlu0 %2701 }
 0x282   :  { %v2621_v31 = vpop.permute.xlu1 %2620 }
 0x283   :  { %v10517_v22 = vadd.f32 %v2621_v31, %v13840_v39  ;;  %v10537_v31 = vadd.f32 %v2691_v42, %v13847_v10 }
 0x284   :  { %2895 = vperm.xlu0 %8893, %v10409_v35  }
 0x285   :  { %1018 = vperm.xlu1 %8894, %v10414_v63   ;;  %v2625_v47 = vpop.permute.xlu0 %2624  ;;  %13848 = vst [vmem:[#allocation44_spill] sm:$0xff] %v10537_v31 }
 0x286   :  { %v2709_v1 = vpop.permute.xlu1 %2708 }
 0x287   :  { %v10525_v14 = vadd.f32 %v2709_v1, %v13843_v44  ;;  %v10553_v44 = vadd.f32 %v2702_v48, %v13854_v12  ;;  %v13861_v48 = vld [vmem:[#allocation52_spill] sm:$0xff] }
 0x288   :  { %967 = vperm.xlu0 %8893, %v10419_v28  }
 0x289   :  { %2898 = vperm.xlu1 %8894, %v10423_v57   ;;  %13844 = vst [vmem:[#allocation37_spill] sm:$0xff] %v10525_v14  ;;  %v2713_v1 = vpop.permute.xlu0 %2712  ;;  %13855 = vst [vmem:[#allocation50_spill] sm:$0xff] %v10553_v44 }
 0x28a   :  { %v2632_v17 = vpop.permute.xlu1 %2631 }
 0x28b   :  { %v10533_v43 = vadd.f32 %v2632_v17, %v13846_v8  ;;  %v13852_v17 = vld [vmem:[#allocation53_spill] sm:$0xff]  ;;  %v10561_v8 = vadd.f32 %v2625_v47, %v13858_v58  ;;  %v13865_v58 = vld [vmem:[#allocation54_spill] sm:$0xff] }
 0x28c   :  { %979 = vperm.xlu0 %8893, %v10428_v15  }
 0x28d   :  { %988 = vperm.xlu1 %8894, %v10432_v29   ;;  %v2636_v42 = vpop.permute.xlu0 %2635 }
 0x28e   :  { %v2720_v25 = vpop.permute.xlu1 %2719 }
 0x28f   :  { %v10541_v45 = vadd.f32 %v2720_v25, %v13849_v40  ;;  %v13856_v25 = vld [vmem:[#allocation60_spill] sm:$0xff]  ;;  %v13859_v40 = vld [vmem:[#allocation62_spill] sm:$0xff] }
 0x290   :  { %985 = vperm.xlu0 %8893, %v10437_v53  }
 0x291   :  { %1012 = vperm.xlu1 %8894, %v10442_v30   ;;  %13850 = vst [vmem:[#allocation47_spill] sm:$0xff] %v10541_v45  ;;  %v13876_v30 = vld [vmem:[#allocation22_spill] sm:$0xff] }
 0x292   :  { %v2643_v9 = vpop.permute.xlu1 %2642 }
 0x293   :  { %v10549_v59 = vadd.f32 %v2643_v9, %v13852_v17  ;;  %v2724_v9 = vpop.permute.xlu0 %2723  ;;  %v10571_v17 = vadd.f32 %v2713_v1, %v13861_v48 }
 0x294   :  { %1003 = vperm.xlu0 %8893, %v10447_v7  }
 0x295   :  { %1024 = vperm.xlu1 %8894, %v10452_v19   ;;  %13853 = vst [vmem:[#allocation38_spill] sm:$0xff] %v10549_v59  ;;  %13862 = vst [vmem:[#allocation49_spill] sm:$0xff] %v10571_v17 }
 0x296   :  { %v2731_v60 = vpop.permute.xlu1 %2730 }
 0x297   :  { %v10557_v16 = vadd.f32 %v2731_v60, %v13856_v25  ;;  %v13863_v60 = vld [vmem:[#allocation65_spill] sm:$0xff]  ;;  %v2647_v47 = vpop.permute.xlu0 %2646 }
 0x298   :  { %1009 = vperm.xlu0 %8893, %v10457_v62  }
 0x299   :  { %1030 = vperm.xlu1 %8894, %v10462_v23   ;;  %13857 = vst [vmem:[#allocation46_spill] sm:$0xff] %v10557_v16 }
 0x29a   :  { %v2654_v21 = vpop.permute.xlu1 %2653 }
 0x29b   :  { %v10567_v0 = vadd.f32 %v2654_v21, %v13859_v40  ;;  %v13866_v21 = vld [vmem:[#allocation61_spill] sm:$0xff]  ;;  %v2735_v40 = vpop.permute.xlu0 %2734 }
 0x29c   :  { %1021 = vperm.xlu0 %8893, %v10467_v54   ;;  %v10586_v1 = vadd.f32 %v2724_v9, %v13866_v21 }
 0x29d   :  { %1036 = vperm.xlu1 %8894, %v10472_v5   ;;  %13860 = vst [vmem:[#allocation58_spill] sm:$0xff] %v10567_v0 }
 0x29e   :  { %v2742_v39 = vpop.permute.xlu1 %2741  ;;  %13867 = vst [vmem:[#allocation59_spill] sm:$0xff] %v10586_v1 }
 0x29f   :  { %v10575_v12 = vadd.f32 %v2742_v39, %v13863_v60  ;;  %v13868_v39 = vld [vmem:[#allocation55_spill] sm:$0xff] }
 0x2a0   :  { %991 = vperm.xlu0 %8893, %v10477_v46   ;;  %v10590_v60 = vadd.f32 %v2647_v47, %v13868_v39 }
 0x2a1   :  { %2856 = vperm.xlu1 %8894, %v10481_v32   ;;  %13864 = vst [vmem:[#allocation53_spill] sm:$0xff] %v10575_v12 }
 0x2a2   :  { %v10564_v10 = vpop.permute.xlu1 %949  ;;  %13869 = vst [vmem:[#allocation60_spill] sm:$0xff] %v10590_v60 }
 0x2a4   :  { %1015 = vperm.xlu0 %8893, %v10486_v38  }
 0x2a5   :  { %2904 = vperm.xlu1 %8894, %v10490_v24  }
 0x2a6   :  { %v10578_v25 = vpop.permute.xlu1 %2844 }
 0x2a8   :  { %1027 = vperm.xlu0 %8893, %v10495_v26  }
 0x2a9   :  { %2862 = vperm.xlu1 %8894, %v10499_v51  }
 0x2aa   :  { %v953_v48 = vpop.permute.xlu1 %952 }
 0x2ac   :  { %1033 = vperm.xlu0 %8893, %v10504_v52  }
 0x2ad   :  { %2910 = vperm.xlu1 %8894, %v10508_v49  }
 0x2b0   :  { %1039 = vperm.xlu0 %8893, %v10513_v61   ;;  %v13875_v61 = vlaneseq }
 0x2b1   :  { %2868 = vperm.xlu1 %8894, %v10517_v22  }
 0x2b2   :  { %v1042_v23 = vand.u32 127, %v13875_v61 }
 0x2b4   :  { %2901 = vperm.xlu0 %8893, %v10521_v18   ;;  %v1047_v26 = vadd.s32 4294967288, %v1042_v23  ;;  %v10638_v62 = vsub.s32 %v1042_v23, %v13876_v30 }
 0x2b5   :  { %2916 = vperm.xlu1 %8894, %v10525_v14   ;;  %v959_v14 = vpop.permute.xlu1 %958 }
 0x2b6   :  { %v10633_v38 = vsub.s32 %v1047_v26, %v13876_v30  ;;  %13878 = vst [vmem:[#allocation54_spill] sm:$0xff] %v10638_v62  ;;  %v1066_v26 = vrot.slane %v959_v14, %v10638_v62 }
 0x2b8   :  { %2859 = vperm.xlu0 %8893, %v10529_v13   ;;  %13877 = vst [vmem:[#allocation65_spill] sm:$0xff] %v10633_v38  ;;  %v1051_v30 = vrot.slane %v10564_v10, %v10633_v38 }
 0x2b9   :  { %2874 = vperm.xlu1 %8894, %v10533_v43   ;;  %v10600_v21 = vpop.permute.xlu1 %970 }
 0x2bc   :  { %2907 = vperm.xlu0 %8893, %v10537_v31  }
 0x2bd   :  { %2922 = vperm.xlu1 %8894, %v10541_v45   ;;  %v2658_v45 = vpop.permute.xlu0 %2657  ;;  %v10607_v39 = vpop.permute.xlu1 %994 }
 0x2c0   :  { %2865 = vperm.xlu0 %8893, %v10545_v33  }
 0x2c1   :  { %2880 = vperm.xlu1 %8894, %v10549_v59   ;;  %v2746_v9 = vpop.permute.xlu0 %2745 }
 0x2c2   :  { %v10604_v47 = vadd.f32 %v2746_v9, %v10349_v50 }
 0x2c4   :  { %2913 = vperm.xlu0 %8893, %v10553_v44   ;;  %13874 = vst [vmem:[#allocation52_spill] sm:$0xff] %v10604_v47 }
 0x2c5   :  { %2928 = vperm.xlu1 %8894, %v10557_v16   ;;  %v10581_v16 = vadd.f32 %v2636_v42, %v13865_v58  ;;  %v13870_v42 = vld [vmem:[#allocation63_spill] sm:$0xff] }
 0x2c6   :  { %v10594_v58 = vadd.f32 %v2735_v40, %v13870_v42 }
 0x2c8   :  { %2871 = vperm.xlu0 %8893, %v10561_v8   ;;  %13871 = vst [vmem:[#allocation39_spill] sm:$0xff] %v10594_v58 }
 0x2c9   :  { %2886 = vperm.xlu1 %8894, %v10567_v0   ;;  %v1057_v0 = vrot.slane %v953_v48, %v10638_v62 }
 0x2cc   :  { %2919 = vperm.xlu0 %8893, %v10571_v17  }
 0x2cd   :  { %2934 = vperm.xlu1 %8894, %v10575_v12   ;;  %v13872_v12 = vld [vmem:[#allocation64_spill] sm:$0xff] }
 0x2ce   :  { %v10598_v17 = vadd.f32 %v2658_v45, %v13872_v12 }
 0x2d0   :  { %2877 = vperm.xlu0 %8893, %v10581_v16   ;;  %13873 = vst [vmem:[#allocation62_spill] sm:$0xff] %v10598_v17 }
 0x2d4   :  { %2925 = vperm.xlu0 %8893, %v10586_v1   ;;  %v947_v1 = vpop.permute.xlu0 %946 }
 0x2d5   :  { %v1046_v61 = vrot.slane %v947_v1, %v10638_v62 }
 0x2d7   :  { %v1053_v48 = vsel %vm1052_vm1, %v1051_v30, %v1046_v61 }
 0x2d8   :  { %2883 = vperm.xlu0 %8893, %v10590_v60  }
 0x2dc   :  { %2931 = vperm.xlu0 %8893, %v10594_v58  }
 0x2e0   :  { %2889 = vperm.xlu0 %8893, %v10598_v17  }
 0x2e4   :  { %2937 = vperm.xlu0 %8893, %v10604_v47   ;;  %v10609_v40 = vpop.permute.xlu1 %2850 }
 0x2eb   :  { %v10611_v42 = vpop.permute.xlu0 %2847 }
 0x2ec   :  { %v10613_v58 = vpop.permute.xlu1 %2892 }
 0x2ef   :  { %v956_v45 = vpop.permute.xlu0 %955 }
 0x2f0   :  { %v965_v12 = vpop.permute.xlu1 %964  ;;  %v1061_v37 = vrot.slane %v956_v45, %v10633_v38 }
 0x2f2   :  { %v1062_v23 = vsel %vm1052_vm1, %v1061_v37, %v1057_v0 }
 0x2f3   :  { %v962_v49 = vpop.permute.xlu0 %961  ;;  %v1190_v60 = vsel %vm1189_vm2, %v1062_v23, %v1053_v48 }
 0x2f4   :  { %v977_v44 = vpop.permute.xlu1 %976  ;;  %v1070_v7 = vrot.slane %v962_v49, %v10633_v38  ;;  %v1075_v49 = vrot.slane %v965_v12, %v10638_v62 }
 0x2f6   :  { %v1071_v45 = vsel %vm1052_vm1, %v1070_v7, %v1066_v26  ;;  %v1093_v7 = vrot.slane %v977_v44, %v10638_v62  ;;  %v1084_v26 = vrot.slane %v10600_v21, %v10638_v62 }
 0x2f7   :  { %v974_v24 = vpop.permute.xlu0 %973  ;;  %v1192_v12 = vsel %vm1191_vm3, %v1071_v45, %v1190_v60 }
 0x2f8   :  { %v983_v31 = vpop.permute.xlu1 %982  ;;  %v1088_v10 = vrot.slane %v974_v24, %v10633_v38 }
 0x2f9   :  { %v1102_v61 = vrot.slane %v983_v31, %v10638_v62 }
 0x2fa   :  { %v1089_v24 = vsel %vm1052_vm1, %v1088_v10, %v1084_v26 }
 0x2fb   :  { %v10615_v57 = vpop.permute.xlu0 %997 }
 0x2fc   :  { %v10617_v50 = vpop.permute.xlu1 %1000 }
 0x2fd   :  { %v1129_v26 = vrot.slane %v10617_v50, %v10638_v62 }
 0x2ff   :  { %v10619_v9 = vpop.permute.xlu0 %2853 }
 0x300   :  { %v10621_v47 = vpop.permute.xlu1 %1006 }
 0x303   :  { %v10623_v18 = vpop.permute.xlu0 %2895 }
 0x304   :  { %v10625_v20 = vpop.permute.xlu1 %1018 }
 0x307   :  { %v968_v35 = vpop.permute.xlu0 %967 }
 0x308   :  { %v10627_v5 = vpop.permute.xlu1 %2898  ;;  %v1079_v17 = vrot.slane %v968_v35, %v10633_v38 }
 0x30a   :  { %v1080_v35 = vsel %vm1052_vm1, %v1079_v17, %v1075_v49 }
 0x30b   :  { %v980_v52 = vpop.permute.xlu0 %979  ;;  %v1194_v17 = vsel %vm1193_vm4, %v1080_v35, %v1192_v12 }
 0x30c   :  { %v989_v19 = vpop.permute.xlu1 %988  ;;  %v1097_v14 = vrot.slane %v980_v52, %v10633_v38  ;;  %v1196_v21 = vsel %vm1195_vm5, %v1089_v24, %v1194_v17  ;;  %v1138_v17 = vrot.slane %v10621_v47, %v10638_v62 }
 0x30d   :  { %v1111_v44 = vrot.slane %v989_v19, %v10638_v62 }
 0x30e   :  { %v1098_v52 = vsel %vm1052_vm1, %v1097_v14, %v1093_v7  ;;  %v1124_v7 = vrot.slane %v10615_v57, %v10633_v38 }
 0x30f   :  { %v986_v63 = vpop.permute.xlu0 %985  ;;  %v1198_v49 = vsel %vm1197_vm6, %v1098_v52, %v1196_v21 }
 0x310   :  { %v10630_v54 = vpop.permute.xlu1 %1012  ;;  %v1106_v37 = vrot.slane %v986_v63, %v10633_v38 }
 0x312   :  { %v1107_v63 = vsel %vm1052_vm1, %v1106_v37, %v1102_v61 }
 0x313   :  { %v10635_v36 = vpop.permute.xlu0 %1003  ;;  %v1200_v48 = vsel %vm1199_vm7, %v1107_v63, %v1198_v49 }
 0x314   :  { %v10642_v6 = vpop.permute.xlu1 %1024  ;;  %v1133_v10 = vrot.slane %v10635_v36, %v10633_v38  ;;  %v1120_v36 = vrot.slane %v10607_v39, %v10638_v62 }
 0x316   :  { %v1134_v24 = vsel %vm1052_vm1, %v1133_v10, %v1129_v26  ;;  %v1125_v57 = vsel %vm1052_vm1, %v1124_v7, %v1120_v36 }
 0x317   :  { %v1010_v59 = vpop.permute.xlu0 %1009 }
 0x318   :  { %v10653_v1 = vpop.permute.xlu1 %1030  ;;  %v1142_v37 = vrot.slane %v1010_v59, %v10633_v38  ;;  %v1147_v59 = vrot.slane %v10630_v54, %v10638_v62  ;;  %v1165_v54 = vrot.slane %v10642_v6, %v10638_v62 }
 0x31a   :  { %v1143_v63 = vsel %vm1052_vm1, %v1142_v37, %v1138_v17 }
 0x31b   :  { %v1022_v0 = vpop.permute.xlu0 %1021 }
 0x31c   :  { %v1037_v30 = vpop.permute.xlu1 %1036  ;;  %v1160_v47 = vrot.slane %v1022_v0, %v10633_v38 }
 0x31d   :  { %v1183_v6 = vrot.slane %v1037_v30, %v10638_v62 }
 0x31f   :  { %v992_v23 = vpop.permute.xlu0 %991 }
 0x320   :  { %v1115_v60 = vrot.slane %v992_v23, %v10633_v38  ;;  %v10673_v31 = vpop.permute.xlu1 %2856 }
 0x322   :  { %v1116_v45 = vsel %vm1052_vm1, %v1115_v60, %v1111_v44  ;;  %v1203_v44 = vsel %vm1189_vm2, %v1134_v24, %v1125_v57 }
 0x323   :  { %v1016_v35 = vpop.permute.xlu0 %1015  ;;  %v1202_v14 = vsel %vm1201_vm8, %v1116_v45, %v1200_v48  ;;  %v1204_v21 = vsel %vm1191_vm3, %v1143_v63, %v1203_v44  ;;  %v1156_v45 = vrot.slane %v10625_v20, %v10638_v62  ;;  %v1174_v48 = vrot.slane %v10653_v1, %v10638_v62 }
 0x324   :  { %v1212_v19 = vsel %vm184_vm0, %v1202_v14, -inf  ;;  %v10683_v12 = vpop.permute.xlu1 %2904  ;;  %v1151_v61 = vrot.slane %v1016_v35, %v10633_v38 }
 0x325   :  { %1213 = vmax.xlane.f32.xlu1 %v1212_v19  ;;  %v1161_v14 = vsel %vm1052_vm1, %v1160_v47, %v1156_v45  ;;  %v2951_v45 = vrot.slane %v10609_v40, %v10638_v62 }
 0x326   :  { %v1152_v50 = vsel %vm1052_vm1, %v1151_v61, %v1147_v59 }
 0x327   :  { %v1028_v52 = vpop.permute.xlu0 %1027  ;;  %v1205_v35 = vsel %vm1193_vm4, %v1152_v50, %v1204_v21 }
 0x328   :  { %v1169_v23 = vrot.slane %v1028_v52, %v10633_v38  ;;  %v10703_v60 = vpop.permute.xlu1 %2862  ;;  %v1206_v7 = vsel %vm1195_vm5, %v1161_v14, %v1205_v35 }
 0x32a   :  { %v1170_v0 = vsel %vm1052_vm1, %v1169_v23, %v1165_v54 }
 0x32b   :  { %v1034_v39 = vpop.permute.xlu0 %1033  ;;  %v1207_v20 = vsel %vm1197_vm6, %v1170_v0, %v1206_v7  ;;  %v2942_v0 = vrot.slane %v10578_v25, %v10638_v62 }
 0x32c   :  { %v1178_v49 = vrot.slane %v1034_v39, %v10633_v38  ;;  %v10720_v26 = vpop.permute.xlu1 %2910 }
 0x32e   :  { %v1179_v10 = vsel %vm1052_vm1, %v1178_v49, %v1174_v48  ;;  %v2955_v49 = vrot.slane %v10619_v9, %v10633_v38  ;;  %v2946_v48 = vrot.slane %v10611_v42, %v10633_v38  ;;  %v3014_v9 = vrot.slane %v10613_v58, %v10638_v62 }
 0x32f   :  { %v1040_v19 = vpop.permute.xlu0 %1039  ;;  %v1208_v61 = vsel %vm1199_vm7, %v1179_v10, %v1207_v20  ;;  %v3018_v10 = vrot.slane %v10623_v18, %v10633_v38  ;;  %v3023_v18 = vrot.slane %v10627_v5, %v10638_v62  ;;  %v3032_v58 = vrot.slane %v10683_v12, %v10638_v62 }
 0x330   :  { %v1187_v37 = vrot.slane %v1040_v19, %v10633_v38  ;;  %v2869_v59 = vpop.permute.xlu1 %2868  ;;  %v2956_v14 = vsel %vm1052_vm1, %v2955_v49, %v2951_v45 }
 0x331   :  { %v3019_v20 = vsel %vm1052_vm1, %v3018_v10, %v3014_v9  ;;  %v2978_v5 = vrot.slane %v2869_v59, %v10638_v62 }
 0x332   :  { %v1188_v1 = vsel %vm1052_vm1, %v1187_v37, %v1183_v6  ;;  %v2947_v6 = vsel %vm1052_vm1, %v2946_v48, %v2942_v0 }
 0x333   :  { %v2902_v17 = vpop.permute.xlu0 %2901  ;;  %v1209_v52 = vsel %vm1201_vm8, %v1188_v1, %v1208_v61  ;;  %v3083_v42 = vsel %vm1189_vm2, %v2956_v14, %v2947_v6  ;;  %v2960_v1 = vrot.slane %v10673_v31, %v10638_v62 }
 0x334   :  { %v1215_v36 = vsel %vm184_vm0, %v1209_v52, -inf  ;;  %v10727_v63 = vpop.permute.xlu1 %2916  ;;  %v3027_v7 = vrot.slane %v2902_v17, %v10633_v38  ;;  %v2969_v52 = vrot.slane %v10703_v60, %v10638_v62 }
 0x335   :  { %1216 = vmax.xlane.f32.xlu0 %v1215_v36 }
 0x336   :  { %v3028_v12 = vsel %vm1052_vm1, %v3027_v7, %v3023_v18 }
 0x337   :  { %v2860_v30 = vpop.permute.xlu0 %2859  ;;  %v3090_v7 = vsel %vm1189_vm2, %v3028_v12, %v3019_v20 }
 0x338   :  { %v2875_v50 = vpop.permute.xlu1 %2874  ;;  %v2964_v40 = vrot.slane %v2860_v30, %v10633_v38  ;;  %v3041_v30 = vrot.slane %v10720_v26, %v10638_v62 }
 0x339   :  { %v2987_v45 = vrot.slane %v2875_v50, %v10638_v62 }
 0x33b   :  { %v2908_v24 = vpop.permute.xlu0 %2907 }
 0x33c   :  { %v2923_v47 = vpop.permute.xlu1 %2922  ;;  %v3036_v17 = vrot.slane %v2908_v24, %v10633_v38 }
 0x33d   :  { %v3059_v6 = vrot.slane %v2923_v47, %v10638_v62 }
 0x33e   :  { %v3037_v14 = vsel %vm1052_vm1, %v3036_v17, %v3032_v58 }
 0x33f   :  { %v2866_v57 = vpop.permute.xlu0 %2865 }
 0x340   :  { %v2881_v54 = vpop.permute.xlu1 %2880  ;;  %v2973_v25 = vrot.slane %v2866_v57, %v10633_v38  ;;  %v2965_v57 = vsel %vm1052_vm1, %v2964_v40, %v2960_v1  ;;  %v3091_v1 = vsel %vm1191_vm3, %v3037_v14, %v3090_v7 }
 0x341   :  { %v2996_v26 = vrot.slane %v2881_v54, %v10638_v62  ;;  %v3084_v0 = vsel %vm1191_vm3, %v2965_v57, %v3083_v42 }
 0x342   :  { %v2974_v60 = vsel %vm1052_vm1, %v2973_v25, %v2969_v52 }
 0x343   :  { %v2914_v23 = vpop.permute.xlu0 %2913 }
 0x344   :  { %v2929_v19 = vpop.permute.xlu1 %2928  ;;  %v3045_v24 = vrot.slane %v2914_v23, %v10633_v38  ;;  %v3085_v23 = vsel %vm1193_vm4, %v2974_v60, %v3084_v0  ;;  %v13881_v0 = vld [vmem:[#allocation42_spill] sm:$0xff] }
 0x346   :  { %v3046_v40 = vsel %vm1052_vm1, %v3045_v24, %v3041_v30 }
 0x347   :  { %v2872_v44 = vpop.permute.xlu0 %2871  ;;  %v3092_v17 = vsel %vm1193_vm4, %v3046_v40, %v3091_v1  ;;  %v13887_v1 = vld [vmem:[#allocation27_spill] sm:$0xff] }
 0x348   :  { %v2982_v61 = vrot.slane %v2872_v44, %v10633_v38  ;;  %v2887_v31 = vpop.permute.xlu1 %2886 }
 0x34a   :  { %v2983_v59 = vsel %vm1052_vm1, %v2982_v61, %v2978_v5 }
 0x34b   :  { %v2920_v39 = vpop.permute.xlu0 %2919 }
 0x34c   :  { %v3054_v48 = vrot.slane %v2920_v39, %v10633_v38  ;;  %v3086_v39 = vsel %vm1195_vm5, %v2983_v59, %v3085_v23  ;;  %v2935_v25 = vpop.permute.xlu1 %2934  ;;  %v13880_v59 = vld [vmem:[#allocation24_spill] sm:$0xff] }
 0x34d   :  { %v3077_v5 = vrot.slane %v2935_v25, %v10638_v62 }
 0x34f   :  { %v2878_v21 = vpop.permute.xlu0 %2877 }
 0x350   :  { %v2991_v36 = vrot.slane %v2878_v21, %v10633_v38  ;;  %v3050_v21 = vrot.slane %v10727_v63, %v10638_v62 }
 0x352   :  { %v2992_v10 = vsel %vm1052_vm1, %v2991_v36, %v2987_v45  ;;  %v3055_v47 = vsel %vm1052_vm1, %v3054_v48, %v3050_v21  ;;  %v13879_v21 = vld [vmem:[#allocation23_spill] sm:$0xff] }
 0x353   :  { %v2926_v35 = vpop.permute.xlu0 %2925  ;;  %v3087_v18 = vsel %vm1197_vm6, %v2992_v10, %v3086_v39  ;;  %v3093_v30 = vsel %vm1195_vm5, %v3055_v47, %v3092_v17  ;;  %v13882_v10 = vld [vmem:[#allocation40_spill] sm:$0xff]  ;;  %v13886_v47 = vld [vmem:[#allocation45_spill] sm:$0xff] }
 0x354   :  { %v3063_v50 = vrot.slane %v2926_v35, %v10633_v38  ;;  %v3068_v35 = vrot.slane %v2929_v19, %v10638_v62 }
 0x356   :  { %v3064_v61 = vsel %vm1052_vm1, %v3063_v50, %v3059_v6  ;;  %v13883_v6 = vld [vmem:[#allocation25_spill] sm:$0xff] }
 0x357   :  { %v2884_v37 = vpop.permute.xlu0 %2883 }
 0x358   :  { %v3000_v44 = vrot.slane %v2884_v37, %v10633_v38  ;;  %v3005_v37 = vrot.slane %v2887_v31, %v10638_v62 }
 0x35a   :  { %v3001_v63 = vsel %vm1052_vm1, %v3000_v44, %v2996_v26  ;;  %v3094_v44 = vsel %vm1197_vm6, %v3064_v61, %v3093_v30  ;;  %v13889_v30 = vld [vmem:[#allocation48_spill] sm:$0xff] }
 0x35b   :  { %v2932_v49 = vpop.permute.xlu0 %2931  ;;  %v3088_v52 = vsel %vm1199_vm7, %v3001_v63, %v3087_v18 }
 0x35c   :  { %v3072_v54 = vrot.slane %v2932_v49, %v10633_v38 }
 0x35e   :  { %v3073_v36 = vsel %vm1052_vm1, %v3072_v54, %v3068_v35  ;;  %v13884_v54 = vld [vmem:[#allocation43_spill] sm:$0xff] }
 0x35f   :  { %v2890_v9 = vpop.permute.xlu0 %2889  ;;  %v3095_v12 = vsel %vm1199_vm7, %v3073_v36, %v3094_v44  ;;  %v13888_v36 = vld [vmem:[#allocation28_spill] sm:$0xff] }
 0x360   :  { %v3009_v42 = vrot.slane %v2890_v9, %v10633_v38 }
 0x362   :  { %v3010_v58 = vsel %vm1052_vm1, %v3009_v42, %v3005_v37  ;;  %v13885_v37 = vld [vmem:[#allocation26_spill] sm:$0xff] }
 0x363   :  { %v2938_v20 = vpop.permute.xlu0 %2937  ;;  %v3089_v19 = vsel %vm1201_vm8, %v3010_v58, %v3088_v52 }
 0x364   :  { %v3081_v57 = vrot.slane %v2938_v20, %v10633_v38  ;;  %v3099_v31 = vsel %vm184_vm0, %v3089_v19, -inf }
 0x365   :  { %3100 = vmax.xlane.f32.xlu1 %v3099_v31 }
 0x366   :  { %v3082_v49 = vsel %vm1052_vm1, %v3081_v57, %v3077_v5 }
 0x367   :  { %v3096_v45 = vsel %vm1201_vm8, %v3082_v49, %v3095_v12 }
 0x368   :  { %v3102_v60 = vsel %vm184_vm0, %v3096_v45, -inf }
 0x369   :  { %3103 = vmax.xlane.f32.xlu0 %v3102_v60 }
 0x3b2   :  { %v1214_v24 = vpop.xlane.xlu1 %1213 }
 0x3b3   :  { %v1223_v26 = vrot.slane %v1214_v24, %v13879_v21  ;;  %v1227_v48 = vrot.slane %v1214_v24, %v13880_v59  ;;  %v1231_v23 = vrot.slane %v1214_v24, %v13883_v6  ;;  %v1235_v42 = vrot.slane %v1214_v24, %v13885_v37 }
 0x3b4   :  { %v1239_v61 = vrot.slane %v1214_v24, %v13887_v1  ;;  %v1243_v20 = vrot.slane %v1214_v24, %v13888_v36 }
 0x3b5   :  { %v1300_v14 = vsub.f32 %v13881_v0, %v1223_v26  ;;  %v1301_v50 = vsub.f32 %v13882_v10, %v1223_v26  ;;  %v1303_v63 = vsub.f32 %v10361_v3, %v1227_v48  ;;  %v1302_v9 = vsub.f32 %v13884_v54, %v1227_v48  ;;  %v13891_v48 = vld [vmem:[#allocation30_spill] sm:$0xff] }
 0x3b6   :  { %v1305_v7 = vsub.f32 %v10371_v55, %v1231_v23  ;;  %v1304_v25 = vsub.f32 %v13886_v47, %v1231_v23  ;;  %v1307_v58 = vsub.f32 %v10419_v28, %v1235_v42  ;;  %v1306_v52 = vsub.f32 %v10366_v27, %v1235_v42  ;;  %v13890_v28 = vld [vmem:[#allocation29_spill] sm:$0xff] }
 0x3b7   :  { %v1332_v40 = vmul.f32 1.442695, %v1300_v14  ;;  %v1334_v39 = vmul.f32 1.442695, %v1301_v50  ;;  %v1338_v35 = vmul.f32 1.442695, %v1303_v63  ;;  %v1309_v55 = vsub.f32 %v10381_v56, %v1239_v61 }
 0x3b8   :  { %v1336_v18 = vmul.f32 1.442695, %v1302_v9  ;;  %v1342_v3 = vmul.f32 1.442695, %v1305_v7  ;;  %v1340_v17 = vmul.f32 1.442695, %v1304_v25  ;;  %v1308_v5 = vsub.f32 %v13889_v30, %v1239_v61 }
 0x3b9   :  { %9022 = vpow2.f32 %v1332_v40  ;;  %v1346_v19 = vmul.f32 1.442695, %v1307_v58  ;;  %v1344_v57 = vmul.f32 1.442695, %v1306_v52  ;;  %v1247_v27 = vrot.slane %v1214_v24, %v13890_v28  ;;  %v13892_v52 = vld [vmem:[#allocation41_spill] sm:$0xff] }
 0x3ba   :  { %9024 = vpow2.f32 %v1334_v39  ;;  %v1311_v49 = vsub.f32 %v10428_v15, %v1243_v20  ;;  %v1350_v12 = vmul.f32 1.442695, %v1309_v55  ;;  %v1310_v56 = vsub.f32 %v10376_v2, %v1243_v20 }
 0x3bb   :  { %9026 = vpow2.f32 %v1338_v35  ;;  %v1348_v45 = vmul.f32 1.442695, %v1308_v5  ;;  %v1251_v0 = vrot.slane %v1214_v24, %v13891_v48  ;;  %v1313_v14 = vsub.f32 %v10437_v53, %v1247_v27 }
 0x3bc   :  { %9028 = vpow2.f32 %v1336_v18  ;;  %v1354_v15 = vmul.f32 1.442695, %v1311_v49  ;;  %v1312_v10 = vsub.f32 %v10386_v11, %v1247_v27  ;;  %v1352_v2 = vmul.f32 1.442695, %v1310_v56 }
 0x3bd   :  { %9030 = vpow2.f32 %v1342_v3  ;;  %v1315_v63 = vsub.f32 %v10477_v46, %v1251_v0  ;;  %v1358_v24 = vmul.f32 1.442695, %v1313_v14  ;;  %v1314_v53 = vsub.f32 %v10432_v29, %v1251_v0 }
 0x3be   :  { %9032 = vpow2.f32 %v1340_v17  ;;  %v1356_v54 = vmul.f32 1.442695, %v1312_v10 }
 0x3bf   :  { %9034 = vpow2.f32 %v1346_v19  ;;  %v1362_v40 = vmul.f32 1.442695, %v1315_v63  ;;  %v1360_v46 = vmul.f32 1.442695, %v1314_v53 }
 0x3c0   :  { %9036 = vpow2.f32 %v1344_v57 }
 0x3c1   :  { %9038 = vpow2.f32 %v1350_v12 }
 0x3c2   :  { %9040 = vpow2.f32 %v1348_v45 }
 0x3c3   :  { %v10821_v31 = vpop.eup %9022  ;;  %9042 = vpow2.f32 %v1354_v15 }
 0x3c4   :  { %v10823_v44 = vpop.eup %9024  ;;  %1429 = vperm.xlu0 %8893, %v10821_v31   ;;  %9044 = vpow2.f32 %v1352_v2 }
 0x3c5   :  { %1432 = vperm.xlu1 %8894, %v10823_v44   ;;  %v10830_v60 = vpop.eup %9026  ;;  %9046 = vpow2.f32 %v1358_v24 }
 0x3c6   :  { %v10832_v26 = vpop.eup %9028  ;;  %9048 = vpow2.f32 %v1356_v54 }
 0x3c7   :  { %v10839_v50 = vpop.eup %9030  ;;  %9050 = vpow2.f32 %v1362_v40 }
 0x3c8   :  { %1438 = vperm.xlu0 %8893, %v10830_v60   ;;  %v10841_v23 = vpop.eup %9032  ;;  %9052 = vpow2.f32 %v1360_v46 }
 0x3c9   :  { %1435 = vperm.xlu1 %8894, %v10832_v26   ;;  %v10847_v9 = vpop.eup %9034 }
 0x3ca   :  { %v10849_v11 = vpop.eup %9036 }
 0x3cb   :  { %v10853_v39 = vpop.eup %9038 }
 0x3cc   :  { %1444 = vperm.xlu0 %8893, %v10839_v50   ;;  %v10855_v42 = vpop.eup %9040 }
 0x3cd   :  { %1441 = vperm.xlu1 %8894, %v10841_v23   ;;  %v10859_v29 = vpop.eup %9042 }
 0x3ce   :  { %v10861_v7 = vpop.eup %9044 }
 0x3cf   :  { %v10865_v35 = vpop.eup %9046 }
 0x3d0   :  { %1450 = vperm.xlu0 %8893, %v10847_v9   ;;  %v10867_v47 = vpop.eup %9048 }
 0x3d1   :  { %1447 = vperm.xlu1 %8894, %v10849_v11   ;;  %v10871_v25 = vpop.eup %9050 }
 0x3d2   :  { %v10873_v18 = vpop.eup %9052 }
 0x3d4   :  { %1456 = vperm.xlu0 %8893, %v10853_v39  }
 0x3d5   :  { %1453 = vperm.xlu1 %8894, %v10855_v42  }
 0x3d8   :  { %1462 = vperm.xlu0 %8893, %v10859_v29  }
 0x3d9   :  { %1459 = vperm.xlu1 %8894, %v10861_v7  }
 0x3dc   :  { %1468 = vperm.xlu0 %8893, %v10865_v35  }
 0x3dd   :  { %1465 = vperm.xlu1 %8894, %v10867_v47  }
 0x3e0   :  { %1474 = vperm.xlu0 %8893, %v10871_v25  }
 0x3e1   :  { %1471 = vperm.xlu1 %8894, %v10873_v18  }
 0x3f2   :  { %v3101_v61 = vpop.xlane.xlu1 %3100 }
 0x3f3   :  { %v3110_v58 = vrot.slane %v3101_v61, %v13879_v21  ;;  %v3114_v3 = vrot.slane %v3101_v61, %v13880_v59  ;;  %v3118_v55 = vrot.slane %v3101_v61, %v13883_v6  ;;  %v3122_v27 = vrot.slane %v3101_v61, %v13885_v37 }
 0x3f4   :  { %v3130_v15 = vrot.slane %v3101_v61, %v13888_v36  ;;  %v3138_v46 = vrot.slane %v3101_v61, %v13891_v48 }
 0x3f5   :  { %v3187_v17 = vsub.f32 %v13892_v52, %v3110_v58  ;;  %v3188_v20 = vsub.f32 %v10353_v41, %v3110_v58  ;;  %v3190_v19 = vsub.f32 %v10400_v4, %v3114_v3  ;;  %v3189_v30 = vsub.f32 %v10347_v34, %v3114_v3  ;;  %v13893_v58 = vld [vmem:[#allocation60_spill] sm:$0xff]  ;;  %v10910_v52 = vpop.xlane.xlu0 %1216 }
 0x3f6   :  { %v3192_v49 = vsub.f32 %v10529_v13, %v3118_v55  ;;  %v3191_v56 = vsub.f32 %v10481_v32, %v3118_v55  ;;  %v3126_v41 = vrot.slane %v3101_v61, %v13887_v1  ;;  %v3194_v0 = vsub.f32 %v10545_v33, %v3122_v27 }
 0x3f7   :  { %v3219_v5 = vmul.f32 1.442695, %v3187_v17  ;;  %v3221_v57 = vmul.f32 1.442695, %v3188_v20  ;;  %v3225_v12 = vmul.f32 1.442695, %v3190_v19  ;;  %v3193_v34 = vsub.f32 %v10499_v51, %v3122_v27 }
 0x3f8   :  { %v3223_v45 = vmul.f32 1.442695, %v3189_v30  ;;  %v3229_v4 = vmul.f32 1.442695, %v3192_v49  ;;  %v3227_v14 = vmul.f32 1.442695, %v3191_v56  ;;  %v3196_v13 = vsub.f32 %v10561_v8, %v3126_v41 }
 0x3f9   :  { %9054 = vpow2.f32 %v3219_v5  ;;  %v3233_v10 = vmul.f32 1.442695, %v3194_v0  ;;  %v3195_v32 = vsub.f32 %v10517_v22, %v3126_v41  ;;  %v3231_v2 = vmul.f32 1.442695, %v3193_v34  ;;  %v13894_v17 = vld [vmem:[#allocation38_spill] sm:$0xff]  ;;  %v13897_v0 = vld [vmem:[#allocation67_spill] sm:$0xff] }
 0x3fa   :  { %9056 = vpow2.f32 %v3221_v57  ;;  %v3134_v51 = vrot.slane %v3101_v61, %v13890_v28  ;;  %v3198_v33 = vsub.f32 %v10581_v16, %v3130_v15  ;;  %v3237_v53 = vmul.f32 1.442695, %v3196_v13  ;;  %v13895_v30 = vld [vmem:[#allocation62_spill] sm:$0xff] }
 0x3fb   :  { %9058 = vpow2.f32 %v3225_v12  ;;  %v3197_v8 = vsub.f32 %v10533_v43, %v3130_v15  ;;  %v3235_v22 = vmul.f32 1.442695, %v3195_v32  ;;  %v1255_v61 = vrot.slane %v10910_v52, %v13879_v21  ;;  %v13896_v27 = vld [vmem:[#allocation58_spill] sm:$0xff] }
 0x3fc   :  { %9060 = vpow2.f32 %v3223_v45  ;;  %v3200_v3 = vsub.f32 %v13893_v58, %v3134_v51  ;;  %v3241_v16 = vmul.f32 1.442695, %v3198_v33  ;;  %v3199_v43 = vsub.f32 %v13894_v17, %v3134_v51  ;;  %v13899_v51 = vld [vmem:[#allocation32_spill] sm:$0xff]  ;;  %v13901_v17 = vld [vmem:[#allocation74_spill] sm:$0xff] }
 0x3fd   :  { %9062 = vpow2.f32 %v3229_v4  ;;  %v3239_v20 = vmul.f32 1.442695, %v3197_v8  ;;  %v3202_v5 = vsub.f32 %v13895_v30, %v3138_v46  ;;  %v3201_v49 = vsub.f32 %v13896_v27, %v3138_v46  ;;  %v13900_v8 = vld [vmem:[#allocation68_spill] sm:$0xff] }
 0x3fe   :  { %9064 = vpow2.f32 %v3227_v14  ;;  %v3245_v57 = vmul.f32 1.442695, %v3200_v3  ;;  %v3243_v12 = vmul.f32 1.442695, %v3199_v43  ;;  %v1259_v41 = vrot.slane %v10910_v52, %v13880_v59  ;;  %v13898_v14 = vld [vmem:[#allocation51_spill] sm:$0xff] }
 0x3ff   :  { %9066 = vpow2.f32 %v3233_v10  ;;  %v1317_v4 = vsub.f32 %v13897_v0, %v1255_v61  ;;  %v3249_v34 = vmul.f32 1.442695, %v3202_v5  ;;  %v1316_v15 = vsub.f32 %v13898_v14, %v1255_v61  ;;  %v13902_v61 = vld [vmem:[#allocation69_spill] sm:$0xff] }
 0x400   :  { %9068 = vpow2.f32 %v3231_v2  ;;  %v3247_v13 = vmul.f32 1.442695, %v3201_v49  ;;  %v1263_v2 = vrot.slane %v10910_v52, %v13883_v6  ;;  %v1319_v33 = vsub.f32 %v13899_v51, %v1259_v41  ;;  %v13909_v51 = vld [vmem:[#allocation76_spill] sm:$0xff] }
 0x401   :  { %9070 = vpow2.f32 %v3237_v53  ;;  %v1366_v53 = vmul.f32 1.442695, %v1317_v4  ;;  %v1364_v46 = vmul.f32 1.442695, %v1316_v15  ;;  %v1271_v49 = vrot.slane %v10910_v52, %v13887_v1  ;;  %v13906_v4 = vld [vmem:[#allocation34_spill] sm:$0xff] }
 0x402   :  { %9072 = vpow2.f32 %v3235_v22  ;;  %v1318_v22 = vsub.f32 %v13900_v8, %v1259_v41  ;;  %v1321_v43 = vsub.f32 %v13901_v17, %v1263_v2  ;;  %v1320_v30 = vsub.f32 %v13902_v61, %v1263_v2  ;;  %v13910_v8 = vld [vmem:[#allocation71_spill] sm:$0xff] }
 0x403   :  { %v10893_v63 = vpop.eup %9054  ;;  %9074 = vpow2.f32 %v3241_v16  ;;  %v1267_v16 = vrot.slane %v10910_v52, %v13885_v37  ;;  %v1275_v2 = vrot.slane %v10910_v52, %v13888_v36 }
 0x404   :  { %v10895_v24 = vpop.eup %9056  ;;  %3316 = vperm.xlu0 %8893, %v10893_v63   ;;  %9076 = vpow2.f32 %v3239_v20  ;;  %v1370_v20 = vmul.f32 1.442695, %v1319_v33  ;;  %v1368_v5 = vmul.f32 1.442695, %v1318_v22  ;;  %v1374_v0 = vmul.f32 1.442695, %v1321_v43 }
 0x405   :  { %3319 = vperm.xlu1 %8894, %v10895_v24   ;;  %v10902_v54 = vpop.eup %9058  ;;  %9078 = vpow2.f32 %v3245_v57  ;;  %v1372_v14 = vmul.f32 1.442695, %v1320_v30  ;;  %v1325_v33 = vsub.f32 %v13909_v51, %v1271_v49  ;;  %v1324_v22 = vsub.f32 %v13910_v8, %v1271_v49  ;;  %v10993_v8 = vpop.xlane.xlu0 %3103 }
 0x406   :  { %v10904_v40 = vpop.eup %9060  ;;  %9080 = vpow2.f32 %v3243_v12  ;;  %v13905_v12 = vld [vmem:[#allocation33_spill] sm:$0xff]  ;;  %v1279_v43 = vrot.slane %v10910_v52, %v13890_v28 }
 0x407   :  { %v10913_v55 = vpop.eup %9062  ;;  %9082 = vpow2.f32 %v3249_v34  ;;  %v1323_v41 = vsub.f32 %v13905_v12, %v1267_v16  ;;  %v1322_v34 = vsub.f32 %v13906_v4, %v1267_v16  ;;  %v1382_v30 = vmul.f32 1.442695, %v1325_v33  ;;  %v13918_v33 = vld [vmem:[#allocation75_spill] sm:$0xff] }
 0x408   :  { %3325 = vperm.xlu0 %8893, %v10902_v54   ;;  %v10915_v19 = vpop.eup %9064  ;;  %9084 = vpow2.f32 %v3247_v13  ;;  %v1380_v49 = vmul.f32 1.442695, %v1324_v22  ;;  %v1283_v4 = vrot.slane %v10910_v52, %v13891_v48 }
 0x409   :  { %3322 = vperm.xlu1 %8894, %v10904_v40   ;;  %v10923_v56 = vpop.eup %9066  ;;  %9086 = vpow2.f32 %v1366_v53  ;;  %v1378_v53 = vmul.f32 1.442695, %v1323_v41 }
 0x40a   :  { %v10925_v45 = vpop.eup %9068  ;;  %9088 = vpow2.f32 %v1364_v46  ;;  %v1376_v46 = vmul.f32 1.442695, %v1322_v34  ;;  %v13917_v34 = vld [vmem:[#allocation56_spill] sm:$0xff] }
 0x40b   :  { %v10933_v10 = vpop.eup %9070  ;;  %9090 = vpow2.f32 %v1370_v20  ;;  %v13913_v20 = vld [vmem:[#allocation79_spill] sm:$0xff] }
 0x40c   :  { %3331 = vperm.xlu0 %8893, %v10913_v55   ;;  %v10935_v32 = vpop.eup %9072  ;;  %9092 = vpow2.f32 %v1368_v5  ;;  %v1327_v61 = vsub.f32 %v13913_v20, %v1275_v2  ;;  %v13914_v5 = vld [vmem:[#allocation73_spill] sm:$0xff] }
 0x40d   :  { %3328 = vperm.xlu1 %8894, %v10915_v19   ;;  %v10943_v58 = vpop.eup %9074  ;;  %9094 = vpow2.f32 %v1374_v0  ;;  %v1326_v12 = vsub.f32 %v13914_v5, %v1275_v2  ;;  %v13921_v20 = vld [vmem:[#allocation57_spill] sm:$0xff] }
 0x40e   :  { %v10945_v3 = vpop.eup %9076  ;;  %9096 = vpow2.f32 %v1372_v14  ;;  %v1329_v14 = vsub.f32 %v13917_v34, %v1279_v43  ;;  %v1386_v51 = vmul.f32 1.442695, %v1327_v61  ;;  %v1331_v52 = vsub.f32 %v13921_v20, %v1283_v4 }
 0x40f   :  { %v10953_v57 = vpop.eup %9078  ;;  %9098 = vpow2.f32 %v1378_v53  ;;  %v1328_v53 = vsub.f32 %v13918_v33, %v1279_v43  ;;  %v1384_v2 = vmul.f32 1.442695, %v1326_v12  ;;  %v3142_v61 = vrot.slane %v10993_v8, %v13879_v21  ;;  %v13922_v43 = vld [vmem:[#allocation77_spill] sm:$0xff] }
 0x410   :  { %3337 = vperm.xlu0 %8893, %v10923_v56   ;;  %13903 = vst [vmem:[#allocation61_spill] sm:$0xff] %v10953_v57  ;;  %v10955_v27 = vpop.eup %9080  ;;  %9100 = vpow2.f32 %v1376_v46  ;;  %v1390_v5 = vmul.f32 1.442695, %v1329_v14  ;;  %v1394_v33 = vmul.f32 1.442695, %v1331_v52  ;;  %v3146_v14 = vrot.slane %v10993_v8, %v13880_v59 }
 0x411   :  { %3334 = vperm.xlu1 %8894, %v10925_v45   ;;  %13904 = vst [vmem:[#allocation55_spill] sm:$0xff] %v10955_v27  ;;  %v10963_v15 = vpop.eup %9082  ;;  %9102 = vpow2.f32 %v1382_v30  ;;  %v1330_v30 = vsub.f32 %v13922_v43, %v1283_v4  ;;  %v1388_v12 = vmul.f32 1.442695, %v1328_v53  ;;  %v13926_v4 = vld [vmem:[#allocation66_spill] sm:$0xff]  ;;  %v3150_v52 = vrot.slane %v10993_v8, %v13883_v6 }
 0x412   :  { %13907 = vst [vmem:[#allocation63_spill] sm:$0xff] %v10963_v15  ;;  %v10965_v13 = vpop.eup %9084  ;;  %9104 = vpow2.f32 %v1380_v49 }
 0x413   :  { %13908 = vst [vmem:[#allocation64_spill] sm:$0xff] %v10965_v13  ;;  %v10973_v16 = vpop.eup %9086  ;;  %9106 = vpow2.f32 %v1386_v51  ;;  %v13925_v51 = vld [vmem:[#allocation70_spill] sm:$0xff] }
 0x414   :  { %3343 = vperm.xlu0 %8893, %v10933_v10   ;;  %13911 = vst [vmem:[#allocation22_spill] sm:$0xff] %v10973_v16  ;;  %v10975_v17 = vpop.eup %9088  ;;  %9108 = vpow2.f32 %v1384_v2  ;;  %v3204_v20 = vsub.f32 %v13925_v51, %v3142_v61  ;;  %v3203_v2 = vsub.f32 %v13926_v4, %v3142_v61 }
 0x415   :  { %3340 = vperm.xlu1 %8894, %v10935_v32   ;;  %13912 = vst [vmem:[#allocation23_spill] sm:$0xff] %v10975_v17  ;;  %v10983_v41 = vpop.eup %9090  ;;  %9110 = vpow2.f32 %v1390_v5  ;;  %v13929_v5 = vld [vmem:[#allocation36_spill] sm:$0xff] }
 0x416   :  { %13915 = vst [vmem:[#allocation42_spill] sm:$0xff] %v10983_v41  ;;  %v10985_v0 = vpop.eup %9092  ;;  %9112 = vpow2.f32 %v1388_v12  ;;  %v13930_v12 = vld [vmem:[#allocation72_spill] sm:$0xff]  ;;  %v3251_v51 = vmul.f32 1.442695, %v3203_v2 }
 0x417   :  { %13916 = vst [vmem:[#allocation40_spill] sm:$0xff] %v10985_v0  ;;  %v10995_v22 = vpop.eup %9094  ;;  %9114 = vpow2.f32 %v1394_v33  ;;  %v3154_v33 = vrot.slane %v10993_v8, %v13885_v37 }
 0x418   :  { %3349 = vperm.xlu0 %8893, %v10943_v58   ;;  %13919 = vst [vmem:[#allocation43_spill] sm:$0xff] %v10995_v22  ;;  %v10997_v46 = vpop.eup %9096 }
 0x419   :  { %3346 = vperm.xlu1 %8894, %v10945_v3   ;;  %13920 = vst [vmem:[#allocation45_spill] sm:$0xff] %v10997_v46  ;;  %v11005_v49 = vpop.eup %9098 }
 0x41a   :  { %13923 = vst [vmem:[#allocation48_spill] sm:$0xff] %v11005_v49  ;;  %v11007_v34 = vpop.eup %9100 }
 0x41b   :  { %13924 = vst [vmem:[#allocation41_spill] sm:$0xff] %v11007_v34  ;;  %v11015_v53 = vpop.eup %9102 }
 0x41c   :  { %3355 = vperm.xlu0 %8893, %v10953_v57   ;;  %13927 = vst [vmem:[#allocation60_spill] sm:$0xff] %v11015_v53  ;;  %v11017_v43 = vpop.eup %9104 }
 0x41d   :  { %3352 = vperm.xlu1 %8894, %v10955_v27   ;;  %13928 = vst [vmem:[#allocation38_spill] sm:$0xff] %v11017_v43  ;;  %v11025_v61 = vpop.eup %9106 }
 0x41e   :  { %13931 = vst [vmem:[#allocation62_spill] sm:$0xff] %v11025_v61  ;;  %v11027_v4 = vpop.eup %9108 }
 0x41f   :  { %13932 = vst [vmem:[#allocation58_spill] sm:$0xff] %v11027_v4  ;;  %v11035_v2 = vpop.eup %9110 }
 0x420   :  { %3361 = vperm.xlu0 %8893, %v10963_v15   ;;  %13935 = vst [vmem:[#allocation67_spill] sm:$0xff] %v11035_v2 }
 0x421   :  { %3358 = vperm.xlu1 %8894, %v10965_v13  }
 0x424   :  { %1480 = vperm.xlu0 %8893, %v10973_v16  }
 0x425   :  { %1477 = vperm.xlu1 %8894, %v10975_v17  }
 0x428   :  { %1486 = vperm.xlu0 %8893, %v10983_v41  }
 0x429   :  { %1483 = vperm.xlu1 %8894, %v10985_v0  }
 0x42c   :  { %1492 = vperm.xlu0 %8893, %v10995_v22   ;;  %v1392_v22 = vmul.f32 1.442695, %v1330_v30  ;;  %v3205_v30 = vsub.f32 %v13930_v12, %v3146_v14  ;;  %v11037_v12 = vpop.eup %9112 }
 0x42d   :  { %1489 = vperm.xlu1 %8894, %v10997_v46   ;;  %v3253_v46 = vmul.f32 1.442695, %v3204_v20  ;;  %v13934_v20 = vld [vmem:[#allocation78_spill] sm:$0xff]  ;;  %13936 = vst [vmem:[#allocation51_spill] sm:$0xff] %v11037_v12 }
 0x42e   :  { %9116 = vpow2.f32 %v1392_v22  ;;  %v3207_v22 = vsub.f32 %v13934_v20, %v3150_v52  ;;  %v3162_v20 = vrot.slane %v10993_v8, %v13888_v36 }
 0x42f   :  { %9118 = vpow2.f32 %v3253_v46 }
 0x430   :  { %1498 = vperm.xlu0 %8893, %v11005_v49   ;;  %v3206_v49 = vsub.f32 %v13929_v5, %v3146_v14  ;;  %9120 = vpow2.f32 %v3251_v51  ;;  %v3255_v14 = vmul.f32 1.442695, %v3205_v30  ;;  %v11045_v30 = vpop.eup %9114 }
 0x431   :  { %1495 = vperm.xlu1 %8894, %v11007_v34   ;;  %13939 = vst [vmem:[#allocation32_spill] sm:$0xff] %v11045_v30 }
 0x432   :  { %v3257_v5 = vmul.f32 1.442695, %v3206_v49  ;;  %v13938_v49 = vld [vmem:[#allocation35_spill] sm:$0xff] }
 0x434   :  { %1504 = vperm.xlu0 %8893, %v11015_v53   ;;  %v13933_v53 = vld [vmem:[#allocation44_spill] sm:$0xff]  ;;  %9122 = vpow2.f32 %v3257_v5 }
 0x435   :  { %1501 = vperm.xlu1 %8894, %v11017_v43   ;;  %v3208_v34 = vsub.f32 %v13933_v53, %v3150_v52  ;;  %v13937_v43 = vld [vmem:[#allocation50_spill] sm:$0xff]  ;;  %v3209_v53 = vsub.f32 %v13938_v49, %v3154_v33  ;;  %9124 = vpow2.f32 %v3255_v14  ;;  %v3259_v52 = vmul.f32 1.442695, %v3207_v22 }
 0x436   :  { %v3210_v41 = vsub.f32 %v13937_v43, %v3154_v33  ;;  %v3166_v49 = vrot.slane %v10993_v8, %v13890_v28 }
 0x437   :  { %v3261_v46 = vmul.f32 1.442695, %v3208_v34  ;;  %v13942_v34 = vld [vmem:[#allocation37_spill] sm:$0xff]  ;;  %v3263_v33 = vmul.f32 1.442695, %v3209_v53 }
 0x438   :  { %1510 = vperm.xlu0 %8893, %v11025_v61   ;;  %v3158_v61 = vrot.slane %v10993_v8, %v13887_v1  ;;  %v11047_v51 = vpop.eup %9116  ;;  %v3265_v43 = vmul.f32 1.442695, %v3210_v41  ;;  %v13946_v41 = vld [vmem:[#allocation47_spill] sm:$0xff] }
 0x439   :  { %1507 = vperm.xlu1 %8894, %v11027_v4   ;;  %13940 = vst [vmem:[#allocation68_spill] sm:$0xff] %v11047_v51  ;;  %9126 = vpow2.f32 %v3261_v46  ;;  %v11055_v22 = vpop.eup %9118  ;;  %v3213_v46 = vsub.f32 %v13946_v41, %v3162_v20 }
 0x43a   :  { %v3211_v5 = vsub.f32 %v13942_v34, %v3158_v61  ;;  %9128 = vpow2.f32 %v3259_v52  ;;  %13943 = vst [vmem:[#allocation74_spill] sm:$0xff] %v11055_v22  ;;  %v11057_v14 = vpop.eup %9120 }
 0x43b   :  { %13944 = vst [vmem:[#allocation69_spill] sm:$0xff] %v11057_v14  ;;  %9130 = vpow2.f32 %v3265_v43 }
 0x43c   :  { %1516 = vperm.xlu0 %8893, %v11035_v2   ;;  %v13941_v2 = vld [vmem:[#allocation49_spill] sm:$0xff]  ;;  %9132 = vpow2.f32 %v3263_v33  ;;  %v3271_v33 = vmul.f32 1.442695, %v3213_v46 }
 0x43d   :  { %1513 = vperm.xlu1 %8894, %v11037_v12   ;;  %v3212_v4 = vsub.f32 %v13941_v2, %v3158_v61  ;;  %v3267_v61 = vmul.f32 1.442695, %v3211_v5 }
 0x43e   :  { %v11065_v53 = vpop.eup %9122 }
 0x43f   :  { %v3269_v2 = vmul.f32 1.442695, %v3212_v4  ;;  %13947 = vst [vmem:[#allocation33_spill] sm:$0xff] %v11065_v53  ;;  %v13949_v4 = vld [vmem:[#allocation39_spill] sm:$0xff] }
 0x440   :  { %1522 = vperm.xlu0 %8893, %v11045_v30   ;;  %v13945_v30 = vld [vmem:[#allocation59_spill] sm:$0xff]  ;;  %v3216_v43 = vsub.f32 %v13949_v4, %v3166_v49 }
 0x441   :  { %1519 = vperm.xlu1 %8894, %v11047_v51   ;;  %v3214_v12 = vsub.f32 %v13945_v30, %v3162_v20  ;;  %v11071_v51 = vpop.eup %9124  ;;  %v3170_v30 = vrot.slane %v10993_v8, %v13891_v48  ;;  %9134 = vpow2.f32 %v3269_v2  ;;  %v13950_v20 = vld [vmem:[#allocation46_spill] sm:$0xff] }
 0x442   :  { %13948 = vst [vmem:[#allocation34_spill] sm:$0xff] %v11071_v51  ;;  %v3215_v5 = vsub.f32 %v13950_v20, %v3166_v49  ;;  %9136 = vpow2.f32 %v3267_v61  ;;  %v3277_v8 = vmul.f32 1.442695, %v3216_v43 }
 0x443   :  { %v11069_v34 = vpop.permute.xlu0 %1429  ;;  %v11079_v41 = vpop.eup %9126 }
 0x444   :  { %3367 = vperm.xlu0 %8893, %v11055_v22   ;;  %v11067_v52 = vpop.permute.xlu1 %1432  ;;  %v3273_v22 = vmul.f32 1.442695, %v3214_v12  ;;  %13951 = vst [vmem:[#allocation76_spill] sm:$0xff] %v11079_v41  ;;  %v13954_v12 = vld [vmem:[#allocation53_spill] sm:$0xff]  ;;  %v3275_v49 = vmul.f32 1.442695, %v3215_v5 }
 0x445   :  { %3364 = vperm.xlu1 %8894, %v11057_v14   ;;  %v11081_v14 = vpop.eup %9128  ;;  %v3217_v2 = vsub.f32 %v13954_v12, %v3170_v30 }
 0x446   :  { %13952 = vst [vmem:[#allocation71_spill] sm:$0xff] %v11081_v14  ;;  %9138 = vpow2.f32 %v3273_v22  ;;  %v11087_v61 = vpop.eup %9130 }
 0x447   :  { %v1439_v4 = vpop.permute.xlu0 %1438  ;;  %9140 = vpow2.f32 %v3271_v33  ;;  %13955 = vst [vmem:[#allocation79_spill] sm:$0xff] %v11087_v61  ;;  %v11089_v46 = vpop.eup %9132  ;;  %v3279_v22 = vmul.f32 1.442695, %v3217_v2 }
 0x448   :  { %3373 = vperm.xlu0 %8893, %v11065_v53   ;;  %v13953_v53 = vld [vmem:[#allocation52_spill] sm:$0xff]  ;;  %v1436_v16 = vpop.permute.xlu1 %1435  ;;  %13956 = vst [vmem:[#allocation73_spill] sm:$0xff] %v11089_v46  ;;  %9142 = vpow2.f32 %v3277_v8 }
 0x449   :  { %3370 = vperm.xlu1 %8894, %v11071_v51   ;;  %v3218_v0 = vsub.f32 %v13953_v53, %v3170_v30  ;;  %9144 = vpow2.f32 %v3275_v49  ;;  %v1531_v51 = vrot.slane %v11067_v52, %v10633_v38 }
 0x44b   :  { %v3281_v20 = vmul.f32 1.442695, %v3218_v0  ;;  %v11093_v53 = vpop.eup %9134 }
 0x44c   :  { %3379 = vperm.xlu0 %8893, %v11079_v41   ;;  %13957 = vst [vmem:[#allocation56_spill] sm:$0xff] %v11093_v53  ;;  %v1442_v43 = vpop.permute.xlu1 %1441  ;;  %v1445_v41 = vpop.permute.xlu0 %1444 }
 0x44d   :  { %3376 = vperm.xlu1 %8894, %v11081_v14   ;;  %v11095_v14 = vpop.eup %9136  ;;  %9146 = vpow2.f32 %v3281_v20 }
 0x44e   :  { %13958 = vst [vmem:[#allocation75_spill] sm:$0xff] %v11095_v14  ;;  %9148 = vpow2.f32 %v3279_v22 }
 0x450   :  { %3385 = vperm.xlu0 %8893, %v11087_v61   ;;  %v11099_v30 = vpop.eup %9138  ;;  %v1448_v0 = vpop.permute.xlu1 %1447  ;;  %v1536_v61 = vrot.slane %v1436_v16, %v10638_v62 }
 0x451   :  { %3382 = vperm.xlu1 %8894, %v11089_v46   ;;  %13959 = vst [vmem:[#allocation57_spill] sm:$0xff] %v11099_v30  ;;  %v11101_v5 = vpop.eup %9140  ;;  %v1451_v33 = vpop.permute.xlu0 %1450  ;;  %v1549_v46 = vrot.slane %v1445_v41, %v10633_v38 }
 0x452   :  { %13960 = vst [vmem:[#allocation77_spill] sm:$0xff] %v11101_v5  ;;  %v11105_v8 = vpop.eup %9142  ;;  %v1558_v17 = vrot.slane %v1451_v33, %v10633_v38 }
 0x453   :  { %13961 = vst [vmem:[#allocation70_spill] sm:$0xff] %v11105_v8  ;;  %v11107_v12 = vpop.eup %9144 }
 0x454   :  { %3391 = vperm.xlu0 %8893, %v11093_v53   ;;  %13962 = vst [vmem:[#allocation66_spill] sm:$0xff] %v11107_v12  ;;  %v1454_v49 = vpop.permute.xlu1 %1453 }
 0x455   :  { %3388 = vperm.xlu1 %8894, %v11095_v14   ;;  %v1457_v20 = vpop.permute.xlu0 %1456  ;;  %v1563_v15 = vrot.slane %v1454_v49, %v10638_v62 }
 0x456   :  { %v1567_v16 = vrot.slane %v1457_v20, %v10633_v38 }
 0x457   :  { %v11111_v2 = vpop.eup %9146 }
 0x458   :  { %3397 = vperm.xlu0 %8893, %v11099_v30   ;;  %13963 = vst [vmem:[#allocation36_spill] sm:$0xff] %v11111_v2  ;;  %v11113_v22 = vpop.eup %9148  ;;  %v1460_v30 = vpop.permute.xlu1 %1459 }
 0x459   :  { %3394 = vperm.xlu1 %8894, %v11101_v5   ;;  %13964 = vst [vmem:[#allocation72_spill] sm:$0xff] %v11113_v22  ;;  %v1463_v5 = vpop.permute.xlu0 %1462  ;;  %v1572_v41 = vrot.slane %v1460_v30, %v10638_v62  ;;  %v1568_v30 = vsel %vm1052_vm1, %v1567_v16, %v1563_v15 }
 0x45a   :  { %v1576_v57 = vrot.slane %v1463_v5, %v10633_v38 }
 0x45c   :  { %3403 = vperm.xlu0 %8893, %v11105_v8   ;;  %v1466_v53 = vpop.permute.xlu1 %1465  ;;  %v1540_v8 = vrot.slane %v1439_v4, %v10633_v38 }
 0x45d   :  { %3400 = vperm.xlu1 %8894, %v11107_v12   ;;  %v1469_v14 = vpop.permute.xlu0 %1468  ;;  %v1545_v12 = vrot.slane %v1442_v43, %v10638_v62 }
 0x45e   :  { %v1541_v43 = vsel %vm1052_vm1, %v1540_v8, %v1536_v61 }
 0x45f   :  { %v1550_v52 = vsel %vm1052_vm1, %v1549_v46, %v1545_v12  ;;  %v1577_v46 = vsel %vm1052_vm1, %v1576_v57, %v1572_v41 }
 0x460   :  { %3409 = vperm.xlu0 %8893, %v11111_v2   ;;  %v1527_v2 = vrot.slane %v11069_v34, %v10638_v62  ;;  %v1472_v13 = vpop.permute.xlu1 %1471  ;;  %v1581_v34 = vrot.slane %v1466_v53, %v10638_v62 }
 0x461   :  { %3406 = vperm.xlu1 %8894, %v11113_v22   ;;  %v1554_v22 = vrot.slane %v1448_v0, %v10638_v62  ;;  %v1475_v4 = vpop.permute.xlu0 %1474  ;;  %v1585_v0 = vrot.slane %v1469_v14, %v10633_v38  ;;  %v1590_v20 = vrot.slane %v1472_v13, %v10638_v62 }
 0x462   :  { %v1532_v33 = vsel %vm1052_vm1, %v1531_v51, %v1527_v2  ;;  %v1594_v27 = vrot.slane %v1475_v4, %v10633_v38 }
 0x463   :  { %v1559_v49 = vsel %vm1052_vm1, %v1558_v17, %v1554_v22  ;;  %v1668_v61 = vsel %vm1189_vm2, %v1541_v43, %v1532_v33  ;;  %v1586_v14 = vsel %vm1052_vm1, %v1585_v0, %v1581_v34 }
 0x464   :  { %v1669_v5 = vsel %vm1191_vm3, %v1550_v52, %v1668_v61  ;;  %v1595_v17 = vsel %vm1052_vm1, %v1594_v27, %v1590_v20 }
 0x465   :  { %v1670_v53 = vsel %vm1193_vm4, %v1559_v49, %v1669_v5 }
 0x466   :  { %v1671_v51 = vsel %vm1195_vm5, %v1568_v30, %v1670_v53 }
 0x467   :  { %v1672_v13 = vsel %vm1197_vm6, %v1577_v46, %v1671_v51 }
 0x468   :  { %v1673_v8 = vsel %vm1199_vm7, %v1586_v14, %v1672_v13 }
 0x469   :  { %v1674_v12 = vsel %vm1201_vm8, %v1595_v17, %v1673_v8 }
 0x46a   :  { %v1684_v15 = vsel %vm184_vm0, %v1674_v12, 0.0 }
 0x47f   :  { %1685 = vadd.xlane.f32.xlu0 %v1684_v15 }
 0x483   :  { %v3317_v2 = vpop.permute.xlu0 %3316 }
 0x484   :  { %v3320_v22 = vpop.permute.xlu1 %3319  ;;  %v3414_v46 = vrot.slane %v3317_v2, %v10638_v62 }
 0x485   :  { %v3418_v5 = vrot.slane %v3320_v22, %v10633_v38 }
 0x487   :  { %v3326_v57 = vpop.permute.xlu0 %3325 }
 0x488   :  { %v3323_v16 = vpop.permute.xlu1 %3322  ;;  %v3427_v33 = vrot.slane %v3326_v57, %v10633_v38 }
 0x489   :  { %v3423_v27 = vrot.slane %v3323_v16, %v10638_v62  ;;  %v3419_v16 = vsel %vm1052_vm1, %v3418_v5, %v3414_v46 }
 0x48b   :  { %v3332_v4 = vpop.permute.xlu0 %3331  ;;  %v3428_v13 = vsel %vm1052_vm1, %v3427_v33, %v3423_v27 }
 0x48c   :  { %v3329_v43 = vpop.permute.xlu1 %3328  ;;  %v3436_v61 = vrot.slane %v3332_v4, %v10633_v38 }
 0x48d   :  { %v3432_v20 = vrot.slane %v3329_v43, %v10638_v62 }
 0x48f   :  { %v3338_v41 = vpop.permute.xlu0 %3337  ;;  %v3437_v57 = vsel %vm1052_vm1, %v3436_v61, %v3432_v20 }
 0x490   :  { %v3335_v52 = vpop.permute.xlu1 %3334  ;;  %v3445_v14 = vrot.slane %v3338_v41, %v10633_v38  ;;  %v3555_v41 = vsel %vm1189_vm2, %v3428_v13, %v3419_v16 }
 0x491   :  { %v3441_v53 = vrot.slane %v3335_v52, %v10638_v62 }
 0x493   :  { %v3344_v34 = vpop.permute.xlu0 %3343  ;;  %v3446_v4 = vsel %vm1052_vm1, %v3445_v14, %v3441_v53 }
 0x494   :  { %v3341_v0 = vpop.permute.xlu1 %3340  ;;  %v3454_v17 = vrot.slane %v3344_v34, %v10633_v38  ;;  %v3556_v34 = vsel %vm1191_vm3, %v3437_v57, %v3555_v41 }
 0x495   :  { %v3450_v51 = vrot.slane %v3341_v0, %v10638_v62  ;;  %v3557_v33 = vsel %vm1193_vm4, %v3446_v4, %v3556_v34 }
 0x497   :  { %v3350_v49 = vpop.permute.xlu0 %3349  ;;  %v3455_v52 = vsel %vm1052_vm1, %v3454_v17, %v3450_v51 }
 0x498   :  { %v3347_v30 = vpop.permute.xlu1 %3346  ;;  %v3463_v12 = vrot.slane %v3350_v49, %v10633_v38 }
 0x499   :  { %v3459_v8 = vrot.slane %v3347_v30, %v10638_v62  ;;  %v3558_v30 = vsel %vm1195_vm5, %v3455_v52, %v3557_v33 }
 0x49b   :  { %v3356_v15 = vpop.permute.xlu0 %3355  ;;  %v3464_v0 = vsel %vm1052_vm1, %v3463_v12, %v3459_v8 }
 0x49c   :  { %v3353_v22 = vpop.permute.xlu1 %3352  ;;  %v3472_v2 = vrot.slane %v3356_v15, %v10633_v38  ;;  %v3559_v46 = vsel %vm1197_vm6, %v3464_v0, %v3558_v30 }
 0x49d   :  { %v3468_v43 = vrot.slane %v3353_v22, %v10638_v62 }
 0x49f   :  { %v3362_v27 = vpop.permute.xlu0 %3361  ;;  %v3473_v49 = vsel %vm1052_vm1, %v3472_v2, %v3468_v43 }
 0x4a0   :  { %v3359_v20 = vpop.permute.xlu1 %3358  ;;  %v3481_v61 = vrot.slane %v3362_v27, %v10633_v38  ;;  %v3560_v51 = vsel %vm1199_vm7, %v3473_v49, %v3559_v46 }
 0x4a1   :  { %v3477_v5 = vrot.slane %v3359_v20, %v10638_v62 }
 0x4a3   :  { %v1481_v53 = vpop.permute.xlu0 %1480  ;;  %v3482_v14 = vsel %vm1052_vm1, %v3481_v61, %v3477_v5 }
 0x4a4   :  { %v1478_v17 = vpop.permute.xlu1 %1477  ;;  %v3561_v13 = vsel %vm1201_vm8, %v3482_v14, %v3560_v51  ;;  %v1603_v20 = vrot.slane %v1481_v53, %v10633_v38 }
 0x4a5   :  { %v3571_v8 = vsel %vm184_vm0, %v3561_v13, 0.0  ;;  %v1599_v49 = vrot.slane %v1478_v17, %v10638_v62 }
 0x4a6   :  { %3572 = vadd.xlane.f32.xlu1 %v3571_v8 }
 0x4a7   :  { %v1487_v12 = vpop.permute.xlu0 %1486 }
 0x4a8   :  { %v1484_v15 = vpop.permute.xlu1 %1483  ;;  %v1612_v52 = vrot.slane %v1487_v12, %v10633_v38 }
 0x4a9   :  { %v1608_v41 = vrot.slane %v1484_v15, %v10638_v62  ;;  %v1604_v15 = vsel %vm1052_vm1, %v1603_v20, %v1599_v49 }
 0x4ab   :  { %v1493_v57 = vpop.permute.xlu0 %1492  ;;  %v1613_v14 = vsel %vm1052_vm1, %v1612_v52, %v1608_v41 }
 0x4ac   :  { %v1490_v22 = vpop.permute.xlu1 %1489  ;;  %v1621_v27 = vrot.slane %v1493_v57, %v10633_v38 }
 0x4ad   :  { %v1617_v0 = vrot.slane %v1490_v22, %v10638_v62 }
 0x4af   :  { %v1499_v2 = vpop.permute.xlu0 %1498  ;;  %v1622_v12 = vsel %vm1052_vm1, %v1621_v27, %v1617_v0 }
 0x4b0   :  { %v1496_v16 = vpop.permute.xlu1 %1495  ;;  %v1630_v30 = vrot.slane %v1499_v2, %v10633_v38  ;;  %v1675_v2 = vsel %vm1189_vm2, %v1613_v14, %v1604_v15 }
 0x4b1   :  { %v1626_v61 = vrot.slane %v1496_v16, %v10638_v62 }
 0x4b3   :  { %v1505_v4 = vpop.permute.xlu0 %1504  ;;  %v1631_v57 = vsel %vm1052_vm1, %v1630_v30, %v1626_v61 }
 0x4b4   :  { %v1502_v43 = vpop.permute.xlu1 %1501  ;;  %v1639_v46 = vrot.slane %v1505_v4, %v10633_v38  ;;  %v1676_v4 = vsel %vm1191_vm3, %v1622_v12, %v1675_v2 }
 0x4b5   :  { %v1635_v5 = vrot.slane %v1502_v43, %v10638_v62  ;;  %v1677_v52 = vsel %vm1193_vm4, %v1631_v57, %v1676_v4 }
 0x4b7   :  { %v1511_v34 = vpop.permute.xlu0 %1510  ;;  %v1640_v16 = vsel %vm1052_vm1, %v1639_v46, %v1635_v5 }
 0x4b8   :  { %v1508_v33 = vpop.permute.xlu1 %1507  ;;  %v1648_v13 = vrot.slane %v1511_v34, %v10633_v38 }
 0x4b9   :  { %v1644_v51 = vrot.slane %v1508_v33, %v10638_v62  ;;  %v1678_v33 = vsel %vm1195_vm5, %v1640_v16, %v1677_v52 }
 0x4bb   :  { %v1517_v8 = vpop.permute.xlu0 %1516  ;;  %v1649_v43 = vsel %vm1052_vm1, %v1648_v13, %v1644_v51 }
 0x4bc   :  { %v1514_v17 = vpop.permute.xlu1 %1513  ;;  %v1657_v53 = vrot.slane %v1517_v8, %v10633_v38  ;;  %v1679_v20 = vsel %vm1197_vm6, %v1649_v43, %v1678_v33 }
 0x4bd   :  { %v1653_v22 = vrot.slane %v1514_v17, %v10638_v62 }
 0x4bf   :  { %v1523_v41 = vpop.permute.xlu0 %1522  ;;  %v1658_v34 = vsel %vm1052_vm1, %v1657_v53, %v1653_v22 }
 0x4c0   :  { %v1520_v0 = vpop.permute.xlu1 %1519  ;;  %v1666_v27 = vrot.slane %v1523_v41, %v10633_v38  ;;  %v1680_v5 = vsel %vm1199_vm7, %v1658_v34, %v1679_v20 }
 0x4c1   :  { %v1662_v49 = vrot.slane %v1520_v0, %v10638_v62 }
 0x4c3   :  { %v3368_v61 = vpop.permute.xlu0 %3367  ;;  %v1667_v30 = vsel %vm1052_vm1, %v1666_v27, %v1662_v49 }
 0x4c4   :  { %v3365_v46 = vpop.permute.xlu1 %3364  ;;  %v1681_v14 = vsel %vm1201_vm8, %v1667_v30, %v1680_v5  ;;  %v3490_v0 = vrot.slane %v3368_v61, %v10633_v38 }
 0x4c5   :  { %v1687_v51 = vsel %vm184_vm0, %v1681_v14, 0.0  ;;  %v3486_v34 = vrot.slane %v3365_v46, %v10638_v62 }
 0x4c6   :  { %1688 = vadd.xlane.f32.xlu0 %v1687_v51 }
 0x4c7   :  { %v3374_v13 = vpop.permute.xlu0 %3373 }
 0x4c8   :  { %v3371_v8 = vpop.permute.xlu1 %3370  ;;  %v3499_v16 = vrot.slane %v3374_v13, %v10633_v38 }
 0x4c9   :  { %v3495_v2 = vrot.slane %v3371_v8, %v10638_v62  ;;  %v3491_v8 = vsel %vm1052_vm1, %v3490_v0, %v3486_v34 }
 0x4cb   :  { %v3380_v12 = vpop.permute.xlu0 %3379  ;;  %v3500_v30 = vsel %vm1052_vm1, %v3499_v16, %v3495_v2 }
 0x4cc   :  { %v3377_v17 = vpop.permute.xlu1 %3376  ;;  %v3508_v41 = vrot.slane %v3380_v12, %v10633_v38 }
 0x4cd   :  { %v3504_v43 = vrot.slane %v3377_v17, %v10638_v62 }
 0x4cf   :  { %v3386_v53 = vpop.permute.xlu0 %3385  ;;  %v3509_v13 = vsel %vm1052_vm1, %v3508_v41, %v3504_v43 }
 0x4d0   :  { %v3383_v15 = vpop.permute.xlu1 %3382  ;;  %v3517_v33 = vrot.slane %v3386_v53, %v10633_v38  ;;  %v3562_v53 = vsel %vm1189_vm2, %v3500_v30, %v3491_v8 }
 0x4d1   :  { %v3513_v27 = vrot.slane %v3383_v15, %v10638_v62 }
 0x4d3   :  { %v3392_v57 = vpop.permute.xlu0 %3391  ;;  %v3518_v12 = vsel %vm1052_vm1, %v3517_v33, %v3513_v27 }
 0x4d4   :  { %v3389_v22 = vpop.permute.xlu1 %3388  ;;  %v3526_v20 = vrot.slane %v3392_v57, %v10633_v38  ;;  %v3563_v57 = vsel %vm1191_vm3, %v3509_v13, %v3562_v53 }
 0x4d5   :  { %v3522_v49 = vrot.slane %v3389_v22, %v10638_v62  ;;  %v3564_v16 = vsel %vm1193_vm4, %v3518_v12, %v3563_v57 }
 0x4d7   :  { %v3398_v4 = vpop.permute.xlu0 %3397  ;;  %v3527_v15 = vsel %vm1052_vm1, %v3526_v20, %v3522_v49 }
 0x4d8   :  { %v3395_v52 = vpop.permute.xlu1 %3394  ;;  %v3535_v14 = vrot.slane %v3398_v4, %v10633_v38 }
 0x4d9   :  { %v3531_v5 = vrot.slane %v3395_v52, %v10638_v62  ;;  %v3565_v52 = vsel %vm1195_vm5, %v3527_v15, %v3564_v16 }
 0x4db   :  { %v3404_v51 = vpop.permute.xlu0 %3403  ;;  %v3536_v22 = vsel %vm1052_vm1, %v3535_v14, %v3531_v5 }
 0x4dc   :  { %v3401_v46 = vpop.permute.xlu1 %3400  ;;  %v3544_v61 = vrot.slane %v3404_v51, %v10633_v38  ;;  %v3566_v0 = vsel %vm1197_vm6, %v3536_v22, %v3565_v52 }
 0x4dd   :  { %v3540_v17 = vrot.slane %v3401_v46, %v10638_v62 }
 0x4df   :  { %v3410_v2 = vpop.permute.xlu0 %3409  ;;  %v3545_v4 = vsel %vm1052_vm1, %v3544_v61, %v3540_v17 }
 0x4e0   :  { %v3407_v43 = vpop.permute.xlu1 %3406  ;;  %v3553_v41 = vrot.slane %v3410_v2, %v10633_v38  ;;  %v3567_v33 = vsel %vm1199_vm7, %v3545_v4, %v3566_v0 }
 0x4e1   :  { %v3549_v34 = vrot.slane %v3407_v43, %v10638_v62 }
 0x4e3   :  { %v3554_v27 = vsel %vm1052_vm1, %v3553_v41, %v3549_v34 }
 0x4e4   :  { %v3568_v49 = vsel %vm1201_vm8, %v3554_v27, %v3567_v33 }
 0x4e5   :  { %v3574_v20 = vsel %vm184_vm0, %v3568_v49, 0.0 }
 0x4e6   :  { %3575 = vadd.xlane.f32.xlu0 %v3574_v20 }
 0x50c   :  { %v1686_v30 = vpop.xlane.xlu0 %1685 }
 0x50d   :  { %9150 = vrcp.f32 %v1686_v30 }
 0x517   :  { %v9151_v5 = vpop.eup %9150 }
 0x518   :  { %v1697_v14 = vrot.slane %v9151_v5, %v13879_v21  ;;  %v1701_v51 = vrot.slane %v9151_v5, %v13880_v59  ;;  %v1705_v13 = vrot.slane %v9151_v5, %v13883_v6  ;;  %v1709_v15 = vrot.slane %v9151_v5, %v13885_v37 }
 0x519   :  { %v1717_v41 = vrot.slane %v9151_v5, %v13888_v36  ;;  %v1721_v20 = vrot.slane %v9151_v5, %v13890_v28  ;;  %v1725_v30 = vrot.slane %v9151_v5, %v13891_v48 }
 0x51a   :  { %v1774_v46 = vmul.f32 %v10821_v31, %v1697_v14  ;;  %v1775_v61 = vmul.f32 %v10823_v44, %v1697_v14  ;;  %v1776_v8 = vmul.f32 %v10832_v26, %v1701_v51  ;;  %v1777_v12 = vmul.f32 %v10830_v60, %v1701_v51 }
 0x51b   :  { %v1778_v53 = vmul.f32 %v10841_v23, %v1705_v13  ;;  %v1779_v16 = vmul.f32 %v10839_v50, %v1705_v13  ;;  %v1780_v31 = vmul.f32 %v10849_v11, %v1709_v15  ;;  %v1713_v44 = vrot.slane %v9151_v5, %v13887_v1 }
 0x51c   :  { %v1806_v17 = vpack.c.bf16 %v1775_v61, %v1774_v46  ;;  %v1807_v2 = vpack.c.bf16 %v1777_v12, %v1776_v8  ;;  %v1781_v60 = vmul.f32 %v10847_v9, %v1709_v15  ;;  %v1784_v11 = vmul.f32 %v10861_v7, %v1717_v41 }
 0x51d   :  { %v1808_v43 = vpack.c.bf16 %v1779_v16, %v1778_v53  ;;  %v1782_v23 = vmul.f32 %v10855_v42, %v1713_v44  ;;  %v1783_v0 = vmul.f32 %v10853_v39, %v1713_v44  ;;  %v1785_v27 = vmul.f32 %v10859_v29, %v1717_v41 }
 0x51e   :  { %v1845_v57 = vunpack.c.h.b16 %v1806_v17  ;;  %v1844_v22 = vunpack.c.l.b16 %v1806_v17  ;;  %v1847_v4 = vunpack.c.h.b16 %v1807_v2  ;;  %v1846_v26 = vunpack.c.l.b16 %v1807_v2 }
 0x51f   :  { %v1849_v52 = vunpack.c.h.b16 %v1808_v43  ;;  %v1848_v34 = vunpack.c.l.b16 %v1808_v43  ;;  %v1809_v50 = vpack.c.bf16 %v1781_v60, %v1780_v31  ;;  %v1810_v9 = vpack.c.bf16 %v1783_v0, %v1782_v23 }
 0x520   :  { %1880 = vperm.xlu0 %8893, %v1845_v57   ;;  %1877 = vperm.xlu1 %8894, %v1844_v22   ;;  %v1811_v42 = vpack.c.bf16 %v1785_v27, %v1784_v11  ;;  %v1786_v39 = vmul.f32 %v10867_v47, %v1721_v20  ;;  %v1787_v13 = vmul.f32 %v10865_v35, %v1721_v20 }
 0x521   :  { %v1851_v33 = vunpack.c.h.b16 %v1809_v50  ;;  %v1850_v49 = vunpack.c.l.b16 %v1809_v50  ;;  %v1853_v14 = vunpack.c.h.b16 %v1810_v9  ;;  %v1852_v51 = vunpack.c.l.b16 %v1810_v9 }
 0x522   :  { %v1788_v29 = vmul.f32 %v10873_v18, %v1725_v30  ;;  %v1855_v7 = vunpack.c.h.b16 %v1811_v42  ;;  %v1854_v46 = vunpack.c.l.b16 %v1811_v42  ;;  %v1812_v61 = vpack.c.bf16 %v1787_v13, %v1786_v39 }
 0x523   :  { %v1789_v8 = vmul.f32 %v10871_v25, %v1725_v30  ;;  %v13965_v30 = vld [vmem:[#allocation55_spill] sm:$0xff] }
 0x524   :  { %1886 = vperm.xlu0 %8893, %v1847_v4   ;;  %1883 = vperm.xlu1 %8894, %v1846_v26   ;;  %v1857_v5 = vunpack.c.h.b16 %v1812_v61  ;;  %v1856_v17 = vunpack.c.l.b16 %v1812_v61 }
 0x525   :  { %v1813_v53 = vpack.c.bf16 %v1789_v8, %v1788_v29 }
 0x527   :  { %v1859_v47 = vunpack.c.h.b16 %v1813_v53  ;;  %v1858_v35 = vunpack.c.l.b16 %v1813_v53 }
 0x528   :  { %1892 = vperm.xlu0 %8893, %v1849_v52   ;;  %1889 = vperm.xlu1 %8894, %v1848_v34  }
 0x52c   :  { %1898 = vperm.xlu0 %8893, %v1851_v33   ;;  %1895 = vperm.xlu1 %8894, %v1850_v49  }
 0x530   :  { %1904 = vperm.xlu0 %8893, %v1853_v14   ;;  %1901 = vperm.xlu1 %8894, %v1852_v51   ;;  %v13966_v14 = vld [vmem:[#allocation61_spill] sm:$0xff] }
 0x533   :  { %v3573_v12 = vpop.xlane.xlu1 %3572 }
 0x534   :  { %9152 = vrcp.f32 %v3573_v12  ;;  %1910 = vperm.xlu0 %8893, %v1855_v7   ;;  %1907 = vperm.xlu1 %8894, %v1854_v46   ;;  %v13967_v7 = vld [vmem:[#allocation64_spill] sm:$0xff]  ;;  %v13968_v46 = vld [vmem:[#allocation63_spill] sm:$0xff] }
 0x538   :  { %1916 = vperm.xlu0 %8893, %v1857_v5   ;;  %1913 = vperm.xlu1 %8894, %v1856_v17  }
 0x53c   :  { %1922 = vperm.xlu0 %8893, %v1859_v47   ;;  %1919 = vperm.xlu1 %8894, %v1858_v35  }
 0x53e   :  { %v9153_v15 = vpop.eup %9152 }
 0x53f   :  { %v3584_v18 = vrot.slane %v9153_v15, %v13879_v21  ;;  %v3592_v57 = vrot.slane %v9153_v15, %v13883_v6  ;;  %v3588_v25 = vrot.slane %v9153_v15, %v13880_v59  ;;  %v3596_v22 = vrot.slane %v9153_v15, %v13885_v37 }
 0x540   :  { %v3600_v41 = vrot.slane %v9153_v15, %v13887_v1  ;;  %v3612_v9 = vrot.slane %v9153_v15, %v13891_v48 }
 0x541   :  { %v3661_v2 = vmul.f32 %v10893_v63, %v3584_v18  ;;  %v3662_v16 = vmul.f32 %v10895_v24, %v3584_v18  ;;  %v3665_v31 = vmul.f32 %v10915_v19, %v3592_v57  ;;  %v3666_v44 = vmul.f32 %v10913_v55, %v3592_v57 }
 0x542   :  { %v3663_v4 = vmul.f32 %v10904_v40, %v3588_v25  ;;  %v3664_v26 = vmul.f32 %v10902_v54, %v3588_v25  ;;  %v3667_v60 = vmul.f32 %v10925_v45, %v3596_v22  ;;  %v3668_v23 = vmul.f32 %v10923_v56, %v3596_v22  ;;  %v13969_v25 = vld [vmem:[#allocation23_spill] sm:$0xff] }
 0x543   :  { %v3693_v43 = vpack.c.bf16 %v3662_v16, %v3661_v2  ;;  %v3695_v63 = vpack.c.bf16 %v3666_v44, %v3665_v31  ;;  %v3669_v24 = vmul.f32 %v10935_v32, %v3600_v41  ;;  %v3604_v55 = vrot.slane %v9153_v15, %v13888_v36  ;;  %v13970_v2 = vld [vmem:[#allocation22_spill] sm:$0xff]  ;;  %v13971_v31 = vld [vmem:[#allocation40_spill] sm:$0xff] }
 0x544   :  { %v3694_v50 = vpack.c.bf16 %v3664_v26, %v3663_v4  ;;  %v3696_v54 = vpack.c.bf16 %v3668_v23, %v3667_v60  ;;  %v3670_v0 = vmul.f32 %v10933_v10, %v3600_v41  ;;  %v3608_v45 = vrot.slane %v9153_v15, %v13890_v28  ;;  %v13972_v4 = vld [vmem:[#allocation42_spill] sm:$0xff] }
 0x545   :  { %v3732_v52 = vunpack.c.h.b16 %v3693_v43  ;;  %v3731_v34 = vunpack.c.l.b16 %v3693_v43  ;;  %v3736_v40 = vunpack.c.h.b16 %v3695_v63  ;;  %v3671_v56 = vmul.f32 %v10945_v3, %v3604_v55 }
 0x546   :  { %v3733_v19 = vunpack.c.l.b16 %v3694_v50  ;;  %v3738_v11 = vunpack.c.h.b16 %v3696_v54  ;;  %v3734_v27 = vunpack.c.h.b16 %v3694_v50  ;;  %v3697_v33 = vpack.c.bf16 %v3670_v0, %v3669_v24  ;;  %v13974_v50 = vld [vmem:[#allocation43_spill] sm:$0xff] }
 0x547   :  { %3767 = vperm.xlu0 %8893, %v3732_v52   ;;  %3764 = vperm.xlu1 %8894, %v3731_v34   ;;  %v3672_v49 = vmul.f32 %v10943_v58, %v3604_v55  ;;  %v3735_v32 = vunpack.c.l.b16 %v3695_v63  ;;  %v3673_v10 = vmul.f32 %v13965_v30, %v3608_v45  ;;  %v3674_v51 = vmul.f32 %v13966_v14, %v3608_v45  ;;  %v13973_v34 = vld [vmem:[#allocation45_spill] sm:$0xff]  ;;  %v13976_v45 = vld [vmem:[#allocation48_spill] sm:$0xff] }
 0x548   :  { %v3740_v20 = vunpack.c.h.b16 %v3697_v33  ;;  %v3737_v39 = vunpack.c.l.b16 %v3696_v54  ;;  %v3675_v58 = vmul.f32 %v13967_v7, %v3612_v9  ;;  %v3676_v61 = vmul.f32 %v13968_v46, %v3612_v9  ;;  %v13975_v55 = vld [vmem:[#allocation41_spill] sm:$0xff] }
 0x549   :  { %v3698_v42 = vpack.c.bf16 %v3672_v49, %v3671_v56  ;;  %v3699_v29 = vpack.c.bf16 %v3674_v51, %v3673_v10  ;;  %v3739_v12 = vunpack.c.l.b16 %v3697_v33  ;;  %v13979_v10 = vld [vmem:[#allocation58_spill] sm:$0xff] }
 0x54a   :  { %v3700_v5 = vpack.c.bf16 %v3676_v61, %v3675_v58 }
 0x54b   :  { %3779 = vperm.xlu0 %8893, %v3736_v40   ;;  %3770 = vperm.xlu1 %8894, %v3733_v19   ;;  %v3742_v13 = vunpack.c.h.b16 %v3698_v42  ;;  %v3744_v8 = vunpack.c.h.b16 %v3699_v29  ;;  %v3741_v53 = vunpack.c.l.b16 %v3698_v42  ;;  %v3743_v18 = vunpack.c.l.b16 %v3699_v29  ;;  %v13978_v42 = vld [vmem:[#allocation60_spill] sm:$0xff]  ;;  %v13980_v29 = vld [vmem:[#allocation62_spill] sm:$0xff] }
 0x54c   :  { %v3746_v17 = vunpack.c.h.b16 %v3700_v5  ;;  %v3745_v60 = vunpack.c.l.b16 %v3700_v5 }
 0x54f   :  { %3785 = vperm.xlu0 %8893, %v3738_v11   ;;  %3773 = vperm.xlu1 %8894, %v3734_v27   ;;  %v13977_v27 = vld [vmem:[#allocation38_spill] sm:$0xff] }
 0x553   :  { %3791 = vperm.xlu0 %8893, %v3740_v20   ;;  %3776 = vperm.xlu1 %8894, %v3735_v32   ;;  %v1689_v3 = vpop.xlane.xlu0 %1688 }
 0x554   :  { %9154 = vrcp.f32 %v1689_v3 }
 0x557   :  { %3797 = vperm.xlu0 %8893, %v3742_v13   ;;  %3782 = vperm.xlu1 %8894, %v3737_v39  }
 0x55b   :  { %3803 = vperm.xlu0 %8893, %v3744_v8   ;;  %3788 = vperm.xlu1 %8894, %v3739_v12   ;;  %v13981_v12 = vld [vmem:[#allocation51_spill] sm:$0xff] }
 0x55e   :  { %v11295_v47 = vpop.eup %9154 }
 0x55f   :  { %3809 = vperm.xlu0 %8893, %v3746_v17   ;;  %3794 = vperm.xlu1 %8894, %v3741_v53   ;;  %v1729_v35 = vrot.slane %v11295_v47, %v13879_v21  ;;  %v1733_v15 = vrot.slane %v11295_v47, %v13880_v59  ;;  %v1737_v57 = vrot.slane %v11295_v47, %v13883_v6  ;;  %v13982_v17 = vld [vmem:[#allocation67_spill] sm:$0xff] }
 0x560   :  { %v1741_v23 = vrot.slane %v11295_v47, %v13885_v37  ;;  %v1745_v19 = vrot.slane %v11295_v47, %v13887_v1  ;;  %v1749_v49 = vrot.slane %v11295_v47, %v13888_v36  ;;  %v1753_v51 = vrot.slane %v11295_v47, %v13890_v28 }
 0x561   :  { %v1790_v22 = vmul.f32 %v13969_v25, %v1729_v35  ;;  %v1791_v16 = vmul.f32 %v13970_v2, %v1729_v35  ;;  %v1792_v44 = vmul.f32 %v13971_v31, %v1733_v15  ;;  %v1793_v26 = vmul.f32 %v13972_v4, %v1733_v15  ;;  %v13983_v4 = vld [vmem:[#allocation69_spill] sm:$0xff] }
 0x562   :  { %v1794_v63 = vmul.f32 %v13973_v34, %v1737_v57  ;;  %v1795_v24 = vmul.f32 %v13974_v50, %v1737_v57  ;;  %v1796_v40 = vmul.f32 %v13975_v55, %v1741_v23  ;;  %v1797_v11 = vmul.f32 %v13976_v45, %v1741_v23  ;;  %v13985_v23 = vld [vmem:[#allocation34_spill] sm:$0xff]  ;;  %v13987_v50 = vld [vmem:[#allocation71_spill] sm:$0xff]  ;;  %v13989_v45 = vld [vmem:[#allocation73_spill] sm:$0xff] }
 0x563   :  { %3800 = vperm.xlu1 %8894, %v3743_v18   ;;  %v1814_v43 = vpack.c.bf16 %v1791_v16, %v1790_v22  ;;  %v1815_v52 = vpack.c.bf16 %v1793_v26, %v1792_v44  ;;  %v1798_v33 = vmul.f32 %v13977_v27, %v1745_v19  ;;  %v1799_v30 = vmul.f32 %v13978_v42, %v1745_v19  ;;  %v13991_v42 = vld [vmem:[#allocation75_spill] sm:$0xff] }
 0x564   :  { %v1816_v56 = vpack.c.bf16 %v1795_v24, %v1794_v63  ;;  %v1817_v20 = vpack.c.bf16 %v1797_v11, %v1796_v40  ;;  %v1800_v14 = vmul.f32 %v13979_v10, %v1749_v49  ;;  %v1801_v7 = vmul.f32 %v13980_v29, %v1749_v49  ;;  %v13993_v29 = vld [vmem:[#allocation77_spill] sm:$0xff] }
 0x565   :  { %v1861_v41 = vunpack.c.h.b16 %v1814_v43  ;;  %v1863_v54 = vunpack.c.h.b16 %v1815_v52  ;;  %v1860_v0 = vunpack.c.l.b16 %v1814_v43  ;;  %v1862_v9 = vunpack.c.l.b16 %v1815_v52  ;;  %v13984_v43 = vld [vmem:[#allocation74_spill] sm:$0xff]  ;;  %v13986_v52 = vld [vmem:[#allocation33_spill] sm:$0xff] }
 0x566   :  { %v1865_v32 = vunpack.c.h.b16 %v1816_v56  ;;  %v1867_v3 = vunpack.c.h.b16 %v1817_v20  ;;  %v1864_v39 = vunpack.c.l.b16 %v1816_v56  ;;  %v1818_v13 = vpack.c.bf16 %v1799_v30, %v1798_v33 }
 0x567   :  { %3806 = vperm.xlu1 %8894, %v3745_v60   ;;  %1928 = vperm.xlu0 %8893, %v1861_v41   ;;  %v1866_v46 = vunpack.c.l.b16 %v1817_v20  ;;  %v1819_v8 = vpack.c.bf16 %v1801_v7, %v1800_v14  ;;  %v1802_v5 = vmul.f32 %v13981_v12, %v1753_v51  ;;  %v1803_v53 = vmul.f32 %v13982_v17, %v1753_v51 }
 0x568   :  { %v1869_v61 = vunpack.c.h.b16 %v1818_v13  ;;  %v1868_v15 = vunpack.c.l.b16 %v1818_v13 }
 0x569   :  { %v1871_v35 = vunpack.c.h.b16 %v1819_v8  ;;  %v1820_v18 = vpack.c.bf16 %v1803_v53, %v1802_v5  ;;  %v1870_v25 = vunpack.c.l.b16 %v1819_v8  ;;  %v13995_v53 = vld [vmem:[#allocation66_spill] sm:$0xff] }
 0x56b   :  { %1934 = vperm.xlu0 %8893, %v1863_v54   ;;  %1925 = vperm.xlu1 %8894, %v1860_v0   ;;  %v1873_v57 = vunpack.c.h.b16 %v1820_v18  ;;  %v1872_v31 = vunpack.c.l.b16 %v1820_v18  ;;  %v13988_v0 = vld [vmem:[#allocation76_spill] sm:$0xff] }
 0x56f   :  { %1940 = vperm.xlu0 %8893, %v1865_v32   ;;  %1931 = vperm.xlu1 %8894, %v1862_v9   ;;  %v13990_v9 = vld [vmem:[#allocation79_spill] sm:$0xff] }
 0x573   :  { %1946 = vperm.xlu0 %8893, %v1867_v3   ;;  %1937 = vperm.xlu1 %8894, %v1864_v39   ;;  %v3576_v58 = vpop.xlane.xlu0 %3575  ;;  %v13992_v39 = vld [vmem:[#allocation56_spill] sm:$0xff] }
 0x574   :  { %9156 = vrcp.f32 %v3576_v58  ;;  %v13994_v58 = vld [vmem:[#allocation57_spill] sm:$0xff] }
 0x577   :  { %1952 = vperm.xlu0 %8893, %v1869_v61   ;;  %1943 = vperm.xlu1 %8894, %v1866_v46  }
 0x57b   :  { %1958 = vperm.xlu0 %8893, %v1871_v35   ;;  %1949 = vperm.xlu1 %8894, %v1868_v15  }
 0x57e   :  { %v9157_v22 = vpop.eup %9156 }
 0x57f   :  { %1964 = vperm.xlu0 %8893, %v1873_v57   ;;  %1955 = vperm.xlu1 %8894, %v1870_v25   ;;  %v3616_v2 = vrot.slane %v9157_v22, %v13879_v21  ;;  %v3620_v16 = vrot.slane %v9157_v22, %v13880_v59  ;;  %v3624_v44 = vrot.slane %v9157_v22, %v13883_v6  ;;  %v13996_v57 = vld [vmem:[#allocation70_spill] sm:$0xff] }
 0x580   :  { %v3628_v55 = vrot.slane %v9157_v22, %v13885_v37  ;;  %v3632_v27 = vrot.slane %v9157_v22, %v13887_v1  ;;  %v3636_v10 = vrot.slane %v9157_v22, %v13888_v36  ;;  %v3640_v61 = vrot.slane %v9157_v22, %v13890_v28 }
 0x581   :  { %v3677_v26 = vmul.f32 %v13983_v4, %v3616_v2  ;;  %v3678_v60 = vmul.f32 %v13984_v43, %v3616_v2  ;;  %v3679_v41 = vmul.f32 %v13985_v23, %v3620_v16  ;;  %v3680_v34 = vmul.f32 %v13986_v52, %v3620_v16 }
 0x582   :  { %v3681_v24 = vmul.f32 %v13987_v50, %v3624_v44  ;;  %v3682_v56 = vmul.f32 %v13988_v0, %v3624_v44  ;;  %v3683_v11 = vmul.f32 %v13989_v45, %v3628_v55  ;;  %v3684_v20 = vmul.f32 %v13990_v9, %v3628_v55 }
 0x583   :  { %1961 = vperm.xlu1 %8894, %v1872_v31   ;;  %v3701_v63 = vpack.c.bf16 %v3678_v60, %v3677_v26  ;;  %v3702_v54 = vpack.c.bf16 %v3680_v34, %v3679_v41  ;;  %v3685_v30 = vmul.f32 %v13991_v42, %v3632_v27  ;;  %v3686_v13 = vmul.f32 %v13992_v39, %v3632_v27  ;;  %v13997_v26 = vld [vmem:[#allocation72_spill] sm:$0xff]  ;;  %v8907_v42 = vld [vmem:[#allocation11 + $0xc] ss:$16 sps:$4 sm:$0xff]  }
 0x584   :  { %v3703_v32 = vpack.c.bf16 %v3682_v56, %v3681_v24  ;;  %v3704_v3 = vpack.c.bf16 %v3684_v20, %v3683_v11  ;;  %v3687_v7 = vmul.f32 %v13993_v29, %v3636_v10  ;;  %v3688_v46 = vmul.f32 %v13994_v58, %v3636_v10  ;;  %v13998_v60 = vld [vmem:[#allocation36_spill] sm:$0xff]  ;;  %4517 = vmatprep.subr.bf16.mxu1 %v8907_v42 }
 0x585   :  { %v3748_v40 = vunpack.c.h.b16 %v3701_v63  ;;  %v3747_v19 = vunpack.c.l.b16 %v3701_v63  ;;  %v3750_v33 = vunpack.c.h.b16 %v3702_v54  ;;  %v3749_v49 = vunpack.c.l.b16 %v3702_v54  ;;  %v13999_v41 = vld [vmem:[#allocation68_spill] sm:$0xff] }
 0x586   :  { %v3752_v14 = vunpack.c.h.b16 %v3703_v32  ;;  %v3751_v51 = vunpack.c.l.b16 %v3703_v32  ;;  %v3754_v8 = vunpack.c.h.b16 %v3704_v3  ;;  %v3753_v12 = vunpack.c.l.b16 %v3704_v3  ;;  %v8904_v20 = vld [vmem:[#allocation11 + $0x4] ss:$16 sps:$4 sm:$0xff]  }
 0x587   :  { %3815 = vperm.xlu0 %8893, %v3748_v40   ;;  %3812 = vperm.xlu1 %8894, %v3747_v19   ;;  %v3705_v5 = vpack.c.bf16 %v3686_v13, %v3685_v30  ;;  %v3706_v17 = vpack.c.bf16 %v3688_v46, %v3687_v7  ;;  %v3689_v35 = vmul.f32 %v13995_v53, %v3640_v61  ;;  %v14001_v9 = vmov 0.0  }
 0x588   :  { %v3690_v25 = vmul.f32 %v13996_v57, %v3640_v61  ;;  %v3644_v2 = vrot.slane %v9157_v22, %v13891_v48  ;;  %v1757_v31 = vrot.slane %v11295_v47, %v13891_v48  ;;  %v14000_v22 = vld [vmem:[#allocation32_spill] sm:$0xff]  ;;  %8840 = vmatprep.mubr.msk.bf16.mxu1 %vm9479_vm9, %v14001_v9  ;;  %8834 = vmatprep.mubr.msk.bf16.mxu0 %vm9479_vm9, %v14001_v9 }
 0x589   :  { %v3756_v15 = vunpack.c.h.b16 %v3705_v5  ;;  %v3755_v18 = vunpack.c.l.b16 %v3705_v5  ;;  %v3758_v16 = vunpack.c.h.b16 %v3706_v17  ;;  %v3757_v44 = vunpack.c.l.b16 %v3706_v17  ;;  %4474 = vmatprep.subr.bf16.mxu0 %v8904_v20 }
 0x58a   :  { %v3707_v4 = vpack.c.bf16 %v3690_v25, %v3689_v35  ;;  %v3691_v43 = vmul.f32 %v13997_v26, %v3644_v2  ;;  %v3692_v23 = vmul.f32 %v13998_v60, %v3644_v2  ;;  %v1804_v52 = vmul.f32 %v13999_v41, %v1757_v31 }
 0x58b   :  { %3821 = vperm.xlu0 %8893, %v3750_v33   ;;  %3818 = vperm.xlu1 %8894, %v3749_v49   ;;  %v1805_v24 = vmul.f32 %v14000_v22, %v1757_v31 }
 0x58c   :  { %v3760_v34 = vunpack.c.h.b16 %v3707_v4  ;;  %v3759_v63 = vunpack.c.l.b16 %v3707_v4  ;;  %v3708_v50 = vpack.c.bf16 %v3692_v23, %v3691_v43 }
 0x58d   :  { %v1821_v54 = vpack.c.bf16 %v1805_v24, %v1804_v52 }
 0x58e   :  { %v3762_v40 = vunpack.c.h.b16 %v3708_v50  ;;  %v3761_v19 = vunpack.c.l.b16 %v3708_v50 }
 0x58f   :  { %3827 = vperm.xlu0 %8893, %v3752_v14   ;;  %3824 = vperm.xlu1 %8894, %v3751_v51   ;;  %v1875_v45 = vunpack.c.h.b16 %v1821_v54  ;;  %v1874_v11 = vunpack.c.l.b16 %v1821_v54 }
 0x593   :  { %3833 = vperm.xlu0 %8893, %v3754_v8   ;;  %3830 = vperm.xlu1 %8894, %v3753_v12  }
 0x597   :  { %3839 = vperm.xlu0 %8893, %v3756_v15   ;;  %3836 = vperm.xlu1 %8894, %v3755_v18  }
 0x59b   :  { %3845 = vperm.xlu0 %8893, %v3758_v16   ;;  %3842 = vperm.xlu1 %8894, %v3757_v44  }
 0x59f   :  { %3851 = vperm.xlu0 %8893, %v3760_v34   ;;  %3848 = vperm.xlu1 %8894, %v3759_v63   ;;  %v11353_v55 = vpop.permute.xlu1 %1877  ;;  %v11355_v47 = vpop.permute.xlu0 %1880 }
 0x5a0   :  { %v1979_v20 = vrot.slane %v11355_v47, %v10633_v38 }
 0x5a3   :  { %3857 = vperm.xlu0 %8893, %v3762_v40   ;;  %3854 = vperm.xlu1 %8894, %v3761_v19   ;;  %v11357_v0 = vpop.permute.xlu1 %1883  ;;  %v11359_v56 = vpop.permute.xlu0 %1886 }
 0x5a4   :  { %v1984_v40 = vrot.slane %v11357_v0, %v10638_v62  ;;  %v1988_v19 = vrot.slane %v11359_v56, %v10633_v38 }
 0x5a6   :  { %v1989_v0 = vsel %vm1052_vm1, %v1988_v19, %v1984_v40 }
 0x5a7   :  { %1970 = vperm.xlu0 %8893, %v1875_v45   ;;  %1967 = vperm.xlu1 %8894, %v1874_v11   ;;  %v11361_v27 = vpop.permute.xlu1 %1889  ;;  %v11363_v33 = vpop.permute.xlu0 %1892  ;;  %v1975_v11 = vrot.slane %v11353_v55, %v10638_v62 }
 0x5a8   :  { %v1993_v42 = vrot.slane %v11361_v27, %v10638_v62  ;;  %v1997_v48 = vrot.slane %v11363_v33, %v10633_v38 }
 0x5a9   :  { %v1980_v33 = vsel %vm1052_vm1, %v1979_v20, %v1975_v11 }
 0x5aa   :  { %v2116_v19 = vsel %vm1189_vm2, %v1989_v0, %v1980_v33  ;;  %v1998_v1 = vsel %vm1052_vm1, %v1997_v48, %v1993_v42 }
 0x5ab   :  { %v11365_v49 = vpop.permute.xlu1 %1895  ;;  %v11367_v32 = vpop.permute.xlu0 %1898 }
 0x5ac   :  { %v2002_v36 = vrot.slane %v11365_v49, %v10638_v62  ;;  %v2006_v55 = vrot.slane %v11367_v32, %v10633_v38 }
 0x5ae   :  { %v2007_v20 = vsel %vm1052_vm1, %v2006_v55, %v2002_v36 }
 0x5af   :  { %v11373_v30 = vpop.permute.xlu1 %1901  ;;  %v11375_v10 = vpop.permute.xlu0 %1904 }
 0x5b0   :  { %v2011_v47 = vrot.slane %v11373_v30, %v10638_v62  ;;  %v2015_v27 = vrot.slane %v11375_v10, %v10633_v38 }
 0x5b2   :  { %v2016_v48 = vsel %vm1052_vm1, %v2015_v27, %v2011_v47 }
 0x5b3   :  { %v11377_v14 = vpop.permute.xlu1 %1907  ;;  %v11379_v51 = vpop.permute.xlu0 %1910 }
 0x5b4   :  { %v2024_v36 = vrot.slane %v11379_v51, %v10633_v38 }
 0x5b7   :  { %v11381_v3 = vpop.permute.xlu1 %1913  ;;  %v11383_v39 = vpop.permute.xlu0 %1916 }
 0x5bb   :  { %v11385_v13 = vpop.permute.xlu1 %1919  ;;  %v11387_v29 = vpop.permute.xlu0 %1922 }
 0x5bc   :  { %v2042_v33 = vrot.slane %v11387_v29, %v10633_v38 }
 0x5c6   :  { %v11389_v7 = vpop.permute.xlu1 %3764  ;;  %v11391_v58 = vpop.permute.xlu0 %3767 }
 0x5c7   :  { %v3862_v49 = vrot.slane %v11389_v7, %v10638_v62  ;;  %v3866_v32 = vrot.slane %v11391_v58, %v10633_v38  ;;  %v2020_v58 = vrot.slane %v11377_v14, %v10638_v62  ;;  %v2029_v14 = vrot.slane %v11381_v3, %v10638_v62 }
 0x5c8   :  { %v2038_v3 = vrot.slane %v11385_v13, %v10638_v62 }
 0x5c9   :  { %v3867_v55 = vsel %vm1052_vm1, %v3866_v32, %v3862_v49  ;;  %v2117_v49 = vsel %vm1191_vm3, %v1998_v1, %v2116_v19 }
 0x5ca   :  { %v3771_v46 = vpop.permute.xlu1 %3770  ;;  %v11393_v61 = vpop.permute.xlu0 %3779 }
 0x5cb   :  { %v3871_v30 = vrot.slane %v3771_v46, %v10638_v62 }
 0x5ce   :  { %v3774_v8 = vpop.permute.xlu1 %3773  ;;  %v11395_v12 = vpop.permute.xlu0 %3785 }
 0x5cf   :  { %v3875_v40 = vrot.slane %v3774_v8, %v10633_v38 }
 0x5d1   :  { %v3876_v46 = vsel %vm1052_vm1, %v3875_v40, %v3871_v30 }
 0x5d2   :  { %v3777_v5 = vpop.permute.xlu1 %3776  ;;  %v11397_v17 = vpop.permute.xlu0 %3791 }
 0x5d3   :  { %v3880_v37 = vrot.slane %v3777_v5, %v10638_v62  ;;  %v3884_v5 = vrot.slane %v11393_v61, %v10633_v38  ;;  %v3902_v61 = vrot.slane %v11397_v17, %v10633_v38  ;;  %v4003_v17 = vsel %vm1189_vm2, %v3876_v46, %v3867_v55 }
 0x5d5   :  { %v3885_v0 = vsel %vm1052_vm1, %v3884_v5, %v3880_v37  ;;  %v2033_v37 = vrot.slane %v11383_v39, %v10633_v38 }
 0x5d6   :  { %v11399_v53 = vpop.permute.xlu1 %3782  ;;  %v11401_v35 = vpop.permute.xlu0 %3797 }
 0x5d7   :  { %v3889_v10 = vrot.slane %v11399_v53, %v10638_v62  ;;  %v3893_v53 = vrot.slane %v11395_v12, %v10633_v38  ;;  %v11543_v46 = vsel %vm1052_vm1, %v2033_v37, %v2029_v14 }
 0x5d9   :  { %v3894_v12 = vsel %vm1052_vm1, %v3893_v53, %v3889_v10 }
 0x5da   :  { %v11403_v15 = vpop.permute.xlu1 %3788  ;;  %v11405_v18 = vpop.permute.xlu0 %3803 }
 0x5db   :  { %v3898_v7 = vrot.slane %v11403_v15, %v10638_v62 }
 0x5dd   :  { %v3903_v27 = vsel %vm1052_vm1, %v3902_v61, %v3898_v7  ;;  %v11537_v7 = vsel %vm1052_vm1, %v2024_v36, %v2020_v58 }
 0x5de   :  { %v11407_v57 = vpop.permute.xlu1 %3794  ;;  %v11409_v25 = vpop.permute.xlu0 %3809 }
 0x5df   :  { %v3907_v42 = vrot.slane %v11407_v57, %v10638_v62  ;;  %v3911_v57 = vrot.slane %v11401_v35, %v10633_v38  ;;  %v4004_v35 = vsel %vm1191_vm3, %v3885_v0, %v4003_v17  ;;  %v3929_v19 = vrot.slane %v11409_v25, %v10633_v38 }
 0x5e0   :  { %v4005_v39 = vsel %vm1193_vm4, %v3894_v12, %v4004_v35 }
 0x5e1   :  { %v3912_v40 = vsel %vm1052_vm1, %v3911_v57, %v3907_v42  ;;  %v4006_v13 = vsel %vm1195_vm5, %v3903_v27, %v4005_v39 }
 0x5e2   :  { %v11411_v2 = vpop.permute.xlu1 %3800  ;;  %v4007_v1 = vsel %vm1197_vm6, %v3912_v40, %v4006_v13 }
 0x5e3   :  { %v3916_v15 = vrot.slane %v11411_v2, %v10638_v62  ;;  %v3920_v2 = vrot.slane %v11405_v18, %v10633_v38  ;;  %v2118_v18 = vsel %vm1193_vm4, %v2007_v20, %v2117_v49 }
 0x5e4   :  { %v11534_v29 = vsel %vm1195_vm5, %v2016_v48, %v2118_v18 }
 0x5e5   :  { %v3921_v32 = vsel %vm1052_vm1, %v3920_v2, %v3916_v15 }
 0x5e6   :  { %v11413_v16 = vpop.permute.xlu1 %3806  ;;  %v11415_v31 = vpop.permute.xlu0 %1928  ;;  %v4008_v20 = vsel %vm1199_vm7, %v3921_v32, %v4007_v1 }
 0x5e7   :  { %v3925_v30 = vrot.slane %v11413_v16, %v10638_v62  ;;  %v11546_v16 = vsel %vm1052_vm1, %v2042_v33, %v2038_v3  ;;  %v2051_v58 = vrot.slane %v11415_v31, %v10633_v38 }
 0x5e9   :  { %v3930_v53 = vsel %vm1052_vm1, %v3929_v19, %v3925_v30 }
 0x5ea   :  { %v11417_v44 = vpop.permute.xlu1 %1925  ;;  %v11419_v4 = vpop.permute.xlu0 %1934 }
 0x5eb   :  { %v2047_v48 = vrot.slane %v11417_v44, %v10638_v62  ;;  %v2060_v36 = vrot.slane %v11419_v4, %v10633_v38 }
 0x5ee   :  { %v11421_v26 = vpop.permute.xlu1 %1931  ;;  %v11423_v43 = vpop.permute.xlu0 %1940 }
 0x5ef   :  { %v2056_v0 = vrot.slane %v11421_v26, %v10638_v62  ;;  %v2052_v26 = vsel %vm1052_vm1, %v2051_v58, %v2047_v48  ;;  %v2069_v12 = vrot.slane %v11423_v43, %v10633_v38 }
 0x5f2   :  { %v11425_v60 = vpop.permute.xlu1 %1937  ;;  %v11427_v23 = vpop.permute.xlu0 %1946 }
 0x5f6   :  { %v11429_v41 = vpop.permute.xlu1 %1943  ;;  %v11431_v52 = vpop.permute.xlu0 %1952 }
 0x5f7   :  { %v2087_v49 = vrot.slane %v11431_v52, %v10633_v38 }
 0x5fa   :  { %v11433_v34 = vpop.permute.xlu1 %1949  ;;  %v11435_v63 = vpop.permute.xlu0 %1958 }
 0x5fb   :  { %v2096_v52 = vrot.slane %v11435_v63, %v10633_v38 }
 0x5fe   :  { %v11437_v50 = vpop.permute.xlu1 %1955  ;;  %v11439_v22 = vpop.permute.xlu0 %1964 }
 0x5ff   :  { %v2092_v39 = vrot.slane %v11437_v50, %v10638_v62 }
 0x602   :  { %v11441_v24 = vpop.permute.xlu1 %1961 }
 0x603   :  { %v2101_v13 = vrot.slane %v11441_v24, %v10638_v62  ;;  %v2105_v24 = vrot.slane %v11439_v22, %v10633_v38 }
 0x606   :  { %v11447_v54 = vpop.permute.xlu1 %3812  ;;  %v11449_v45 = vpop.permute.xlu0 %3815 }
 0x60a   :  { %v11460_v28 = vpop.permute.xlu1 %3818  ;;  %v11462_v56 = vpop.permute.xlu0 %3821 }
 0x60b   :  { %v3943_v42 = vrot.slane %v11460_v28, %v10638_v62  ;;  %v3947_v25 = vrot.slane %v11462_v56, %v10633_v38  ;;  %v3934_v28 = vrot.slane %v11447_v54, %v10638_v62  ;;  %v3938_v56 = vrot.slane %v11449_v45, %v10633_v38 }
 0x60d   :  { %v3948_v54 = vsel %vm1052_vm1, %v3947_v25, %v3943_v42  ;;  %v3939_v43 = vsel %vm1052_vm1, %v3938_v56, %v3934_v28 }
 0x60e   :  { %v11484_v11 = vpop.permute.xlu1 %3824  ;;  %v11486_v8 = vpop.permute.xlu0 %3827  ;;  %v4010_v40 = vsel %vm1189_vm2, %v3948_v54, %v3939_v43  ;;  %v8925_v43 = vld [vmem:[#allocation11 + $0x6c] ss:$16 sps:$4 sm:$0xff]  }
 0x60f   :  { %v3952_v44 = vrot.slane %v11484_v11, %v10638_v62  ;;  %v3956_v61 = vrot.slane %v11486_v8, %v10633_v38  ;;  %v2065_v11 = vrot.slane %v11425_v60, %v10638_v62  ;;  %v2074_v60 = vrot.slane %v11429_v41, %v10638_v62 }
 0x611   :  { %v3957_v37 = vsel %vm1052_vm1, %v3956_v61, %v3952_v44  ;;  %v2070_v35 = vsel %vm1052_vm1, %v2069_v12, %v2065_v11  ;;  %v4009_v61 = vsel %vm1201_vm8, %v3930_v53, %v4008_v20  ;;  %v2120_v20 = vsel %vm1197_vm6, %v11537_v7, %v11534_v29  ;;  %v8910_v7 = vld [vmem:[#allocation11 + $0x24] ss:$16 sps:$4 sm:$0xff]  }
 0x612   :  { %v3831_v47 = vpop.permute.xlu1 %3830  ;;  %v3834_v51 = vpop.permute.xlu0 %3833  ;;  %v4011_v32 = vsel %vm1191_vm3, %v3957_v37, %v4010_v40  ;;  %v2121_v12 = vsel %vm1199_vm7, %v11543_v46, %v2120_v20  ;;  %v8919_v37 = vld [vmem:[#allocation11 + $0x4c] ss:$16 sps:$4 sm:$0xff]   ;;  %v8908_v46 = vld [vmem:[#allocation11 + $0x20] ss:$16 sps:$4 sm:$0xff]   ;;  %v8928_v40 = vld [vmem:[#allocation11 + $0x84] ss:$16 sps:$4 sm:$0xff]  }
 0x613   :  { %v3961_v14 = vrot.slane %v3831_v47, %v10638_v62  ;;  %v3965_v4 = vrot.slane %v3834_v51, %v10633_v38  ;;  %v2061_v47 = vsel %vm1052_vm1, %v2060_v36, %v2056_v0  ;;  %v2078_v51 = vrot.slane %v11427_v23, %v10633_v38  ;;  %v8983_v20 = vld [vmem:[#allocation11 + $0x1a8] ss:$16 sps:$4 sm:$0xff]  }
 0x614   :  { %v2083_v23 = vrot.slane %v11433_v34, %v10638_v62  ;;  %v2123_v58 = vsel %vm1189_vm2, %v2061_v47, %v2052_v26  ;;  %v2097_v0 = vsel %vm1052_vm1, %v2096_v52, %v2092_v39  ;;  %v8935_v39 = vld [vmem:[#allocation11 + $0xa8] ss:$16 sps:$4 sm:$0xff]   ;;  %v8946_v52 = vld [vmem:[#allocation11 + $0xe4] ss:$16 sps:$4 sm:$0xff]  }
 0x615   :  { %v3966_v2 = vsel %vm1052_vm1, %v3965_v4, %v3961_v14  ;;  %v2079_v18 = vsel %vm1052_vm1, %v2078_v51, %v2074_v60  ;;  %v2124_v36 = vsel %vm1191_vm3, %v2070_v35, %v2123_v58  ;;  %v8905_v14 = vld [vmem:[#allocation11 + $0x8] ss:$16 sps:$4 sm:$0xff]   ;;  %v8902_v51 = vld [vmem:[#allocation11] ss:$16 sps:$4 sm:$0xff]   ;;  %v8952_v58 = vld [vmem:[#allocation11 + $0x104] ss:$16 sps:$4 sm:$0xff]  }
 0x616   :  { %v3837_v10 = vpop.permute.xlu1 %3836  ;;  %v3840_v5 = vpop.permute.xlu0 %3839  ;;  %v4012_v34 = vsel %vm1193_vm4, %v3966_v2, %v4011_v32  ;;  %v2088_v42 = vsel %vm1052_vm1, %v2087_v49, %v2083_v23  ;;  %v8911_v60 = vld [vmem:[#allocation11 + $0x28] ss:$16 sps:$4 sm:$0xff]   ;;  %v8920_v35 = vld [vmem:[#allocation11 + $0x60] ss:$16 sps:$4 sm:$0xff]   ;;  %v8934_v32 = vld [vmem:[#allocation11 + $0xa4] ss:$16 sps:$4 sm:$0xff]  }
 0x617   :  { %v3970_v55 = vrot.slane %v3837_v10, %v10638_v62  ;;  %v3974_v8 = vrot.slane %v3840_v5, %v10633_v38  ;;  %v8923_v2 = vld [vmem:[#allocation11 + $0x68] ss:$16 sps:$4 sm:$0xff]   ;;  %v8926_v49 = vld [vmem:[#allocation11 + $0x80] ss:$16 sps:$4 sm:$0xff]  }
 0x618   :  { %v8929_v23 = vld [vmem:[#allocation11 + $0x88] ss:$16 sps:$4 sm:$0xff]  }
 0x619   :  { %v3975_v41 = vsel %vm1052_vm1, %v3974_v8, %v3970_v55  ;;  %v8913_v8 = vld [vmem:[#allocation11 + $0x2c] ss:$16 sps:$4 sm:$0xff]  }
 0x61a   :  { %v3843_v15 = vpop.permute.xlu1 %3842  ;;  %v3846_v31 = vpop.permute.xlu0 %3845  ;;  %v4013_v50 = vsel %vm1195_vm5, %v3975_v41, %v4012_v34  ;;  %v8937_v41 = vld [vmem:[#allocation11 + $0xac] ss:$16 sps:$4 sm:$0xff]   ;;  %v8940_v34 = vld [vmem:[#allocation11 + $0xc4] ss:$16 sps:$4 sm:$0xff]  }
 0x61b   :  { %v3979_v45 = vrot.slane %v3843_v15, %v10638_v62  ;;  %v3983_v57 = vrot.slane %v3846_v31, %v10633_v38  ;;  %v2125_v15 = vsel %vm1193_vm4, %v2079_v18, %v2124_v36  ;;  %v2106_v31 = vsel %vm1052_vm1, %v2105_v24, %v2101_v13  ;;  %v8932_v18 = vld [vmem:[#allocation11 + $0xa0] ss:$16 sps:$4 sm:$0xff]   ;;  %v8941_v13 = vld [vmem:[#allocation11 + $0xc8] ss:$16 sps:$4 sm:$0xff]   ;;  %v8958_v36 = vld [vmem:[#allocation11 + $0x124] ss:$16 sps:$4 sm:$0xff]  }
 0x61c   :  { %v2126_v4 = vsel %vm1195_vm5, %v2088_v42, %v2125_v15  ;;  %v8961_v42 = vld [vmem:[#allocation11 + $0x12c] ss:$16 sps:$4 sm:$0xff]   ;;  %v8950_v24 = vld [vmem:[#allocation11 + $0x100] ss:$16 sps:$4 sm:$0xff]  }
 0x61d   :  { %v3984_v30 = vsel %vm1052_vm1, %v3983_v57, %v3979_v45  ;;  %v2127_v53 = vsel %vm1197_vm6, %v2097_v0, %v2126_v4  ;;  %v2122_v57 = vsel %vm1201_vm8, %v11546_v16, %v2121_v12  ;;  %v8914_v16 = vld [vmem:[#allocation11 + $0x40] ss:$16 sps:$4 sm:$0xff]   ;;  %v8967_v0 = vld [vmem:[#allocation11 + $0x14c] ss:$16 sps:$4 sm:$0xff]   ;;  %v8977_v4 = vld [vmem:[#allocation11 + $0x188] ss:$16 sps:$4 sm:$0xff]  }
 0x61e   :  { %v3849_v17 = vpop.permute.xlu1 %3848  ;;  %v3852_v27 = vpop.permute.xlu0 %3851  ;;  %v4014_v25 = vsel %vm1197_vm6, %v3984_v30, %v4013_v50  ;;  %v2128_v54 = vsel %vm1199_vm7, %v2106_v31, %v2127_v53  ;;  %v8943_v30 = vld [vmem:[#allocation11 + $0xcc] ss:$16 sps:$4 sm:$0xff]   ;;  %v8962_v31 = vld [vmem:[#allocation11 + $0x140] ss:$16 sps:$4 sm:$0xff]  }
 0x61f   :  { %v3988_v3 = vrot.slane %v3849_v17, %v10638_v62  ;;  %v3992_v33 = vrot.slane %v3852_v27, %v10633_v38  ;;  %v8917_v17 = vld [vmem:[#allocation11 + $0x48] ss:$16 sps:$4 sm:$0xff]   ;;  %v8916_v27 = vld [vmem:[#allocation11 + $0x44] ss:$16 sps:$4 sm:$0xff]   ;;  %v8955_v50 = vld [vmem:[#allocation11 + $0x10c] ss:$16 sps:$4 sm:$0xff]  }
 0x620   :  { %v8973_v15 = vld [vmem:[#allocation11 + $0x16c] ss:$16 sps:$4 sm:$0xff]   ;;  %v8986_v12 = vld [vmem:[#allocation11 + $0x1c0] ss:$16 sps:$4 sm:$0xff]  }
 0x621   :  { %v3993_v10 = vsel %vm1052_vm1, %v3992_v33, %v3988_v3  ;;  %v8922_v3 = vld [vmem:[#allocation11 + $0x64] ss:$16 sps:$4 sm:$0xff]   ;;  %v8931_v33 = vld [vmem:[#allocation11 + $0x8c] ss:$16 sps:$4 sm:$0xff]  }
 0x622   :  { %v3855_v5 = vpop.permute.xlu1 %3854  ;;  %v3858_v1 = vpop.permute.xlu0 %3857  ;;  %v4015_v63 = vsel %vm1199_vm7, %v3993_v10, %v4014_v25  ;;  %v8949_v10 = vld [vmem:[#allocation11 + $0xec] ss:$16 sps:$4 sm:$0xff]   ;;  %v8959_v25 = vld [vmem:[#allocation11 + $0x128] ss:$16 sps:$4 sm:$0xff]  }
 0x623   :  { %v3997_v19 = vrot.slane %v3855_v5, %v10638_v62  ;;  %v4001_v48 = vrot.slane %v3858_v1, %v10633_v38  ;;  %v8938_v5 = vld [vmem:[#allocation11 + $0xc0] ss:$16 sps:$4 sm:$0xff]   ;;  %v8947_v1 = vld [vmem:[#allocation11 + $0xe8] ss:$16 sps:$4 sm:$0xff]   ;;  %v8985_v53 = vld [vmem:[#allocation11 + $0x1ac] ss:$16 sps:$4 sm:$0xff]  }
 0x625   :  { %v4002_v44 = vsel %vm1052_vm1, %v4001_v48, %v3997_v19  ;;  %v8944_v19 = vld [vmem:[#allocation11 + $0xe0] ss:$16 sps:$4 sm:$0xff]   ;;  %v8953_v48 = vld [vmem:[#allocation11 + $0x108] ss:$16 sps:$4 sm:$0xff]  }
 0x626   :  { %v4016_v28 = vsel %vm1201_vm8, %v4002_v44, %v4015_v63  ;;  %v1968_v56 = vpop.permute.xlu1 %1967  ;;  %v1971_v22 = vpop.permute.xlu0 %1970  ;;  %v8956_v63 = vld [vmem:[#allocation11 + $0x120] ss:$16 sps:$4 sm:$0xff]   ;;  %v8965_v44 = vld [vmem:[#allocation11 + $0x148] ss:$16 sps:$4 sm:$0xff]  }
 0x627   :  { %v4017_v26 = vpack.c.b16 %v4016_v28, %v4009_v61  ;;  %v2110_v11 = vrot.slane %v1968_v56, %v10638_v62  ;;  %v2114_v55 = vrot.slane %v1971_v22, %v10633_v38  ;;  %v8964_v61 = vld [vmem:[#allocation11 + $0x144] ss:$16 sps:$4 sm:$0xff]   ;;  %v8971_v28 = vld [vmem:[#allocation11 + $0x168] ss:$16 sps:$4 sm:$0xff]   ;;  %v8979_v22 = vld [vmem:[#allocation11 + $0x18c] ss:$16 sps:$4 sm:$0xff]  }
 0x628   :  { %v8970_v56 = vld [vmem:[#allocation11 + $0x164] ss:$16 sps:$4 sm:$0xff]  }
 0x629   :  { %v2115_v45 = vsel %vm1052_vm1, %v2114_v55, %v2110_v11  ;;  %8841 = vmatmul.mubr.msk.bf16.vlgmr.msra.gmra.mrb[4].mxu1 %vm184_vm0, %v4017_v26  ;;  %v8976_v26 = vld [vmem:[#allocation11 + $0x184] ss:$16 sps:$4 sm:$0xff]   ;;  %v8974_v11 = vld [vmem:[#allocation11 + $0x180] ss:$16 sps:$4 sm:$0xff]  }
 0x62a   :  { %v2129_v47 = vsel %vm1201_vm8, %v2115_v45, %v2128_v54  ;;  %4518 = vmatpush1.bf16.msra.mxu1 %v8905_v14  ;;  %v8968_v14 = vld [vmem:[#allocation11 + $0x160] ss:$16 sps:$4 sm:$0xff]   ;;  %v8988_v54 = vld [vmem:[#allocation11 + $0x1c4] ss:$16 sps:$4 sm:$0xff]   ;;  %v8989_v45 = vld [vmem:[#allocation11 + $0x1c8] ss:$16 sps:$4 sm:$0xff]  }
 0x62b   :  { %v2130_v29 = vpack.c.b16 %v2129_v47, %v2122_v57  ;;  %4519 = vmatprep.subr.bf16.mxu1 %v8913_v8  ;;  %v8980_v55 = vld [vmem:[#allocation11 + $0x1a0] ss:$16 sps:$4 sm:$0xff]   ;;  %v8982_v8 = vld [vmem:[#allocation11 + $0x1a4] ss:$16 sps:$4 sm:$0xff]   ;;  %v8991_v57 = vld [vmem:[#allocation11 + $0x1cc] ss:$16 sps:$4 sm:$0xff]  }
 0x62c   :  { %v8992_v47 = vld [vmem:[#allocation11 + $0x1e0] ss:$16 sps:$4 sm:$0xff]  }
 0x62d   :  { %8835 = vmatmul.mubr.msk.bf16.vlgmr.msra.gmra.mrb[4].mxu0 %vm184_vm0, %v2130_v29  ;;  %v8997_v29 = vld [vmem:[#allocation11 + $0x1ec] ss:$16 sps:$4 sm:$0xff]  }
 0x62e   :  { %4475 = vmatpush1.bf16.msra.mxu0 %v8902_v51  ;;  %4520 = vmatpush1.bf16.msra.mxu1 %v8911_v60  ;;  %v8994_v51 = vld [vmem:[#allocation11 + $0x1e4] ss:$16 sps:$4 sm:$0xff]   ;;  %v8995_v60 = vld [vmem:[#allocation11 + $0x1e8] ss:$16 sps:$4 sm:$0xff]  }
 0x62f   :  { %4476 = vmatprep.subr.bf16.mxu0 %v8910_v7  ;;  %4521 = vmatprep.subr.bf16.mxu1 %v8919_v37  ;;  %v8790_v7 = vld [vmem:[#allocation8] sm:$0xff]  }
 0x630   :  { %v11642_v37 = vunpack.c.l.bf16 %v8790_v7 }
 0x632   :  { %4477 = vmatpush1.bf16.msra.mxu0 %v8908_v46  ;;  %4522 = vmatpush1.bf16.msra.mxu1 %v8917_v17  ;;  %v6849_v46 = vrot.slane %v11642_v37, %v13879_v21  ;;  %v11647_v17 = vunpack.c.h.bf16 %v8790_v7 }
 0x633   :  { %4478 = vmatprep.subr.bf16.mxu0 %v8916_v27  ;;  %4523 = vmatprep.subr.bf16.mxu1 %v8925_v43  ;;  %v6860_v27 = vrot.slane %v11642_v37, %v13880_v59 }
 0x634   :  { %6851 = vbcast.lane.b32.xlu1 %v6849_v46, 256  ;;  %6855 = vbcast.lane.b32.xlu0 %v6849_v46, 264  ;;  %v6937_v43 = vrot.slane %v11647_v17, %v13879_v21 }
 0x636   :  { %4479 = vmatpush1.bf16.msra.mxu0 %v8914_v16  ;;  %4524 = vmatpush1.bf16.msra.mxu1 %v8923_v2  ;;  %v6948_v16 = vrot.slane %v11647_v17, %v13880_v59  ;;  %v6871_v2 = vrot.slane %v11642_v37, %v13883_v6 }
 0x637   :  { %4480 = vmatprep.subr.bf16.mxu0 %v8922_v3  ;;  %4525 = vmatprep.subr.bf16.mxu1 %v8931_v33  ;;  %v6959_v3 = vrot.slane %v11647_v17, %v13883_v6  ;;  %v14002_v33 = vld [vmem:[#allocation26_spill] sm:$0xff] }
 0x638   :  { %6862 = vbcast.lane.b32.xlu1 %v6860_v27, 256  ;;  %6943 = vbcast.lane.b32.xlu0 %v6937_v43, 264 }
 0x63a   :  { %4481 = vmatpush1.bf16.msra.mxu0 %v8920_v35  ;;  %4526 = vmatpush1.bf16.msra.mxu1 %v8929_v23  ;;  %v6882_v35 = vrot.slane %v11642_v37, %v14002_v33  ;;  %v6970_v23 = vrot.slane %v11647_v17, %v14002_v33 }
 0x63b   :  { %4482 = vmatprep.subr.bf16.mxu0 %v8928_v40  ;;  %4527 = vmatprep.subr.bf16.mxu1 %v8937_v41  ;;  %v14003_v40 = vld [vmem:[#allocation27_spill] sm:$0xff] }
 0x63c   :  { %6866 = vbcast.lane.b32.xlu1 %v6860_v27, 264  ;;  %6954 = vbcast.lane.b32.xlu0 %v6948_v16, 264  ;;  %v6893_v41 = vrot.slane %v11642_v37, %v14003_v40 }
 0x63e   :  { %4483 = vmatpush1.bf16.msra.mxu0 %v8926_v49  ;;  %4528 = vmatpush1.bf16.msra.mxu1 %v8935_v39  ;;  %v6981_v49 = vrot.slane %v11647_v17, %v14003_v40  ;;  %v14004_v39 = vld [vmem:[#allocation28_spill] sm:$0xff] }
 0x63f   :  { %4484 = vmatprep.subr.bf16.mxu0 %v8934_v32  ;;  %4529 = vmatprep.subr.bf16.mxu1 %v8943_v30  ;;  %v6904_v32 = vrot.slane %v11642_v37, %v14004_v39  ;;  %v6992_v30 = vrot.slane %v11647_v17, %v14004_v39 }
 0x640   :  { %6939 = vbcast.lane.b32.xlu1 %v6937_v43, 256  ;;  %4968 = vbcast.lane.b32.xlu0 %v6849_v46, 264 }
 0x642   :  { %4485 = vmatpush1.bf16.msra.mxu0 %v8932_v18  ;;  %4530 = vmatpush1.bf16.msra.mxu1 %v8941_v13  ;;  %v14005_v18 = vld [vmem:[#allocation29_spill] sm:$0xff] }
 0x643   :  { %4486 = vmatprep.subr.bf16.mxu0 %v8940_v34  ;;  %4531 = vmatprep.subr.bf16.mxu1 %v8949_v10  ;;  %v6915_v13 = vrot.slane %v11642_v37, %v14005_v18  ;;  %v7003_v34 = vrot.slane %v11647_v17, %v14005_v18  ;;  %v14006_v10 = vld [vmem:[#allocation30_spill] sm:$0xff] }
 0x644   :  { %6950 = vbcast.lane.b32.xlu1 %v6948_v16, 256  ;;  %4979 = vbcast.lane.b32.xlu0 %v6860_v27, 264 }
 0x646   :  { %4487 = vmatpush1.bf16.msra.mxu0 %v8938_v5  ;;  %4532 = vmatpush1.bf16.msra.mxu1 %v8947_v1  ;;  %v6926_v5 = vrot.slane %v11642_v37, %v14006_v10  ;;  %v8678_v1 = vld [vmem:[%s13543_s5 + $0x1] ss:$0 sm:$0xff] }
 0x647   :  { %4488 = vmatprep.subr.bf16.mxu0 %v8946_v52  ;;  %4533 = vmatprep.subr.bf16.mxu1 %v8955_v50  ;;  %v7014_v50 = vrot.slane %v11647_v17, %v14006_v10 }
 0x648   :  { %4964 = vbcast.lane.b32.xlu1 %v6849_v46, 256  ;;  %5056 = vbcast.lane.b32.xlu0 %v6937_v43, 264 }
 0x64a   :  { %4489 = vmatpush1.bf16.msra.mxu0 %v8944_v19  ;;  %4534 = vmatpush1.bf16.msra.mxu1 %v8953_v48 }
 0x64b   :  { %4490 = vmatprep.subr.bf16.mxu0 %v8952_v58  ;;  %4535 = vmatprep.subr.bf16.mxu1 %v8961_v42  ;;  %v8674_v42 = vld [vmem:[%s13543_s5] ss:$0 sm:$0xff] }
 0x64c   :  { %4975 = vbcast.lane.b32.xlu1 %v6860_v27, 256  ;;  %5067 = vbcast.lane.b32.xlu0 %v6948_v16, 264 }
 0x64e   :  { %4491 = vmatpush1.bf16.msra.mxu0 %v8950_v24  ;;  %4536 = vmatpush1.bf16.msra.mxu1 %v8959_v25 }
 0x64f   :  { %4492 = vmatprep.subr.bf16.mxu0 %v8958_v36  ;;  %4537 = vmatprep.subr.bf16.mxu1 %v8967_v0 }
 0x650   :  { %5052 = vbcast.lane.b32.xlu1 %v6937_v43, 256  ;;  %6877 = vbcast.lane.b32.xlu0 %v6871_v2, 264 }
 0x652   :  { %4493 = vmatpush1.bf16.msra.mxu0 %v8956_v63  ;;  %4538 = vmatpush1.bf16.msra.mxu1 %v8965_v44 }
 0x653   :  { %4494 = vmatprep.subr.bf16.mxu0 %v8964_v61  ;;  %4539 = vmatprep.subr.bf16.mxu1 %v8973_v15 }
 0x654   :  { %5063 = vbcast.lane.b32.xlu1 %v6948_v16, 256  ;;  %6965 = vbcast.lane.b32.xlu0 %v6959_v3, 264 }
 0x656   :  { %4495 = vmatpush1.bf16.msra.mxu0 %v8962_v31  ;;  %4540 = vmatpush1.bf16.msra.mxu1 %v8971_v28 }
 0x657   :  { %4496 = vmatprep.subr.bf16.mxu0 %v8970_v56  ;;  %4541 = vmatprep.subr.bf16.mxu1 %v8979_v22 }
 0x658   :  { %6873 = vbcast.lane.b32.xlu1 %v6871_v2, 256  ;;  %4990 = vbcast.lane.b32.xlu0 %v6871_v2, 264 }
 0x65a   :  { %4497 = vmatpush1.bf16.msra.mxu0 %v8968_v14  ;;  %4542 = vmatpush1.bf16.msra.mxu1 %v8977_v4 }
 0x65b   :  { %4498 = vmatprep.subr.bf16.mxu0 %v8976_v26  ;;  %4543 = vmatprep.subr.bf16.mxu1 %v8985_v53 }
 0x65c   :  { %6961 = vbcast.lane.b32.xlu1 %v6959_v3, 256  ;;  %5078 = vbcast.lane.b32.xlu0 %v6959_v3, 264 }
 0x65e   :  { %4499 = vmatpush1.bf16.msra.mxu0 %v8974_v11  ;;  %4544 = vmatpush1.bf16.msra.mxu1 %v8983_v20 }
 0x65f   :  { %4500 = vmatprep.subr.bf16.mxu0 %v8982_v8  ;;  %4545 = vmatprep.subr.bf16.mxu1 %v8991_v57 }
 0x660   :  { %4986 = vbcast.lane.b32.xlu1 %v6871_v2, 256  ;;  %6888 = vbcast.lane.b32.xlu0 %v6882_v35, 264 }
 0x662   :  { %4501 = vmatpush1.bf16.msra.mxu0 %v8980_v55  ;;  %4546 = vmatpush1.bf16.msra.mxu1 %v8989_v45 }
 0x663   :  { %4502 = vmatprep.subr.bf16.mxu0 %v8988_v54  ;;  %4547 = vmatprep.subr.bf16.mxu1 %v8997_v29  ;;  %v4132_v54 = vld [vmem:[%s13545_s7] sm:$0xf] }
 0x664   :  { %5074 = vbcast.lane.b32.xlu1 %v6959_v3, 256  ;;  %6976 = vbcast.lane.b32.xlu0 %v6970_v23, 264  ;;  %v4145_v45 = vrot.slane %v4132_v54, %v13883_v6  ;;  %v4149_v46 = vrot.slane %v4132_v54, %v14002_v33  ;;  %v14013_v3 = vld [vmem:[#allocation31_spill] sm:$0xff] }
 0x666   :  { %4503 = vmatpush1.bf16.msra.mxu0 %v8986_v12  ;;  %4548 = vmatpush1.bf16.msra.mxu1 %v8995_v60 }
 0x667   :  { %4504 = vmatprep.subr.bf16.mxu0 %v8994_v51  ;;  %8850 = vmatprep.subr.bf16.mxu1 %v14001_v9 }
 0x668   :  { %6884 = vbcast.lane.b32.xlu1 %v6882_v35, 256  ;;  %5001 = vbcast.lane.b32.xlu0 %v6882_v35, 264 }
 0x66a   :  { %4505 = vmatpush1.bf16.msra.mxu0 %v8992_v47 }
 0x66b   :  { %8844 = vmatprep.subr.bf16.mxu0 %v14001_v9 }
 0x66c   :  { %6972 = vbcast.lane.b32.xlu1 %v6970_v23, 256  ;;  %5089 = vbcast.lane.b32.xlu0 %v6970_v23, 264 }
 0x670   :  { %4997 = vbcast.lane.b32.xlu1 %v6882_v35, 256  ;;  %6899 = vbcast.lane.b32.xlu0 %v6893_v41, 264 }
 0x674   :  { %5085 = vbcast.lane.b32.xlu1 %v6970_v23, 256  ;;  %6987 = vbcast.lane.b32.xlu0 %v6981_v49, 264 }
 0x678   :  { %6895 = vbcast.lane.b32.xlu1 %v6893_v41, 256  ;;  %5012 = vbcast.lane.b32.xlu0 %v6893_v41, 264 }
 0x67c   :  { %6983 = vbcast.lane.b32.xlu1 %v6981_v49, 256  ;;  %5100 = vbcast.lane.b32.xlu0 %v6981_v49, 264 }
 0x680   :  { %5008 = vbcast.lane.b32.xlu1 %v6893_v41, 256  ;;  %6910 = vbcast.lane.b32.xlu0 %v6904_v32, 264 }
 0x684   :  { %5096 = vbcast.lane.b32.xlu1 %v6981_v49, 256  ;;  %6998 = vbcast.lane.b32.xlu0 %v6992_v30, 264  ;;  %v4137_v49 = vrot.slane %v4132_v54, %v13879_v21 }
 0x688   :  { %6906 = vbcast.lane.b32.xlu1 %v6904_v32, 256  ;;  %5023 = vbcast.lane.b32.xlu0 %v6904_v32, 264 }
 0x68c   :  { %6994 = vbcast.lane.b32.xlu1 %v6992_v30, 256  ;;  %5111 = vbcast.lane.b32.xlu0 %v6992_v30, 264 }
 0x690   :  { %5019 = vbcast.lane.b32.xlu1 %v6904_v32, 256  ;;  %6921 = vbcast.lane.b32.xlu0 %v6915_v13, 264 }
 0x694   :  { %5107 = vbcast.lane.b32.xlu1 %v6992_v30, 256  ;;  %7009 = vbcast.lane.b32.xlu0 %v7003_v34, 264  ;;  %v4141_v30 = vrot.slane %v4132_v54, %v13880_v59 }
 0x698   :  { %6917 = vbcast.lane.b32.xlu1 %v6915_v13, 256  ;;  %5034 = vbcast.lane.b32.xlu0 %v6915_v13, 264 }
 0x69c   :  { %7005 = vbcast.lane.b32.xlu1 %v7003_v34, 256  ;;  %5122 = vbcast.lane.b32.xlu0 %v7003_v34, 264 }
 0x6a0   :  { %5030 = vbcast.lane.b32.xlu1 %v6915_v13, 256  ;;  %6932 = vbcast.lane.b32.xlu0 %v6926_v5, 264 }
 0x6a4   :  { %5118 = vbcast.lane.b32.xlu1 %v7003_v34, 256  ;;  %7020 = vbcast.lane.b32.xlu0 %v7014_v50, 264 }
 0x6a6   :  { %v11690_v26 = vpop.permute.xlu1 %6851  ;;  %v11694_v55 = vpop.permute.xlu0 %6855 }
 0x6a8   :  { %6928 = vbcast.lane.b32.xlu1 %v6926_v5, 256  ;;  %5045 = vbcast.lane.b32.xlu0 %v6926_v5, 264 }
 0x6aa   :  { %v11692_v11 = vpop.permute.xlu1 %6862  ;;  %v11698_v20 = vpop.permute.xlu0 %6943 }
 0x6ab   :  { %14007 = vst [vmem:[#allocation44_spill] sm:$0xff] %v11692_v11  ;;  %14009 = vst [vmem:[#allocation50_spill] sm:$0xff] %v11698_v20 }
 0x6ac   :  { %7016 = vbcast.lane.b32.xlu1 %v7014_v50, 256  ;;  %5133 = vbcast.lane.b32.xlu0 %v7014_v50, 264 }
 0x6ae   :  { %v11696_v8 = vpop.permute.xlu1 %6866  ;;  %v11702_v12 = vpop.permute.xlu0 %6954 }
 0x6af   :  { %14008 = vst [vmem:[#allocation78_spill] sm:$0xff] %v11696_v8  ;;  %14011 = vst [vmem:[#allocation49_spill] sm:$0xff] %v11702_v12 }
 0x6b0   :  { %5041 = vbcast.lane.b32.xlu1 %v6926_v5, 256 }
 0x6b2   :  { %v11700_v53 = vpop.permute.xlu1 %6939  ;;  %v11710_v47 = vpop.permute.xlu0 %4968 }
 0x6b3   :  { %14010 = vst [vmem:[#allocation35_spill] sm:$0xff] %v11700_v53 }
 0x6b4   :  { %5129 = vbcast.lane.b32.xlu1 %v7014_v50, 256 }
 0x6b6   :  { %v11708_v57 = vpop.permute.xlu1 %6950  ;;  %v11716_v41 = vpop.permute.xlu0 %4979 }
 0x6b7   :  { %14012 = vst [vmem:[#allocation37_spill] sm:$0xff] %v11708_v57 }
 0x6ba   :  { %v11713_v2 = vpop.permute.xlu1 %4964 }
 0x6be   :  { %v11721_v13 = vpop.permute.xlu1 %4975 }
 0x6fc   :  { %v4055_v52 = vpop.f32.mrb[4].mxu1 }
 0x6fd   :  { %v4056_v19 = vadd.f32 %v8678_v1, %v4055_v52  ;;  %v8842_v48 = vpop.f32.mrb[5].mxu1 }
 0x6fe   :  { %v4058_v58 = vpop.f32.mrb[6].mxu1 }
 0x6ff   :  { %v4059_v24 = vadd.f32 %v8678_v1, %v4058_v58  ;;  %v8843_v25 = vpop.f32.mrb[7].mxu1  ;;  %v4062_v0 = vmax.f32 %v4056_v19, 0.0 }
 0x700   :  { %v2168_v36 = vpop.f32.mrb[4].mxu0 }
 0x701   :  { %v4063_v63 = vmax.f32 %v4059_v24, 0.0  ;;  %v2169_v44 = vadd.f32 %v8674_v42, %v2168_v36  ;;  %v8836_v61 = vpop.f32.mrb[5].mxu0 }
 0x702   :  { %v2171_v15 = vpop.f32.mrb[6].mxu0 }
 0x703   :  { %v4064_v31 = vpack.c.bf16 %v4063_v63, %v4062_v0  ;;  %v2172_v28 = vadd.f32 %v8674_v42, %v2171_v15  ;;  %v8837_v56 = vpop.f32.mrb[7].mxu0  ;;  %v2175_v22 = vmax.f32 %v2169_v44, 0.0  ;;  %v11733_v42 = vpop.permute.xlu0 %5056 }
 0x704   :  { %14014 = vst [vmem:[#allocation59_spill] sm:$0xff] %v11733_v42  ;;  %v11748_v15 = vpop.permute.xlu1 %5052 }
 0x705   :  { %v2176_v14 = vmax.f32 %v2172_v28, 0.0  ;;  %4506 = vmatprep.mubr.bf16.mxu0 %v4064_v31  ;;  %4549 = vmatprep.mubr.bf16.mxu1 %v4064_v31  ;;  %14015 = vst [vmem:[#allocation47_spill] sm:$0xff] %v11748_v15 }
 0x707   :  { %v2177_v4 = vpack.c.bf16 %v2176_v14, %v2175_v22 }
 0x709   :  { %4507 = vmatmul.mubr.bf16.vlgmr.msra.gmra.mrb[8].mxu0 %v2177_v4  ;;  %4550 = vmatmul.mubr.bf16.vlgmr.msra.gmra.mrb[8].mxu1 %v2177_v4 }
 0x70a   :  { %8852 = vmatprep.mubr.msk.bf16.mxu1 %vm9479_vm9, %v14001_v9  ;;  %8846 = vmatprep.mubr.msk.bf16.mxu0 %vm9479_vm9, %v14001_v9 }
 0x7dc   :  { %v4508_v51 = vpop.f32.mrb[8].mxu0  ;;  %v4551_v60 = vpop.f32.mrb[8].mxu1 }
 0x7dd   :  { %v4552_v29 = vadd.f32 %v4551_v60, %v4145_v45  ;;  %v4510_v7 = vpop.f32.mrb[9].mxu0  ;;  %v4553_v37 = vpop.f32.mrb[9].mxu1  ;;  %v11728_v19 = vadd.f32 %v4508_v51, %v4137_v49 }
 0x7de   :  { %v4512_v17 = vpop.f32.mrb[10].mxu0  ;;  %v4555_v27 = vpop.f32.mrb[10].mxu1  ;;  %v4554_v23 = vadd.f32 %v4553_v37, %v4149_v46  ;;  %v11731_v58 = vadd.f32 %v4510_v7, %v4141_v30 }
 0x7df   :  { %v4514_v43 = vpop.f32.mrb[11].mxu0  ;;  %v4557_v16 = vpop.f32.mrb[11].mxu1  ;;  %v4584_v35 = vrot.slane %v4552_v29, %v14013_v3  ;;  %v11724_v5 = vadd.f32 %v4512_v17, %v4137_v49  ;;  %v4577_v52 = vcombine.high %v4552_v29, %v4552_v29  ;;  %v11738_v25 = vadd.f32 %v4555_v27, %v4145_v45  ;;  %v11774_v17 = vld [vmem:[%s13546_s8] ss:$0 sm:$0xff] }
 0x7e0   :  { %v6471_v34 = vrot.slane %v4554_v23, %v14013_v3  ;;  %v11726_v1 = vadd.f32 %v4514_v43, %v4141_v30  ;;  %v6464_v28 = vcombine.high %v4554_v23, %v4554_v23  ;;  %v11764_v45 = vpop.permute.xlu0 %5067  ;;  %v11766_v51 = vadd.f32 %v4557_v16, %v4149_v46  ;;  %v11781_v46 = vpop.permute.xlu1 %5063 }
 0x7e1   :  { %v4600_v32 = vrot.slane %v4584_v35, %v14013_v3  ;;  %v4592_v50 = vcombine.high %v4584_v35, %v4584_v35  ;;  %v4570_v36 = vpack.c.bf16 %v11724_v5, %v11728_v19  ;;  %v4591_v63 = vrot.slane %v4577_v52, %v14013_v3  ;;  %14016 = vst [vmem:[#allocation39_spill] sm:$0xff] %v11764_v45 }
 0x7e2   :  { %v11736_v24 = vrot.slane %v6471_v34, %v14013_v3  ;;  %v6456_v0 = vpack.c.bf16 %v11726_v1, %v11731_v58  ;;  %v11755_v22 = vrot.slane %v11738_v25, %v14013_v3  ;;  %v6478_v29 = vrot.slane %v6464_v28, %v14013_v3  ;;  %14017 = vst [vmem:[#allocation46_spill] sm:$0xff] %v11781_v46  ;;  %v11796_v28 = vld [vmem:[%s13546_s8 + $0x1] ss:$0 sm:$0xff] }
 0x7e3   :  { %v4678_v48 = vrot.slane %v4600_v32, %v13879_v21  ;;  %v11746_v44 = vrot.slane %v4592_v50, %v14013_v3  ;;  %v4622_v61 = vcombine.high %v4600_v32, %v4600_v32  ;;  %8845 = vmatpush3.bf16.msra.mxu0 %v4570_v36  ;;  %v11759_v14 = vrot.slane %v4591_v63, %v14013_v3 }
 0x7e4   :  { %8851 = vmatpush3.bf16.msra.mxu1 %v6456_v0  ;;  %v6565_v56 = vrot.slane %v11736_v24, %v13879_v21  ;;  %v6479_v7 = vcombine.high %v6471_v34, %v6471_v34  ;;  %v4626_v37 = vcombine.high %v11738_v25, %v11738_v25  ;;  %v11779_v43 = vrot.slane %v11755_v22, %v14013_v3  ;;  %v11809_v18 = vpop.permute.xlu1 %6873 }
 0x7e5   :  { %v4756_v31 = vadd.f32 %v4678_v48, %v11724_v5  ;;  %8856 = vmatprep.subr.bf16.mxu1 %v14001_v9  ;;  %v4682_v4 = vrot.slane %v11746_v44, %v13879_v21  ;;  %v4686_v54 = vrot.slane %v4622_v61, %v13879_v21  ;;  %v4755_v27 = vadd.f32 %v4678_v48, %v11728_v19  ;;  %v11791_v61 = vpop.permute.xlu0 %6877 }
 0x7e6   :  { %v6642_v35 = vadd.f32 %v6565_v56, %v11731_v58  ;;  %v6643_v23 = vadd.f32 %v6565_v56, %v11726_v1  ;;  %v4694_v49 = vrot.slane %v11759_v14, %v13879_v21  ;;  %v4593_v36 = vcombine.high %v4591_v63, %v4591_v63  ;;  %14018 = vst [vmem:[#allocation52_spill] sm:$0xff] %v11791_v61 }
 0x7e7   :  { %v4788_v60 = vmul.f32 0.2, %v4756_v31  ;;  %v4787_v32 = vmul.f32 0.2, %v4755_v27  ;;  %v4757_v30 = vadd.f32 %v4682_v4, %v11728_v19  ;;  %v4759_v34 = vadd.f32 %v4686_v54, %v11728_v19  ;;  %14019 = vst [vmem:[#allocation53_spill] sm:$0xff] %v11809_v18 }
 0x7e8   :  { %v6674_v50 = vmul.f32 0.2, %v6642_v35  ;;  %v6675_v48 = vmul.f32 0.2, %v6643_v23  ;;  %v4758_v25 = vadd.f32 %v4682_v4, %v11724_v5  ;;  %v6480_v0 = vcombine.high %v6478_v29, %v6478_v29 }
 0x7e9   :  { %v4820_v16 = vmax.f32 %v4756_v31, %v4788_v60  ;;  %v4819_v31 = vmax.f32 %v4755_v27, %v4787_v32  ;;  %v4789_v56 = vmul.f32 0.2, %v4757_v30  ;;  %v11799_v60 = vrot.slane %v6479_v7, %v14013_v3 }
 0x7ea   :  { %v11805_v4 = vrot.slane %v11766_v51, %v14013_v3  ;;  %v6706_v63 = vmax.f32 %v6642_v35, %v6674_v50  ;;  %v6707_v32 = vmax.f32 %v6643_v23, %v6675_v48  ;;  %v4791_v9 = vmul.f32 0.2, %v4759_v34 }
 0x7eb   :  { %v4858_v52 = vmul.f32 %v11774_v17, %v4820_v16  ;;  %v4710_v16 = vrot.slane %v11779_v43, %v13879_v21  ;;  %v4857_v27 = vmul.f32 %v11774_v17, %v4819_v31  ;;  %v4763_v10 = vadd.f32 %v4694_v49, %v11728_v19 }
 0x7ec   :  { %v6744_v7 = vmul.f32 %v11796_v28, %v6706_v63  ;;  %v4821_v39 = vmax.f32 %v4757_v30, %v4789_v56  ;;  %v4790_v40 = vmul.f32 0.2, %v4758_v25  ;;  %v4760_v33 = vadd.f32 %v4686_v54, %v11724_v5 }
 0x7ed   :  { %4891 = vadd.xlane.f32.xlu0 %v4858_v52  ;;  %v11814_v6 = vrot.slane %v4593_v36, %v14013_v3  ;;  %v4624_v23 = vcombine.high %v11746_v44, %v11746_v44  ;;  %v11821_v52 = vrot.slane %v6478_v29, %v14013_v3  ;;  %4889 = vadd.xlane.f32.xlu1 %v4857_v27  ;;  %v11834_v36 = vpop.permute.xlu0 %6965  ;;  %v4795_v31 = vmul.f32 0.2, %v4763_v10 }
 0x7ee   :  { %v6569_v50 = vrot.slane %v11799_v60, %v13879_v21  ;;  %v11826_v30 = vrot.slane %v4626_v37, %v14013_v3  ;;  %v4641_v54 = vcombine.high %v11755_v22, %v11755_v22  ;;  %v11832_v48 = vrot.slane %v11805_v4, %v14013_v3  ;;  %14020 = vst [vmem:[#allocation55_spill] sm:$0xff] %v11834_v36 }
 0x7ef   :  { %v6745_v44 = vmul.f32 %v11796_v28, %v6707_v32  ;;  %v4823_v29 = vmax.f32 %v4759_v34, %v4791_v9  ;;  %v4771_v56 = vadd.f32 %v4710_v16, %v11728_v19  ;;  %v4859_v63 = vmul.f32 %v11774_v17, %v4821_v39  ;;  %v11858_v34 = vpop.permute.xlu1 %6961 }
 0x7f0   :  { %v4822_v37 = vmax.f32 %v4758_v25, %v4790_v40  ;;  %v4792_v27 = vmul.f32 0.2, %v4760_v33  ;;  %v4764_v35 = vadd.f32 %v4694_v49, %v11724_v5  ;;  %v11841_v22 = vrot.slane %v6480_v0, %v14013_v3  ;;  %14021 = vst [vmem:[#allocation61_spill] sm:$0xff] %v11858_v34 }
 0x7f1   :  { %6776 = vadd.xlane.f32.xlu0 %v6744_v7  ;;  %v6509_v7 = vcombine.high %v11736_v24, %v11736_v24  ;;  %v6513_v9 = vcombine.high %v11766_v51, %v11766_v51  ;;  %6778 = vadd.xlane.f32.xlu1 %v6745_v44  ;;  %v11851_v39 = vrot.slane %v11826_v30, %v14013_v3  ;;  %v4803_v32 = vmul.f32 0.2, %v4771_v56  ;;  %v11872_v12 = vpop.permute.xlu0 %4990 }
 0x7f2   :  { %v11854_v40 = vrot.slane %v4641_v54, %v14013_v3  ;;  %v6597_v49 = vrot.slane %v11832_v48, %v13879_v21  ;;  %v6645_v24 = vadd.f32 %v6569_v50, %v11726_v1  ;;  %v4671_v25 = vcombine.high %v11779_v43, %v11779_v43  ;;  %14022 = vst [vmem:[#allocation64_spill] sm:$0xff] %v11872_v12 }
 0x7f3   :  { %v4861_v51 = vmul.f32 %v11774_v17, %v4823_v29  ;;  %v4827_v0 = vmax.f32 %v4763_v10, %v4795_v31  ;;  %v4860_v44 = vmul.f32 %v11774_v17, %v4822_v37  ;;  %v4824_v59 = vmax.f32 %v4760_v33, %v4792_v27 }
 0x7f4   :  { %v4796_v54 = vmul.f32 0.2, %v4764_v35  ;;  %v4772_v62 = vadd.f32 %v4710_v16, %v11724_v5  ;;  %v6581_v36 = vrot.slane %v11821_v52, %v13879_v21  ;;  %v6527_v43 = vrot.slane %v6513_v9, %v14013_v3  ;;  %v11889_v9 = vpop.permute.xlu1 %4986 }
 0x7f5   :  { %4893 = vadd.xlane.f32.xlu0 %v4859_v63  ;;  %v6573_v63 = vrot.slane %v6509_v7, %v13879_v21  ;;  %4897 = vadd.xlane.f32.xlu1 %v4861_v51  ;;  %v11876_v10 = vrot.slane %v11854_v40, %v13879_v21  ;;  %v6528_v33 = vcombine.high %v11805_v4, %v11805_v4  ;;  %v6677_v16 = vmul.f32 0.2, %v6645_v24 }
 0x7f6   :  { %v6659_v29 = vadd.f32 %v6597_v49, %v11726_v1  ;;  %v11882_v31 = vrot.slane %v4671_v25, %v13879_v21  ;;  %v11886_v37 = vrot.slane %v11851_v39, %v13879_v21  ;;  %v4865_v27 = vmul.f32 %v11774_v17, %v4827_v0  ;;  %14023 = vst [vmem:[#allocation63_spill] sm:$0xff] %v11889_v9 }
 0x7f7   :  { %v4835_v7 = vmax.f32 %v4771_v56, %v4803_v32  ;;  %v4862_v51 = vmul.f32 %v11774_v17, %v4824_v59  ;;  %v4828_v38 = vmax.f32 %v4764_v35, %v4796_v54  ;;  %v4804_v4 = vmul.f32 0.2, %v4772_v62  ;;  %v11898_v59 = vpop.permute.xlu0 %5078 }
 0x7f8   :  { %v6647_v34 = vadd.f32 %v6573_v63, %v11726_v1  ;;  %v6658_v25 = vadd.f32 %v6597_v49, %v11731_v58  ;;  %v6651_v57 = vadd.f32 %v6581_v36, %v11726_v1  ;;  %v4690_v45 = vrot.slane %v4624_v23, %v13879_v21  ;;  %14024 = vst [vmem:[#allocation23_spill] sm:$0xff] %v11898_v59  ;;  %v11918_v20 = vpop.permute.xlu1 %5074 }
 0x7f9   :  { %4895 = vadd.xlane.f32.xlu0 %v4860_v44  ;;  %v6644_v44 = vadd.f32 %v6569_v50, %v11731_v58  ;;  %4905 = vadd.xlane.f32.xlu1 %v4865_v27  ;;  %v6529_v46 = vcombine.high %v6527_v43, %v6527_v43  ;;  %v6709_v56 = vmax.f32 %v6645_v24, %v6677_v16  ;;  %v6691_v0 = vmul.f32 0.2, %v6659_v29 }
 0x7fa   :  { %v6646_v32 = vadd.f32 %v6573_v63, %v11731_v58  ;;  %v4873_v35 = vmul.f32 %v11774_v17, %v4835_v7  ;;  %v6650_v50 = vadd.f32 %v6581_v36, %v11731_v58  ;;  %v4698_v54 = vrot.slane %v11814_v6, %v13879_v21  ;;  %14026 = vst [vmem:[#allocation22_spill] sm:$0xff] %v11918_v20 }
 0x7fb   :  { %v14025_v49 = vcombine.high %v11759_v14, %v11759_v14  ;;  %v11911_v24 = vrot.slane %v6527_v43, %v14013_v3  ;;  %v4866_v63 = vmul.f32 %v11774_v17, %v4828_v38  ;;  %v4836_v16 = vmax.f32 %v4772_v62, %v4804_v4 }
 0x7fc   :  { %v6676_v27 = vmul.f32 0.2, %v6644_v44  ;;  %v6679_v7 = vmul.f32 0.2, %v6647_v34  ;;  %v6683_v36 = vmul.f32 0.2, %v6651_v57  ;;  %v4761_v59 = vadd.f32 %v4690_v45, %v11728_v19 }
 0x7fd   :  { %4899 = vadd.xlane.f32.xlu0 %v4862_v51  ;;  %v11908_v23 = vrot.slane %v14025_v49, %v13879_v21  ;;  %4921 = vadd.xlane.f32.xlu1 %v4873_v35  ;;  %v6690_v51 = vmul.f32 0.2, %v6658_v25  ;;  %v11916_v61 = vrot.slane %v6528_v33, %v14013_v3  ;;  %v6723_v14 = vmax.f32 %v6659_v29, %v6691_v0 }
 0x7fe   :  { %v6678_v49 = vmul.f32 0.2, %v6646_v32  ;;  %v11921_v43 = vadd.f32 %v4690_v45, %v11724_v5  ;;  %v6747_v62 = vmul.f32 %v11796_v28, %v6709_v56  ;;  %v6682_v38 = vmul.f32 0.2, %v6650_v50 }
 0x7ff   :  { %v11925_v4 = vadd.f32 %v4698_v54, %v11728_v19  ;;  %v11929_v35 = vadd.f32 %v11908_v23, %v11728_v19  ;;  %v11932_v33 = vrot.slane %v6529_v46, %v14013_v3  ;;  %v6558_v29 = vcombine.high %v11832_v48, %v11832_v48 }
 0x800   :  { %v4874_v0 = vmul.f32 %v11774_v17, %v4836_v16  ;;  %v6708_v45 = vmax.f32 %v6644_v44, %v6676_v27  ;;  %v6711_v56 = vmax.f32 %v6647_v34, %v6679_v7  ;;  %v6722_v20 = vmax.f32 %v6658_v25, %v6690_v51 }
 0x801   :  { %4907 = vadd.xlane.f32.xlu0 %v4866_v63  ;;  %v11937_v63 = vpop.permute.xlu0 %6888  ;;  %6782 = vadd.xlane.f32.xlu1 %v6747_v62  ;;  %v6715_v18 = vmax.f32 %v6651_v57, %v6683_v36  ;;  %v4793_v8 = vmul.f32 0.2, %v4761_v59  ;;  %v11941_v53 = vrot.slane %v11916_v61, %v13879_v21  ;;  %v6710_v46 = vmax.f32 %v6646_v32, %v6678_v49 }
 0x802   :  { %14027 = vst [vmem:[#allocation40_spill] sm:$0xff] %v11937_v63  ;;  %v11944_v11 = vmul.f32 0.2, %v11921_v43  ;;  %v11947_v48 = vadd.f32 %v4698_v54, %v11724_v5  ;;  %v6761_v44 = vmul.f32 %v11796_v28, %v6723_v14  ;;  %v6714_v16 = vmax.f32 %v6650_v50, %v6682_v38  ;;  %v11963_v54 = vpop.permute.xlu1 %6884 }
 0x803   :  { %v11951_v34 = vmul.f32 0.2, %v11925_v4  ;;  %v11954_v57 = vmul.f32 0.2, %v11929_v35  ;;  %v11959_v32 = vrot.slane %v6558_v29, %v13879_v21  ;;  %v6613_v27 = vrot.slane %v11911_v24, %v13879_v21  ;;  %14028 = vst [vmem:[#allocation42_spill] sm:$0xff] %v11963_v54 }
 0x804   :  { %v6746_v7 = vmul.f32 %v11796_v28, %v6708_v45  ;;  %v6749_v50 = vmul.f32 %v11796_v28, %v6711_v56  ;;  %v6760_v51 = vmul.f32 %v11796_v28, %v6722_v20  ;;  %v6753_v36 = vmul.f32 %v11796_v28, %v6715_v18 }
 0x805   :  { %4923 = vadd.xlane.f32.xlu0 %v4874_v0  ;;  %6810 = vadd.xlane.f32.xlu1 %v6761_v44  ;;  %v4825_v14 = vmax.f32 %v4761_v59, %v4793_v8  ;;  %v6748_v49 = vmul.f32 %v11796_v28, %v6710_v46  ;;  %v11973_v38 = vmul.f32 0.2, %v11947_v48  ;;  %v6660_v29 = vadd.f32 %v11941_v53, %v11731_v58  ;;  %v11977_v0 = vpop.permute.xlu0 %6976 }
 0x806   :  { %14029 = vst [vmem:[#allocation45_spill] sm:$0xff] %v11977_v0  ;;  %v6752_v45 = vmul.f32 %v11796_v28, %v6714_v16  ;;  %v4829_v18 = vmax.f32 %v11925_v4, %v11951_v34  ;;  %v14030_v20 = vcombine.high %v11799_v60, %v11799_v60  ;;  %v11990_v56 = vadd.f32 %v11876_v10, %v11728_v19 }
 0x807   :  { %v6692_v46 = vmul.f32 0.2, %v6660_v29  ;;  %v6662_v44 = vadd.f32 %v11959_v32, %v11731_v58  ;;  %v6667_v16 = vadd.f32 %v6613_v27, %v11726_v1  ;;  %v4863_v4 = vmul.f32 %v11774_v17, %v4825_v14 }
 0x808   :  { %v6577_v59 = vrot.slane %v14030_v20, %v13879_v21  ;;  %v6585_v60 = vrot.slane %v11841_v22, %v13879_v21  ;;  %v12000_v20 = vpop.permute.xlu1 %6972  ;;  %v6666_v0 = vadd.f32 %v6613_v27, %v11731_v58 }
 0x809   :  { %6780 = vadd.xlane.f32.xlu0 %v6746_v7  ;;  %6786 = vadd.xlane.f32.xlu1 %v6749_v50  ;;  %14031 = vst [vmem:[#allocation43_spill] sm:$0xff] %v12000_v20  ;;  %v6724_v25 = vmax.f32 %v6660_v29, %v6692_v46  ;;  %v6694_v8 = vmul.f32 0.2, %v6662_v44  ;;  %v6699_v62 = vmul.f32 0.2, %v6667_v16  ;;  %v12005_v50 = vadd.f32 %v11908_v23, %v11724_v5 }
 0x80a   :  { %v6649_v34 = vadd.f32 %v6577_v59, %v11726_v1  ;;  %v6648_v7 = vadd.f32 %v6577_v59, %v11731_v58  ;;  %v6653_v54 = vadd.f32 %v6585_v60, %v11726_v1  ;;  %v6698_v20 = vmul.f32 0.2, %v6666_v0 }
 0x80b   :  { %v12009_v59 = vmul.f32 %v11796_v28, %v6724_v25  ;;  %v6726_v12 = vmax.f32 %v6662_v44, %v6694_v8  ;;  %v6731_v42 = vmax.f32 %v6667_v16, %v6699_v62  ;;  %v14032_v23 = vcombine.high %v11821_v52, %v11821_v52 }
 0x80c   :  { %v6681_v14 = vmul.f32 0.2, %v6649_v34  ;;  %v6680_v63 = vmul.f32 0.2, %v6648_v7  ;;  %v6685_v27 = vmul.f32 0.2, %v6653_v54  ;;  %v6730_v62 = vmax.f32 %v6666_v0, %v6698_v20  ;;  %v12031_v16 = vpop.permute.xlu1 %4997 }
 0x80d   :  { %6808 = vadd.xlane.f32.xlu0 %v6760_v51  ;;  %v12011_v51 = vpop.permute.xlu0 %5001  ;;  %6794 = vadd.xlane.f32.xlu1 %v6753_v36  ;;  %v6589_v9 = vrot.slane %v14032_v23, %v13879_v21  ;;  %v12018_v15 = vmul.f32 %v11796_v28, %v6726_v12  ;;  %v12021_v25 = vmul.f32 %v11796_v28, %v6731_v42 }
 0x80e   :  { %v6713_v29 = vmax.f32 %v6649_v34, %v6681_v14  ;;  %v6712_v46 = vmax.f32 %v6648_v7, %v6680_v63  ;;  %v6652_v8 = vadd.f32 %v6585_v60, %v11731_v58  ;;  %v6717_v44 = vmax.f32 %v6653_v54, %v6685_v27 }
 0x80f   :  { %v6655_v52 = vadd.f32 %v6589_v9, %v11726_v1  ;;  %v4775_v12 = vadd.f32 %v11882_v31, %v11728_v19  ;;  %v12036_v42 = vmul.f32 %v11796_v28, %v6730_v62  ;;  %v6654_v0 = vadd.f32 %v6589_v9, %v11731_v58 }
 0x810   :  { %v12025_v36 = vmul.f32 %v11796_v28, %v6713_v29  ;;  %v12028_v63 = vmul.f32 %v11796_v28, %v6712_v46  ;;  %v4805_v34 = vmul.f32 0.2, %v11990_v56  ;;  %v4800_v7 = vmul.f32 0.2, %v12005_v50 }
 0x811   :  { %6784 = vadd.xlane.f32.xlu0 %v6748_v49  ;;  %v6684_v49 = vmul.f32 0.2, %v6652_v8  ;;  %4901 = vadd.xlane.f32.xlu1 %v4863_v4  ;;  %v12042_v54 = vmul.f32 %v11796_v28, %v6717_v44  ;;  %v6687_v60 = vmul.f32 0.2, %v6655_v52  ;;  %v4774_v20 = vadd.f32 %v11876_v10, %v11724_v5  ;;  %v12050_v9 = vpop.permute.xlu0 %5089 }
 0x812   :  { %v12048_v14 = vadd.f32 %v11886_v37, %v11728_v19  ;;  %v6686_v46 = vmul.f32 0.2, %v6654_v0  ;;  %14033 = vst [vmem:[#allocation41_spill] sm:$0xff] %v12050_v9  ;;  %v4867_v4 = vmul.f32 %v11774_v17, %v4829_v18  ;;  %v14034_v27 = vmax.f32 %v11921_v43, %v11944_v11 }
 0x813   :  { %v6716_v29 = vmax.f32 %v6652_v8, %v6684_v49  ;;  %v6719_v62 = vmax.f32 %v6655_v52, %v6687_v60  ;;  %v4807_v10 = vmul.f32 0.2, %v4775_v12  ;;  %v12061_v44 = vadd.f32 %v11882_v31, %v11724_v5 }
 0x814   :  { %v4864_v23 = vmul.f32 %v11774_v17, %v14034_v27  ;;  %v6718_v49 = vmax.f32 %v6654_v0, %v6686_v46  ;;  %v4837_v18 = vmax.f32 %v11990_v56, %v4805_v34  ;;  %v4832_v11 = vmax.f32 %v12005_v50, %v4800_v7 }
 0x815   :  { %6792 = vadd.xlane.f32.xlu0 %v6752_v45  ;;  %v4830_v45 = vmax.f32 %v11947_v48, %v11973_v38  ;;  %v12064_v8 = vmul.f32 %v11796_v28, %v6716_v29  ;;  %4909 = vadd.xlane.f32.xlu1 %v4867_v4  ;;  %v12070_v43 = vadd.f32 %v11941_v53, %v11726_v1  ;;  %v12075_v38 = vpop.permute.xlu1 %5085  ;;  %v4806_v31 = vmul.f32 0.2, %v4774_v20 }
 0x816   :  { %v12073_v48 = vmul.f32 %v11796_v28, %v6719_v62  ;;  %14035 = vst [vmem:[#allocation48_spill] sm:$0xff] %v12075_v38  ;;  %v4811_v52 = vmul.f32 0.2, %v12048_v14  ;;  %v12079_v0 = vmul.f32 %v11796_v28, %v6718_v49  ;;  %v6512_v56 = vcombine.high %v11841_v22, %v11841_v22 }
 0x817   :  { %v6559_v50 = vcombine.high %v11911_v24, %v11911_v24  ;;  %v14036_v53 = vmax.f32 %v11929_v35, %v11954_v57  ;;  %v12091_v7 = vadd.f32 %v11886_v37, %v11724_v5  ;;  %v4868_v60 = vmul.f32 %v11774_v17, %v4830_v45  ;;  %v12101_v35 = vpop.permute.xlu0 %6899 }
 0x818   :  { %v4839_v29 = vmax.f32 %v4775_v12, %v4807_v10  ;;  %v4808_v46 = vmul.f32 0.2, %v12061_v44  ;;  %v14037_v22 = vcombine.high %v11916_v61, %v11916_v61  ;;  %v6561_v24 = vcombine.high %v11932_v33, %v11932_v33 }
 0x819   :  { %4903 = vadd.xlane.f32.xlu0 %v4864_v23  ;;  %v4869_v34 = vmul.f32 %v11774_v17, %v14036_v53  ;;  %v4875_v57 = vmul.f32 %v11774_v17, %v4837_v18  ;;  %v4870_v37 = vmul.f32 %v11774_v17, %v4832_v11  ;;  %v6693_v27 = vmul.f32 0.2, %v12070_v43  ;;  %v12114_v11 = vpop.permute.xlu1 %6895 }
 0x81a   :  { %v6609_v4 = vrot.slane %v14037_v22, %v13879_v21  ;;  %v4838_v12 = vmax.f32 %v4774_v20, %v4806_v31  ;;  %v4843_v23 = vmax.f32 %v12048_v14, %v4811_v52  ;;  %v6617_v61 = vrot.slane %v11932_v33, %v13879_v21 }
 0x81b   :  { %4913 = vadd.xlane.f32.xlu1 %v4869_v34  ;;  %v4812_v62 = vmul.f32 0.2, %v12091_v7  ;;  %v6621_v49 = vrot.slane %v6559_v50, %v13879_v21  ;;  %v6593_v18 = vrot.slane %v6512_v56, %v13879_v21  ;;  %v4877_v53 = vmul.f32 %v11774_v17, %v4839_v29 }
 0x81c   :  { %v6665_v45 = vadd.f32 %v6609_v4, %v11726_v1  ;;  %v6664_v10 = vadd.f32 %v6609_v4, %v11731_v58  ;;  %v4840_v20 = vmax.f32 %v12061_v44, %v4808_v46  ;;  %v6669_v31 = vadd.f32 %v6617_v61, %v11726_v1  ;;  %v12125_v44 = vpop.permute.xlu0 %6987 }
 0x81d   :  { %4911 = vadd.xlane.f32.xlu0 %v4868_v60  ;;  %v6725_v33 = vmax.f32 %v12070_v43, %v6693_v27  ;;  %v6671_v34 = vadd.f32 %v6621_v49, %v11726_v1  ;;  %v6668_v60 = vadd.f32 %v6617_v61, %v11731_v58  ;;  %v4876_v56 = vmul.f32 %v11774_v17, %v4838_v12 }
 0x81e   :  { %v6697_v14 = vmul.f32 0.2, %v6665_v45  ;;  %v6696_v52 = vmul.f32 0.2, %v6664_v10  ;;  %v6663_v50 = vadd.f32 %v11959_v32, %v11726_v1  ;;  %v6701_v22 = vmul.f32 0.2, %v6669_v31 }
 0x81f   :  { %4925 = vadd.xlane.f32.xlu1 %v4875_v57  ;;  %v6703_v4 = vmul.f32 0.2, %v6671_v34  ;;  %v6700_v57 = vmul.f32 0.2, %v6668_v60  ;;  %v6657_v43 = vadd.f32 %v6593_v18, %v11726_v1  ;;  %v4881_v27 = vmul.f32 %v11774_v17, %v4843_v23 }
 0x820   :  { %v6729_v29 = vmax.f32 %v6665_v45, %v6697_v14  ;;  %v6728_v46 = vmax.f32 %v6664_v10, %v6696_v52  ;;  %v6670_v12 = vadd.f32 %v6621_v49, %v11731_v58  ;;  %v12136_v10 = vpop.permute.xlu1 %6983  ;;  %v6695_v52 = vmul.f32 0.2, %v6663_v50 }
 0x821   :  { %4915 = vadd.xlane.f32.xlu0 %v4870_v37  ;;  %v6733_v37 = vmax.f32 %v6669_v31, %v6701_v22  ;;  %v6735_v45 = vmax.f32 %v6671_v34, %v6703_v4  ;;  %v6732_v61 = vmax.f32 %v6668_v60, %v6700_v57  ;;  %v6689_v14 = vmul.f32 0.2, %v6657_v43  ;;  %v12151_v4 = vpop.permute.xlu0 %5012 }
 0x822   :  { %v12130_v9 = vmul.f32 %v11796_v28, %v6729_v29  ;;  %v12134_v32 = vmul.f32 %v11796_v28, %v6728_v46  ;;  %v6702_v23 = vmul.f32 0.2, %v6670_v12  ;;  %v6656_v29 = vadd.f32 %v6593_v18, %v11731_v58 }
 0x823   :  { %4929 = vadd.xlane.f32.xlu1 %v4877_v53  ;;  %v12139_v38 = vmul.f32 %v11796_v28, %v6733_v37  ;;  %v12143_v31 = vmul.f32 %v11796_v28, %v6735_v45  ;;  %v12146_v49 = vmul.f32 %v11796_v28, %v6732_v61  ;;  %v6721_v53 = vmax.f32 %v6657_v43, %v6689_v14 }
 0x824   :  { %v6625_v34 = vrot.slane %v6561_v24, %v13879_v21  ;;  %v4878_v60 = vmul.f32 %v11774_v17, %v4840_v20  ;;  %v6734_v22 = vmax.f32 %v6670_v12, %v6702_v23  ;;  %v6688_v46 = vmul.f32 0.2, %v6656_v29  ;;  %v12162_v45 = vpop.permute.xlu1 %5008 }
 0x825   :  { %4927 = vadd.xlane.f32.xlu0 %v4876_v56  ;;  %v4844_v56 = vmax.f32 %v12091_v7, %v4812_v62  ;;  %v12154_v18 = vmul.f32 %v11796_v28, %v6721_v53  ;;  %v6763_v20 = vmul.f32 %v11796_v28, %v6725_v33  ;;  %v6727_v7 = vmax.f32 %v6663_v50, %v6695_v52  ;;  %v12170_v23 = vpop.permute.xlu0 %5100 }
 0x826   :  { %v6673_v57 = vadd.f32 %v6625_v34, %v11726_v1  ;;  %v6672_v37 = vadd.f32 %v6625_v34, %v11731_v58  ;;  %v12159_v43 = vmul.f32 %v11796_v28, %v6734_v22  ;;  %v6720_v24 = vmax.f32 %v6656_v29, %v6688_v46 }
 0x827   :  { %4937 = vadd.xlane.f32.xlu1 %v4881_v27  ;;  %v4882_v27 = vmul.f32 %v11774_v17, %v4844_v56  ;;  %v4625_v14 = vcombine.high %v11814_v6, %v11814_v6  ;;  %v6765_v33 = vmul.f32 %v11796_v28, %v6727_v7  ;;  %v4642_v53 = vcombine.high %v11826_v30, %v11826_v30 }
 0x828   :  { %v6705_v62 = vmul.f32 0.2, %v6673_v57  ;;  %v6704_v12 = vmul.f32 0.2, %v6672_v37  ;;  %v12166_v61 = vmul.f32 %v11796_v28, %v6720_v24  ;;  %v12179_v29 = vpop.permute.xlu1 %5096  ;;  %v4673_v6 = vcombine.high %v11854_v40, %v11854_v40 }
 0x829   :  { %4931 = vadd.xlane.f32.xlu0 %v4878_v60  ;;  %v4706_v34 = vrot.slane %v4625_v14, %v13879_v21  ;;  %v12187_v60 = vpop.permute.xlu0 %6910  ;;  %v4672_v30 = vcombine.high %v11851_v39, %v11851_v39 }
 0x82a   :  { %v6737_v1 = vmax.f32 %v6673_v57, %v6705_v62  ;;  %v6736_v58 = vmax.f32 %v6672_v37, %v6704_v12 }
 0x82b   :  { %6814 = vadd.xlane.f32.xlu1 %v6763_v20  ;;  %v4769_v56 = vadd.f32 %v4706_v34, %v11728_v19  ;;  %v4770_v46 = vadd.f32 %v4706_v34, %v11724_v5  ;;  %v4734_v39 = vrot.slane %v4672_v30, %v13879_v21 }
 0x82c   :  { %v12174_v50 = vmul.f32 %v11796_v28, %v6737_v1  ;;  %v12177_v52 = vmul.f32 %v11796_v28, %v6736_v58  ;;  %v4670_v28 = vrot.slane %v4642_v53, %v14013_v3  ;;  %v12194_v22 = vpop.permute.xlu1 %6906 }
 0x82d   :  { %4939 = vadd.xlane.f32.xlu0 %v4882_v27  ;;  %v12200_v40 = vpop.permute.xlu0 %6998  ;;  %v4802_v24 = vmul.f32 0.2, %v4770_v46 }
 0x82e   :  { %v4730_v3 = vrot.slane %v4670_v28, %v13879_v21 }
 0x82f   :  { %6818 = vadd.xlane.f32.xlu1 %v6765_v33  ;;  %v4834_v1 = vmax.f32 %v4770_v46, %v4802_v24 }
 0x830   :  { %v12206_v57 = vpop.permute.xlu1 %6994  ;;  %v4781_v37 = vadd.f32 %v4730_v3, %v11728_v19  ;;  %v4782_v14 = vadd.f32 %v4730_v3, %v11724_v5 }
 0x831   :  { %6812 = vadd.xlane.f32.xlu0 %v12009_v59  ;;  %v4722_v59 = vrot.slane %v4673_v6, %v13879_v21  ;;  %v12212_v7 = vpop.permute.xlu0 %5023  ;;  %v4872_v6 = vmul.f32 %v11774_v17, %v4834_v1 }
 0x832   :  { %v4813_v12 = vmul.f32 0.2, %v4781_v37 }
 0x833   :  { %6790 = vadd.xlane.f32.xlu1 %v12025_v36  ;;  %v4801_v36 = vmul.f32 0.2, %v4769_v56  ;;  %v4778_v20 = vadd.f32 %v4722_v59, %v11724_v5 }
 0x834   :  { %v12218_v27 = vpop.permute.xlu1 %5019 }
 0x835   :  { %6816 = vadd.xlane.f32.xlu0 %v12018_v15  ;;  %v4777_v15 = vadd.f32 %v4722_v59, %v11728_v19  ;;  %v4810_v58 = vmul.f32 0.2, %v4778_v20  ;;  %v12222_v33 = vpop.permute.xlu0 %5111  ;;  %v4784_v59 = vadd.f32 %v4734_v39, %v11724_v5 }
 0x837   :  { %6826 = vadd.xlane.f32.xlu1 %v12021_v25  ;;  %v4833_v25 = vmax.f32 %v4769_v56, %v4801_v36  ;;  %v4842_v34 = vmax.f32 %v4778_v20, %v4810_v58  ;;  %v4814_v56 = vmul.f32 0.2, %v4782_v14  ;;  %v4816_v46 = vmul.f32 0.2, %v4784_v59 }
 0x838   :  { %v12227_v30 = vpop.permute.xlu1 %5107 }
 0x839   :  { %6788 = vadd.xlane.f32.xlu0 %v12028_v63  ;;  %v4809_v63 = vmul.f32 0.2, %v4777_v15  ;;  %v4846_v3 = vmax.f32 %v4782_v14, %v4814_v56  ;;  %v4848_v20 = vmax.f32 %v4784_v59, %v4816_v46 }
 0x83b   :  { %6798 = vadd.xlane.f32.xlu1 %v12042_v54  ;;  %v4871_v54 = vmul.f32 %v11774_v17, %v4833_v25  ;;  %v4841_v62 = vmax.f32 %v4777_v15, %v4809_v63  ;;  %v12231_v25 = vpop.permute.xlu0 %6921  ;;  %v4674_v63 = vcombine.high %v4670_v28, %v4670_v28 }
 0x83c   :  { %v12234_v24 = vpop.permute.xlu1 %6917 }
 0x83d   :  { %6824 = vadd.xlane.f32.xlu0 %v12036_v42  ;;  %v4783_v42 = vadd.f32 %v4734_v39, %v11728_v19  ;;  %v4884_v39 = vmul.f32 %v11774_v17, %v4846_v3 }
 0x83f   :  { %6802 = vadd.xlane.f32.xlu1 %v12073_v48  ;;  %v4879_v48 = vmul.f32 %v11774_v17, %v4841_v62  ;;  %v4815_v53 = vmul.f32 0.2, %v4783_v42  ;;  %v4738_v62 = vrot.slane %v4674_v63, %v13879_v21 }
 0x841   :  { %6796 = vadd.xlane.f32.xlu0 %v12064_v8  ;;  %v4845_v8 = vmax.f32 %v4781_v37, %v4813_v12  ;;  %v4847_v15 = vmax.f32 %v4783_v42, %v4815_v53  ;;  %v4886_v12 = vmul.f32 %v11774_v17, %v4848_v20  ;;  %v12242_v42 = vpop.permute.xlu1 %7005  ;;  %v4785_v28 = vadd.f32 %v4738_v62, %v11728_v19 }
 0x843   :  { %4917 = vadd.xlane.f32.xlu1 %v4871_v54  ;;  %v4883_v36 = vmul.f32 %v11774_v17, %v4845_v8  ;;  %v4885_v37 = vmul.f32 %v11774_v17, %v4847_v15  ;;  %v12237_v54 = vpop.permute.xlu0 %7009  ;;  %v4817_v58 = vmul.f32 0.2, %v4785_v28 }
 0x845   :  { %6800 = vadd.xlane.f32.xlu0 %v12079_v0  ;;  %v4880_v0 = vmul.f32 %v11774_v17, %v4842_v34  ;;  %v12249_v14 = vpop.permute.xlu1 %5030  ;;  %v4849_v8 = vmax.f32 %v4785_v28, %v4817_v58  ;;  %v14045_v28 = vld [vmem:[#allocation63_spill] sm:$0xff] }
 0x847   :  { %4933 = vadd.xlane.f32.xlu1 %v4879_v48  ;;  %v12245_v1 = vpop.permute.xlu0 %5034  ;;  %v4786_v48 = vadd.f32 %v4738_v62, %v11724_v5  ;;  %v14043_v62 = vld [vmem:[#allocation47_spill] sm:$0xff] }
 0x849   :  { %4919 = vadd.xlane.f32.xlu0 %v4872_v6  ;;  %v4818_v53 = vmul.f32 0.2, %v4786_v48  ;;  %v12257_v19 = vpop.permute.xlu1 %5118 }
 0x84b   :  { %4941 = vadd.xlane.f32.xlu1 %v4883_v36 }
 0x84d   :  { %4935 = vadd.xlane.f32.xlu0 %v4880_v0  ;;  %v12264_v5 = vpop.permute.xlu1 %6928 }
 0x84f   :  { %4945 = vadd.xlane.f32.xlu1 %v4885_v37 }
 0x851   :  { %4943 = vadd.xlane.f32.xlu0 %v4884_v39 }
 0x853   :  { %6822 = vadd.xlane.f32.xlu1 %v12130_v9  ;;  %v12254_v9 = vpop.permute.xlu0 %5122 }
 0x855   :  { %4947 = vadd.xlane.f32.xlu0 %v4886_v12 }
 0x857   :  { %6830 = vadd.xlane.f32.xlu1 %v12139_v38  ;;  %v4887_v38 = vmul.f32 %v11774_v17, %v4849_v8  ;;  %v12261_v6 = vpop.permute.xlu0 %6932  ;;  %v14047_v8 = vld [vmem:[#allocation59_spill] sm:$0xff] }
 0x859   :  { %6820 = vadd.xlane.f32.xlu0 %v12134_v32  ;;  %v4850_v32 = vmax.f32 %v4786_v48, %v4818_v53 }
 0x85b   :  { %6834 = vadd.xlane.f32.xlu1 %v12143_v31  ;;  %v4888_v31 = vmul.f32 %v11774_v17, %v4850_v32 }
 0x85d   :  { %6828 = vadd.xlane.f32.xlu0 %v12146_v49  ;;  %v12268_v49 = vpop.permute.xlu0 %7020 }
 0x85f   :  { %6806 = vadd.xlane.f32.xlu1 %v12154_v18  ;;  %v12270_v18 = vpop.permute.xlu1 %7016 }
 0x861   :  { %6832 = vadd.xlane.f32.xlu0 %v12159_v43  ;;  %v12273_v43 = vpop.permute.xlu0 %5045 }
 0x863   :  { %4949 = vadd.xlane.f32.xlu1 %v4887_v38  ;;  %v12275_v34 = vpop.permute.xlu1 %5041 }
 0x865   :  { %6804 = vadd.xlane.f32.xlu0 %v12166_v61  ;;  %v12277_v56 = vpop.permute.xlu0 %5133 }
 0x867   :  { %6838 = vadd.xlane.f32.xlu1 %v12174_v50  ;;  %v12279_v61 = vpop.permute.xlu1 %5129 }
 0x869   :  { %4951 = vadd.xlane.f32.xlu0 %v4888_v31  ;;  %v14050_v31 = vld [vmem:[#allocation64_spill] sm:$0xff] }
 0x86d   :  { %6836 = vadd.xlane.f32.xlu0 %v12177_v52 }
 0x87a   :  { %v4892_v59 = vpop.xlane.xlu0 %4891  ;;  %v4890_v36 = vpop.xlane.xlu1 %4889 }
 0x87b   :  { %v12282_v17 = vadd.f32 %v11713_v2, %v4890_v36  ;;  %v12289_v52 = vadd.f32 %v11710_v47, %v4892_v59  ;;  %v14052_v36 = vld [vmem:[#allocation44_spill] sm:$0xff] }
 0x87d   :  { %5232 = vperm.xlu1 %8894, %v12282_v17   ;;  %14039 = vst [vmem:[#allocation60_spill] sm:$0xff] %v12289_v52 }
 0x87e   :  { %v6777_v50 = vpop.xlane.xlu0 %6776  ;;  %v6779_v0 = vpop.xlane.xlu1 %6778 }
 0x87f   :  { %v12286_v15 = vadd.f32 %v11690_v26, %v6777_v50  ;;  %v12297_v2 = vadd.f32 %v11694_v55, %v6779_v0 }
 0x881   :  { %14038 = vst [vmem:[#allocation38_spill] sm:$0xff] %v12286_v15  ;;  %7119 = vperm.xlu1 %8894, %v12286_v15   ;;  %14041 = vst [vmem:[#allocation62_spill] sm:$0xff] %v12297_v2 }
 0x882   :  { %v4894_v3 = vpop.xlane.xlu0 %4893  ;;  %v4898_v63 = vpop.xlane.xlu1 %4897 }
 0x883   :  { %5235 = vperm.xlu0 %8893, %v12289_v52   ;;  %v12294_v46 = vadd.f32 %v11721_v13, %v4894_v3  ;;  %v12310_v58 = vadd.f32 %v14045_v28, %v4898_v63  ;;  %v14059_v28 = vld [vmem:[#allocation53_spill] sm:$0xff] }
 0x885   :  { %14040 = vst [vmem:[#allocation58_spill] sm:$0xff] %v12294_v46  ;;  %5238 = vperm.xlu1 %8894, %v12294_v46   ;;  %14046 = vst [vmem:[#allocation69_spill] sm:$0xff] %v12310_v58 }
 0x886   :  { %v4896_v37 = vpop.xlane.xlu0 %4895  ;;  %v4906_v47 = vpop.xlane.xlu1 %4905 }
 0x887   :  { %7122 = vperm.xlu0 %8893, %v12297_v2   ;;  %v12302_v26 = vadd.f32 %v11716_v41, %v4896_v37  ;;  %v12318_v38 = vadd.f32 %v12162_v45, %v4906_v47  ;;  %v14055_v45 = vld [vmem:[#allocation35_spill] sm:$0xff] }
 0x889   :  { %14042 = vst [vmem:[#allocation51_spill] sm:$0xff] %v12302_v26  ;;  %14049 = vst [vmem:[#allocation34_spill] sm:$0xff] %v12318_v38 }
 0x88a   :  { %v4900_v39 = vpop.xlane.xlu0 %4899  ;;  %v4922_v20 = vpop.xlane.xlu1 %4921 }
 0x88b   :  { %5241 = vperm.xlu0 %8893, %v12302_v26   ;;  %v12306_v13 = vadd.f32 %v14043_v62, %v4922_v20  ;;  %v12321_v59 = vadd.f32 %v14050_v31, %v4900_v39  ;;  %v14057_v20 = vld [vmem:[#allocation78_spill] sm:$0xff] }
 0x88d   :  { %14044 = vst [vmem:[#allocation67_spill] sm:$0xff] %v12306_v13  ;;  %5280 = vperm.xlu1 %8894, %v12306_v13   ;;  %14051 = vst [vmem:[#allocation33_spill] sm:$0xff] %v12321_v59  ;;  %v14071_v13 = vld [vmem:[#allocation39_spill] sm:$0xff] }
 0x88e   :  { %v4908_v12 = vpop.xlane.xlu0 %4907  ;;  %v6783_v55 = vpop.xlane.xlu1 %6782 }
 0x88f   :  { %v12329_v63 = vadd.f32 %v12151_v4, %v4908_v12  ;;  %v12337_v62 = vadd.f32 %v14057_v20, %v6783_v55  ;;  %v14061_v12 = vld [vmem:[#allocation50_spill] sm:$0xff] }
 0x891   :  { %5244 = vperm.xlu1 %8894, %v12310_v58   ;;  %14054 = vst [vmem:[#allocation76_spill] sm:$0xff] %v12329_v63  ;;  %14058 = vst [vmem:[#allocation79_spill] sm:$0xff] %v12337_v62 }
 0x892   :  { %v4924_v48 = vpop.xlane.xlu0 %4923  ;;  %v6811_v41 = vpop.xlane.xlu1 %6810 }
 0x893   :  { %v12313_v53 = vadd.f32 %v14047_v8, %v4924_v48 }
 0x895   :  { %14048 = vst [vmem:[#allocation74_spill] sm:$0xff] %v12313_v53  ;;  %5283 = vperm.xlu0 %8893, %v12313_v53   ;;  %5256 = vperm.xlu1 %8894, %v12318_v38  }
 0x896   :  { %v6781_v32 = vpop.xlane.xlu0 %6780  ;;  %v6787_v0 = vpop.xlane.xlu1 %6786 }
 0x897   :  { %v12325_v50 = vadd.f32 %v14052_v36, %v6781_v32  ;;  %v12345_v32 = vadd.f32 %v14061_v12, %v6811_v41 }
 0x899   :  { %14053 = vst [vmem:[#allocation71_spill] sm:$0xff] %v12325_v50  ;;  %5247 = vperm.xlu0 %8893, %v12321_v59   ;;  %7125 = vperm.xlu1 %8894, %v12325_v50   ;;  %14062 = vst [vmem:[#allocation56_spill] sm:$0xff] %v12345_v32 }
 0x89a   :  { %v6809_v3 = vpop.xlane.xlu0 %6808  ;;  %v6795_v47 = vpop.xlane.xlu1 %6794 }
 0x89b   :  { %v12333_v37 = vadd.f32 %v14055_v45, %v6809_v3  ;;  %v14064_v3 = vld [vmem:[#allocation52_spill] sm:$0xff]  ;;  %v12358_v41 = vadd.f32 %v12101_v35, %v6795_v47 }
 0x89c   :  { %v12353_v45 = vadd.f32 %v14064_v3, %v6787_v0  ;;  %v14069_v3 = vld [vmem:[#allocation22_spill] sm:$0xff] }
 0x89d   :  { %14056 = vst [vmem:[#allocation73_spill] sm:$0xff] %v12333_v37  ;;  %5259 = vperm.xlu0 %8893, %v12329_v63   ;;  %7167 = vperm.xlu1 %8894, %v12333_v37   ;;  %14066 = vst [vmem:[#allocation66_spill] sm:$0xff] %v12358_v41 }
 0x89e   :  { %v6785_v39 = vpop.xlane.xlu0 %6784  ;;  %v4902_v8 = vpop.xlane.xlu1 %4901  ;;  %14065 = vst [vmem:[#allocation57_spill] sm:$0xff] %v12353_v45 }
 0x89f   :  { %v12341_v48 = vadd.f32 %v14059_v28, %v6785_v39  ;;  %v12374_v47 = vadd.f32 %v12031_v16, %v4902_v8 }
 0x8a1   :  { %14060 = vst [vmem:[#allocation75_spill] sm:$0xff] %v12341_v48  ;;  %7128 = vperm.xlu0 %8893, %v12337_v62   ;;  %7131 = vperm.xlu1 %8894, %v12341_v48   ;;  %14073 = vst [vmem:[#allocation68_spill] sm:$0xff] %v12374_v47 }
 0x8a2   :  { %v6793_v4 = vpop.xlane.xlu0 %6792  ;;  %v4910_v36 = vpop.xlane.xlu1 %4909 }
 0x8a3   :  { %v12349_v31 = vadd.f32 %v12114_v11, %v6793_v4  ;;  %v14067_v11 = vld [vmem:[#allocation46_spill] sm:$0xff]  ;;  %v12390_v8 = vadd.f32 %v12218_v27, %v4910_v36  ;;  %v14082_v36 = vld [vmem:[#allocation37_spill] sm:$0xff] }
 0x8a5   :  { %14063 = vst [vmem:[#allocation77_spill] sm:$0xff] %v12349_v31  ;;  %7170 = vperm.xlu0 %8893, %v12345_v32   ;;  %7143 = vperm.xlu1 %8894, %v12349_v31   ;;  %14078 = vst [vmem:[#allocation63_spill] sm:$0xff] %v12390_v8 }
 0x8a6   :  { %v4904_v55 = vpop.xlane.xlu0 %4903 }
 0x8a8   :  { %v4914_v39 = vpop.xlane.xlu1 %4913 }
 0x8a9   :  { %7134 = vperm.xlu0 %8893, %v12353_v45  }
 0x8aa   :  { %v4912_v20 = vpop.xlane.xlu0 %4911 }
 0x8ac   :  { %v4926_v28 = vpop.xlane.xlu1 %4925 }
 0x8ad   :  { %7146 = vperm.xlu0 %8893, %v12358_v41   ;;  %v12362_v4 = vadd.f32 %v14067_v11, %v4926_v28  ;;  %v14074_v11 = vld [vmem:[#allocation23_spill] sm:$0xff] }
 0x8ae   :  { %v4916_v12 = vpop.xlane.xlu0 %4915 }
 0x8af   :  { %14068 = vst [vmem:[#allocation70_spill] sm:$0xff] %v12362_v4  ;;  %5286 = vperm.xlu1 %8894, %v12362_v4  }
 0x8b0   :  { %v4930_v0 = vpop.xlane.xlu1 %4929 }
 0x8b1   :  { %v12366_v37 = vadd.f32 %v14069_v3, %v4930_v0  ;;  %v12385_v3 = vadd.f32 %v12011_v51, %v4904_v55  ;;  %v12398_v51 = vadd.f32 %v12249_v14, %v4914_v39  ;;  %v14085_v39 = vld [vmem:[#allocation61_spill] sm:$0xff] }
 0x8b2   :  { %v4928_v32 = vpop.xlane.xlu0 %4927 }
 0x8b3   :  { %14070 = vst [vmem:[#allocation72_spill] sm:$0xff] %v12366_v37  ;;  %v12369_v53 = vadd.f32 %v14071_v13, %v4928_v32  ;;  %5292 = vperm.xlu1 %8894, %v12366_v37   ;;  %14077 = vst [vmem:[#allocation47_spill] sm:$0xff] %v12385_v3 }
 0x8b4   :  { %v4938_v35 = vpop.xlane.xlu1 %4937  ;;  %14080 = vst [vmem:[#allocation64_spill] sm:$0xff] %v12398_v51 }
 0x8b5   :  { %14072 = vst [vmem:[#allocation36_spill] sm:$0xff] %v12369_v53  ;;  %5289 = vperm.xlu0 %8893, %v12369_v53   ;;  %v12382_v13 = vadd.f32 %v12179_v29, %v4938_v35  ;;  %v12401_v35 = vadd.f32 %v12212_v7, %v4912_v20 }
 0x8b6   :  { %v4932_v28 = vpop.xlane.xlu0 %4931 }
 0x8b7   :  { %v12377_v31 = vadd.f32 %v14074_v11, %v4932_v28  ;;  %5250 = vperm.xlu1 %8894, %v12374_v47   ;;  %14076 = vst [vmem:[#allocation31_spill] sm:$0xff] %v12382_v13  ;;  %14081 = vst [vmem:[#allocation44_spill] sm:$0xff] %v12401_v35 }
 0x8b8   :  { %v6815_v0 = vpop.xlane.xlu1 %6814 }
 0x8b9   :  { %14075 = vst [vmem:[#allocation32_spill] sm:$0xff] %v12377_v31  ;;  %5295 = vperm.xlu0 %8893, %v12377_v31  }
 0x8ba   :  { %v4940_v32 = vpop.xlane.xlu0 %4939 }
 0x8bb   :  { %5304 = vperm.xlu1 %8894, %v12382_v13   ;;  %v12393_v11 = vadd.f32 %v12170_v23, %v4940_v32  ;;  %v12409_v13 = vadd.f32 %v12245_v1, %v4916_v12 }
 0x8bc   :  { %v6819_v16 = vpop.xlane.xlu1 %6818 }
 0x8bd   :  { %5253 = vperm.xlu0 %8893, %v12385_v3   ;;  %14079 = vst [vmem:[#allocation59_spill] sm:$0xff] %v12393_v11  ;;  %14084 = vst [vmem:[#allocation78_spill] sm:$0xff] %v12409_v13 }
 0x8be   :  { %v6813_v28 = vpop.xlane.xlu0 %6812 }
 0x8bf   :  { %5262 = vperm.xlu1 %8894, %v12390_v8   ;;  %v12406_v23 = vadd.f32 %v14082_v36, %v6813_v28  ;;  %v14089_v36 = vld [vmem:[#allocation42_spill] sm:$0xff] }
 0x8c0   :  { %v6791_v29 = vpop.xlane.xlu1 %6790 }
 0x8c1   :  { %5307 = vperm.xlu0 %8893, %v12393_v11   ;;  %14083 = vst [vmem:[#allocation35_spill] sm:$0xff] %v12406_v23  ;;  %v14087_v11 = vld [vmem:[#allocation49_spill] sm:$0xff] }
 0x8c2   :  { %v6817_v55 = vpop.xlane.xlu0 %6816  ;;  %v12417_v37 = vadd.f32 %v14087_v11, %v6815_v0 }
 0x8c3   :  { %5268 = vperm.xlu1 %8894, %v12398_v51   ;;  %v12414_v7 = vadd.f32 %v14085_v39, %v6817_v55  ;;  %v14094_v39 = vld [vmem:[#allocation40_spill] sm:$0xff] }
 0x8c4   :  { %v6827_v27 = vpop.xlane.xlu1 %6826  ;;  %14088 = vst [vmem:[#allocation50_spill] sm:$0xff] %v12417_v37 }
 0x8c5   :  { %5265 = vperm.xlu0 %8893, %v12401_v35   ;;  %14086 = vst [vmem:[#allocation53_spill] sm:$0xff] %v12414_v7  ;;  %v14126_v35 = vld [vmem:[#allocation54_spill] sm:$0xff] }
 0x8c6   :  { %v6789_v32 = vpop.xlane.xlu0 %6788 }
 0x8c7   :  { %7173 = vperm.xlu1 %8894, %v12406_v23   ;;  %v12422_v1 = vadd.f32 %v14089_v36, %v6789_v32  ;;  %v14091_v23 = vld [vmem:[#allocation55_spill] sm:$0xff]  ;;  %v12441_v36 = vadd.f32 %v12125_v44, %v6827_v27 }
 0x8c8   :  { %v6799_v14 = vpop.xlane.xlu1 %6798  ;;  %v12425_v4 = vadd.f32 %v14091_v23, %v6819_v16 }
 0x8c9   :  { %5271 = vperm.xlu0 %8893, %v12409_v13   ;;  %14090 = vst [vmem:[#allocation52_spill] sm:$0xff] %v12422_v1  ;;  %14097 = vst [vmem:[#allocation37_spill] sm:$0xff] %v12441_v36 }
 0x8ca   :  { %v6825_v20 = vpop.xlane.xlu0 %6824  ;;  %14092 = vst [vmem:[#allocation46_spill] sm:$0xff] %v12425_v4 }
 0x8cb   :  { %7179 = vperm.xlu1 %8894, %v12414_v7   ;;  %v12430_v0 = vadd.f32 %v12136_v10, %v6825_v20  ;;  %v12433_v7 = vadd.f32 %v14094_v39, %v6791_v29  ;;  %v12449_v39 = vadd.f32 %v12187_v60, %v6799_v14 }
 0x8cc   :  { %v6803_v28 = vpop.xlane.xlu1 %6802 }
 0x8cd   :  { %7176 = vperm.xlu0 %8893, %v12417_v37   ;;  %14093 = vst [vmem:[#allocation22_spill] sm:$0xff] %v12430_v0  ;;  %14095 = vst [vmem:[#allocation39_spill] sm:$0xff] %v12433_v7 }
 0x8ce   :  { %v6797_v12 = vpop.xlane.xlu0 %6796  ;;  %14099 = vst [vmem:[#allocation49_spill] sm:$0xff] %v12449_v39 }
 0x8cf   :  { %7137 = vperm.xlu1 %8894, %v12422_v1   ;;  %v12438_v16 = vadd.f32 %v12194_v22, %v6797_v12  ;;  %v14100_v12 = vld [vmem:[#allocation48_spill] sm:$0xff] }
 0x8d0   :  { %v4918_v55 = vpop.xlane.xlu1 %4917 }
 0x8d1   :  { %7182 = vperm.xlu0 %8893, %v12425_v4   ;;  %14096 = vst [vmem:[#allocation23_spill] sm:$0xff] %v12438_v16 }
 0x8d2   :  { %v6801_v11 = vpop.xlane.xlu0 %6800 }
 0x8d3   :  { %7191 = vperm.xlu1 %8894, %v12430_v0   ;;  %v12446_v29 = vadd.f32 %v12234_v24, %v6801_v11  ;;  %v12457_v0 = vadd.f32 %v12231_v25, %v6803_v28  ;;  %v14104_v11 = vld [vmem:[#allocation41_spill] sm:$0xff] }
 0x8d4   :  { %v4934_v32 = vpop.xlane.xlu1 %4933 }
 0x8d5   :  { %7140 = vperm.xlu0 %8893, %v12433_v7   ;;  %14098 = vst [vmem:[#allocation61_spill] sm:$0xff] %v12446_v29  ;;  %v12454_v44 = vadd.f32 %v14100_v12, %v4934_v32  ;;  %14102 = vst [vmem:[#allocation55_spill] sm:$0xff] %v12457_v0 }
 0x8d6   :  { %v4920_v23 = vpop.xlane.xlu0 %4919 }
 0x8d7   :  { %7149 = vperm.xlu1 %8894, %v12438_v16   ;;  %14101 = vst [vmem:[#allocation42_spill] sm:$0xff] %v12454_v44 }
 0x8d8   :  { %v4942_v10 = vpop.xlane.xlu1 %4941 }
 0x8d9   :  { %7194 = vperm.xlu0 %8893, %v12441_v36   ;;  %v12462_v60 = vadd.f32 %v12227_v30, %v4942_v10  ;;  %v12478_v10 = vadd.f32 %v12275_v34, %v4918_v55 }
 0x8da   :  { %v4936_v20 = vpop.xlane.xlu0 %4935 }
 0x8db   :  { %7155 = vperm.xlu1 %8894, %v12446_v29   ;;  %14103 = vst [vmem:[#allocation40_spill] sm:$0xff] %v12462_v60  ;;  %v12465_v36 = vadd.f32 %v14104_v11, %v4936_v20  ;;  %14108 = vst [vmem:[#allocation81_spill] sm:$0xff] %v12478_v10 }
 0x8dc   :  { %v4946_v22 = vpop.xlane.xlu1 %4945 }
 0x8dd   :  { %7152 = vperm.xlu0 %8893, %v12449_v39   ;;  %14105 = vst [vmem:[#allocation48_spill] sm:$0xff] %v12465_v36  ;;  %v12470_v25 = vadd.f32 %v12257_v19, %v4946_v22  ;;  %v14110_v19 = vld [vmem:[#allocation43_spill] sm:$0xff] }
 0x8de   :  { %v4944_v27 = vpop.xlane.xlu0 %4943 }
 0x8df   :  { %5298 = vperm.xlu1 %8894, %v12454_v44   ;;  %14106 = vst [vmem:[#allocation41_spill] sm:$0xff] %v12470_v25  ;;  %v12473_v12 = vadd.f32 %v12222_v33, %v4944_v27  ;;  %v12489_v27 = vadd.f32 %v12273_v43, %v4920_v23 }
 0x8e0   :  { %v6823_v24 = vpop.xlane.xlu1 %6822 }
 0x8e1   :  { %7158 = vperm.xlu0 %8893, %v12457_v0   ;;  %14107 = vst [vmem:[#allocation80_spill] sm:$0xff] %v12473_v12  ;;  %14112 = vst [vmem:[#allocation83_spill] sm:$0xff] %v12489_v27 }
 0x8e2   :  { %v4948_v14 = vpop.xlane.xlu0 %4947 }
 0x8e3   :  { %5310 = vperm.xlu1 %8894, %v12462_v60   ;;  %v12481_v11 = vadd.f32 %v12254_v9, %v4948_v14  ;;  %v14114_v9 = vld [vmem:[#allocation45_spill] sm:$0xff] }
 0x8e4   :  { %v6831_v32 = vpop.xlane.xlu1 %6830  ;;  %v12497_v55 = vadd.f32 %v14114_v9, %v6823_v24 }
 0x8e5   :  { %5301 = vperm.xlu0 %8893, %v12465_v36   ;;  %14109 = vst [vmem:[#allocation82_spill] sm:$0xff] %v12481_v11  ;;  %v12505_v23 = vadd.f32 %v12200_v40, %v6831_v32 }
 0x8e6   :  { %v6821_v28 = vpop.xlane.xlu0 %6820  ;;  %14115 = vst [vmem:[#allocation45_spill] sm:$0xff] %v12497_v55 }
 0x8e7   :  { %5316 = vperm.xlu1 %8894, %v12470_v25   ;;  %v12486_v22 = vadd.f32 %v14110_v19, %v6821_v28  ;;  %14117 = vst [vmem:[#allocation86_spill] sm:$0xff] %v12505_v23 }
 0x8e8   :  { %v6835_v30 = vpop.xlane.xlu1 %6834 }
 0x8e9   :  { %5313 = vperm.xlu0 %8893, %v12473_v12   ;;  %14111 = vst [vmem:[#allocation43_spill] sm:$0xff] %v12486_v22  ;;  %v12513_v24 = vadd.f32 %v12237_v54, %v6835_v30 }
 0x8ea   :  { %v6829_v20 = vpop.xlane.xlu0 %6828 }
 0x8eb   :  { %5274 = vperm.xlu1 %8894, %v12478_v10   ;;  %v12494_v34 = vadd.f32 %v12206_v57, %v6829_v20  ;;  %14119 = vst [vmem:[#allocation88_spill] sm:$0xff] %v12513_v24 }
 0x8ec   :  { %v6807_v4 = vpop.xlane.xlu1 %6806 }
 0x8ed   :  { %5319 = vperm.xlu0 %8893, %v12481_v11   ;;  %14113 = vst [vmem:[#allocation84_spill] sm:$0xff] %v12494_v34  ;;  %v12521_v40 = vadd.f32 %v12261_v6, %v6807_v4 }
 0x8ee   :  { %v6833_v33 = vpop.xlane.xlu0 %6832 }
 0x8ef   :  { %7185 = vperm.xlu1 %8894, %v12486_v22   ;;  %v12502_v43 = vadd.f32 %v12242_v42, %v6833_v33  ;;  %14121 = vst [vmem:[#allocation90_spill] sm:$0xff] %v12521_v40 }
 0x8f0   :  { %v4950_v28 = vpop.xlane.xlu1 %4949 }
 0x8f1   :  { %5277 = vperm.xlu0 %8893, %v12489_v27   ;;  %14116 = vst [vmem:[#allocation85_spill] sm:$0xff] %v12502_v43  ;;  %v12518_v42 = vadd.f32 %v12279_v61, %v4950_v28  ;;  %v14125_v27 = vld [vmem:[#allocation65_spill] sm:$0xff] }
 0x8f2   :  { %v6805_v14 = vpop.xlane.xlu0 %6804 }
 0x8f3   :  { %7197 = vperm.xlu1 %8894, %v12494_v34   ;;  %v12510_v57 = vadd.f32 %v12264_v5, %v6805_v14  ;;  %14120 = vst [vmem:[#allocation89_spill] sm:$0xff] %v12518_v42 }
 0x8f4   :  { %v6839_v20 = vpop.xlane.xlu1 %6838 }
 0x8f5   :  { %7188 = vperm.xlu0 %8893, %v12497_v55   ;;  %14118 = vst [vmem:[#allocation87_spill] sm:$0xff] %v12510_v57  ;;  %v12540_v6 = vadd.f32 %v12268_v49, %v6839_v20 }
 0x8f6   :  { %v4952_v19 = vpop.xlane.xlu0 %4951 }
 0x8f7   :  { %7203 = vperm.xlu1 %8894, %v12502_v43   ;;  %v12531_v5 = vadd.f32 %v12277_v56, %v4952_v19  ;;  %14124 = vst [vmem:[#allocation93_spill] sm:$0xff] %v12540_v6 }
 0x8f9   :  { %7200 = vperm.xlu0 %8893, %v12505_v23   ;;  %14123 = vst [vmem:[#allocation92_spill] sm:$0xff] %v12531_v5 }
 0x8fa   :  { %v6837_v32 = vpop.xlane.xlu0 %6836 }
 0x8fb   :  { %7161 = vperm.xlu1 %8894, %v12510_v57   ;;  %v12528_v54 = vadd.f32 %v12270_v18, %v6837_v32 }
 0x8fc   :  { %v12523_v33 = vpop.permute.xlu1 %5232 }
 0x8fd   :  { %7206 = vperm.xlu0 %8893, %v12513_v24   ;;  %14122 = vst [vmem:[#allocation91_spill] sm:$0xff] %v12528_v54  ;;  %v5330_v59 = vrot.slane %v12523_v33, %v14126_v35 }
 0x8ff   :  { %5322 = vperm.xlu1 %8894, %v12518_v42  }
 0x900   :  { %v12536_v30 = vpop.permute.xlu1 %7119 }
 0x901   :  { %7164 = vperm.xlu0 %8893, %v12521_v40  }
 0x902   :  { %v12534_v61 = vpop.permute.xlu0 %5235 }
 0x903   :  { %7209 = vperm.xlu1 %8894, %v12528_v54   ;;  %v5334_v51 = vrot.slane %v12534_v61, %v14125_v27 }
 0x904   :  { %v5239_v18 = vpop.permute.xlu1 %5238 }
 0x905   :  { %5325 = vperm.xlu0 %8893, %v12531_v5   ;;  %v5339_v8 = vrot.slane %v5239_v18, %v14126_v35  ;;  %v5335_v61 = vsel %vm1052_vm1, %v5334_v51, %v5330_v59 }
 0x906   :  { %v12543_v4 = vpop.permute.xlu0 %7122 }
 0x909   :  { %7212 = vperm.xlu0 %8893, %v12540_v6  }
 0x90a   :  { %v5242_v56 = vpop.permute.xlu0 %5241 }
 0x90b   :  { %v5343_v10 = vrot.slane %v5242_v56, %v14125_v27 }
 0x90c   :  { %v12545_v9 = vpop.permute.xlu1 %5280 }
 0x90d   :  { %v5344_v56 = vsel %vm1052_vm1, %v5343_v10, %v5339_v8 }
 0x910   :  { %v5245_v14 = vpop.permute.xlu1 %5244 }
 0x911   :  { %v5348_v3 = vrot.slane %v5245_v14, %v14126_v35  ;;  %v5471_v14 = vsel %vm1189_vm2, %v5344_v56, %v5335_v61  ;;  %v7217_v56 = vrot.slane %v12536_v30, %v14126_v35 }
 0x914   :  { %v12547_v28 = vpop.permute.xlu0 %5283  ;;  %v12549_v19 = vpop.permute.xlu1 %5256 }
 0x915   :  { %v5366_v59 = vrot.slane %v12549_v19, %v14126_v35 }
 0x918   :  { %v5248_v32 = vpop.permute.xlu0 %5247  ;;  %v12551_v54 = vpop.permute.xlu1 %7125 }
 0x919   :  { %v5352_v13 = vrot.slane %v5248_v32, %v14125_v27 }
 0x91b   :  { %v5353_v58 = vsel %vm1052_vm1, %v5352_v13, %v5348_v3 }
 0x91c   :  { %v12553_v43 = vpop.permute.xlu0 %5259  ;;  %v12555_v49 = vpop.permute.xlu1 %7167  ;;  %v5472_v8 = vsel %vm1191_vm3, %v5353_v58, %v5471_v14 }
 0x91d   :  { %v5370_v46 = vrot.slane %v12553_v43, %v14125_v27 }
 0x920   :  { %v12557_v20 = vpop.permute.xlu0 %7128  ;;  %v12561_v34 = vpop.permute.xlu1 %7131 }
 0x921   :  { %v7230_v10 = vrot.slane %v12557_v20, %v14125_v27  ;;  %v7226_v20 = vrot.slane %v12551_v54, %v14126_v35 }
 0x924   :  { %v12559_v6 = vpop.permute.xlu0 %7170  ;;  %v12565_v23 = vpop.permute.xlu1 %7143 }
 0x928   :  { %v12563_v24 = vpop.permute.xlu0 %7134 }
 0x92c   :  { %v12569_v55 = vpop.permute.xlu0 %7146 }
 0x92d   :  { %v7257_v54 = vrot.slane %v12569_v55, %v14125_v27  ;;  %v7253_v55 = vrot.slane %v12565_v23, %v14126_v35 }
 0x92e   :  { %v12567_v22 = vpop.permute.xlu1 %5286 }
 0x932   :  { %v12571_v37 = vpop.permute.xlu1 %5292 }
 0x934   :  { %v12573_v42 = vpop.permute.xlu0 %5289 }
 0x936   :  { %v5251_v25 = vpop.permute.xlu1 %5250 }
 0x937   :  { %v5357_v32 = vrot.slane %v5251_v25, %v14126_v35  ;;  %v5371_v25 = vsel %vm1052_vm1, %v5370_v46, %v5366_v59  ;;  %v7221_v46 = vrot.slane %v12543_v4, %v14125_v27  ;;  %v7293_v4 = vrot.slane %v12559_v6, %v14125_v27 }
 0x938   :  { %v12575_v5 = vpop.permute.xlu0 %5295  ;;  %v7289_v6 = vrot.slane %v12555_v49, %v14126_v35 }
 0x939   :  { %v7222_v59 = vsel %vm1052_vm1, %v7221_v46, %v7217_v56 }
 0x93a   :  { %v12577_v60 = vpop.permute.xlu1 %5304  ;;  %v7294_v49 = vsel %vm1052_vm1, %v7293_v4, %v7289_v6 }
 0x93c   :  { %v5254_v11 = vpop.permute.xlu0 %5253 }
 0x93d   :  { %v5361_v63 = vrot.slane %v5254_v11, %v14125_v27 }
 0x93e   :  { %v5263_v12 = vpop.permute.xlu1 %5262 }
 0x93f   :  { %v5362_v18 = vsel %vm1052_vm1, %v5361_v63, %v5357_v32  ;;  %v5375_v13 = vrot.slane %v5263_v12, %v14126_v35  ;;  %v7239_v12 = vrot.slane %v12563_v24, %v14125_v27  ;;  %v5406_v24 = vrot.slane %v12547_v28, %v14125_v27 }
 0x940   :  { %v12579_v44 = vpop.permute.xlu0 %5307  ;;  %v5473_v63 = vsel %vm1193_vm4, %v5362_v18, %v5472_v8 }
 0x942   :  { %v5269_v36 = vpop.permute.xlu1 %5268 }
 0x944   :  { %v5266_v31 = vpop.permute.xlu0 %5265 }
 0x945   :  { %v5379_v11 = vrot.slane %v5266_v31, %v14125_v27  ;;  %v5384_v31 = vrot.slane %v5269_v36, %v14126_v35  ;;  %v5474_v36 = vsel %vm1195_vm5, %v5371_v25, %v5473_v63  ;;  %v5415_v63 = vrot.slane %v12573_v42, %v14125_v27 }
 0x946   :  { %v12581_v53 = vpop.permute.xlu1 %7173  ;;  %v5411_v42 = vrot.slane %v12567_v22, %v14126_v35 }
 0x947   :  { %v5380_v3 = vsel %vm1052_vm1, %v5379_v11, %v5375_v13  ;;  %v7231_v11 = vsel %vm1052_vm1, %v7230_v10, %v7226_v20  ;;  %v7258_v10 = vsel %vm1052_vm1, %v7257_v54, %v7253_v55 }
 0x948   :  { %v5272_v57 = vpop.permute.xlu0 %5271  ;;  %v5475_v32 = vsel %vm1197_vm6, %v5380_v3, %v5474_v36 }
 0x949   :  { %v5388_v33 = vrot.slane %v5272_v57, %v14125_v27 }
 0x94a   :  { %v12583_v29 = vpop.permute.xlu1 %7179 }
 0x94b   :  { %v5389_v58 = vsel %vm1052_vm1, %v5388_v33, %v5384_v31  ;;  %v7358_v31 = vsel %vm1189_vm2, %v7231_v11, %v7222_v59 }
 0x94c   :  { %v12585_v40 = vpop.permute.xlu0 %7176  ;;  %v5476_v30 = vsel %vm1199_vm7, %v5389_v58, %v5475_v32 }
 0x94e   :  { %v12587_v16 = vpop.permute.xlu1 %7137 }
 0x94f   :  { %v7244_v3 = vrot.slane %v12587_v16, %v14126_v35 }
 0x950   :  { %v12589_v0 = vpop.permute.xlu0 %7182 }
 0x951   :  { %v7311_v22 = vrot.slane %v12589_v0, %v14125_v27  ;;  %v7307_v0 = vrot.slane %v12583_v29, %v14126_v35 }
 0x952   :  { %v12591_v39 = vpop.permute.xlu1 %7191 }
 0x953   :  { %v7312_v29 = vsel %vm1052_vm1, %v7311_v22, %v7307_v0 }
 0x954   :  { %v12593_v1 = vpop.permute.xlu0 %7140 }
 0x955   :  { %v7248_v8 = vrot.slane %v12593_v1, %v14125_v27  ;;  %v5424_v1 = vrot.slane %v12575_v5, %v14125_v27  ;;  %v7302_v5 = vrot.slane %v12585_v40, %v14125_v27  ;;  %v7298_v40 = vrot.slane %v12581_v53, %v14126_v35 }
 0x956   :  { %v12595_v41 = vpop.permute.xlu1 %7149 }
 0x957   :  { %v7249_v16 = vsel %vm1052_vm1, %v7248_v8, %v7244_v3  ;;  %v7262_v56 = vrot.slane %v12595_v41, %v14126_v35  ;;  %v7303_v41 = vsel %vm1052_vm1, %v7302_v5, %v7298_v40 }
 0x958   :  { %v12597_v48 = vpop.permute.xlu0 %7194  ;;  %v7365_v4 = vsel %vm1189_vm2, %v7303_v41, %v7294_v49 }
 0x959   :  { %v7366_v6 = vsel %vm1191_vm3, %v7312_v29, %v7365_v4 }
 0x95a   :  { %v12599_v7 = vpop.permute.xlu1 %7155 }
 0x95c   :  { %v12601_v62 = vpop.permute.xlu0 %7152 }
 0x95e   :  { %v12603_v45 = vpop.permute.xlu1 %5298 }
 0x95f   :  { %v5429_v20 = vrot.slane %v12603_v45, %v14126_v35 }
 0x960   :  { %v12605_v50 = vpop.permute.xlu0 %7158 }
 0x962   :  { %v12607_v2 = vpop.permute.xlu1 %5310 }
 0x963   :  { %v5447_v54 = vrot.slane %v12607_v2, %v14126_v35  ;;  %v7329_v2 = vrot.slane %v12597_v48, %v14125_v27 }
 0x964   :  { %v12609_v15 = vpop.permute.xlu0 %5301 }
 0x965   :  { %v5433_v36 = vrot.slane %v12609_v15, %v14125_v27 }
 0x966   :  { %v12617_v38 = vpop.permute.xlu1 %5316 }
 0x968   :  { %v12620_v47 = vpop.permute.xlu0 %5313 }
 0x96a   :  { %v5275_v26 = vpop.permute.xlu1 %5274 }
 0x96b   :  { %v5393_v57 = vrot.slane %v5275_v26, %v14126_v35  ;;  %v7235_v26 = vrot.slane %v12561_v34, %v14126_v35  ;;  %v5402_v34 = vrot.slane %v12545_v9, %v14126_v35 }
 0x96c   :  { %v12634_v52 = vpop.permute.xlu0 %5319 }
 0x96d   :  { %v7240_v33 = vsel %vm1052_vm1, %v7239_v12, %v7235_v26  ;;  %v5407_v9 = vsel %vm1052_vm1, %v5406_v24, %v5402_v34  ;;  %v7266_v12 = vrot.slane %v12601_v62, %v14125_v27  ;;  %v7275_v62 = vrot.slane %v12605_v50, %v14125_v27 }
 0x96e   :  { %v12643_v51 = vpop.permute.xlu1 %7185  ;;  %v7359_v23 = vsel %vm1191_vm3, %v7240_v33, %v7358_v31  ;;  %v7271_v50 = vrot.slane %v12599_v7, %v14126_v35 }
 0x96f   :  { %v7360_v15 = vsel %vm1193_vm4, %v7249_v16, %v7359_v23  ;;  %v7267_v24 = vsel %vm1052_vm1, %v7266_v12, %v7262_v56 }
 0x970   :  { %v5278_v43 = vpop.permute.xlu0 %5277  ;;  %v7276_v45 = vsel %vm1052_vm1, %v7275_v62, %v7271_v50  ;;  %v7361_v7 = vsel %vm1195_vm5, %v7258_v10, %v7360_v15  ;;  %v14127_v50 = vld [vmem:[#allocation24_spill] sm:$0xff] }
 0x971   :  { %v5397_v19 = vrot.slane %v5278_v43, %v14125_v27  ;;  %v5420_v43 = vrot.slane %v12571_v37, %v14126_v35  ;;  %v7362_v8 = vsel %vm1197_vm6, %v7267_v24, %v7361_v7  ;;  %v14131_v7 = vld [vmem:[#allocation51_spill] sm:$0xff] }
 0x972   :  { %v12665_v61 = vpop.permute.xlu1 %7197  ;;  %v7363_v55 = vsel %vm1199_vm7, %v7276_v45, %v7362_v8  ;;  %v14133_v8 = vld [vmem:[#allocation69_spill] sm:$0xff] }
 0x973   :  { %v5398_v18 = vsel %vm1052_vm1, %v5397_v19, %v5393_v57  ;;  %v5416_v57 = vsel %vm1052_vm1, %v5415_v63, %v5411_v42  ;;  %v5442_v19 = vrot.slane %v12579_v44, %v14125_v27  ;;  %v5425_v37 = vsel %vm1052_vm1, %v5424_v1, %v5420_v43 }
 0x974   :  { %v12674_v14 = vpop.permute.xlu0 %7188  ;;  %v5477_v28 = vsel %vm1201_vm8, %v5398_v18, %v5476_v30  ;;  %v5438_v44 = vrot.slane %v12577_v60, %v14126_v35  ;;  %v5478_v53 = vsel %vm1189_vm2, %v5416_v57, %v5407_v9  ;;  %v5434_v18 = vsel %vm1052_vm1, %v5433_v36, %v5429_v20 }
 0x975   :  { %v5487_v13 = vsel %vm184_vm0, %v5477_v28, -inf  ;;  %v5479_v60 = vsel %vm1191_vm3, %v5425_v37, %v5478_v53  ;;  %v5451_v30 = vrot.slane %v12620_v47, %v14125_v27  ;;  %v7320_v11 = vrot.slane %v12674_v14, %v14125_v27 }
 0x976   :  { %5488 = vmax.xlane.f32.xlu0 %v5487_v13  ;;  %v12696_v25 = vpop.permute.xlu1 %7203  ;;  %v5443_v26 = vsel %vm1052_vm1, %v5442_v19, %v5438_v44  ;;  %v5460_v28 = vrot.slane %v12634_v52, %v14125_v27  ;;  %v5480_v13 = vsel %vm1193_vm4, %v5434_v18, %v5479_v60  ;;  %v7316_v47 = vrot.slane %v12643_v51, %v14126_v35  ;;  %v14129_v18 = vld [vmem:[#allocation25_spill] sm:$0xff] }
 0x977   :  { %v5456_v52 = vrot.slane %v12617_v38, %v14126_v35  ;;  %v5452_v63 = vsel %vm1052_vm1, %v5451_v30, %v5447_v54  ;;  %v5481_v38 = vsel %vm1195_vm5, %v5443_v26, %v5480_v13  ;;  %v7334_v23 = vrot.slane %v12665_v61, %v14126_v35  ;;  %v14128_v26 = vld [vmem:[#allocation60_spill] sm:$0xff]  ;;  %v14130_v30 = vld [vmem:[#allocation58_spill] sm:$0xff] }
 0x978   :  { %v12703_v58 = vpop.permute.xlu0 %7200  ;;  %v7321_v9 = vsel %vm1052_vm1, %v7320_v11, %v7316_v47  ;;  %v7325_v43 = vrot.slane %v12591_v39, %v14126_v35  ;;  %v7343_v16 = vrot.slane %v12696_v25, %v14126_v35  ;;  %v5482_v57 = vsel %vm1197_vm6, %v5452_v63, %v5481_v38 }
 0x979   :  { %v7338_v51 = vrot.slane %v12703_v58, %v14125_v27  ;;  %v5461_v1 = vsel %vm1052_vm1, %v5460_v28, %v5456_v52  ;;  %v7367_v5 = vsel %vm1193_vm4, %v7321_v9, %v7366_v6  ;;  %v14135_v6 = vld [vmem:[#allocation27_spill] sm:$0xff]  ;;  %v14136_v52 = vld [vmem:[#allocation68_spill] sm:$0xff] }
 0x97a   :  { %v7162_v46 = vpop.permute.xlu1 %7161  ;;  %v5483_v22 = vsel %vm1199_vm7, %v5461_v1, %v5482_v57  ;;  %v7330_v36 = vsel %vm1052_vm1, %v7329_v2, %v7325_v43  ;;  %v14137_v9 = vld [vmem:[#allocation47_spill] sm:$0xff]  ;;  %v14138_v1 = vld [vmem:[#allocation28_spill] sm:$0xff] }
 0x97b   :  { %v7280_v14 = vrot.slane %v7162_v46, %v14126_v35  ;;  %v7339_v61 = vsel %vm1052_vm1, %v7338_v51, %v7334_v23  ;;  %v7368_v46 = vsel %vm1195_vm5, %v7330_v36, %v7367_v5  ;;  %v14140_v23 = vld [vmem:[#allocation76_spill] sm:$0xff]  ;;  %v14141_v5 = vld [vmem:[#allocation29_spill] sm:$0xff] }
 0x97c   :  { %v7207_v32 = vpop.permute.xlu0 %7206  ;;  %v7369_v44 = vsel %vm1197_vm6, %v7339_v61, %v7368_v46 }
 0x97d   :  { %v7347_v3 = vrot.slane %v7207_v32, %v14125_v27 }
 0x97e   :  { %v5323_v34 = vpop.permute.xlu1 %5322 }
 0x97f   :  { %v5465_v10 = vrot.slane %v5323_v34, %v14126_v35  ;;  %v7348_v37 = vsel %vm1052_vm1, %v7347_v3, %v7343_v16  ;;  %v14132_v34 = vld [vmem:[#allocation26_spill] sm:$0xff] }
 0x980   :  { %v7165_v33 = vpop.permute.xlu0 %7164  ;;  %v7370_v15 = vsel %vm1199_vm7, %v7348_v37, %v7369_v44  ;;  %v14146_v44 = vld [vmem:[#allocation78_spill] sm:$0xff] }
 0x981   :  { %v7284_v59 = vrot.slane %v7165_v33, %v14125_v27 }
 0x982   :  { %v7210_v12 = vpop.permute.xlu1 %7209 }
 0x983   :  { %v7285_v31 = vsel %vm1052_vm1, %v7284_v59, %v7280_v14  ;;  %v7352_v56 = vrot.slane %v7210_v12, %v14126_v35  ;;  %v14134_v14 = vld [vmem:[#allocation33_spill] sm:$0xff]  ;;  %v14142_v12 = vld [vmem:[#allocation63_spill] sm:$0xff] }
 0x984   :  { %v5326_v49 = vpop.permute.xlu0 %5325  ;;  %v7364_v48 = vsel %vm1201_vm8, %v7285_v31, %v7363_v55 }
 0x985   :  { %v5469_v42 = vrot.slane %v5326_v49, %v14125_v27  ;;  %v7374_v58 = vsel %vm184_vm0, %v7364_v48, -inf  ;;  %v14139_v49 = vld [vmem:[#allocation34_spill] sm:$0xff] }
 0x986   :  { %7375 = vmax.xlane.f32.xlu1 %v7374_v58 }
 0x987   :  { %v5470_v19 = vsel %vm1052_vm1, %v5469_v42, %v5465_v10 }
 0x988   :  { %v7213_v39 = vpop.permute.xlu0 %7212  ;;  %v5484_v40 = vsel %vm1201_vm8, %v5470_v19, %v5483_v22  ;;  %v14143_v19 = vld [vmem:[#allocation44_spill] sm:$0xff] }
 0x989   :  { %v7356_v25 = vrot.slane %v7213_v39, %v14125_v27  ;;  %v5490_v62 = vsel %vm184_vm0, %v5484_v40, -inf  ;;  %v14144_v40 = vld [vmem:[#allocation30_spill] sm:$0xff] }
 0x98a   :  { %5491 = vmax.xlane.f32.xlu0 %v5490_v62 }
 0x98b   :  { %v7357_v0 = vsel %vm1052_vm1, %v7356_v25, %v7352_v56  ;;  %v14145_v25 = vld [vmem:[#allocation64_spill] sm:$0xff] }
 0x98c   :  { %v7371_v20 = vsel %vm1201_vm8, %v7357_v0, %v7370_v15 }
 0x98d   :  { %v7377_v32 = vsel %vm184_vm0, %v7371_v20, -inf }
 0x98e   :  { %7378 = vmax.xlane.f32.xlu0 %v7377_v32 }
 0xa03   :  { %v5489_v53 = vpop.xlane.xlu0 %5488 }
 0xa04   :  { %v5498_v41 = vrot.slane %v5489_v53, %v13879_v21  ;;  %v5502_v24 = vrot.slane %v5489_v53, %v14127_v50  ;;  %v5506_v45 = vrot.slane %v5489_v53, %v14129_v18  ;;  %v5510_v33 = vrot.slane %v5489_v53, %v14132_v34 }
 0xa05   :  { %v5514_v2 = vrot.slane %v5489_v53, %v14135_v6  ;;  %v5518_v3 = vrot.slane %v5489_v53, %v14138_v1  ;;  %v5522_v16 = vrot.slane %v5489_v53, %v14141_v5  ;;  %v5526_v56 = vrot.slane %v5489_v53, %v14144_v40 }
 0xa06   :  { %v5575_v60 = vsub.f32 %v12282_v17, %v5498_v41  ;;  %v5576_v29 = vsub.f32 %v14128_v26, %v5498_v41  ;;  %v5577_v11 = vsub.f32 %v14130_v30, %v5502_v24  ;;  %v5578_v4 = vsub.f32 %v14131_v7, %v5502_v24  ;;  %v14147_v24 = vld [vmem:[#allocation81_spill] sm:$0xff] }
 0xa07   :  { %v5579_v13 = vsub.f32 %v14133_v8, %v5506_v45  ;;  %v5580_v59 = vsub.f32 %v14134_v14, %v5506_v45  ;;  %v5581_v55 = vsub.f32 %v14136_v52, %v5510_v33  ;;  %v5582_v51 = vsub.f32 %v14137_v9, %v5510_v33  ;;  %v14152_v9 = vld [vmem:[#allocation57_spill] sm:$0xff] }
 0xa08   :  { %v5607_v54 = vmul.f32 1.442695, %v5575_v60  ;;  %v5609_v28 = vmul.f32 1.442695, %v5576_v29  ;;  %v5611_v47 = vmul.f32 1.442695, %v5577_v11  ;;  %v5583_v48 = vsub.f32 %v14139_v49, %v5514_v2 }
 0xa09   :  { %v5613_v17 = vmul.f32 1.442695, %v5578_v4  ;;  %v5615_v63 = vmul.f32 1.442695, %v5579_v13  ;;  %v5617_v31 = vmul.f32 1.442695, %v5580_v59  ;;  %v5584_v10 = vsub.f32 %v14140_v23, %v5514_v2 }
 0xa0a   :  { %9158 = vpow2.f32 %v5607_v54  ;;  %v5619_v38 = vmul.f32 1.442695, %v5581_v55  ;;  %v5621_v42 = vmul.f32 1.442695, %v5582_v51  ;;  %v5585_v57 = vsub.f32 %v14142_v12, %v5518_v3  ;;  %v14148_v29 = vld [vmem:[#allocation83_spill] sm:$0xff] }
 0xa0b   :  { %9160 = vpow2.f32 %v5609_v28  ;;  %v5623_v61 = vmul.f32 1.442695, %v5583_v48  ;;  %v5586_v22 = vsub.f32 %v14143_v19, %v5518_v3  ;;  %v5625_v36 = vmul.f32 1.442695, %v5584_v10  ;;  %v14149_v28 = vld [vmem:[#allocation38_spill] sm:$0xff]  ;;  %v14151_v2 = vld [vmem:[#allocation71_spill] sm:$0xff] }
 0xa0c   :  { %9162 = vpow2.f32 %v5611_v47  ;;  %v5587_v62 = vsub.f32 %v14145_v25, %v5522_v16  ;;  %v5627_v46 = vmul.f32 1.442695, %v5585_v57  ;;  %v5588_v0 = vsub.f32 %v14146_v44, %v5522_v16  ;;  %v14150_v47 = vld [vmem:[#allocation62_spill] sm:$0xff]  ;;  %v14153_v48 = vld [vmem:[#allocation79_spill] sm:$0xff] }
 0xa0d   :  { %9164 = vpow2.f32 %v5613_v17  ;;  %v5629_v15 = vmul.f32 1.442695, %v5586_v22  ;;  %v5589_v53 = vsub.f32 %v14147_v24, %v5526_v56  ;;  %v5590_v45 = vsub.f32 %v14148_v29, %v5526_v56  ;;  %v14155_v19 = vld [vmem:[#allocation75_spill] sm:$0xff]  ;;  %v14156_v25 = vld [vmem:[#allocation66_spill] sm:$0xff] }
 0xa0e   :  { %9166 = vpow2.f32 %v5615_v63  ;;  %v5631_v60 = vmul.f32 1.442695, %v5587_v62  ;;  %v5633_v30 = vmul.f32 1.442695, %v5588_v0 }
 0xa0f   :  { %9168 = vpow2.f32 %v5617_v31  ;;  %v5635_v4 = vmul.f32 1.442695, %v5589_v53  ;;  %v5637_v8 = vmul.f32 1.442695, %v5590_v45 }
 0xa10   :  { %9170 = vpow2.f32 %v5619_v38 }
 0xa11   :  { %9172 = vpow2.f32 %v5621_v42  ;;  %v14154_v42 = vld [vmem:[#allocation39_spill] sm:$0xff] }
 0xa12   :  { %9174 = vpow2.f32 %v5623_v61 }
 0xa13   :  { %9176 = vpow2.f32 %v5625_v36  ;;  %v12834_v20 = vpop.xlane.xlu1 %7375 }
 0xa14   :  { %v12816_v58 = vpop.eup %9158  ;;  %9178 = vpow2.f32 %v5627_v46  ;;  %v7385_v26 = vrot.slane %v12834_v20, %v13879_v21  ;;  %v7389_v54 = vrot.slane %v12834_v20, %v14127_v50  ;;  %v7393_v13 = vrot.slane %v12834_v20, %v14129_v18 }
 0xa15   :  { %v12818_v43 = vpop.eup %9160  ;;  %5704 = vperm.xlu1 %8894, %v12816_v58   ;;  %9180 = vpow2.f32 %v5629_v15  ;;  %v7397_v63 = vrot.slane %v12834_v20, %v14132_v34  ;;  %v7401_v10 = vrot.slane %v12834_v20, %v14135_v6  ;;  %v7405_v56 = vrot.slane %v12834_v20, %v14138_v1  ;;  %v14157_v15 = vld [vmem:[#allocation52_spill] sm:$0xff] }
 0xa16   :  { %5707 = vperm.xlu0 %8893, %v12818_v43   ;;  %v12825_v37 = vpop.eup %9162  ;;  %9182 = vpow2.f32 %v5631_v60  ;;  %v7462_v33 = vsub.f32 %v14149_v28, %v7385_v26  ;;  %v7463_v14 = vsub.f32 %v14150_v47, %v7385_v26  ;;  %v7464_v52 = vsub.f32 %v14151_v2, %v7389_v54  ;;  %v14158_v26 = vld [vmem:[#allocation49_spill] sm:$0xff] }
 0xa17   :  { %v12827_v39 = vpop.eup %9164  ;;  %9184 = vpow2.f32 %v5633_v30  ;;  %v7467_v51 = vsub.f32 %v14152_v9, %v7393_v13  ;;  %v7465_v38 = vsub.f32 %v14153_v48, %v7389_v54  ;;  %v7469_v16 = vsub.f32 %v14154_v42, %v7397_v63  ;;  %v14159_v54 = vld [vmem:[#allocation77_spill] sm:$0xff] }
 0xa18   :  { %v12836_v32 = vpop.eup %9166  ;;  %9186 = vpow2.f32 %v5635_v4  ;;  %v7494_v55 = vmul.f32 1.442695, %v7462_v33  ;;  %v7496_v31 = vmul.f32 1.442695, %v7463_v14  ;;  %v7498_v23 = vmul.f32 1.442695, %v7464_v52  ;;  %v12910_v52 = vpop.xlane.xlu0 %5491 }
 0xa19   :  { %5710 = vperm.xlu1 %8894, %v12825_v37   ;;  %v12838_v41 = vpop.eup %9168  ;;  %9188 = vpow2.f32 %v5637_v8  ;;  %v7504_v12 = vmul.f32 1.442695, %v7467_v51  ;;  %v7466_v22 = vsub.f32 %v14155_v19, %v7393_v13  ;;  %v7500_v36 = vmul.f32 1.442695, %v7465_v38  ;;  %v14160_v13 = vld [vmem:[#allocation55_spill] sm:$0xff]  ;;  %v14163_v42 = vld [vmem:[#allocation61_spill] sm:$0xff] }
 0xa1a   :  { %5713 = vperm.xlu0 %8893, %v12827_v39   ;;  %v12846_v11 = vpop.eup %9170  ;;  %9190 = vpow2.f32 %v7494_v55  ;;  %v7471_v62 = vsub.f32 %v14156_v25, %v7401_v10  ;;  %v7508_v46 = vmul.f32 1.442695, %v7469_v16  ;;  %v7468_v24 = vsub.f32 %v14157_v15, %v7397_v63  ;;  %v14161_v63 = vld [vmem:[#allocation23_spill] sm:$0xff] }
 0xa1b   :  { %v12848_v7 = vpop.eup %9172  ;;  %9192 = vpow2.f32 %v7496_v31  ;;  %v7502_v53 = vmul.f32 1.442695, %v7466_v22  ;;  %v7409_v60 = vrot.slane %v12834_v20, %v14141_v5  ;;  %v7473_v29 = vsub.f32 %v14158_v26, %v7405_v56  ;;  %v14162_v31 = vld [vmem:[#allocation90_spill] sm:$0xff] }
 0xa1c   :  { %v12858_v59 = vpop.eup %9174  ;;  %9194 = vpow2.f32 %v7498_v23  ;;  %v7512_v45 = vmul.f32 1.442695, %v7471_v62  ;;  %v7470_v28 = vsub.f32 %v14159_v54, %v7401_v10  ;;  %v7506_v33 = vmul.f32 1.442695, %v7468_v24 }
 0xa1d   :  { %5716 = vperm.xlu1 %8894, %v12836_v32   ;;  %v12860_v17 = vpop.eup %9176  ;;  %9196 = vpow2.f32 %v7504_v12  ;;  %v7413_v8 = vrot.slane %v12834_v20, %v14144_v40  ;;  %v7475_v47 = vsub.f32 %v14160_v13, %v7409_v60  ;;  %v7516_v14 = vmul.f32 1.442695, %v7473_v29 }
 0xa1e   :  { %5719 = vperm.xlu0 %8893, %v12838_v41   ;;  %v12868_v3 = vpop.eup %9178  ;;  %9198 = vpow2.f32 %v7500_v36  ;;  %v7472_v9 = vsub.f32 %v14161_v63, %v7405_v56  ;;  %v7510_v51 = vmul.f32 1.442695, %v7470_v28  ;;  %v5530_v38 = vrot.slane %v12910_v52, %v13879_v21  ;;  %v14164_v36 = vld [vmem:[#allocation74_spill] sm:$0xff] }
 0xa1f   :  { %v12870_v49 = vpop.eup %9180  ;;  %9200 = vpow2.f32 %v7508_v46  ;;  %v7477_v20 = vsub.f32 %v14162_v31, %v7413_v8  ;;  %v7520_v48 = vmul.f32 1.442695, %v7475_v47  ;;  %v7474_v16 = vsub.f32 %v14163_v42, %v7409_v60  ;;  %v14165_v46 = vld [vmem:[#allocation87_spill] sm:$0xff]  ;;  %v14166_v60 = vld [vmem:[#allocation36_spill] sm:$0xff]  ;;  %v14170_v31 = vld [vmem:[#allocation70_spill] sm:$0xff] }
 0xa20   :  { %v12878_v57 = vpop.eup %9182  ;;  %9202 = vpow2.f32 %v7502_v53  ;;  %v7514_v12 = vmul.f32 1.442695, %v7472_v9  ;;  %v5534_v22 = vrot.slane %v12910_v52, %v14127_v50  ;;  %v5592_v56 = vsub.f32 %v14164_v36, %v5530_v38  ;;  %v14168_v47 = vld [vmem:[#allocation32_spill] sm:$0xff] }
 0xa21   :  { %5722 = vperm.xlu1 %8894, %v12846_v11   ;;  %v12880_v61 = vpop.eup %9184  ;;  %9204 = vpow2.f32 %v7512_v45  ;;  %v7524_v19 = vmul.f32 1.442695, %v7477_v20  ;;  %v7476_v15 = vsub.f32 %v14165_v46, %v7413_v8  ;;  %v7518_v24 = vmul.f32 1.442695, %v7474_v16  ;;  %v14171_v42 = vld [vmem:[#allocation48_spill] sm:$0xff] }
 0xa22   :  { %5725 = vperm.xlu0 %8893, %v12848_v7   ;;  %v12888_v44 = vpop.eup %9186  ;;  %9206 = vpow2.f32 %v7506_v33  ;;  %v5538_v53 = vrot.slane %v12910_v52, %v14129_v18  ;;  %v5594_v26 = vsub.f32 %v14166_v60, %v5534_v22  ;;  %v5641_v29 = vmul.f32 1.442695, %v5592_v56  ;;  %v14167_v33 = vld [vmem:[#allocation67_spill] sm:$0xff]  ;;  %v14173_v56 = vld [vmem:[#allocation72_spill] sm:$0xff] }
 0xa23   :  { %v12890_v0 = vpop.eup %9188  ;;  %9208 = vpow2.f32 %v7516_v14  ;;  %v7522_v28 = vmul.f32 1.442695, %v7476_v15  ;;  %v5591_v8 = vsub.f32 %v14167_v33, %v5530_v38  ;;  %v5542_v13 = vrot.slane %v12910_v52, %v14132_v34  ;;  %v14176_v33 = vld [vmem:[#allocation42_spill] sm:$0xff] }
 0xa24   :  { %v12898_v30 = vpop.eup %9190  ;;  %9210 = vpow2.f32 %v7510_v51  ;;  %v5596_v14 = vsub.f32 %v14168_v47, %v5538_v53  ;;  %v5645_v63 = vmul.f32 1.442695, %v5594_v26  ;;  %v5593_v20 = vsub.f32 %v14170_v31, %v5534_v22 }
 0xa25   :  { %5728 = vperm.xlu1 %8894, %v12858_v59   ;;  %v12900_v4 = vpop.eup %9192  ;;  %9212 = vpow2.f32 %v7520_v48  ;;  %v5639_v48 = vmul.f32 1.442695, %v5591_v8  ;;  %v5546_v38 = vrot.slane %v12910_v52, %v14135_v6  ;;  %v5598_v16 = vsub.f32 %v14171_v42, %v5542_v13  ;;  %v14180_v42 = vld [vmem:[#allocation31_spill] sm:$0xff] }
 0xa26   :  { %5731 = vperm.xlu0 %8893, %v12860_v17   ;;  %v12908_v2 = vpop.eup %9194  ;;  %9214 = vpow2.f32 %v7514_v12  ;;  %v5649_v12 = vmul.f32 1.442695, %v5596_v14  ;;  %v5595_v46 = vsub.f32 %v14173_v56, %v5538_v53  ;;  %v5643_v22 = vmul.f32 1.442695, %v5593_v20  ;;  %v14177_v14 = vld [vmem:[#allocation80_spill] sm:$0xff]  ;;  %v14181_v56 = vld [vmem:[#allocation82_spill] sm:$0xff] }
 0xa27   :  { %v12912_v55 = vpop.eup %9196  ;;  %9216 = vpow2.f32 %v7524_v19  ;;  %v5550_v15 = vrot.slane %v12910_v52, %v14138_v1  ;;  %v5653_v26 = vmul.f32 1.442695, %v5598_v16  ;;  %v5597_v8 = vsub.f32 %v14176_v33, %v5542_v13 }
 0xa28   :  { %v12920_v23 = vpop.eup %9198  ;;  %9218 = vpow2.f32 %v7518_v24  ;;  %v14174_v24 = vld [vmem:[#allocation59_spill] sm:$0xff]  ;;  %v5647_v53 = vmul.f32 1.442695, %v5595_v46  ;;  %v5554_v47 = vrot.slane %v12910_v52, %v14141_v5  ;;  %v5599_v16 = vsub.f32 %v14180_v42, %v5546_v38 }
 0xa29   :  { %5734 = vperm.xlu1 %8894, %v12868_v3   ;;  %v12922_v10 = vpop.eup %9200  ;;  %9220 = vpow2.f32 %v5641_v29  ;;  %v5600_v60 = vsub.f32 %v14174_v24, %v5546_v38  ;;  %v5651_v13 = vmul.f32 1.442695, %v5597_v8  ;;  %v14184_v38 = vld [vmem:[#allocation40_spill] sm:$0xff] }
 0xa2a   :  { %5737 = vperm.xlu0 %8893, %v12870_v49   ;;  %v12930_v25 = vpop.eup %9202  ;;  %9222 = vpow2.f32 %v7522_v28  ;;  %v5604_v46 = vsub.f32 %v14181_v56, %v5554_v47  ;;  %v5601_v33 = vsub.f32 %v14184_v38, %v5550_v15  ;;  %v5655_v8 = vmul.f32 1.442695, %v5599_v16  ;;  %v14188_v56 = vld [vmem:[#allocation41_spill] sm:$0xff] }
 0xa2b   :  { %v12932_v62 = vpop.eup %9204  ;;  %9224 = vpow2.f32 %v5645_v63  ;;  %v5602_v63 = vsub.f32 %v14177_v14, %v5550_v15  ;;  %v5657_v31 = vmul.f32 1.442695, %v5600_v60  ;;  %v12992_v60 = vpop.xlane.xlu0 %7378 }
 0xa2c   :  { %v12940_v45 = vpop.eup %9206  ;;  %9226 = vpow2.f32 %v5639_v48  ;;  %v5665_v14 = vmul.f32 1.442695, %v5604_v46  ;;  %v5659_v15 = vmul.f32 1.442695, %v5601_v33  ;;  %v14189_v46 = vld [vmem:[#allocation56_spill] sm:$0xff]  ;;  %v7425_v33 = vrot.slane %v12992_v60, %v14129_v18 }
 0xa2d   :  { %5740 = vperm.xlu1 %8894, %v12878_v57   ;;  %v12942_v54 = vpop.eup %9208  ;;  %9228 = vpow2.f32 %v5649_v12  ;;  %v5558_v12 = vrot.slane %v12910_v52, %v14144_v40 }
 0xa2e   :  { %5743 = vperm.xlu0 %8893, %v12880_v61   ;;  %v12950_v9 = vpop.eup %9210  ;;  %9230 = vpow2.f32 %v5643_v22  ;;  %v5661_v22 = vmul.f32 1.442695, %v5602_v63  ;;  %v7417_v63 = vrot.slane %v12992_v60, %v13879_v21 }
 0xa2f   :  { %v12952_v51 = vpop.eup %9212  ;;  %9232 = vpow2.f32 %v5653_v26 }
 0xa30   :  { %14169 = vst [vmem:[#allocation65_spill] sm:$0xff] %v12952_v51  ;;  %v12960_v19 = vpop.eup %9214  ;;  %9234 = vpow2.f32 %v5647_v53  ;;  %v14185_v53 = vld [vmem:[#allocation92_spill] sm:$0xff] }
 0xa31   :  { %5746 = vperm.xlu1 %8894, %v12888_v44   ;;  %v12962_v36 = vpop.eup %9216  ;;  %9236 = vpow2.f32 %v5657_v31  ;;  %v5606_v52 = vsub.f32 %v14185_v53, %v5558_v12 }
 0xa32   :  { %5749 = vperm.xlu0 %8893, %v12890_v0   ;;  %14172 = vst [vmem:[#allocation54_spill] sm:$0xff] %v12962_v36  ;;  %v12970_v29 = vpop.eup %9218  ;;  %9238 = vpow2.f32 %v5651_v13  ;;  %v7421_v13 = vrot.slane %v12992_v60, %v14127_v50 }
 0xa33   :  { %v12972_v28 = vpop.eup %9220  ;;  %9240 = vpow2.f32 %v5661_v22  ;;  %v5669_v16 = vmul.f32 1.442695, %v5606_v52  ;;  %v7479_v22 = vsub.f32 %v14189_v46, %v7417_v63 }
 0xa34   :  { %14175 = vst [vmem:[#allocation24_spill] sm:$0xff] %v12972_v28  ;;  %v12980_v20 = vpop.eup %9222  ;;  %9242 = vpow2.f32 %v5655_v8  ;;  %v14193_v8 = vld [vmem:[#allocation50_spill] sm:$0xff] }
 0xa35   :  { %7591 = vperm.xlu1 %8894, %v12898_v30   ;;  %14178 = vst [vmem:[#allocation60_spill] sm:$0xff] %v12980_v20  ;;  %v12982_v48 = vpop.eup %9224  ;;  %9244 = vpow2.f32 %v5665_v14  ;;  %v7481_v52 = vsub.f32 %v14193_v8, %v7421_v13  ;;  %v7528_v14 = vmul.f32 1.442695, %v7479_v22 }
 0xa36   :  { %7594 = vperm.xlu0 %8893, %v12900_v4   ;;  %14179 = vst [vmem:[#allocation25_spill] sm:$0xff] %v12982_v48  ;;  %v12990_v24 = vpop.eup %9226  ;;  %9246 = vpow2.f32 %v5659_v15  ;;  %v14197_v15 = vld [vmem:[#allocation46_spill] sm:$0xff] }
 0xa37   :  { %14182 = vst [vmem:[#allocation58_spill] sm:$0xff] %v12990_v24  ;;  %v12994_v26 = vpop.eup %9228  ;;  %9248 = vpow2.f32 %v5669_v16  ;;  %v7483_v16 = vsub.f32 %v14197_v15, %v7425_v33  ;;  %v7532_v8 = vmul.f32 1.442695, %v7481_v52 }
 0xa38   :  { %14183 = vst [vmem:[#allocation51_spill] sm:$0xff] %v12994_v26  ;;  %v13002_v31 = vpop.eup %9230 }
 0xa39   :  { %7597 = vperm.xlu1 %8894, %v12908_v2   ;;  %14186 = vst [vmem:[#allocation26_spill] sm:$0xff] %v13002_v31  ;;  %v13004_v42 = vpop.eup %9232 }
 0xa3a   :  { %7606 = vperm.xlu0 %8893, %v12912_v55   ;;  %14187 = vst [vmem:[#allocation69_spill] sm:$0xff] %v13004_v42  ;;  %v13012_v38 = vpop.eup %9234 }
 0xa3b   :  { %14190 = vst [vmem:[#allocation33_spill] sm:$0xff] %v13012_v38  ;;  %v13014_v53 = vpop.eup %9236 }
 0xa3c   :  { %14191 = vst [vmem:[#allocation27_spill] sm:$0xff] %v13014_v53 }
 0xa3d   :  { %7600 = vperm.xlu1 %8894, %v12920_v23  }
 0xa3e   :  { %7612 = vperm.xlu0 %8893, %v12922_v10  }
 0xa41   :  { %7603 = vperm.xlu1 %8894, %v12930_v25  }
 0xa42   :  { %7618 = vperm.xlu0 %8893, %v12932_v62  }
 0xa45   :  { %7609 = vperm.xlu1 %8894, %v12940_v45  }
 0xa46   :  { %7624 = vperm.xlu0 %8893, %v12942_v54  }
 0xa49   :  { %7615 = vperm.xlu1 %8894, %v12950_v9  }
 0xa4a   :  { %7630 = vperm.xlu0 %8893, %v12952_v51  }
 0xa4d   :  { %7621 = vperm.xlu1 %8894, %v12960_v19  }
 0xa4e   :  { %7636 = vperm.xlu0 %8893, %v12962_v36  }
 0xa51   :  { %7627 = vperm.xlu1 %8894, %v12970_v29  }
 0xa52   :  { %5755 = vperm.xlu0 %8893, %v12972_v28  }
 0xa55   :  { %7633 = vperm.xlu1 %8894, %v12980_v20  }
 0xa56   :  { %5761 = vperm.xlu0 %8893, %v12982_v48   ;;  %v5603_v48 = vsub.f32 %v14188_v56, %v5554_v47  ;;  %v13022_v56 = vpop.eup %9238 }
 0xa57   :  { %14194 = vst [vmem:[#allocation68_spill] sm:$0xff] %v13022_v56  ;;  %v13024_v46 = vpop.eup %9240 }
 0xa58   :  { %v5663_v47 = vmul.f32 1.442695, %v5603_v48  ;;  %14195 = vst [vmem:[#allocation47_spill] sm:$0xff] %v13024_v46  ;;  %v7429_v48 = vrot.slane %v12992_v60, %v14132_v34  ;;  %v13032_v22 = vpop.eup %9242 }
 0xa59   :  { %5752 = vperm.xlu1 %8894, %v12990_v24   ;;  %14198 = vst [vmem:[#allocation28_spill] sm:$0xff] %v13032_v22 }
 0xa5a   :  { %5767 = vperm.xlu0 %8893, %v12994_v26   ;;  %v14192_v26 = vld [vmem:[#allocation89_spill] sm:$0xff]  ;;  %9250 = vpow2.f32 %v5663_v47  ;;  %v14200_v47 = vld [vmem:[#allocation35_spill] sm:$0xff] }
 0xa5b   :  { %9252 = vpow2.f32 %v7528_v14  ;;  %v7536_v14 = vmul.f32 1.442695, %v7483_v16 }
 0xa5d   :  { %5758 = vperm.xlu1 %8894, %v13002_v31   ;;  %v5605_v31 = vsub.f32 %v14192_v26, %v5558_v12  ;;  %v14196_v12 = vld [vmem:[#allocation73_spill] sm:$0xff] }
 0xa5e   :  { %5773 = vperm.xlu0 %8893, %v13004_v42   ;;  %v7478_v26 = vsub.f32 %v14196_v12, %v7417_v63  ;;  %v7433_v63 = vrot.slane %v12992_v60, %v14135_v6  ;;  %v14201_v12 = vld [vmem:[#allocation45_spill] sm:$0xff] }
 0xa5f   :  { %v5667_v42 = vmul.f32 1.442695, %v5605_v31  ;;  %v7480_v31 = vsub.f32 %v14200_v47, %v7421_v13  ;;  %v14205_v47 = vld [vmem:[#allocation37_spill] sm:$0xff] }
 0xa61   :  { %5764 = vperm.xlu1 %8894, %v13012_v38   ;;  %9254 = vpow2.f32 %v5667_v42  ;;  %v7530_v13 = vmul.f32 1.442695, %v7480_v31 }
 0xa62   :  { %5779 = vperm.xlu0 %8893, %v13014_v53   ;;  %v13034_v53 = vpop.eup %9244  ;;  %9256 = vpow2.f32 %v7532_v8 }
 0xa63   :  { %14199 = vst [vmem:[#allocation34_spill] sm:$0xff] %v13034_v53  ;;  %v13042_v52 = vpop.eup %9246 }
 0xa64   :  { %14202 = vst [vmem:[#allocation76_spill] sm:$0xff] %v13042_v52  ;;  %v13044_v15 = vpop.eup %9248 }
 0xa65   :  { %5770 = vperm.xlu1 %8894, %v13022_v56   ;;  %v7526_v56 = vmul.f32 1.442695, %v7478_v26  ;;  %14203 = vst [vmem:[#allocation29_spill] sm:$0xff] %v13044_v15  ;;  %v7437_v26 = vrot.slane %v12992_v60, %v14138_v1  ;;  %v13052_v16 = vpop.eup %9250 }
 0xa66   :  { %5785 = vperm.xlu0 %8893, %v13024_v46   ;;  %v7485_v46 = vsub.f32 %v14201_v12, %v7429_v48  ;;  %14206 = vst [vmem:[#allocation63_spill] sm:$0xff] %v13052_v16  ;;  %v13054_v12 = vpop.eup %9252 }
 0xa67   :  { %9258 = vpow2.f32 %v7526_v56  ;;  %14207 = vst [vmem:[#allocation44_spill] sm:$0xff] %v13054_v12  ;;  %v7441_v56 = vrot.slane %v12992_v60, %v14141_v5 }
 0xa68   :  { %9260 = vpow2.f32 %v7536_v14  ;;  %v7540_v8 = vmul.f32 1.442695, %v7485_v46 }
 0xa69   :  { %5776 = vperm.xlu1 %8894, %v13032_v22   ;;  %v14204_v22 = vld [vmem:[#allocation53_spill] sm:$0xff]  ;;  %9262 = vpow2.f32 %v7530_v13 }
 0xa6a   :  { %5791 = vperm.xlu0 %8893, %v13034_v53   ;;  %v7482_v42 = vsub.f32 %v14204_v22, %v7425_v33  ;;  %v7487_v53 = vsub.f32 %v14205_v47, %v7433_v63  ;;  %v14209_v22 = vld [vmem:[#allocation86_spill] sm:$0xff]  ;;  %9264 = vpow2.f32 %v7540_v8 }
 0xa6b   :  { %v7489_v31 = vsub.f32 %v14209_v22, %v7437_v26  ;;  %v13062_v46 = vpop.eup %9254 }
 0xa6c   :  { %v7534_v33 = vmul.f32 1.442695, %v7482_v42  ;;  %v7544_v14 = vmul.f32 1.442695, %v7487_v53  ;;  %14210 = vst [vmem:[#allocation30_spill] sm:$0xff] %v13062_v46  ;;  %v13064_v47 = vpop.eup %9256  ;;  %v14213_v42 = vld [vmem:[#allocation88_spill] sm:$0xff] }
 0xa6d   :  { %5782 = vperm.xlu1 %8894, %v13042_v52   ;;  %v14208_v52 = vld [vmem:[#allocation43_spill] sm:$0xff]  ;;  %14211 = vst [vmem:[#allocation64_spill] sm:$0xff] %v13064_v47  ;;  %v7491_v13 = vsub.f32 %v14213_v42, %v7441_v56  ;;  %v7548_v8 = vmul.f32 1.442695, %v7489_v31  ;;  %v14220_v31 = vld [vmem:[#allocation85_spill] sm:$0xff] }
 0xa6e   :  { %5797 = vperm.xlu0 %8893, %v13044_v15   ;;  %v7484_v38 = vsub.f32 %v14208_v52, %v7429_v48  ;;  %v14212_v15 = vld [vmem:[#allocation22_spill] sm:$0xff]  ;;  %9266 = vpow2.f32 %v7534_v33  ;;  %v7445_v52 = vrot.slane %v12992_v60, %v14144_v40  ;;  %v7490_v42 = vsub.f32 %v14220_v31, %v7441_v56 }
 0xa6f   :  { %9268 = vpow2.f32 %v7544_v14  ;;  %v7552_v60 = vmul.f32 1.442695, %v7491_v13 }
 0xa70   :  { %v7538_v48 = vmul.f32 1.442695, %v7484_v38  ;;  %v14217_v38 = vld [vmem:[#allocation93_spill] sm:$0xff] }
 0xa71   :  { %5788 = vperm.xlu1 %8894, %v13052_v16   ;;  %v7486_v16 = vsub.f32 %v14212_v15, %v7433_v63  ;;  %v13072_v53 = vpop.eup %9258  ;;  %v7493_v15 = vsub.f32 %v14217_v38, %v7445_v52 }
 0xa72   :  { %7642 = vperm.xlu0 %8893, %v13054_v12   ;;  %14214 = vst [vmem:[#allocation78_spill] sm:$0xff] %v13072_v53  ;;  %v13074_v22 = vpop.eup %9260  ;;  %9270 = vpow2.f32 %v7538_v48  ;;  %v14223_v48 = vld [vmem:[#allocation91_spill] sm:$0xff] }
 0xa73   :  { %14215 = vst [vmem:[#allocation81_spill] sm:$0xff] %v13074_v22  ;;  %v7542_v63 = vmul.f32 1.442695, %v7486_v16  ;;  %9272 = vpow2.f32 %v7548_v8  ;;  %v13080_v33 = vpop.eup %9262  ;;  %v7492_v13 = vsub.f32 %v14223_v48, %v7445_v52  ;;  %v7550_v8 = vmul.f32 1.442695, %v7490_v42 }
 0xa74   :  { %14218 = vst [vmem:[#allocation83_spill] sm:$0xff] %v13080_v33  ;;  %v13082_v14 = vpop.eup %9264 }
 0xa75   :  { %5794 = vperm.xlu1 %8894, %v13062_v46   ;;  %v14216_v46 = vld [vmem:[#allocation84_spill] sm:$0xff]  ;;  %14219 = vst [vmem:[#allocation38_spill] sm:$0xff] %v13082_v14  ;;  %9274 = vpow2.f32 %v7542_v63  ;;  %v7554_v63 = vmul.f32 1.442695, %v7492_v13 }
 0xa76   :  { %7648 = vperm.xlu0 %8893, %v13064_v47   ;;  %v7488_v12 = vsub.f32 %v14216_v46, %v7437_v26  ;;  %9276 = vpow2.f32 %v7552_v60  ;;  %v7556_v26 = vmul.f32 1.442695, %v7493_v15 }
 0xa78   :  { %v7546_v47 = vmul.f32 1.442695, %v7488_v12  ;;  %v13087_v16 = vpop.eup %9266 }
 0xa79   :  { %7639 = vperm.xlu1 %8894, %v13072_v53   ;;  %14221 = vst [vmem:[#allocation62_spill] sm:$0xff] %v13087_v16  ;;  %v13089_v46 = vpop.eup %9268 }
 0xa7a   :  { %7654 = vperm.xlu0 %8893, %v13074_v22   ;;  %14222 = vst [vmem:[#allocation71_spill] sm:$0xff] %v13089_v46  ;;  %9278 = vpow2.f32 %v7546_v47 }
 0xa7b   :  { %9280 = vpow2.f32 %v7556_v26 }
 0xa7c   :  { %v13094_v56 = vpop.eup %9270  ;;  %9282 = vpow2.f32 %v7550_v8 }
 0xa7d   :  { %7645 = vperm.xlu1 %8894, %v13080_v33   ;;  %14224 = vst [vmem:[#allocation57_spill] sm:$0xff] %v13094_v56  ;;  %v13096_v12 = vpop.eup %9272  ;;  %9284 = vpow2.f32 %v7554_v63 }
 0xa7e   :  { %7660 = vperm.xlu0 %8893, %v13082_v14   ;;  %14225 = vst [vmem:[#allocation79_spill] sm:$0xff] %v13096_v12 }
 0xa7f   :  { %v13100_v38 = vpop.eup %9274 }
 0xa80   :  { %14226 = vst [vmem:[#allocation39_spill] sm:$0xff] %v13100_v38  ;;  %v13102_v15 = vpop.eup %9276 }
 0xa81   :  { %7651 = vperm.xlu1 %8894, %v13087_v16   ;;  %14227 = vst [vmem:[#allocation75_spill] sm:$0xff] %v13102_v15 }
 0xa82   :  { %7666 = vperm.xlu0 %8893, %v13089_v46  }
 0xa84   :  { %v13106_v47 = vpop.eup %9278 }
 0xa85   :  { %7657 = vperm.xlu1 %8894, %v13094_v56   ;;  %14228 = vst [vmem:[#allocation66_spill] sm:$0xff] %v13106_v47  ;;  %v13108_v52 = vpop.eup %9280 }
 0xa86   :  { %7672 = vperm.xlu0 %8893, %v13096_v12   ;;  %14229 = vst [vmem:[#allocation52_spill] sm:$0xff] %v13108_v52  ;;  %v13112_v60 = vpop.eup %9282 }
 0xa87   :  { %14230 = vst [vmem:[#allocation49_spill] sm:$0xff] %v13112_v60  ;;  %v13115_v31 = vpop.eup %9284 }
 0xa88   :  { %14231 = vst [vmem:[#allocation77_spill] sm:$0xff] %v13115_v31 }
 0xa89   :  { %7663 = vperm.xlu1 %8894, %v13100_v38  }
 0xa8a   :  { %7678 = vperm.xlu0 %8893, %v13102_v15  }
 0xa8d   :  { %7669 = vperm.xlu1 %8894, %v13106_v47  }
 0xa8e   :  { %7684 = vperm.xlu0 %8893, %v13108_v52  }
 0xa91   :  { %7675 = vperm.xlu1 %8894, %v13112_v60  }
 0xa94   :  { %v5705_v42 = vpop.permute.xlu1 %5704 }
 0xa95   :  { %v5708_v26 = vpop.permute.xlu0 %5707  ;;  %7681 = vperm.xlu1 %8894, %v13115_v31   ;;  %v5802_v16 = vrot.slane %v5705_v42, %v14126_v35 }
 0xa96   :  { %v5806_v31 = vrot.slane %v5708_v26, %v14125_v27 }
 0xa98   :  { %v5711_v48 = vpop.permute.xlu1 %5710 }
 0xa99   :  { %v5714_v13 = vpop.permute.xlu0 %5713  ;;  %v5811_v38 = vrot.slane %v5711_v48, %v14126_v35 }
 0xa9a   :  { %v5815_v52 = vrot.slane %v5714_v13, %v14125_v27 }
 0xa9c   :  { %v5717_v8 = vpop.permute.xlu1 %5716  ;;  %v5816_v48 = vsel %vm1052_vm1, %v5815_v52, %v5811_v38 }
 0xa9d   :  { %v5720_v63 = vpop.permute.xlu0 %5719  ;;  %v5820_v56 = vrot.slane %v5717_v8, %v14126_v35 }
 0xa9e   :  { %v5824_v60 = vrot.slane %v5720_v63, %v14125_v27 }
 0xaa0   :  { %v5723_v15 = vpop.permute.xlu1 %5722  ;;  %v5825_v36 = vsel %vm1052_vm1, %v5824_v60, %v5820_v56 }
 0xaa1   :  { %v5726_v12 = vpop.permute.xlu0 %5725  ;;  %v5829_v53 = vrot.slane %v5723_v15, %v14126_v35 }
 0xaa2   :  { %v5833_v33 = vrot.slane %v5726_v12, %v14125_v27  ;;  %v5807_v12 = vsel %vm1052_vm1, %v5806_v31, %v5802_v16 }
 0xaa4   :  { %v5729_v46 = vpop.permute.xlu1 %5728  ;;  %v5834_v15 = vsel %vm1052_vm1, %v5833_v33, %v5829_v53 }
 0xaa5   :  { %v5732_v47 = vpop.permute.xlu0 %5731  ;;  %v5838_v13 = vrot.slane %v5729_v46, %v14126_v35  ;;  %v5943_v46 = vsel %vm1189_vm2, %v5816_v48, %v5807_v12 }
 0xaa6   :  { %v5842_v28 = vrot.slane %v5732_v47, %v14125_v27 }
 0xaa8   :  { %v5735_v14 = vpop.permute.xlu1 %5734  ;;  %v5843_v38 = vsel %vm1052_vm1, %v5842_v28, %v5838_v13 }
 0xaa9   :  { %v5738_v22 = vpop.permute.xlu0 %5737  ;;  %v5847_v63 = vrot.slane %v5735_v14, %v14126_v35 }
 0xaaa   :  { %v5851_v24 = vrot.slane %v5738_v22, %v14125_v27  ;;  %v5944_v22 = vsel %vm1191_vm3, %v5825_v36, %v5943_v46 }
 0xaab   :  { %v5945_v56 = vsel %vm1193_vm4, %v5834_v15, %v5944_v22 }
 0xaac   :  { %v5741_v8 = vpop.permute.xlu1 %5740  ;;  %v5852_v14 = vsel %vm1052_vm1, %v5851_v24, %v5847_v63  ;;  %v5946_v53 = vsel %vm1195_vm5, %v5843_v38, %v5945_v56 }
 0xaad   :  { %v5744_v26 = vpop.permute.xlu0 %5743  ;;  %v5856_v42 = vrot.slane %v5741_v8, %v14126_v35  ;;  %v5947_v31 = vsel %vm1197_vm6, %v5852_v14, %v5946_v53 }
 0xaae   :  { %v5860_v47 = vrot.slane %v5744_v26, %v14125_v27 }
 0xab0   :  { %v5747_v52 = vpop.permute.xlu1 %5746  ;;  %v5861_v60 = vsel %vm1052_vm1, %v5860_v47, %v5856_v42 }
 0xab1   :  { %v5750_v8 = vpop.permute.xlu0 %5749  ;;  %v5865_v16 = vrot.slane %v5747_v52, %v14126_v35  ;;  %v5948_v36 = vsel %vm1199_vm7, %v5861_v60, %v5947_v31 }
 0xab2   :  { %v5869_v33 = vrot.slane %v5750_v8, %v14125_v27 }
 0xab4   :  { %v7592_v48 = vpop.permute.xlu1 %7591  ;;  %v5870_v28 = vsel %vm1052_vm1, %v5869_v33, %v5865_v16 }
 0xab5   :  { %v7595_v24 = vpop.permute.xlu0 %7594  ;;  %v5949_v13 = vsel %vm1201_vm8, %v5870_v28, %v5948_v36  ;;  %v7689_v53 = vrot.slane %v7592_v48, %v14126_v35 }
 0xab6   :  { %v5959_v63 = vsel %vm184_vm0, %v5949_v13, 0.0  ;;  %v7693_v16 = vrot.slane %v7595_v24, %v14125_v27 }
 0xab7   :  { %5960 = vadd.xlane.f32.xlu0 %v5959_v63 }
 0xab8   :  { %v7598_v26 = vpop.permute.xlu1 %7597 }
 0xab9   :  { %v7607_v42 = vpop.permute.xlu0 %7606  ;;  %v7698_v33 = vrot.slane %v7598_v26, %v14126_v35  ;;  %v7694_v26 = vsel %vm1052_vm1, %v7693_v16, %v7689_v53 }
 0xaba   :  { %v7711_v36 = vrot.slane %v7607_v42, %v14125_v27 }
 0xabc   :  { %v7601_v12 = vpop.permute.xlu1 %7600 }
 0xabd   :  { %v7613_v15 = vpop.permute.xlu0 %7612  ;;  %v7702_v56 = vrot.slane %v7601_v12, %v14125_v27 }
 0xabe   :  { %v7720_v63 = vrot.slane %v7613_v15, %v14125_v27 }
 0xabf   :  { %v7703_v12 = vsel %vm1052_vm1, %v7702_v56, %v7698_v33 }
 0xac0   :  { %v7604_v47 = vpop.permute.xlu1 %7603  ;;  %v7830_v15 = vsel %vm1189_vm2, %v7703_v12, %v7694_v26 }
 0xac1   :  { %v7619_v46 = vpop.permute.xlu0 %7618  ;;  %v7707_v60 = vrot.slane %v7604_v47, %v14126_v35 }
 0xac2   :  { %v7729_v20 = vrot.slane %v7619_v46, %v14125_v27 }
 0xac3   :  { %v7712_v24 = vsel %vm1052_vm1, %v7711_v36, %v7707_v60 }
 0xac4   :  { %v7610_v38 = vpop.permute.xlu1 %7609  ;;  %v7831_v46 = vsel %vm1191_vm3, %v7712_v24, %v7830_v15 }
 0xac5   :  { %v7625_v22 = vpop.permute.xlu0 %7624  ;;  %v7716_v31 = vrot.slane %v7610_v38, %v14126_v35 }
 0xac6   :  { %v7738_v38 = vrot.slane %v7625_v22, %v14125_v27 }
 0xac7   :  { %v7721_v51 = vsel %vm1052_vm1, %v7720_v63, %v7716_v31 }
 0xac8   :  { %v7616_v14 = vpop.permute.xlu1 %7615  ;;  %v7832_v33 = vsel %vm1193_vm4, %v7721_v51, %v7831_v46 }
 0xac9   :  { %v7631_v52 = vpop.permute.xlu0 %7630  ;;  %v7725_v13 = vrot.slane %v7616_v14, %v14126_v35 }
 0xaca   :  { %v7747_v56 = vrot.slane %v7631_v52, %v14125_v27 }
 0xacc   :  { %v7622_v8 = vpop.permute.xlu1 %7621 }
 0xacd   :  { %v7637_v28 = vpop.permute.xlu0 %7636  ;;  %v7734_v47 = vrot.slane %v7622_v8, %v14126_v35  ;;  %v7730_v8 = vsel %vm1052_vm1, %v7729_v20, %v7725_v13 }
 0xace   :  { %v7833_v53 = vsel %vm1195_vm5, %v7730_v8, %v7832_v33  ;;  %v7756_v31 = vrot.slane %v7637_v28, %v14125_v27 }
 0xacf   :  { %v7739_v60 = vsel %vm1052_vm1, %v7738_v38, %v7734_v47 }
 0xad0   :  { %v7628_v48 = vpop.permute.xlu1 %7627  ;;  %v7834_v52 = vsel %vm1197_vm6, %v7739_v60, %v7833_v53 }
 0xad1   :  { %v5756_v42 = vpop.permute.xlu0 %5755  ;;  %v7743_v14 = vrot.slane %v7628_v48, %v14126_v35 }
 0xad3   :  { %v7748_v16 = vsel %vm1052_vm1, %v7747_v56, %v7743_v14 }
 0xad4   :  { %v7634_v22 = vpop.permute.xlu1 %7633  ;;  %v7835_v13 = vsel %vm1199_vm7, %v7748_v16, %v7834_v52 }
 0xad5   :  { %v5762_v36 = vpop.permute.xlu0 %5761  ;;  %v7752_v63 = vrot.slane %v7634_v22, %v14126_v35 }
 0xad6   :  { %v5887_v16 = vrot.slane %v5762_v36, %v14125_v27 }
 0xad7   :  { %v7757_v20 = vsel %vm1052_vm1, %v7756_v31, %v7752_v63 }
 0xad8   :  { %v5753_v12 = vpop.permute.xlu1 %5752  ;;  %v7836_v47 = vsel %vm1201_vm8, %v7757_v20, %v7835_v13  ;;  %v5878_v20 = vrot.slane %v5756_v42, %v14125_v27 }
 0xad9   :  { %v5768_v51 = vpop.permute.xlu0 %5767  ;;  %v7846_v24 = vsel %vm184_vm0, %v7836_v47, 0.0  ;;  %v5874_v22 = vrot.slane %v5753_v12, %v14126_v35 }
 0xada   :  { %7847 = vadd.xlane.f32.xlu1 %v7846_v24  ;;  %v5896_v63 = vrot.slane %v5768_v51, %v14125_v27 }
 0xadc   :  { %v5759_v48 = vpop.permute.xlu1 %5758 }
 0xadd   :  { %v5774_v26 = vpop.permute.xlu0 %5773  ;;  %v5883_v46 = vrot.slane %v5759_v48, %v14126_v35 }
 0xade   :  { %v5905_v13 = vrot.slane %v5774_v26, %v14125_v27 }
 0xadf   :  { %v5888_v47 = vsel %vm1052_vm1, %v5887_v16, %v5883_v46 }
 0xae0   :  { %v5765_v38 = vpop.permute.xlu1 %5764 }
 0xae1   :  { %v5780_v28 = vpop.permute.xlu0 %5779  ;;  %v5892_v60 = vrot.slane %v5765_v38, %v14126_v35  ;;  %v5879_v38 = vsel %vm1052_vm1, %v5878_v20, %v5874_v22 }
 0xae2   :  { %v5914_v48 = vrot.slane %v5780_v28, %v14125_v27  ;;  %v5950_v26 = vsel %vm1189_vm2, %v5888_v47, %v5879_v38 }
 0xae3   :  { %v5897_v36 = vsel %vm1052_vm1, %v5896_v63, %v5892_v60 }
 0xae4   :  { %v5771_v14 = vpop.permute.xlu1 %5770  ;;  %v5951_v28 = vsel %vm1191_vm3, %v5897_v36, %v5950_v26 }
 0xae5   :  { %v5786_v15 = vpop.permute.xlu0 %5785  ;;  %v5901_v53 = vrot.slane %v5771_v14, %v14126_v35 }
 0xae6   :  { %v5923_v14 = vrot.slane %v5786_v15, %v14125_v27 }
 0xae7   :  { %v5906_v51 = vsel %vm1052_vm1, %v5905_v13, %v5901_v53 }
 0xae8   :  { %v5777_v56 = vpop.permute.xlu1 %5776  ;;  %v5952_v16 = vsel %vm1193_vm4, %v5906_v51, %v5951_v28 }
 0xae9   :  { %v5792_v8 = vpop.permute.xlu0 %5791  ;;  %v5910_v52 = vrot.slane %v5777_v56, %v14126_v35 }
 0xaea   :  { %v5932_v46 = vrot.slane %v5792_v8, %v14125_v27 }
 0xaec   :  { %v5783_v33 = vpop.permute.xlu1 %5782 }
 0xaed   :  { %v5798_v31 = vpop.permute.xlu0 %5797  ;;  %v5919_v24 = vrot.slane %v5783_v33, %v14126_v35  ;;  %v5915_v33 = vsel %vm1052_vm1, %v5914_v48, %v5910_v52 }
 0xaee   :  { %v5953_v53 = vsel %vm1195_vm5, %v5915_v33, %v5952_v16  ;;  %v5941_v63 = vrot.slane %v5798_v31, %v14125_v27 }
 0xaef   :  { %v5924_v60 = vsel %vm1052_vm1, %v5923_v14, %v5919_v24 }
 0xaf0   :  { %v5789_v12 = vpop.permute.xlu1 %5788  ;;  %v5954_v8 = vsel %vm1197_vm6, %v5924_v60, %v5953_v53 }
 0xaf1   :  { %v7643_v56 = vpop.permute.xlu0 %7642  ;;  %v5928_v42 = vrot.slane %v5789_v12, %v14126_v35 }
 0xaf3   :  { %v5933_v22 = vsel %vm1052_vm1, %v5932_v46, %v5928_v42 }
 0xaf4   :  { %v5795_v15 = vpop.permute.xlu1 %5794  ;;  %v5955_v47 = vsel %vm1199_vm7, %v5933_v22, %v5954_v8  ;;  %v7765_v8 = vrot.slane %v7643_v56, %v14125_v27 }
 0xaf5   :  { %v7649_v20 = vpop.permute.xlu0 %7648  ;;  %v5937_v13 = vrot.slane %v5795_v15, %v14126_v35 }
 0xaf6   :  { %v7774_v22 = vrot.slane %v7649_v20, %v14125_v27 }
 0xaf7   :  { %v5942_v52 = vsel %vm1052_vm1, %v5941_v63, %v5937_v13 }
 0xaf8   :  { %v7640_v48 = vpop.permute.xlu1 %7639  ;;  %v5956_v24 = vsel %vm1201_vm8, %v5942_v52, %v5955_v47 }
 0xaf9   :  { %v7655_v36 = vpop.permute.xlu0 %7654  ;;  %v5962_v12 = vsel %vm184_vm0, %v5956_v24, 0.0  ;;  %v7761_v15 = vrot.slane %v7640_v48, %v14126_v35 }
 0xafa   :  { %5963 = vadd.xlane.f32.xlu0 %v5962_v12  ;;  %v7783_v63 = vrot.slane %v7655_v36, %v14125_v27 }
 0xafb   :  { %v7766_v48 = vsel %vm1052_vm1, %v7765_v8, %v7761_v15 }
 0xafc   :  { %v7646_v38 = vpop.permute.xlu1 %7645 }
 0xafd   :  { %v7661_v14 = vpop.permute.xlu0 %7660  ;;  %v7770_v33 = vrot.slane %v7646_v38, %v14126_v35 }
 0xafe   :  { %v7792_v52 = vrot.slane %v7661_v14, %v14125_v27 }
 0xaff   :  { %v7775_v47 = vsel %vm1052_vm1, %v7774_v22, %v7770_v33 }
 0xb00   :  { %v7652_v51 = vpop.permute.xlu1 %7651  ;;  %v7837_v56 = vsel %vm1189_vm2, %v7775_v47, %v7766_v48 }
 0xb01   :  { %v7667_v31 = vpop.permute.xlu0 %7666  ;;  %v7779_v28 = vrot.slane %v7652_v51, %v14126_v35 }
 0xb02   :  { %v7801_v12 = vrot.slane %v7667_v31, %v14125_v27 }
 0xb03   :  { %v7784_v20 = vsel %vm1052_vm1, %v7783_v63, %v7779_v28 }
 0xb04   :  { %v7658_v42 = vpop.permute.xlu1 %7657  ;;  %v7838_v31 = vsel %vm1191_vm3, %v7784_v20, %v7837_v56 }
 0xb05   :  { %v7673_v26 = vpop.permute.xlu0 %7672  ;;  %v7788_v53 = vrot.slane %v7658_v42, %v14126_v35 }
 0xb06   :  { %v7810_v51 = vrot.slane %v7673_v26, %v14125_v27 }
 0xb07   :  { %v7793_v36 = vsel %vm1052_vm1, %v7792_v52, %v7788_v53 }
 0xb08   :  { %v7664_v46 = vpop.permute.xlu1 %7663 }
 0xb09   :  { %v7679_v60 = vpop.permute.xlu0 %7678  ;;  %v7797_v13 = vrot.slane %v7664_v46, %v14126_v35 }
 0xb0a   :  { %v7819_v14 = vrot.slane %v7679_v60, %v14125_v27 }
 0xb0b   :  { %v7802_v46 = vsel %vm1052_vm1, %v7801_v12, %v7797_v13 }
 0xb0c   :  { %v7670_v16 = vpop.permute.xlu1 %7669 }
 0xb0d   :  { %v7806_v24 = vrot.slane %v7670_v16, %v14126_v35  ;;  %v7685_v33 = vpop.permute.xlu0 %7684  ;;  %v7839_v16 = vsel %vm1193_vm4, %v7793_v36, %v7838_v31 }
 0xb0e   :  { %v7840_v15 = vsel %vm1195_vm5, %v7802_v46, %v7839_v16  ;;  %v7828_v53 = vrot.slane %v7685_v33, %v14125_v27 }
 0xb0f   :  { %v7811_v28 = vsel %vm1052_vm1, %v7810_v51, %v7806_v24 }
 0xb10   :  { %v7676_v38 = vpop.permute.xlu1 %7675  ;;  %v7841_v60 = vsel %vm1197_vm6, %v7811_v28, %v7840_v15 }
 0xb11   :  { %v7815_v42 = vrot.slane %v7676_v38, %v14126_v35 }
 0xb13   :  { %v7820_v22 = vsel %vm1052_vm1, %v7819_v14, %v7815_v42 }
 0xb14   :  { %v7682_v26 = vpop.permute.xlu1 %7681  ;;  %v7842_v8 = vsel %vm1199_vm7, %v7820_v22, %v7841_v60 }
 0xb15   :  { %v7824_v63 = vrot.slane %v7682_v26, %v14126_v35 }
 0xb17   :  { %v7829_v13 = vsel %vm1052_vm1, %v7828_v53, %v7824_v63 }
 0xb18   :  { %v7843_v52 = vsel %vm1201_vm8, %v7829_v13, %v7842_v8 }
 0xb19   :  { %v7849_v47 = vsel %vm184_vm0, %v7843_v52, 0.0 }
 0xb1a   :  { %7850 = vadd.xlane.f32.xlu0 %v7849_v47 }
 0xb44   :  { %v5961_v24 = vpop.xlane.xlu0 %5960 }
 0xb45   :  { %9286 = vrcp.f32 %v5961_v24 }
 0xb4f   :  { %v9287_v12 = vpop.eup %9286 }
 0xb50   :  { %v5972_v20 = vrot.slane %v9287_v12, %v13879_v21  ;;  %v5976_v38 = vrot.slane %v9287_v12, %v14127_v50  ;;  %v5980_v48 = vrot.slane %v9287_v12, %v14129_v18  ;;  %v5984_v33 = vrot.slane %v9287_v12, %v14132_v34 }
 0xb51   :  { %v5992_v53 = vrot.slane %v9287_v12, %v14138_v1  ;;  %v5996_v24 = vrot.slane %v9287_v12, %v14141_v5 }
 0xb52   :  { %v6049_v51 = vmul.f32 %v12816_v58, %v5972_v20  ;;  %v6050_v36 = vmul.f32 %v12818_v43, %v5972_v20  ;;  %v6051_v42 = vmul.f32 %v12825_v37, %v5976_v38  ;;  %v6052_v56 = vmul.f32 %v12827_v39, %v5976_v38 }
 0xb53   :  { %v6053_v46 = vmul.f32 %v12836_v32, %v5980_v48  ;;  %v6054_v22 = vmul.f32 %v12838_v41, %v5980_v48  ;;  %v6055_v58 = vmul.f32 %v12846_v11, %v5984_v33  ;;  %v5988_v43 = vrot.slane %v9287_v12, %v14135_v6 }
 0xb54   :  { %v6081_v14 = vpack.c.bf16 %v6050_v36, %v6049_v51  ;;  %v6082_v16 = vpack.c.bf16 %v6052_v56, %v6051_v42  ;;  %v6056_v39 = vmul.f32 %v12848_v7, %v5984_v33  ;;  %v6059_v11 = vmul.f32 %v12868_v3, %v5992_v53 }
 0xb55   :  { %v6083_v15 = vpack.c.bf16 %v6054_v22, %v6053_v46  ;;  %v6057_v32 = vmul.f32 %v12858_v59, %v5988_v43  ;;  %v6058_v13 = vmul.f32 %v12860_v17, %v5988_v43  ;;  %v6060_v8 = vmul.f32 %v12870_v49, %v5992_v53 }
 0xb56   :  { %v6119_v31 = vunpack.c.l.b16 %v6081_v14  ;;  %v6120_v28 = vunpack.c.h.b16 %v6081_v14  ;;  %v6121_v26 = vunpack.c.l.b16 %v6082_v16  ;;  %v6122_v37 = vunpack.c.h.b16 %v6082_v16 }
 0xb57   :  { %v6123_v63 = vunpack.c.l.b16 %v6083_v15  ;;  %v6124_v60 = vunpack.c.h.b16 %v6083_v15  ;;  %v6084_v41 = vpack.c.bf16 %v6056_v39, %v6055_v58  ;;  %v6085_v7 = vpack.c.bf16 %v6058_v13, %v6057_v32 }
 0xb58   :  { %6152 = vperm.xlu1 %8894, %v6119_v31   ;;  %6155 = vperm.xlu0 %8893, %v6120_v28   ;;  %v6086_v59 = vpack.c.bf16 %v6060_v8, %v6059_v11  ;;  %v6000_v20 = vrot.slane %v9287_v12, %v14144_v40  ;;  %v6061_v17 = vmul.f32 %v12878_v57, %v5996_v24 }
 0xb59   :  { %v6125_v52 = vunpack.c.l.b16 %v6084_v41  ;;  %v6126_v47 = vunpack.c.h.b16 %v6084_v41  ;;  %v6127_v38 = vunpack.c.l.b16 %v6085_v7  ;;  %v6128_v48 = vunpack.c.h.b16 %v6085_v7 }
 0xb5a   :  { %v6062_v51 = vmul.f32 %v12880_v61, %v5996_v24  ;;  %v6063_v3 = vmul.f32 %v12888_v44, %v6000_v20  ;;  %v6129_v49 = vunpack.c.l.b16 %v6086_v59  ;;  %v6130_v42 = vunpack.c.h.b16 %v6086_v59 }
 0xb5b   :  { %v6064_v14 = vmul.f32 %v12890_v0, %v6000_v20  ;;  %v14232_v20 = vld [vmem:[#allocation65_spill] sm:$0xff] }
 0xb5c   :  { %6158 = vperm.xlu1 %8894, %v6121_v26   ;;  %6161 = vperm.xlu0 %8893, %v6122_v37   ;;  %v6087_v56 = vpack.c.bf16 %v6062_v51, %v6061_v17 }
 0xb5d   :  { %v6088_v33 = vpack.c.bf16 %v6064_v14, %v6063_v3  ;;  %v14233_v3 = vld [vmem:[#allocation60_spill] sm:$0xff] }
 0xb5e   :  { %v6131_v12 = vunpack.c.l.b16 %v6087_v56  ;;  %v6132_v46 = vunpack.c.h.b16 %v6087_v56 }
 0xb5f   :  { %v6133_v61 = vunpack.c.l.b16 %v6088_v33  ;;  %v6134_v31 = vunpack.c.h.b16 %v6088_v33 }
 0xb60   :  { %6164 = vperm.xlu1 %8894, %v6123_v63   ;;  %6167 = vperm.xlu0 %8893, %v6124_v60  }
 0xb64   :  { %6170 = vperm.xlu1 %8894, %v6125_v52   ;;  %6173 = vperm.xlu0 %8893, %v6126_v47  }
 0xb67   :  { %v7848_v36 = vpop.xlane.xlu1 %7847 }
 0xb68   :  { %6176 = vperm.xlu1 %8894, %v6127_v38   ;;  %6179 = vperm.xlu0 %8893, %v6128_v48   ;;  %9288 = vrcp.f32 %v7848_v36 }
 0xb6c   :  { %6182 = vperm.xlu1 %8894, %v6129_v49   ;;  %6185 = vperm.xlu0 %8893, %v6130_v42   ;;  %v14234_v49 = vld [vmem:[#allocation54_spill] sm:$0xff] }
 0xb70   :  { %6188 = vperm.xlu1 %8894, %v6131_v12   ;;  %6191 = vperm.xlu0 %8893, %v6132_v46  }
 0xb72   :  { %v9289_v57 = vpop.eup %9288 }
 0xb73   :  { %v7859_v28 = vrot.slane %v9289_v57, %v13879_v21  ;;  %v7867_v16 = vrot.slane %v9289_v57, %v14129_v18  ;;  %v7863_v44 = vrot.slane %v9289_v57, %v14127_v50  ;;  %v7871_v0 = vrot.slane %v9289_v57, %v14132_v34 }
 0xb74   :  { %6194 = vperm.xlu1 %8894, %v6133_v61   ;;  %6197 = vperm.xlu0 %8893, %v6134_v31   ;;  %v7875_v63 = vrot.slane %v9289_v57, %v14135_v6  ;;  %v7879_v11 = vrot.slane %v9289_v57, %v14138_v1  ;;  %v7887_v48 = vrot.slane %v9289_v57, %v14144_v40 }
 0xb75   :  { %v7936_v22 = vmul.f32 %v12898_v30, %v7859_v28  ;;  %v7937_v58 = vmul.f32 %v12900_v4, %v7859_v28  ;;  %v7940_v43 = vmul.f32 %v12930_v25, %v7867_v16  ;;  %v7941_v26 = vmul.f32 %v12912_v55, %v7867_v16  ;;  %v14235_v16 = vld [vmem:[#allocation58_spill] sm:$0xff] }
 0xb76   :  { %v7938_v37 = vmul.f32 %v12908_v2, %v7863_v44  ;;  %v7939_v15 = vmul.f32 %v12920_v23, %v7863_v44  ;;  %v7942_v32 = vmul.f32 %v12940_v45, %v7871_v0  ;;  %v7943_v53 = vmul.f32 %v12922_v10, %v7871_v0  ;;  %v14236_v0 = vld [vmem:[#allocation24_spill] sm:$0xff] }
 0xb77   :  { %v7968_v39 = vpack.c.bf16 %v7937_v58, %v7936_v22  ;;  %v7970_v30 = vpack.c.bf16 %v7941_v26, %v7940_v43  ;;  %v7944_v4 = vmul.f32 %v12950_v9, %v7875_v63  ;;  %v7945_v55 = vmul.f32 %v12932_v62, %v7875_v63  ;;  %v14237_v58 = vld [vmem:[#allocation26_spill] sm:$0xff]  ;;  %v14238_v26 = vld [vmem:[#allocation25_spill] sm:$0xff] }
 0xb78   :  { %v7969_v13 = vpack.c.bf16 %v7939_v15, %v7938_v37  ;;  %v7971_v23 = vpack.c.bf16 %v7943_v53, %v7942_v32  ;;  %v7883_v45 = vrot.slane %v9289_v57, %v14141_v5  ;;  %v7946_v47 = vmul.f32 %v12960_v19, %v7879_v11 }
 0xb79   :  { %v8007_v60 = vunpack.c.h.b16 %v7968_v39  ;;  %v8006_v41 = vunpack.c.l.b16 %v7968_v39  ;;  %v8011_v2 = vunpack.c.h.b16 %v7970_v30  ;;  %v7972_v10 = vpack.c.bf16 %v7945_v55, %v7944_v4  ;;  %v14241_v4 = vld [vmem:[#allocation68_spill] sm:$0xff] }
 0xb7a   :  { %v8008_v25 = vunpack.c.l.b16 %v7969_v13  ;;  %v8013_v8 = vunpack.c.h.b16 %v7971_v23  ;;  %v8009_v52 = vunpack.c.h.b16 %v7969_v13  ;;  %v7947_v7 = vmul.f32 %v12942_v54, %v7879_v11 }
 0xb7b   :  { %8042 = vperm.xlu0 %8893, %v8007_v60   ;;  %8039 = vperm.xlu1 %8894, %v8006_v41   ;;  %v8015_v9 = vunpack.c.h.b16 %v7972_v10  ;;  %v8010_v62 = vunpack.c.l.b16 %v7970_v30  ;;  %v7948_v59 = vmul.f32 %v12970_v29, %v7883_v45  ;;  %v7949_v38 = vmul.f32 %v14232_v20, %v7883_v45  ;;  %v14239_v60 = vld [vmem:[#allocation33_spill] sm:$0xff]  ;;  %v14240_v30 = vld [vmem:[#allocation51_spill] sm:$0xff]  ;;  %v14245_v20 = vld [vmem:[#allocation76_spill] sm:$0xff] }
 0xb7c   :  { %v7973_v24 = vpack.c.bf16 %v7947_v7, %v7946_v47  ;;  %v8012_v51 = vunpack.c.l.b16 %v7971_v23  ;;  %v7950_v54 = vmul.f32 %v14233_v3, %v7887_v48  ;;  %v7951_v42 = vmul.f32 %v14234_v49, %v7887_v48 }
 0xb7d   :  { %v7974_v19 = vpack.c.bf16 %v7949_v38, %v7948_v59  ;;  %v8014_v14 = vunpack.c.l.b16 %v7972_v10  ;;  %v14242_v10 = vld [vmem:[#allocation69_spill] sm:$0xff] }
 0xb7e   :  { %v8017_v36 = vunpack.c.h.b16 %v7973_v24  ;;  %v7975_v29 = vpack.c.bf16 %v7951_v42, %v7950_v54  ;;  %v8016_v46 = vunpack.c.l.b16 %v7973_v24  ;;  %v14244_v24 = vld [vmem:[#allocation27_spill] sm:$0xff] }
 0xb7f   :  { %8054 = vperm.xlu0 %8893, %v8011_v2   ;;  %8045 = vperm.xlu1 %8894, %v8008_v25   ;;  %v8019_v56 = vunpack.c.h.b16 %v7974_v19  ;;  %v8018_v31 = vunpack.c.l.b16 %v7974_v19  ;;  %v14246_v19 = vld [vmem:[#allocation47_spill] sm:$0xff] }
 0xb80   :  { %v8021_v12 = vunpack.c.h.b16 %v7975_v29  ;;  %v8020_v39 = vunpack.c.l.b16 %v7975_v29 }
 0xb83   :  { %8060 = vperm.xlu0 %8893, %v8013_v8   ;;  %8048 = vperm.xlu1 %8894, %v8009_v52   ;;  %v14243_v8 = vld [vmem:[#allocation28_spill] sm:$0xff] }
 0xb87   :  { %v5964_v17 = vpop.xlane.xlu0 %5963  ;;  %8066 = vperm.xlu0 %8893, %v8015_v9   ;;  %8051 = vperm.xlu1 %8894, %v8010_v62  }
 0xb88   :  { %9290 = vrcp.f32 %v5964_v17 }
 0xb8b   :  { %8072 = vperm.xlu0 %8893, %v8017_v36   ;;  %8057 = vperm.xlu1 %8894, %v8012_v51  }
 0xb8f   :  { %8078 = vperm.xlu0 %8893, %v8019_v56   ;;  %8063 = vperm.xlu1 %8894, %v8014_v14   ;;  %v14247_v14 = vld [vmem:[#allocation63_spill] sm:$0xff] }
 0xb92   :  { %v13294_v33 = vpop.eup %9290 }
 0xb93   :  { %8084 = vperm.xlu0 %8893, %v8021_v12   ;;  %8069 = vperm.xlu1 %8894, %v8016_v46   ;;  %v6004_v57 = vrot.slane %v13294_v33, %v13879_v21  ;;  %v6008_v61 = vrot.slane %v13294_v33, %v14127_v50  ;;  %v6012_v28 = vrot.slane %v13294_v33, %v14129_v18  ;;  %v14248_v12 = vld [vmem:[#allocation34_spill] sm:$0xff] }
 0xb94   :  { %v6016_v32 = vrot.slane %v13294_v33, %v14132_v34  ;;  %v6020_v2 = vrot.slane %v13294_v33, %v14135_v6  ;;  %v6024_v47 = vrot.slane %v13294_v33, %v14138_v1  ;;  %v6028_v48 = vrot.slane %v13294_v33, %v14141_v5 }
 0xb95   :  { %v6065_v44 = vmul.f32 %v14235_v16, %v6004_v57  ;;  %v6066_v22 = vmul.f32 %v14236_v0, %v6004_v57  ;;  %v6067_v43 = vmul.f32 %v14237_v58, %v6008_v61  ;;  %v6068_v37 = vmul.f32 %v14238_v26, %v6008_v61  ;;  %v14249_v26 = vld [vmem:[#allocation78_spill] sm:$0xff] }
 0xb96   :  { %v6069_v41 = vmul.f32 %v14239_v60, %v6012_v28  ;;  %v6070_v13 = vmul.f32 %v14240_v30, %v6012_v28  ;;  %v6071_v55 = vmul.f32 %v14241_v4, %v6016_v32  ;;  %v6072_v45 = vmul.f32 %v14242_v10, %v6016_v32  ;;  %v14251_v32 = vld [vmem:[#allocation83_spill] sm:$0xff]  ;;  %v14253_v30 = vld [vmem:[#allocation62_spill] sm:$0xff] }
 0xb97   :  { %8075 = vperm.xlu1 %8894, %v8018_v31   ;;  %v6089_v15 = vpack.c.bf16 %v6066_v22, %v6065_v44  ;;  %v6090_v63 = vpack.c.bf16 %v6068_v37, %v6067_v43  ;;  %v6073_v52 = vmul.f32 %v14243_v8, %v6020_v2  ;;  %v6074_v59 = vmul.f32 %v14244_v24, %v6020_v2  ;;  %v14254_v2 = vld [vmem:[#allocation81_spill] sm:$0xff] }
 0xb98   :  { %v6091_v11 = vpack.c.bf16 %v6070_v13, %v6069_v41  ;;  %v6092_v62 = vpack.c.bf16 %v6072_v45, %v6071_v55  ;;  %v6075_v38 = vmul.f32 %v14245_v20, %v6024_v47  ;;  %v6076_v3 = vmul.f32 %v14246_v19, %v6024_v47  ;;  %v14258_v20 = vld [vmem:[#allocation71_spill] sm:$0xff] }
 0xb99   :  { %v6136_v53 = vunpack.c.h.b16 %v6089_v15  ;;  %v6138_v25 = vunpack.c.h.b16 %v6090_v63  ;;  %v6135_v23 = vunpack.c.l.b16 %v6089_v15  ;;  %v6137_v9 = vunpack.c.l.b16 %v6090_v63  ;;  %v14250_v15 = vld [vmem:[#allocation44_spill] sm:$0xff] }
 0xb9a   :  { %v6140_v7 = vunpack.c.h.b16 %v6091_v11  ;;  %v6142_v17 = vunpack.c.h.b16 %v6092_v62  ;;  %v6139_v51 = vunpack.c.l.b16 %v6091_v11  ;;  %v6093_v36 = vpack.c.bf16 %v6074_v59, %v6073_v52  ;;  %v14252_v63 = vld [vmem:[#allocation64_spill] sm:$0xff]  ;;  %v14256_v52 = vld [vmem:[#allocation38_spill] sm:$0xff] }
 0xb9b   :  { %6203 = vperm.xlu0 %8893, %v6136_v53   ;;  %8081 = vperm.xlu1 %8894, %v8020_v39   ;;  %v6141_v49 = vunpack.c.l.b16 %v6092_v62  ;;  %v6094_v56 = vpack.c.bf16 %v6076_v3, %v6075_v38  ;;  %v6077_v29 = vmul.f32 %v14247_v14, %v6028_v48  ;;  %v6078_v46 = vmul.f32 %v14248_v12, %v6028_v48  ;;  %v14259_v48 = vld [vmem:[#allocation66_spill] sm:$0xff] }
 0xb9c   :  { %v6144_v42 = vunpack.c.h.b16 %v6093_v36  ;;  %v6143_v61 = vunpack.c.l.b16 %v6093_v36 }
 0xb9d   :  { %v6146_v57 = vunpack.c.h.b16 %v6094_v56  ;;  %v6095_v31 = vpack.c.bf16 %v6078_v46, %v6077_v29  ;;  %v6145_v16 = vunpack.c.l.b16 %v6094_v56  ;;  %v14262_v29 = vld [vmem:[#allocation75_spill] sm:$0xff] }
 0xb9f   :  { %6209 = vperm.xlu0 %8893, %v6138_v25   ;;  %6200 = vperm.xlu1 %8894, %v6135_v23   ;;  %v6148_v28 = vunpack.c.h.b16 %v6095_v31  ;;  %v6147_v58 = vunpack.c.l.b16 %v6095_v31 }
 0xba3   :  { %6215 = vperm.xlu0 %8893, %v6140_v7   ;;  %6206 = vperm.xlu1 %8894, %v6137_v9   ;;  %v14257_v7 = vld [vmem:[#allocation39_spill] sm:$0xff] }
 0xba7   :  { %v7851_v54 = vpop.xlane.xlu0 %7850  ;;  %6221 = vperm.xlu0 %8893, %v6142_v17   ;;  %6212 = vperm.xlu1 %8894, %v6139_v51   ;;  %v14260_v17 = vld [vmem:[#allocation79_spill] sm:$0xff] }
 0xba8   :  { %9292 = vrcp.f32 %v7851_v54 }
 0xbab   :  { %6227 = vperm.xlu0 %8893, %v6144_v42   ;;  %6218 = vperm.xlu1 %8894, %v6141_v49  }
 0xbaf   :  { %6233 = vperm.xlu0 %8893, %v6146_v57   ;;  %6224 = vperm.xlu1 %8894, %v6143_v61  }
 0xbb2   :  { %v9293_v44 = vpop.eup %9292 }
 0xbb3   :  { %6239 = vperm.xlu0 %8893, %v6148_v28   ;;  %6230 = vperm.xlu1 %8894, %v6145_v16   ;;  %v7891_v0 = vrot.slane %v9293_v44, %v13879_v21  ;;  %v7895_v22 = vrot.slane %v9293_v44, %v14127_v50  ;;  %v7899_v43 = vrot.slane %v9293_v44, %v14129_v18  ;;  %v14255_v18 = vld [vmem:[#allocation57_spill] sm:$0xff] }
 0xbb4   :  { %v7903_v4 = vrot.slane %v9293_v44, %v14132_v34  ;;  %v7907_v11 = vrot.slane %v9293_v44, %v14135_v6  ;;  %v7911_v9 = vrot.slane %v9293_v44, %v14138_v1  ;;  %v7915_v36 = vrot.slane %v9293_v44, %v14141_v5  ;;  %v14261_v1 = vld [vmem:[#allocation49_spill] sm:$0xff] }
 0xbb5   :  { %v7952_v37 = vmul.f32 %v14249_v26, %v7891_v0  ;;  %v7953_v39 = vmul.f32 %v14250_v15, %v7891_v0  ;;  %v7954_v53 = vmul.f32 %v14251_v32, %v7895_v22  ;;  %v7955_v60 = vmul.f32 %v14252_v63, %v7895_v22  ;;  %v14263_v28 = vld [vmem:[#allocation77_spill] sm:$0xff]  ;;  %v14264_v0 = vld [vmem:[#allocation52_spill] sm:$0xff] }
 0xbb6   :  { %v7956_v13 = vmul.f32 %v14253_v30, %v7899_v43  ;;  %v7957_v25 = vmul.f32 %v14254_v2, %v7899_v43  ;;  %v7958_v23 = vmul.f32 %v14255_v18, %v7903_v4  ;;  %v7959_v47 = vmul.f32 %v14256_v52, %v7903_v4 }
 0xbb7   :  { %6236 = vperm.xlu1 %8894, %v6147_v58   ;;  %v7976_v41 = vpack.c.bf16 %v7953_v39, %v7952_v37  ;;  %v7977_v50 = vpack.c.bf16 %v7955_v60, %v7954_v53  ;;  %v7960_v34 = vmul.f32 %v14257_v7, %v7907_v11  ;;  %v7961_v38 = vmul.f32 %v14258_v20, %v7907_v11  ;;  %v14265_v58 = vld [vmem:[#allocation30_spill] sm:$0xff] }
 0xbb8   :  { %v7978_v8 = vpack.c.bf16 %v7957_v25, %v7956_v13  ;;  %v7979_v59 = vpack.c.bf16 %v7959_v47, %v7958_v23  ;;  %v7962_v6 = vmul.f32 %v14259_v48, %v7911_v9  ;;  %v7963_v51 = vmul.f32 %v14260_v17, %v7911_v9 }
 0xbb9   :  { %v8023_v21 = vunpack.c.h.b16 %v7976_v41  ;;  %v8022_v55 = vunpack.c.l.b16 %v7976_v41  ;;  %v8025_v10 = vunpack.c.h.b16 %v7977_v50  ;;  %v8024_v45 = vunpack.c.l.b16 %v7977_v50 }
 0xbba   :  { %v8027_v62 = vunpack.c.h.b16 %v7978_v8  ;;  %v8026_v24 = vunpack.c.l.b16 %v7978_v8  ;;  %v8029_v19 = vunpack.c.h.b16 %v7979_v59  ;;  %v8028_v3 = vunpack.c.l.b16 %v7979_v59  ;;  %v8998_v8 = vld [vmem:[#allocation13 + $0x40] sm:$0xff]  }
 0xbbb   :  { %8090 = vperm.xlu0 %8893, %v8023_v21   ;;  %8087 = vperm.xlu1 %8894, %v8022_v55   ;;  %v7980_v54 = vpack.c.bf16 %v7961_v38, %v7960_v34  ;;  %v7981_v49 = vpack.c.bf16 %v7963_v51, %v7962_v6  ;;  %v7964_v42 = vmul.f32 %v14261_v1, %v7915_v36 }
 0xbbc   :  { %v7965_v12 = vmul.f32 %v14262_v29, %v7915_v36  ;;  %v7919_v46 = vrot.slane %v9293_v44, %v14144_v40  ;;  %v6032_v5 = vrot.slane %v13294_v33, %v14144_v40  ;;  %v14266_v44 = vld [vmem:[#allocation29_spill] sm:$0xff]  ;;  %8801 = vmatprep.subr.bf16.mxu0 %v8998_v8 }
 0xbbd   :  { %v8031_v56 = vunpack.c.h.b16 %v7980_v54  ;;  %v8030_v14 = vunpack.c.l.b16 %v7980_v54  ;;  %v8033_v57 = vunpack.c.h.b16 %v7981_v49  ;;  %v8032_v61 = vunpack.c.l.b16 %v7981_v49 }
 0xbbe   :  { %v7982_v31 = vpack.c.bf16 %v7965_v12, %v7964_v42  ;;  %v7966_v16 = vmul.f32 %v14263_v28, %v7919_v46  ;;  %v7967_v22 = vmul.f32 %v14264_v0, %v7919_v46  ;;  %v6079_v43 = vmul.f32 %v14265_v58, %v6032_v5 }
 0xbbf   :  { %8096 = vperm.xlu0 %8893, %v8025_v10   ;;  %8093 = vperm.xlu1 %8894, %v8024_v45   ;;  %v6080_v39 = vmul.f32 %v14266_v44, %v6032_v5 }
 0xbc0   :  { %v8035_v26 = vunpack.c.h.b16 %v7982_v31  ;;  %v8034_v37 = vunpack.c.l.b16 %v7982_v31  ;;  %v7983_v15 = vpack.c.bf16 %v7967_v22, %v7966_v16 }
 0xbc1   :  { %v6096_v40 = vpack.c.bf16 %v6080_v39, %v6079_v43 }
 0xbc2   :  { %v8037_v32 = vunpack.c.h.b16 %v7983_v15  ;;  %v8036_v53 = vunpack.c.l.b16 %v7983_v15 }
 0xbc3   :  { %8102 = vperm.xlu0 %8893, %v8027_v62   ;;  %8099 = vperm.xlu1 %8894, %v8026_v24   ;;  %v6150_v30 = vunpack.c.h.b16 %v6096_v40  ;;  %v6149_v13 = vunpack.c.l.b16 %v6096_v40 }
 0xbc7   :  { %8108 = vperm.xlu0 %8893, %v8029_v19   ;;  %8105 = vperm.xlu1 %8894, %v8028_v3  }
 0xbcb   :  { %8114 = vperm.xlu0 %8893, %v8031_v56   ;;  %8111 = vperm.xlu1 %8894, %v8030_v14  }
 0xbcf   :  { %8120 = vperm.xlu0 %8893, %v8033_v57   ;;  %8117 = vperm.xlu1 %8894, %v8032_v61  }
 0xbd3   :  { %8126 = vperm.xlu0 %8893, %v8035_v26   ;;  %8123 = vperm.xlu1 %8894, %v8034_v37  }
 0xbd7   :  { %v6156_v33 = vpop.permute.xlu0 %6155  ;;  %v6153_v63 = vpop.permute.xlu1 %6152  ;;  %8132 = vperm.xlu0 %8893, %v8037_v32   ;;  %8129 = vperm.xlu1 %8894, %v8036_v53  }
 0xbd8   :  { %v6254_v60 = vrot.slane %v6156_v33, %v14125_v27  ;;  %v6250_v41 = vrot.slane %v6153_v63, %v14126_v35 }
 0xbda   :  { %v6255_v4 = vsel %vm1052_vm1, %v6254_v60, %v6250_v41 }
 0xbdb   :  { %v6162_v21 = vpop.permute.xlu0 %6161  ;;  %v6159_v55 = vpop.permute.xlu1 %6158  ;;  %6245 = vperm.xlu0 %8893, %v6150_v30   ;;  %6242 = vperm.xlu1 %8894, %v6149_v13  }
 0xbdc   :  { %v6263_v50 = vrot.slane %v6162_v21, %v14125_v27  ;;  %v6259_v2 = vrot.slane %v6159_v55, %v14126_v35 }
 0xbde   :  { %v6264_v25 = vsel %vm1052_vm1, %v6263_v50, %v6259_v2 }
 0xbdf   :  { %v6391_v18 = vsel %vm1189_vm2, %v6264_v25, %v6255_v4  ;;  %v6168_v23 = vpop.permute.xlu0 %6167  ;;  %v6165_v11 = vpop.permute.xlu1 %6164 }
 0xbe0   :  { %v6272_v10 = vrot.slane %v6168_v23, %v14125_v27  ;;  %v6268_v45 = vrot.slane %v6165_v11, %v14126_v35 }
 0xbe2   :  { %v6273_v52 = vsel %vm1052_vm1, %v6272_v10, %v6268_v45 }
 0xbe3   :  { %v6392_v47 = vsel %vm1191_vm3, %v6273_v52, %v6391_v18  ;;  %v6174_v7 = vpop.permute.xlu0 %6173  ;;  %v6171_v34 = vpop.permute.xlu1 %6170 }
 0xbe4   :  { %v6281_v9 = vrot.slane %v6174_v7, %v14125_v27  ;;  %v6277_v62 = vrot.slane %v6171_v34, %v14126_v35 }
 0xbe6   :  { %v6282_v24 = vsel %vm1052_vm1, %v6281_v9, %v6277_v62 }
 0xbe7   :  { %v6393_v59 = vsel %vm1193_vm4, %v6282_v24, %v6392_v47  ;;  %v6180_v20 = vpop.permute.xlu0 %6179  ;;  %v6177_v38 = vpop.permute.xlu1 %6176 }
 0xbe8   :  { %v6290_v48 = vrot.slane %v6180_v20, %v14125_v27  ;;  %v6286_v6 = vrot.slane %v6177_v38, %v14126_v35 }
 0xbea   :  { %v6291_v17 = vsel %vm1052_vm1, %v6290_v48, %v6286_v6 }
 0xbeb   :  { %v6394_v51 = vsel %vm1195_vm5, %v6291_v17, %v6393_v59  ;;  %v6186_v36 = vpop.permute.xlu0 %6185  ;;  %v6183_v19 = vpop.permute.xlu1 %6182 }
 0xbec   :  { %v6299_v3 = vrot.slane %v6186_v36, %v14125_v27  ;;  %v6295_v54 = vrot.slane %v6183_v19, %v14126_v35 }
 0xbee   :  { %v6300_v49 = vsel %vm1052_vm1, %v6299_v3, %v6295_v54 }
 0xbef   :  { %v6395_v1 = vsel %vm1197_vm6, %v6300_v49, %v6394_v51  ;;  %v6192_v42 = vpop.permute.xlu0 %6191  ;;  %v6189_v56 = vpop.permute.xlu1 %6188 }
 0xbf0   :  { %v6308_v14 = vrot.slane %v6192_v42, %v14125_v27  ;;  %v6304_v29 = vrot.slane %v6189_v56, %v14126_v35 }
 0xbf2   :  { %v6309_v12 = vsel %vm1052_vm1, %v6308_v14, %v6304_v29 }
 0xbf3   :  { %v6396_v46 = vsel %vm1199_vm7, %v6309_v12, %v6395_v1  ;;  %v6198_v57 = vpop.permute.xlu0 %6197  ;;  %v6195_v5 = vpop.permute.xlu1 %6194 }
 0xbf4   :  { %v6317_v61 = vrot.slane %v6198_v57, %v14125_v27  ;;  %v6313_v31 = vrot.slane %v6195_v5, %v14126_v35 }
 0xbf6   :  { %v6318_v28 = vsel %vm1052_vm1, %v6317_v61, %v6313_v31 }
 0xbf7   :  { %v13383_v16 = vsel %vm1201_vm8, %v6318_v28, %v6396_v46 }
 0xbfa   :  { %v8043_v0 = vpop.permute.xlu0 %8042  ;;  %v8040_v22 = vpop.permute.xlu1 %8039 }
 0xbfb   :  { %v8141_v58 = vrot.slane %v8043_v0, %v14125_v27  ;;  %v8137_v43 = vrot.slane %v8040_v22, %v14126_v35 }
 0xbfd   :  { %v8142_v26 = vsel %vm1052_vm1, %v8141_v58, %v8137_v43 }
 0xbfe   :  { %v8055_v37 = vpop.permute.xlu0 %8054  ;;  %v8046_v15 = vpop.permute.xlu1 %8045 }
 0xbff   :  { %v8146_v32 = vrot.slane %v8046_v15, %v14126_v35  ;;  %v8159_v41 = vrot.slane %v8055_v37, %v14125_v27 }
 0xc02   :  { %v8061_v44 = vpop.permute.xlu0 %8060  ;;  %v8049_v39 = vpop.permute.xlu1 %8048 }
 0xc03   :  { %v8150_v53 = vrot.slane %v8049_v39, %v14125_v27  ;;  %v8168_v50 = vrot.slane %v8061_v44, %v14125_v27 }
 0xc05   :  { %v8151_v40 = vsel %vm1052_vm1, %v8150_v53, %v8146_v32 }
 0xc06   :  { %v8278_v33 = vsel %vm1189_vm2, %v8151_v40, %v8142_v26  ;;  %v8067_v63 = vpop.permute.xlu0 %8066  ;;  %v8052_v60 = vpop.permute.xlu1 %8051 }
 0xc07   :  { %v8155_v30 = vrot.slane %v8052_v60, %v14126_v35  ;;  %v8177_v11 = vrot.slane %v8067_v63, %v14125_v27 }
 0xc09   :  { %v8160_v13 = vsel %vm1052_vm1, %v8159_v41, %v8155_v30 }
 0xc0a   :  { %v8279_v4 = vsel %vm1191_vm3, %v8160_v13, %v8278_v33  ;;  %v8073_v21 = vpop.permute.xlu0 %8072  ;;  %v8058_v55 = vpop.permute.xlu1 %8057 }
 0xc0b   :  { %v8164_v2 = vrot.slane %v8058_v55, %v14126_v35  ;;  %v8186_v7 = vrot.slane %v8073_v21, %v14125_v27 }
 0xc0d   :  { %v8169_v25 = vsel %vm1052_vm1, %v8168_v50, %v8164_v2 }
 0xc0e   :  { %v8280_v18 = vsel %vm1193_vm4, %v8169_v25, %v8279_v4  ;;  %v8064_v23 = vpop.permute.xlu1 %8063  ;;  %v8079_v45 = vpop.permute.xlu0 %8078 }
 0xc0f   :  { %v8173_v10 = vrot.slane %v8064_v23, %v14126_v35  ;;  %v8195_v22 = vrot.slane %v8079_v45, %v14125_v27 }
 0xc11   :  { %v8178_v8 = vsel %vm1052_vm1, %v8177_v11, %v8173_v10 }
 0xc12   :  { %v8281_v52 = vsel %vm1195_vm5, %v8178_v8, %v8280_v18  ;;  %v8070_v47 = vpop.permute.xlu1 %8069  ;;  %v8085_v62 = vpop.permute.xlu0 %8084 }
 0xc13   :  { %v8182_v34 = vrot.slane %v8070_v47, %v14126_v35  ;;  %v8204_v15 = vrot.slane %v8085_v62, %v14125_v27 }
 0xc15   :  { %v8187_v9 = vsel %vm1052_vm1, %v8186_v7, %v8182_v34 }
 0xc16   :  { %v8282_v24 = vsel %vm1197_vm6, %v8187_v9, %v8281_v52  ;;  %v8076_v59 = vpop.permute.xlu1 %8075 }
 0xc17   :  { %v8191_v31 = vrot.slane %v8076_v59, %v14126_v35 }
 0xc19   :  { %v8196_v58 = vsel %vm1052_vm1, %v8195_v22, %v8191_v31 }
 0xc1a   :  { %v6204_v20 = vpop.permute.xlu0 %6203  ;;  %v8082_v38 = vpop.permute.xlu1 %8081  ;;  %v8283_v44 = vsel %vm1199_vm7, %v8196_v58, %v8282_v24 }
 0xc1b   :  { %v8200_v43 = vrot.slane %v8082_v38, %v14126_v35  ;;  %v6326_v32 = vrot.slane %v6204_v20, %v14125_v27 }
 0xc1d   :  { %v8205_v53 = vsel %vm1052_vm1, %v8204_v15, %v8200_v43 }
 0xc1e   :  { %v6210_v48 = vpop.permute.xlu0 %6209  ;;  %v6201_v6 = vpop.permute.xlu1 %6200 }
 0xc1f   :  { %v6322_v39 = vrot.slane %v6201_v6, %v14126_v35  ;;  %v6335_v63 = vrot.slane %v6210_v48, %v14125_v27 }
 0xc21   :  { %v6327_v25 = vsel %vm1052_vm1, %v6326_v32, %v6322_v39  ;;  %v8284_v39 = vsel %vm1201_vm8, %v8205_v53, %v8283_v44 }
 0xc22   :  { %v6216_v17 = vpop.permute.xlu0 %6215  ;;  %v6207_v51 = vpop.permute.xlu1 %6206 }
 0xc23   :  { %v6331_v60 = vrot.slane %v6207_v51, %v14126_v35  ;;  %v6344_v10 = vrot.slane %v6216_v17, %v14125_v27 }
 0xc25   :  { %v6336_v47 = vsel %vm1052_vm1, %v6335_v63, %v6331_v60 }
 0xc26   :  { %v13408_v36 = vpop.permute.xlu0 %6221  ;;  %v6213_v19 = vpop.permute.xlu1 %6212  ;;  %v6398_v22 = vsel %vm1189_vm2, %v6336_v47, %v6327_v25  ;;  %v9000_v25 = vld [vmem:[#allocation13 + $0x48] sm:$0xff]   ;;  %v9011_v47 = vld [vmem:[#allocation13 + $0x30] sm:$0xff]  }
 0xc27   :  { %v6340_v18 = vrot.slane %v6213_v19, %v14126_v35  ;;  %v6353_v7 = vrot.slane %v13408_v36, %v14125_v27 }
 0xc29   :  { %v6345_v6 = vsel %vm1052_vm1, %v6344_v10, %v6340_v18  ;;  %v9003_v18 = vld [vmem:[#allocation13 + $0x10] sm:$0xff]   ;;  %v9006_v10 = vld [vmem:[#allocation13 + $0x60] sm:$0xff]  }
 0xc2a   :  { %v13410_v3 = vpop.permute.xlu0 %6227  ;;  %v13412_v54 = vpop.permute.xlu1 %6218 }
 0xc2b   :  { %v6349_v34 = vrot.slane %v13412_v54, %v14126_v35  ;;  %v6362_v19 = vrot.slane %v13410_v3, %v14125_v27 }
 0xc2e   :  { %v13414_v49 = vpop.permute.xlu1 %6224  ;;  %v13416_v1 = vpop.permute.xlu0 %6233 }
 0xc2f   :  { %v6358_v17 = vrot.slane %v13414_v49, %v14126_v35  ;;  %v6371_v3 = vrot.slane %v13416_v1, %v14125_v27 }
 0xc31   :  { %v6363_v58 = vsel %vm1052_vm1, %v6362_v19, %v6358_v17  ;;  %v8745_v19 = vld [vmem:[%s13547_s9] ss:$0 sm:$0xff] }
 0xc32   :  { %v13418_v42 = vpop.permute.xlu1 %6230  ;;  %v13420_v56 = vpop.permute.xlu0 %6239 }
 0xc33   :  { %v6367_v54 = vrot.slane %v13418_v42, %v14126_v35 }
 0xc36   :  { %v13422_v14 = vpop.permute.xlu1 %6236 }
 0xc3a   :  { %v8091_v29 = vpop.permute.xlu0 %8090  ;;  %v8088_v12 = vpop.permute.xlu1 %8087 }
 0xc3b   :  { %v8213_v21 = vrot.slane %v8091_v29, %v14125_v27  ;;  %v8209_v55 = vrot.slane %v8088_v12, %v14126_v35 }
 0xc3d   :  { %v8214_v59 = vsel %vm1052_vm1, %v8213_v21, %v8209_v55  ;;  %v8999_v55 = vld [vmem:[#allocation13] sm:$0xff]  }
 0xc3e   :  { %v8097_v46 = vpop.permute.xlu0 %8096  ;;  %v8094_v57 = vpop.permute.xlu1 %8093 }
 0xc3f   :  { %v8222_v40 = vrot.slane %v8097_v46, %v14125_v27  ;;  %v8218_v33 = vrot.slane %v8094_v57, %v14126_v35  ;;  %v6354_v46 = vsel %vm1052_vm1, %v6353_v7, %v6349_v34  ;;  %v6376_v57 = vrot.slane %v13422_v14, %v14126_v35  ;;  %v9012_v7 = vld [vmem:[#allocation13 + $0x78] sm:$0xff]  }
 0xc40   :  { %v6380_v14 = vrot.slane %v13420_v56, %v14125_v27  ;;  %v9013_v34 = vld [vmem:[#allocation13 + $0x38] sm:$0xff]  }
 0xc41   :  { %v8223_v45 = vsel %vm1052_vm1, %v8222_v40, %v8218_v33 }
 0xc42   :  { %v8103_v5 = vpop.permute.xlu0 %8102  ;;  %v8100_v61 = vpop.permute.xlu1 %8099  ;;  %v8285_v51 = vsel %vm1189_vm2, %v8223_v45, %v8214_v59  ;;  %v6381_v40 = vsel %vm1052_vm1, %v6380_v14, %v6376_v57  ;;  %v9007_v45 = vld [vmem:[#allocation13 + $0x20] sm:$0xff]   ;;  %v9017_v59 = vld [vmem:[#allocation14 + $0x18] sm:$0xff]  }
 0xc43   :  { %v8231_v41 = vrot.slane %v8103_v5, %v14125_v27  ;;  %v8227_v30 = vrot.slane %v8100_v61, %v14126_v35  ;;  %v9021_v14 = vld [vmem:[#allocation14 + $0x38] sm:$0xff]  }
 0xc45   :  { %v8232_v9 = vsel %vm1052_vm1, %v8231_v41, %v8227_v30 }
 0xc46   :  { %v8109_v28 = vpop.permute.xlu0 %8108  ;;  %v8106_v0 = vpop.permute.xlu1 %8105  ;;  %v8286_v29 = vsel %vm1191_vm3, %v8232_v9, %v8285_v51  ;;  %v9014_v9 = vld [vmem:[#allocation14] sm:$0xff]  }
 0xc47   :  { %v8240_v50 = vrot.slane %v8109_v28, %v14125_v27  ;;  %v8236_v2 = vrot.slane %v8106_v0, %v14126_v35 }
 0xc49   :  { %v8241_v20 = vsel %vm1052_vm1, %v8240_v50, %v8236_v2  ;;  %v14267_v50 = vmov 0.0  }
 0xc4a   :  { %v8115_v26 = vpop.permute.xlu0 %8114  ;;  %v8112_v37 = vpop.permute.xlu1 %8111  ;;  %v8287_v49 = vsel %vm1193_vm4, %v8241_v20, %v8286_v29  ;;  %v9018_v20 = vld [vmem:[#allocation14 + $0x20] sm:$0xff]  }
 0xc4b   :  { %v8249_v23 = vrot.slane %v8115_v26, %v14125_v27  ;;  %v8245_v11 = vrot.slane %v8112_v37, %v14126_v35  ;;  %v6399_v26 = vsel %vm1191_vm3, %v6345_v6, %v6398_v22  ;;  %v6372_v37 = vsel %vm1052_vm1, %v6371_v3, %v6367_v54 }
 0xc4c   :  { %v6400_v32 = vsel %vm1193_vm4, %v6354_v46, %v6399_v26 }
 0xc4d   :  { %v8250_v36 = vsel %vm1052_vm1, %v8249_v23, %v8245_v11  ;;  %v6401_v60 = vsel %vm1195_vm5, %v6363_v58, %v6400_v32  ;;  %v9004_v23 = vld [vmem:[#allocation13 + $0x58] sm:$0xff]   ;;  %v9020_v58 = vld [vmem:[#allocation14 + $0x30] sm:$0xff]  }
 0xc4e   :  { %v8121_v13 = vpop.permute.xlu0 %8120  ;;  %v8118_v4 = vpop.permute.xlu1 %8117  ;;  %v8288_v42 = vsel %vm1195_vm5, %v8250_v36, %v8287_v49  ;;  %v9005_v11 = vld [vmem:[#allocation13 + $0x18] sm:$0xff]  }
 0xc4f   :  { %v8258_v8 = vrot.slane %v8121_v13, %v14125_v27  ;;  %v8254_v52 = vrot.slane %v8118_v4, %v14126_v35  ;;  %v6402_v4 = vsel %vm1197_vm6, %v6372_v37, %v6401_v60 }
 0xc50   :  { %v6403_v21 = vsel %vm1199_vm7, %v6381_v40, %v6402_v4 }
 0xc51   :  { %v8259_v12 = vsel %vm1052_vm1, %v8258_v8, %v8254_v52  ;;  %v9009_v8 = vld [vmem:[#allocation13 + $0x28] sm:$0xff]   ;;  %v9010_v52 = vld [vmem:[#allocation13 + $0x70] sm:$0xff]  }
 0xc52   :  { %v8127_v62 = vpop.permute.xlu0 %8126  ;;  %v8124_v24 = vpop.permute.xlu1 %8123  ;;  %v8289_v43 = vsel %vm1197_vm6, %v8259_v12, %v8288_v42 }
 0xc53   :  { %v8267_v38 = vrot.slane %v8127_v62, %v14125_v27  ;;  %v8263_v48 = vrot.slane %v8124_v24, %v14126_v35  ;;  %v9015_v62 = vld [vmem:[#allocation14 + $0x8] sm:$0xff]   ;;  %v9016_v24 = vld [vmem:[#allocation14 + $0x10] sm:$0xff]  }
 0xc55   :  { %v8268_v5 = vsel %vm1052_vm1, %v8267_v38, %v8263_v48  ;;  %v9019_v38 = vld [vmem:[#allocation14 + $0x28] sm:$0xff]   ;;  %v8749_v48 = vld [vmem:[%s13547_s9 + $0x1] ss:$0 sm:$0xff] }
 0xc56   :  { %v8133_v61 = vpop.permute.xlu0 %8132  ;;  %v8130_v31 = vpop.permute.xlu1 %8129  ;;  %v8290_v1 = vsel %vm1199_vm7, %v8268_v5, %v8289_v43 }
 0xc57   :  { %v8276_v28 = vrot.slane %v8133_v61, %v14125_v27  ;;  %v8272_v0 = vrot.slane %v8130_v31, %v14126_v35 }
 0xc59   :  { %v8277_v15 = vsel %vm1052_vm1, %v8276_v28, %v8272_v0 }
 0xc5a   :  { %v8291_v33 = vsel %vm1201_vm8, %v8277_v15, %v8290_v1  ;;  %v6246_v63 = vpop.permute.xlu0 %6245  ;;  %v6243_v56 = vpop.permute.xlu1 %6242  ;;  %v8751_v15 = vld [vmem:[%s13549_s11] ss:$0 sm:$0xff]  ;;  %s9480_s11 = smov [#allocation16]  }
 0xc5b   :  { %v8292_v41 = vpack.c.b16 %v8291_v33, %v8284_v39  ;;  %v6389_v30 = vrot.slane %v6246_v63, %v14125_v27  ;;  %v6385_v13 = vrot.slane %v6243_v56, %v14126_v35  ;;  %v9001_v35 = vld [vmem:[#allocation13 + $0x8] sm:$0xff]   ;;  %v9002_v27 = vld [vmem:[#allocation13 + $0x50] sm:$0xff]  }
 0xc5c   :  { %v8768_v56 = vld [vmem:[%s13551_s13] ss:$0 sm:$0xff]  ;;  %s8651_s13 = sshll.u32 %s9480_s11, 4  ;;  %s8652_s13 = int_to_ptr.vmem [resolvable:$true] %s8651_s13 }
 0xc5d   :  { %v6390_v44 = vsel %vm1052_vm1, %v6389_v30, %v6385_v13  ;;  %8853 = vmatmul.mubr.msk.bf16.vlgmr.msra.gmra.mrb[12].mxu1 %vm184_vm0, %v8292_v41  ;;  %s9434_s1 = scalar_lea.vmem %s8652_s13, 256  ;;  %p9439_p7 = scmp.lt.s32.totalorder %s8652_s13, %s8652_s13 }
 0xc5e   :  { %v6404_v53 = vsel %vm1201_vm8, %v6390_v44, %v6403_v21  ;;  %8872 = vmatprep.mubr.msk.bf16.mxu1 %vm9479_vm9, %v14267_v50  ;;  %8857 = vmatpush3.bf16.msra.mxu1 %v9014_v9  ;;  %p9435_p6 = scmp.ne.s32.totalorder %s8652_s13, %s9434_s1  ;;  %p9440_p8 = scmp.lt.s32.totalorder %s9434_s1, %s9434_s1 }
 0xc5f   :  { %v6405_v2 = vpack.c.b16 %v6404_v53, %v13383_v16  ;;  %v9008_v16 = vld [vmem:[#allocation13 + $0x68] sm:$0xff]   ;;  %8858 = vmatprep.subr.bf16.mxu1 %v14267_v50 }
 0xc60   :  { %p9441_p9 = por %p9440_p8, %p9439_p7 }
 0xc61   :  { %8847 = vmatmul.mubr.msk.bf16.vlgmr.msra.gmra.mrb[12].mxu0 %vm184_vm0, %v6405_v2 }
 0xc62   :  { %8802 = vmatpush3.bf16.msra.mxu0 %v8999_v55  ;;  %8859 = vmatpush3.bf16.msra.mxu1 %v9015_v62  ;;  %p9442_p10 = pnand %p9441_p9, %p9435_p6 }
 0xc63   :  { %8803 = vmatprep.subr.bf16.mxu0 %v9000_v25  ;;  %8860 = vmatprep.subr.bf16.mxu1 %v14267_v50 }
 0xc66   :  { %8804 = vmatpush3.bf16.msra.mxu0 %v9001_v35  ;;  %8861 = vmatpush3.bf16.msra.mxu1 %v9016_v24 }
 0xc67   :  { %8805 = vmatprep.subr.bf16.mxu0 %v9002_v27  ;;  %8862 = vmatprep.subr.bf16.mxu1 %v14267_v50 }
 0xc6a   :  { %8806 = vmatpush3.bf16.msra.mxu0 %v9003_v18  ;;  %8863 = vmatpush3.bf16.msra.mxu1 %v9017_v59 }
 0xc6b   :  { %8807 = vmatprep.subr.bf16.mxu0 %v9004_v23  ;;  %8864 = vmatprep.subr.bf16.mxu1 %v14267_v50 }
 0xc6e   :  { %8808 = vmatpush3.bf16.msra.mxu0 %v9005_v11  ;;  %8865 = vmatpush3.bf16.msra.mxu1 %v9018_v20 }
 0xc6f   :  { %8809 = vmatprep.subr.bf16.mxu0 %v9006_v10  ;;  %8866 = vmatprep.subr.bf16.mxu1 %v14267_v50 }
 0xc72   :  { %8810 = vmatpush3.bf16.msra.mxu0 %v9007_v45  ;;  %8867 = vmatpush3.bf16.msra.mxu1 %v9019_v38 }
 0xc73   :  { %8811 = vmatprep.subr.bf16.mxu0 %v9008_v16  ;;  %8868 = vmatprep.subr.bf16.mxu1 %v14267_v50 }
 0xc76   :  { %8812 = vmatpush3.bf16.msra.mxu0 %v9009_v8  ;;  %8869 = vmatpush3.bf16.msra.mxu1 %v9020_v58 }
 0xc77   :  { %8813 = vmatprep.subr.bf16.mxu0 %v9010_v52  ;;  %8870 = vmatprep.subr.bf16.mxu1 %v14267_v50 }
 0xc7a   :  { %8814 = vmatpush3.bf16.msra.mxu0 %v9011_v47  ;;  %8871 = vmatpush3.bf16.msra.mxu1 %v9021_v14 }
 0xc7b   :  { %8815 = vmatprep.subr.bf16.mxu0 %v9012_v7 }
 0xc7e   :  { %8816 = vmatpush3.bf16.msra.mxu0 %v9013_v34 }
 0xd30   :  { %v8330_v6 = vpop.f32.mrb[12].mxu1 }
 0xd31   :  { %v8331_v17 = vadd.f32 %v8749_v48, %v8330_v6  ;;  %v8854_v51 = vpop.f32.mrb[13].mxu1 }
 0xd32   :  { %v8333_v36 = vpop.f32.mrb[14].mxu1 }
 0xd33   :  { %v8334_v54 = vadd.f32 %v8749_v48, %v8333_v36  ;;  %v8855_v29 = vpop.f32.mrb[15].mxu1  ;;  %v8337_v46 = vmax.f32 %v8331_v17, 0.0 }
 0xd34   :  { %v6443_v12 = vpop.f32.mrb[12].mxu0 }
 0xd35   :  { %v8338_v57 = vmax.f32 %v8334_v54, 0.0  ;;  %v6444_v49 = vadd.f32 %v8745_v19, %v6443_v12  ;;  %v8848_v5 = vpop.f32.mrb[13].mxu0 }
 0xd36   :  { %v6446_v61 = vpop.f32.mrb[14].mxu0 }
 0xd37   :  { %v8339_v31 = vpack.c.bf16 %v8338_v57, %v8337_v46  ;;  %v6447_v3 = vadd.f32 %v8745_v19, %v6446_v61  ;;  %v8849_v42 = vpop.f32.mrb[15].mxu0  ;;  %v6450_v28 = vmax.f32 %v6444_v49, 0.0 }
 0xd39   :  { %v6451_v0 = vmax.f32 %v6447_v3, 0.0  ;;  %8510 = vmatprep.mubr.bf16.mxu0 %v8339_v31 }
 0xd3b   :  { %v6452_v22 = vpack.c.bf16 %v6451_v0, %v6450_v28 }
 0xd3d   :  { %8511 = vmatmul.mubr.bf16.vlgmr.msra.gmra.mrb[16].mxu0 %v6452_v22 }
 0xe10   :  { %v8817_v43 = vpop.f32.mrb[16].mxu0 }
 0xe11   :  { %v8818_v26 = vpop.f32.mrb[17].mxu0 }
 0xe12   :  { %v8819_v37 = vadd.f32 %v8818_v26, %v8817_v43  ;;  %v8820_v1 = vpop.f32.mrb[18].mxu0 }
 0xe13   :  { %v8821_v39 = vpop.f32.mrb[19].mxu0 }
 0xe14   :  { %v8822_v32 = vadd.f32 %v8821_v39, %v8820_v1  ;;  %v8513_v40 = vadd.f32 %v8819_v37, %v8751_v15 }
 0xe16   :  { %v8516_v33 = vadd.f32 %v8822_v32, %v8751_v15 }
 0xe18   :  { %v8519_v63 = vpack.c.bf16 %v8516_v33, %v8513_v40 }
 0xe1a   :  { %8873 = vmatmul.mubr.bf16.vlgmr.msra.gmra.mrb[16].mxu1 %v8519_v63 }
 0xeed   :  { %v8625_v60 = vpop.f32.mrb[16].mxu1 }
 0xeee   :  { %v8626_v41 = vadd.f32 %v8768_v56, %v8625_v60  ;;  %v8874_v30 = vpop.f32.mrb[17].mxu1 }
 0xeef   :  { %v8628_v13 = vpop.f32.mrb[18].mxu1 }
 0xef0   :  { %v8632_v4 = vsub.f32 0.0, %v8626_v41  ;;  %v8629_v21 = vadd.f32 %v8768_v56, %v8628_v13  ;;  %v8875_v44 = vpop.f32.mrb[19].mxu1 }
 0xef2   :  { %v8634_v53 = vmul.f32 1.442695, %v8632_v4  ;;  %v8633_v55 = vsub.f32 0.0, %v8629_v21 }
 0xef4   :  { %9294 = vpow2.f32 %v8634_v53  ;;  %v8636_v50 = vmul.f32 1.442695, %v8633_v55 }
 0xef6   :  { %9296 = vpow2.f32 %v8636_v50 }
 0xefe   :  { %v9295_v2 = vpop.eup %9294 }
 0xeff   :  { %v8638_v25 = vadd.f32 1.0, %v9295_v2 }
 0xf00   :  { %v9297_v35 = vpop.eup %9296 }
 0xf01   :  { %9298 = vrcp.f32 %v8638_v25  ;;  %v8639_v27 = vadd.f32 1.0, %v9297_v35 }
 0xf03   :  { %9300 = vrcp.f32 %v8639_v27 }
 0xf0b   :  { %v9299_v18 = vpop.eup %9298 }
 0xf0c   :  { %8644 = vst [vmem:[#allocation16] sm:$0xff] %v9299_v18 }
 0xf0d   :  { %v9301_v23 = vpop.eup %9300 }
 0xf0e   :  { %8645 = vst [vmem:[#allocation16 + $0x8] sm:$0xff] %v9301_v23 }
 0xf0f   :  { %9445 = shalt.err (!%p9442_p10)
}
 0xf10   :  { %s9446_s29 = scalar_lea.hbm %s13552_s14, 256 }
 0xf11   :  { %p9447_p11 = scmp.ne.s32.totalorder %s13552_s14, %s9446_s29  ;;  %p9450_p12 = scmp.lt.u32.totalorder %s9446_s29, %s13552_s14 }
 0xf13   :  { %p9452_p13 = pnand %p9450_p12, %p9447_p11 }
 0xf15   :  { %9455 = shalt.err (!%p9452_p13)
}
 0xf16   :  { %s9481_s16 = smov 128   ;;  %s9482_s17 = smov 8  }
 0xf17   :  { %8657 = dma.vmem_to_hbm [thread:$0]  %s8652_s13, 256, %s13552_s14, [#allocation7], %s9481_s16, %s9481_s16, %s9482_s17  }
 0xf18   :  { %9464 = dma.done.wait [#allocation7], 256  }
 0xf19   :  { %9465 = vsyncadd [#allocation7], 4294967040 }
 0xf1a   :  { %8661 = vsyncpa [#allocation6], 1 }
 0xf1b   :  { %8662 = vsyncpa [#allocation9], 1 }
 0xf1c   :  { %8663 = vsyncpa [#allocation12], 1 }
 0xf1d   :  { %8664 = vsyncpa [#allocation15], 1 }
 0xf1e   :  { %8665 = vsyncpa [#allocation7], 1 }

</bundles_post_ra>
